<compile_context>
chip_gen: v6e
topology: v6e:2x2x1
jax: 0.10.0
libtpu: 0.0.40
codegen_flags: <defaults>
</compile_context>

<pallas_src>
import jax
import jax.numpy as jnp
from jax import lax
from jax.experimental import pallas as pl
from jax.experimental.pallas import tpu as pltpu


def gru_lm_kernel(ids_ref, w_table_ref, w_hh_hbm, w_fc_hbm, bias_ref, out_ref,
                  gi_scratch, w_hh_vmem, w_fc_vmem, dma_sem):
    TB = ids_ref.shape[0]          # T * Bp
    V = w_table_ref.shape[0]
    H = w_hh_vmem.shape[0]
    Bp = out_ref.shape[0]
    T = TB // Bp

    # ---- Kick off the big weight DMAs immediately; overlap with Phase 1 ----
    cp_hh = pltpu.make_async_copy(w_hh_hbm, w_hh_vmem, dma_sem.at[0])
    cp_fc = pltpu.make_async_copy(w_fc_hbm, w_fc_vmem, dma_sem.at[1])
    cp_hh.start()
    cp_fc.start()

    # ---- Phase 1: fused embedding gather + input projection + bias --------
    # one-hot rows sum to 1, and the table already holds emb@W_ih + b_gi,
    # so one dense [TB,128] x [128,768] matmul produces gi for all timesteps.
    ids = ids_ref[...]                                              # [TB, 1]
    lane = lax.broadcasted_iota(jnp.int32, (TB, V), 1)
    one_hot = (jnp.broadcast_to(ids, (TB, V)) == lane).astype(jnp.float32)
    gi_scratch[...] = jnp.dot(one_hot, w_table_ref[...],
                              preferred_element_type=jnp.float32)   # [TB, 3H]

    b_hn = jnp.broadcast_to(bias_ref[:, :H], (Bp, H))   # hoisted broadcast
    b_fc = bias_ref[:, H:]                              # [1, V]

    # ---- Phase 2: serial GRU recurrence (h carried as a value) ------------
    cp_hh.wait()                                        # W_hh now in VMEM

    def step(t, h):
        row = pl.multiple_of(t * Bp, 8)
        gi = gi_scratch[pl.ds(row, Bp), :]                          # [Bp, 3H]
        gh = jnp.dot(h, w_hh_vmem[...],
                     preferred_element_type=jnp.float32)            # [Bp, 3H]
        rz = jax.nn.sigmoid(gi[:, :2 * H] + gh[:, :2 * H])          # fused r|z
        r = rz[:, :H]
        z = rz[:, H:]
        n = jnp.tanh(gi[:, 2 * H:] + r * (gh[:, 2 * H:] + b_hn))
        return (1.0 - z) * n + z * h

    h = lax.fori_loop(0, T, step, jnp.zeros((Bp, H), jnp.float32), unroll=True)

    # ---- Phase 3: final Linear(H -> V) on the last hidden state -----------
    cp_fc.wait()                                        # W_fc now in VMEM
    logits = jnp.dot(h, w_fc_vmem[...],
                     preferred_element_type=jnp.float32) + b_fc
    out_ref[...] = logits.astype(out_ref.dtype)


def gru_lm_forward(x_ids, params):
    """x_ids: int32 [B, T] token ids. Returns logits [B, V]."""
    emb = params["embedding"]          # [V, E]
    w_ih = params["w_ih"]              # [E, 3H]  (gates ordered r|z|n)
    w_hh = params["w_hh"]              # [H, 3H]
    b_ih = params["b_ih"]              # [1, 3H]
    b_hh = params["b_hh"]              # [1, 3H]
    w_fc = params["w_fc"]              # [H, V]
    b_fc = params["b_fc"]              # [1, V]

    B, T = x_ids.shape
    V, E = emb.shape
    H = w_hh.shape[0]

    # Pad batch to a multiple of 8 (f32 sublanes); pad rows use token 0 and
    # are sliced off the output.
    Bp = max(8, ((B + 7) // 8) * 8)
    ids_pad = jnp.zeros((Bp, T), jnp.int32).at[:B].set(x_ids)
    ids_tm = jnp.transpose(ids_pad, (1, 0)).reshape(T * Bp, 1)   # row = t*Bp + b

    # Fold hidden-path r/z biases into the input-path bias, then fuse
    # embedding + input projection + bias into ONE [V, 3H] table.
    # (PyTorch GRU: r,z use b_ih + b_hh; n uses b_ih directly, b_hh inside r*().)
    b_gi = jnp.concatenate(
        [b_ih[:, :2 * H] + b_hh[:, :2 * H], b_ih[:, 2 * H:]], axis=1)   # [1, 3H]
    w_table = jnp.dot(emb, w_ih,
                      precision=jax.lax.Precision.HIGHEST) + b_gi       # [V, 3H]
    bias_pack = jnp.concatenate([b_hh[:, 2 * H:], b_fc], axis=1)        # [1, H+V]

    grid_spec = pltpu.PrefetchScalarGridSpec(
        num_scalar_prefetch=0,
        grid=(1,),                                       # single invocation
        in_specs=[
            pl.BlockSpec((T * Bp, 1), lambda i: (0, 0)),     # token ids (time-major)
            pl.BlockSpec((V, 3 * H), lambda i: (0, 0)),      # fused emb@W_ih + b_gi
            pl.BlockSpec(memory_space=pl.ANY),               # W_hh -> manual DMA
            pl.BlockSpec(memory_space=pl.ANY),               # W_fc -> manual DMA
            pl.BlockSpec((1, H + V), lambda i: (0, 0)),      # packed b_hh_n | b_fc
        ],
        out_specs=pl.BlockSpec((Bp, V), lambda i: (0, 0)),
        scratch_shapes=[
            pltpu.VMEM((T * Bp, 3 * H), jnp.float32),   # gi for all timesteps
            pltpu.VMEM((H, 3 * H), jnp.float32),        # W_hh landing buffer
            pltpu.VMEM((H, V), jnp.float32),            # W_fc landing buffer
            pltpu.SemaphoreType.DMA((2,)),              # per-weight DMA sems
        ],
    )

    logits_pad = pl.pallas_call(
        gru_lm_kernel,
        out_shape=jax.ShapeDtypeStruct((Bp, V), jnp.float32),
        grid_spec=grid_spec,
        compiler_params=pltpu.CompilerParams(
            dimension_semantics=("arbitrary",)),
    )(ids_tm, w_table, w_hh, w_fc, bias_pack)

    return logits_pad[:B]


def gru_lm_reference(x_ids, params):
    """Pure-JAX reference of the same forward pass (for validation)."""
    emb = params["embedding"]
    H = params["w_hh"].shape[0]
    embedded = jnp.take(emb, x_ids, axis=0)          # [B, T, E]
    B = embedded.shape[0]

    def step(h, x_t):
        gi = x_t @ params["w_ih"] + params["b_ih"]
        gh = h @ params["w_hh"] + params["b_hh"]
        i_r, i_z, i_n = gi[:, :H], gi[:, H:2 * H], gi[:, 2 * H:]
        h_r, h_z, h_n = gh[:, :H], gh[:, H:2 * H], gh[:, 2 * H:]
        r = jax.nn.sigmoid(i_r + h_r)
        z = jax.nn.sigmoid(i_z + h_z)
        n = jnp.tanh(i_n + r * h_n)
        h_new = (1.0 - z) * n + z * h
        return h_new, None

    h0 = jnp.zeros((B, H), jnp.float32)
    h_final, _ = jax.lax.scan(step, h0, jnp.transpose(embedded, (1, 0, 2)))
    return h_final @ params["w_fc"] + params["b_fc"]


def init_params(key, vocab_size, embed_dim, hidden):
    ks = jax.random.split(key, 7)
    scale = 0.1
    return {
        "embedding": scale * jax.random.normal(ks[0], (vocab_size, embed_dim), jnp.float32),
        "w_ih": scale * jax.random.normal(ks[1], (embed_dim, 3 * hidden), jnp.float32),
        "w_hh": scale * jax.random.normal(ks[2], (hidden, 3 * hidden), jnp.float32),
        "b_ih": scale * jax.random.normal(ks[3], (1, 3 * hidden), jnp.float32),
        "b_hh": scale * jax.random.normal(ks[4], (1, 3 * hidden), jnp.float32),
        "w_fc": scale * jax.random.normal(ks[5], (hidden, vocab_size), jnp.float32),
        "b_fc": scale * jax.random.normal(ks[6], (1, vocab_size), jnp.float32),
    }


if __name__ == "__main__":
    B, T = 4, 8            # small batch / sequence length
    VOCAB = 128            # len(self.data['vocab'])
    EMBED = 32             # embedding_dim
    HIDDEN = 256           # nn.GRU(embedding_dim, 256)

    key = jax.random.PRNGKey(0)
    k_ids, k_params = jax.random.split(key)
    params = init_params(k_params, VOCAB, EMBED, HIDDEN)
    x_ids = jax.random.randint(k_ids, (B, T), 0, VOCAB, dtype=jnp.int32)

    logits = jax.block_until_ready(gru_lm_forward(x_ids, params))
    ref = jax.block_until_ready(gru_lm_reference(x_ids, params))

    assert logits.shape == (B, VOCAB), logits.shape
    assert jnp.allclose(logits, ref, atol=1e-4, rtol=1e-4), \
        float(jnp.max(jnp.abs(logits - ref)))
    print("KERNEL_OK")
</pallas_src>

<mosaic_0001>
module attributes {stable_mosaic.version = 11 : i64} {
  func.func @gru_lm_kernel(%arg0: i32, %arg1: memref<64x1xi32, #tpu.memory_space<vmem>>, %arg2: memref<128x768xf32, #tpu.memory_space<vmem>>, %arg3: memref<256x768xf32, #tpu.memory_space<any>>, %arg4: memref<256x128xf32, #tpu.memory_space<any>>, %arg5: memref<1x384xf32, #tpu.memory_space<vmem>>, %arg6: memref<8x128xf32, #tpu.memory_space<vmem>>, %arg7: memref<64x768xf32, #tpu.memory_space<vmem>>, %arg8: memref<256x768xf32, #tpu.memory_space<vmem>>, %arg9: memref<256x128xf32, #tpu.memory_space<vmem>>, %arg10: memref<2x!tpu.dma_semaphore, #tpu.memory_space<semaphore_mem>>) attributes {dimension_semantics = [#tpu.dimension_semantics<arbitrary>], iteration_bounds = array<i64: 1>, scalar_prefetch = 0 : i64, scratch_operands = 4 : i64, tpu.core_type = #tpu.core_type<tc>, window_params = [{pipeline_mode = #tpu.pipeline_mode<synchronous>, transform_indices = @transform_0, window_bounds = array<i64: 64, 1>}, {pipeline_mode = #tpu.pipeline_mode<synchronous>, transform_indices = @transform_1, window_bounds = array<i64: 128, 768>}, {}, {}, {pipeline_mode = #tpu.pipeline_mode<synchronous>, transform_indices = @transform_4, window_bounds = array<i64: 1, 384>}, {pipeline_mode = #tpu.pipeline_mode<synchronous>, transform_indices = @transform_5, window_bounds = array<i64: 8, 128>}]} {
    %c0_i32 = arith.constant 0 : i32
    %0 = tpu.memref_slice %arg10[%c0_i32] : memref<2x!tpu.dma_semaphore, #tpu.memory_space<semaphore_mem>> -> memref<1x!tpu.dma_semaphore, #tpu.memory_space<semaphore_mem>>
    %1 = tpu.memref_squeeze %0 : memref<1x!tpu.dma_semaphore, #tpu.memory_space<semaphore_mem>> -> memref<!tpu.dma_semaphore, #tpu.memory_space<semaphore_mem>>
    tpu.enqueue_dma source(%arg3 : memref<256x768xf32, #tpu.memory_space<any>>) target(%arg8 : memref<256x768xf32, #tpu.memory_space<vmem>>) target_semaphore(%1 : memref<!tpu.dma_semaphore, #tpu.memory_space<semaphore_mem>>)
    %c1_i32 = arith.constant 1 : i32
    %2 = tpu.memref_slice %arg10[%c1_i32] : memref<2x!tpu.dma_semaphore, #tpu.memory_space<semaphore_mem>> -> memref<1x!tpu.dma_semaphore, #tpu.memory_space<semaphore_mem>>
    %3 = tpu.memref_squeeze %2 : memref<1x!tpu.dma_semaphore, #tpu.memory_space<semaphore_mem>> -> memref<!tpu.dma_semaphore, #tpu.memory_space<semaphore_mem>>
    tpu.enqueue_dma source(%arg4 : memref<256x128xf32, #tpu.memory_space<any>>) target(%arg9 : memref<256x128xf32, #tpu.memory_space<vmem>>) target_semaphore(%3 : memref<!tpu.dma_semaphore, #tpu.memory_space<semaphore_mem>>)
    %c0 = arith.constant 0 : index
    %c0_0 = arith.constant 0 : index
    %4 = vector.load %arg1[%c0, %c0_0] : memref<64x1xi32, #tpu.memory_space<vmem>>, vector<64x1xi32>
    %5 = tpu.iota {dimensions = array<i32: 1>} : vector<64x128xi32>
    %6 = vector.shape_cast %4 : vector<64x1xi32> to vector<64x1xi32>
    %7 = vector.broadcast %6 : vector<64x1xi32> to vector<64x128xi32>
    %8 = arith.cmpi eq, %7, %5 : vector<64x128xi32>
    %9 = arith.extui %8 : vector<64x128xi1> to vector<64x128xi32>
    %10 = arith.sitofp %9 : vector<64x128xi32> to vector<64x128xf32>
    %c0_1 = arith.constant 0 : index
    %c0_2 = arith.constant 0 : index
    %11 = vector.load %arg2[%c0_1, %c0_2] : memref<128x768xf32, #tpu.memory_space<vmem>>, vector<128x768xf32>
    %cst = arith.constant dense<0.000000e+00> : vector<64x768xf32>
    %12 = tpu.matmul %10, %11, %cst {dimension_numbers = #tpu.dot_dimension_numbers<[1], [0], [0], [1], [0, 0, 1, 1], [], []>} : vector<64x128xf32>, vector<128x768xf32>, vector<64x768xf32> -> vector<64x768xf32>
    %c0_3 = arith.constant 0 : index
    %c0_4 = arith.constant 0 : index
    %13 = vector.load %arg7[%c0_3, %c0_4] : memref<64x768xf32, #tpu.memory_space<vmem>>, vector<64x768xf32>
    tpu.vector_store %arg7[%c0_3, %c0_4], %12 {strides = array<i32>} : memref<64x768xf32, #tpu.memory_space<vmem>>, vector<64x768xf32>,
    %c0_5 = arith.constant 0 : index
    %c0_6 = arith.constant 0 : index
    %14 = vector.load %arg5[%c0_5, %c0_6] : memref<1x384xf32, #tpu.memory_space<vmem>>, vector<1x256xf32>
    %15 = vector.shape_cast %14 : vector<1x256xf32> to vector<1x256xf32>
    %16 = vector.broadcast %15 : vector<1x256xf32> to vector<8x256xf32>
    %c0_7 = arith.constant 0 : index
    %c256 = arith.constant 256 : index
    %17 = vector.load %arg5[%c0_7, %c256] : memref<1x384xf32, #tpu.memory_space<vmem>>, vector<1x128xf32>
    %c0_i32_8 = arith.constant 0 : i32
    %18 = tpu.memref_slice %arg10[%c0_i32_8] : memref<2x!tpu.dma_semaphore, #tpu.memory_space<semaphore_mem>> -> memref<1x!tpu.dma_semaphore, #tpu.memory_space<semaphore_mem>>
    %19 = tpu.memref_squeeze %18 : memref<1x!tpu.dma_semaphore, #tpu.memory_space<semaphore_mem>> -> memref<!tpu.dma_semaphore, #tpu.memory_space<semaphore_mem>>
    tpu.wait_dma2 semaphore(%19 : memref<!tpu.dma_semaphore, #tpu.memory_space<semaphore_mem>>) src(%arg3 : memref<256x768xf32, #tpu.memory_space<any>>) dst(%arg8 : memref<256x768xf32, #tpu.memory_space<vmem>>)
    %cst_9 = arith.constant 0.000000e+00 : f32
    %20 = vector.broadcast %cst_9 : f32 to vector<8x256xf32>
    %c0_i32_10 = arith.constant 0 : i32
    %c8_i32 = arith.constant 8 : i32
    %21 = arith.muli %c0_i32_10, %c8_i32 : i32
    %22 = tpu.assume_multiple %21, 8 : i32
    %23 = arith.index_cast %22 : i32 to index
    %c0_11 = arith.constant 0 : index
    %24 = vector.load %arg7[%23, %c0_11] : memref<64x768xf32, #tpu.memory_space<vmem>>, vector<8x768xf32>
    %c0_12 = arith.constant 0 : index
    %c0_13 = arith.constant 0 : index
    %25 = vector.load %arg8[%c0_12, %c0_13] : memref<256x768xf32, #tpu.memory_space<vmem>>, vector<256x768xf32>
    %cst_14 = arith.constant dense<0.000000e+00> : vector<8x768xf32>
    %26 = tpu.matmul %20, %25, %cst_14 {dimension_numbers = #tpu.dot_dimension_numbers<[1], [0], [0], [1], [0, 0, 1, 1], [], []>} : vector<8x256xf32>, vector<256x768xf32>, vector<8x768xf32> -> vector<8x768xf32>
    %27 = vector.extract_strided_slice %24 {offsets = [0, 0], sizes = [8, 512], strides = [1, 1]} : vector<8x768xf32> to vector<8x512xf32>
    %28 = vector.extract_strided_slice %26 {offsets = [0, 0], sizes = [8, 512], strides = [1, 1]} : vector<8x768xf32> to vector<8x512xf32>
    %29 = arith.addf %27, %28 : vector<8x512xf32>
    %30 = arith.negf %29 : vector<8x512xf32>
    %31 = math.exp %30 : vector<8x512xf32>
    %cst_15 = arith.constant 1.000000e+00 : f32
    %32 = vector.broadcast %cst_15 : f32 to vector<8x512xf32>
    %33 = arith.addf %32, %31 : vector<8x512xf32>
    %34 = arith.divf %32, %33 : vector<8x512xf32>
    %35 = vector.extract_strided_slice %34 {offsets = [0, 0], sizes = [8, 256], strides = [1, 1]} : vector<8x512xf32> to vector<8x256xf32>
    %36 = vector.extract_strided_slice %34 {offsets = [0, 256], sizes = [8, 256], strides = [1, 1]} : vector<8x512xf32> to vector<8x256xf32>
    %37 = vector.extract_strided_slice %24 {offsets = [0, 512], sizes = [8, 256], strides = [1, 1]} : vector<8x768xf32> to vector<8x256xf32>
    %38 = vector.extract_strided_slice %26 {offsets = [0, 512], sizes = [8, 256], strides = [1, 1]} : vector<8x768xf32> to vector<8x256xf32>
    %39 = arith.addf %38, %16 : vector<8x256xf32>
    %40 = arith.mulf %35, %39 : vector<8x256xf32>
    %41 = arith.addf %37, %40 : vector<8x256xf32>
    %42 = math.tanh %41 : vector<8x256xf32>
    %cst_16 = arith.constant 1.000000e+00 : f32
    %43 = vector.broadcast %cst_16 : f32 to vector<8x256xf32>
    %44 = arith.subf %43, %36 : vector<8x256xf32>
    %45 = arith.mulf %44, %42 : vector<8x256xf32>
    %46 = arith.mulf %36, %20 : vector<8x256xf32>
    %47 = arith.addf %45, %46 : vector<8x256xf32>
    %c1_i32_17 = arith.constant 1 : i32
    %c8_i32_18 = arith.constant 8 : i32
    %48 = arith.muli %c1_i32_17, %c8_i32_18 : i32
    %49 = tpu.assume_multiple %48, 8 : i32
    %50 = arith.index_cast %49 : i32 to index
    %c0_19 = arith.constant 0 : index
    %51 = vector.load %arg7[%50, %c0_19] : memref<64x768xf32, #tpu.memory_space<vmem>>, vector<8x768xf32>
    %c0_20 = arith.constant 0 : index
    %c0_21 = arith.constant 0 : index
    %52 = vector.load %arg8[%c0_20, %c0_21] : memref<256x768xf32, #tpu.memory_space<vmem>>, vector<256x768xf32>
    %cst_22 = arith.constant dense<0.000000e+00> : vector<8x768xf32>
    %53 = tpu.matmul %47, %52, %cst_22 {dimension_numbers = #tpu.dot_dimension_numbers<[1], [0], [0], [1], [0, 0, 1, 1], [], []>} : vector<8x256xf32>, vector<256x768xf32>, vector<8x768xf32> -> vector<8x768xf32>
    %54 = vector.extract_strided_slice %51 {offsets = [0, 0], sizes = [8, 512], strides = [1, 1]} : vector<8x768xf32> to vector<8x512xf32>
    %55 = vector.extract_strided_slice %53 {offsets = [0, 0], sizes = [8, 512], strides = [1, 1]} : vector<8x768xf32> to vector<8x512xf32>
    %56 = arith.addf %54, %55 : vector<8x512xf32>
    %57 = arith.negf %56 : vector<8x512xf32>
    %58 = math.exp %57 : vector<8x512xf32>
    %cst_23 = arith.constant 1.000000e+00 : f32
    %59 = vector.broadcast %cst_23 : f32 to vector<8x512xf32>
    %60 = arith.addf %59, %58 : vector<8x512xf32>
    %61 = arith.divf %59, %60 : vector<8x512xf32>
    %62 = vector.extract_strided_slice %61 {offsets = [0, 0], sizes = [8, 256], strides = [1, 1]} : vector<8x512xf32> to vector<8x256xf32>
    %63 = vector.extract_strided_slice %61 {offsets = [0, 256], sizes = [8, 256], strides = [1, 1]} : vector<8x512xf32> to vector<8x256xf32>
    %64 = vector.extract_strided_slice %51 {offsets = [0, 512], sizes = [8, 256], strides = [1, 1]} : vector<8x768xf32> to vector<8x256xf32>
    %65 = vector.extract_strided_slice %53 {offsets = [0, 512], sizes = [8, 256], strides = [1, 1]} : vector<8x768xf32> to vector<8x256xf32>
    %66 = arith.addf %65, %16 : vector<8x256xf32>
    %67 = arith.mulf %62, %66 : vector<8x256xf32>
    %68 = arith.addf %64, %67 : vector<8x256xf32>
    %69 = math.tanh %68 : vector<8x256xf32>
    %cst_24 = arith.constant 1.000000e+00 : f32
    %70 = vector.broadcast %cst_24 : f32 to vector<8x256xf32>
    %71 = arith.subf %70, %63 : vector<8x256xf32>
    %72 = arith.mulf %71, %69 : vector<8x256xf32>
    %73 = arith.mulf %63, %47 : vector<8x256xf32>
    %74 = arith.addf %72, %73 : vector<8x256xf32>
    %c2_i32 = arith.constant 2 : i32
    %c8_i32_25 = arith.constant 8 : i32
    %75 = arith.muli %c2_i32, %c8_i32_25 : i32
    %76 = tpu.assume_multiple %75, 8 : i32
    %77 = arith.index_cast %76 : i32 to index
    %c0_26 = arith.constant 0 : index
    %78 = vector.load %arg7[%77, %c0_26] : memref<64x768xf32, #tpu.memory_space<vmem>>, vector<8x768xf32>
    %c0_27 = arith.constant 0 : index
    %c0_28 = arith.constant 0 : index
    %79 = vector.load %arg8[%c0_27, %c0_28] : memref<256x768xf32, #tpu.memory_space<vmem>>, vector<256x768xf32>
    %cst_29 = arith.constant dense<0.000000e+00> : vector<8x768xf32>
    %80 = tpu.matmul %74, %79, %cst_29 {dimension_numbers = #tpu.dot_dimension_numbers<[1], [0], [0], [1], [0, 0, 1, 1], [], []>} : vector<8x256xf32>, vector<256x768xf32>, vector<8x768xf32> -> vector<8x768xf32>
    %81 = vector.extract_strided_slice %78 {offsets = [0, 0], sizes = [8, 512], strides = [1, 1]} : vector<8x768xf32> to vector<8x512xf32>
    %82 = vector.extract_strided_slice %80 {offsets = [0, 0], sizes = [8, 512], strides = [1, 1]} : vector<8x768xf32> to vector<8x512xf32>
    %83 = arith.addf %81, %82 : vector<8x512xf32>
    %84 = arith.negf %83 : vector<8x512xf32>
    %85 = math.exp %84 : vector<8x512xf32>
    %cst_30 = arith.constant 1.000000e+00 : f32
    %86 = vector.broadcast %cst_30 : f32 to vector<8x512xf32>
    %87 = arith.addf %86, %85 : vector<8x512xf32>
    %88 = arith.divf %86, %87 : vector<8x512xf32>
    %89 = vector.extract_strided_slice %88 {offsets = [0, 0], sizes = [8, 256], strides = [1, 1]} : vector<8x512xf32> to vector<8x256xf32>
    %90 = vector.extract_strided_slice %88 {offsets = [0, 256], sizes = [8, 256], strides = [1, 1]} : vector<8x512xf32> to vector<8x256xf32>
    %91 = vector.extract_strided_slice %78 {offsets = [0, 512], sizes = [8, 256], strides = [1, 1]} : vector<8x768xf32> to vector<8x256xf32>
    %92 = vector.extract_strided_slice %80 {offsets = [0, 512], sizes = [8, 256], strides = [1, 1]} : vector<8x768xf32> to vector<8x256xf32>
    %93 = arith.addf %92, %16 : vector<8x256xf32>
    %94 = arith.mulf %89, %93 : vector<8x256xf32>
    %95 = arith.addf %91, %94 : vector<8x256xf32>
    %96 = math.tanh %95 : vector<8x256xf32>
    %cst_31 = arith.constant 1.000000e+00 : f32
    %97 = vector.broadcast %cst_31 : f32 to vector<8x256xf32>
    %98 = arith.subf %97, %90 : vector<8x256xf32>
    %99 = arith.mulf %98, %96 : vector<8x256xf32>
    %100 = arith.mulf %90, %74 : vector<8x256xf32>
    %101 = arith.addf %99, %100 : vector<8x256xf32>
    %c3_i32 = arith.constant 3 : i32
    %c8_i32_32 = arith.constant 8 : i32
    %102 = arith.muli %c3_i32, %c8_i32_32 : i32
    %103 = tpu.assume_multiple %102, 8 : i32
    %104 = arith.index_cast %103 : i32 to index
    %c0_33 = arith.constant 0 : index
    %105 = vector.load %arg7[%104, %c0_33] : memref<64x768xf32, #tpu.memory_space<vmem>>, vector<8x768xf32>
    %c0_34 = arith.constant 0 : index
    %c0_35 = arith.constant 0 : index
    %106 = vector.load %arg8[%c0_34, %c0_35] : memref<256x768xf32, #tpu.memory_space<vmem>>, vector<256x768xf32>
    %cst_36 = arith.constant dense<0.000000e+00> : vector<8x768xf32>
    %107 = tpu.matmul %101, %106, %cst_36 {dimension_numbers = #tpu.dot_dimension_numbers<[1], [0], [0], [1], [0, 0, 1, 1], [], []>} : vector<8x256xf32>, vector<256x768xf32>, vector<8x768xf32> -> vector<8x768xf32>
    %108 = vector.extract_strided_slice %105 {offsets = [0, 0], sizes = [8, 512], strides = [1, 1]} : vector<8x768xf32> to vector<8x512xf32>
    %109 = vector.extract_strided_slice %107 {offsets = [0, 0], sizes = [8, 512], strides = [1, 1]} : vector<8x768xf32> to vector<8x512xf32>
    %110 = arith.addf %108, %109 : vector<8x512xf32>
    %111 = arith.negf %110 : vector<8x512xf32>
    %112 = math.exp %111 : vector<8x512xf32>
    %cst_37 = arith.constant 1.000000e+00 : f32
    %113 = vector.broadcast %cst_37 : f32 to vector<8x512xf32>
    %114 = arith.addf %113, %112 : vector<8x512xf32>
    %115 = arith.divf %113, %114 : vector<8x512xf32>
    %116 = vector.extract_strided_slice %115 {offsets = [0, 0], sizes = [8, 256], strides = [1, 1]} : vector<8x512xf32> to vector<8x256xf32>
    %117 = vector.extract_strided_slice %115 {offsets = [0, 256], sizes = [8, 256], strides = [1, 1]} : vector<8x512xf32> to vector<8x256xf32>
    %118 = vector.extract_strided_slice %105 {offsets = [0, 512], sizes = [8, 256], strides = [1, 1]} : vector<8x768xf32> to vector<8x256xf32>
    %119 = vector.extract_strided_slice %107 {offsets = [0, 512], sizes = [8, 256], strides = [1, 1]} : vector<8x768xf32> to vector<8x256xf32>
    %120 = arith.addf %119, %16 : vector<8x256xf32>
    %121 = arith.mulf %116, %120 : vector<8x256xf32>
    %122 = arith.addf %118, %121 : vector<8x256xf32>
    %123 = math.tanh %122 : vector<8x256xf32>
    %cst_38 = arith.constant 1.000000e+00 : f32
    %124 = vector.broadcast %cst_38 : f32 to vector<8x256xf32>
    %125 = arith.subf %124, %117 : vector<8x256xf32>
    %126 = arith.mulf %125, %123 : vector<8x256xf32>
    %127 = arith.mulf %117, %101 : vector<8x256xf32>
    %128 = arith.addf %126, %127 : vector<8x256xf32>
    %c4_i32 = arith.constant 4 : i32
    %c8_i32_39 = arith.constant 8 : i32
    %129 = arith.muli %c4_i32, %c8_i32_39 : i32
    %130 = tpu.assume_multiple %129, 8 : i32
    %131 = arith.index_cast %130 : i32 to index
    %c0_40 = arith.constant 0 : index
    %132 = vector.load %arg7[%131, %c0_40] : memref<64x768xf32, #tpu.memory_space<vmem>>, vector<8x768xf32>
    %c0_41 = arith.constant 0 : index
    %c0_42 = arith.constant 0 : index
    %133 = vector.load %arg8[%c0_41, %c0_42] : memref<256x768xf32, #tpu.memory_space<vmem>>, vector<256x768xf32>
    %cst_43 = arith.constant dense<0.000000e+00> : vector<8x768xf32>
    %134 = tpu.matmul %128, %133, %cst_43 {dimension_numbers = #tpu.dot_dimension_numbers<[1], [0], [0], [1], [0, 0, 1, 1], [], []>} : vector<8x256xf32>, vector<256x768xf32>, vector<8x768xf32> -> vector<8x768xf32>
    %135 = vector.extract_strided_slice %132 {offsets = [0, 0], sizes = [8, 512], strides = [1, 1]} : vector<8x768xf32> to vector<8x512xf32>
    %136 = vector.extract_strided_slice %134 {offsets = [0, 0], sizes = [8, 512], strides = [1, 1]} : vector<8x768xf32> to vector<8x512xf32>
    %137 = arith.addf %135, %136 : vector<8x512xf32>
    %138 = arith.negf %137 : vector<8x512xf32>
    %139 = math.exp %138 : vector<8x512xf32>
    %cst_44 = arith.constant 1.000000e+00 : f32
    %140 = vector.broadcast %cst_44 : f32 to vector<8x512xf32>
    %141 = arith.addf %140, %139 : vector<8x512xf32>
    %142 = arith.divf %140, %141 : vector<8x512xf32>
    %143 = vector.extract_strided_slice %142 {offsets = [0, 0], sizes = [8, 256], strides = [1, 1]} : vector<8x512xf32> to vector<8x256xf32>
    %144 = vector.extract_strided_slice %142 {offsets = [0, 256], sizes = [8, 256], strides = [1, 1]} : vector<8x512xf32> to vector<8x256xf32>
    %145 = vector.extract_strided_slice %132 {offsets = [0, 512], sizes = [8, 256], strides = [1, 1]} : vector<8x768xf32> to vector<8x256xf32>
    %146 = vector.extract_strided_slice %134 {offsets = [0, 512], sizes = [8, 256], strides = [1, 1]} : vector<8x768xf32> to vector<8x256xf32>
    %147 = arith.addf %146, %16 : vector<8x256xf32>
    %148 = arith.mulf %143, %147 : vector<8x256xf32>
    %149 = arith.addf %145, %148 : vector<8x256xf32>
    %150 = math.tanh %149 : vector<8x256xf32>
    %cst_45 = arith.constant 1.000000e+00 : f32
    %151 = vector.broadcast %cst_45 : f32 to vector<8x256xf32>
    %152 = arith.subf %151, %144 : vector<8x256xf32>
    %153 = arith.mulf %152, %150 : vector<8x256xf32>
    %154 = arith.mulf %144, %128 : vector<8x256xf32>
    %155 = arith.addf %153, %154 : vector<8x256xf32>
    %c5_i32 = arith.constant 5 : i32
    %c8_i32_46 = arith.constant 8 : i32
    %156 = arith.muli %c5_i32, %c8_i32_46 : i32
    %157 = tpu.assume_multiple %156, 8 : i32
    %158 = arith.index_cast %157 : i32 to index
    %c0_47 = arith.constant 0 : index
    %159 = vector.load %arg7[%158, %c0_47] : memref<64x768xf32, #tpu.memory_space<vmem>>, vector<8x768xf32>
    %c0_48 = arith.constant 0 : index
    %c0_49 = arith.constant 0 : index
    %160 = vector.load %arg8[%c0_48, %c0_49] : memref<256x768xf32, #tpu.memory_space<vmem>>, vector<256x768xf32>
    %cst_50 = arith.constant dense<0.000000e+00> : vector<8x768xf32>
    %161 = tpu.matmul %155, %160, %cst_50 {dimension_numbers = #tpu.dot_dimension_numbers<[1], [0], [0], [1], [0, 0, 1, 1], [], []>} : vector<8x256xf32>, vector<256x768xf32>, vector<8x768xf32> -> vector<8x768xf32>
    %162 = vector.extract_strided_slice %159 {offsets = [0, 0], sizes = [8, 512], strides = [1, 1]} : vector<8x768xf32> to vector<8x512xf32>
    %163 = vector.extract_strided_slice %161 {offsets = [0, 0], sizes = [8, 512], strides = [1, 1]} : vector<8x768xf32> to vector<8x512xf32>
    %164 = arith.addf %162, %163 : vector<8x512xf32>
    %165 = arith.negf %164 : vector<8x512xf32>
    %166 = math.exp %165 : vector<8x512xf32>
    %cst_51 = arith.constant 1.000000e+00 : f32
    %167 = vector.broadcast %cst_51 : f32 to vector<8x512xf32>
    %168 = arith.addf %167, %166 : vector<8x512xf32>
    %169 = arith.divf %167, %168 : vector<8x512xf32>
    %170 = vector.extract_strided_slice %169 {offsets = [0, 0], sizes = [8, 256], strides = [1, 1]} : vector<8x512xf32> to vector<8x256xf32>
    %171 = vector.extract_strided_slice %169 {offsets = [0, 256], sizes = [8, 256], strides = [1, 1]} : vector<8x512xf32> to vector<8x256xf32>
    %172 = vector.extract_strided_slice %159 {offsets = [0, 512], sizes = [8, 256], strides = [1, 1]} : vector<8x768xf32> to vector<8x256xf32>
    %173 = vector.extract_strided_slice %161 {offsets = [0, 512], sizes = [8, 256], strides = [1, 1]} : vector<8x768xf32> to vector<8x256xf32>
    %174 = arith.addf %173, %16 : vector<8x256xf32>
    %175 = arith.mulf %170, %174 : vector<8x256xf32>
    %176 = arith.addf %172, %175 : vector<8x256xf32>
    %177 = math.tanh %176 : vector<8x256xf32>
    %cst_52 = arith.constant 1.000000e+00 : f32
    %178 = vector.broadcast %cst_52 : f32 to vector<8x256xf32>
    %179 = arith.subf %178, %171 : vector<8x256xf32>
    %180 = arith.mulf %179, %177 : vector<8x256xf32>
    %181 = arith.mulf %171, %155 : vector<8x256xf32>
    %182 = arith.addf %180, %181 : vector<8x256xf32>
    %c6_i32 = arith.constant 6 : i32
    %c8_i32_53 = arith.constant 8 : i32
    %183 = arith.muli %c6_i32, %c8_i32_53 : i32
    %184 = tpu.assume_multiple %183, 8 : i32
    %185 = arith.index_cast %184 : i32 to index
    %c0_54 = arith.constant 0 : index
    %186 = vector.load %arg7[%185, %c0_54] : memref<64x768xf32, #tpu.memory_space<vmem>>, vector<8x768xf32>
    %c0_55 = arith.constant 0 : index
    %c0_56 = arith.constant 0 : index
    %187 = vector.load %arg8[%c0_55, %c0_56] : memref<256x768xf32, #tpu.memory_space<vmem>>, vector<256x768xf32>
    %cst_57 = arith.constant dense<0.000000e+00> : vector<8x768xf32>
    %188 = tpu.matmul %182, %187, %cst_57 {dimension_numbers = #tpu.dot_dimension_numbers<[1], [0], [0], [1], [0, 0, 1, 1], [], []>} : vector<8x256xf32>, vector<256x768xf32>, vector<8x768xf32> -> vector<8x768xf32>
    %189 = vector.extract_strided_slice %186 {offsets = [0, 0], sizes = [8, 512], strides = [1, 1]} : vector<8x768xf32> to vector<8x512xf32>
    %190 = vector.extract_strided_slice %188 {offsets = [0, 0], sizes = [8, 512], strides = [1, 1]} : vector<8x768xf32> to vector<8x512xf32>
    %191 = arith.addf %189, %190 : vector<8x512xf32>
    %192 = arith.negf %191 : vector<8x512xf32>
    %193 = math.exp %192 : vector<8x512xf32>
    %cst_58 = arith.constant 1.000000e+00 : f32
    %194 = vector.broadcast %cst_58 : f32 to vector<8x512xf32>
    %195 = arith.addf %194, %193 : vector<8x512xf32>
    %196 = arith.divf %194, %195 : vector<8x512xf32>
    %197 = vector.extract_strided_slice %196 {offsets = [0, 0], sizes = [8, 256], strides = [1, 1]} : vector<8x512xf32> to vector<8x256xf32>
    %198 = vector.extract_strided_slice %196 {offsets = [0, 256], sizes = [8, 256], strides = [1, 1]} : vector<8x512xf32> to vector<8x256xf32>
    %199 = vector.extract_strided_slice %186 {offsets = [0, 512], sizes = [8, 256], strides = [1, 1]} : vector<8x768xf32> to vector<8x256xf32>
    %200 = vector.extract_strided_slice %188 {offsets = [0, 512], sizes = [8, 256], strides = [1, 1]} : vector<8x768xf32> to vector<8x256xf32>
    %201 = arith.addf %200, %16 : vector<8x256xf32>
    %202 = arith.mulf %197, %201 : vector<8x256xf32>
    %203 = arith.addf %199, %202 : vector<8x256xf32>
    %204 = math.tanh %203 : vector<8x256xf32>
    %cst_59 = arith.constant 1.000000e+00 : f32
    %205 = vector.broadcast %cst_59 : f32 to vector<8x256xf32>
    %206 = arith.subf %205, %198 : vector<8x256xf32>
    %207 = arith.mulf %206, %204 : vector<8x256xf32>
    %208 = arith.mulf %198, %182 : vector<8x256xf32>
    %209 = arith.addf %207, %208 : vector<8x256xf32>
    %c7_i32 = arith.constant 7 : i32
    %c8_i32_60 = arith.constant 8 : i32
    %210 = arith.muli %c7_i32, %c8_i32_60 : i32
    %211 = tpu.assume_multiple %210, 8 : i32
    %212 = arith.index_cast %211 : i32 to index
    %c0_61 = arith.constant 0 : index
    %213 = vector.load %arg7[%212, %c0_61] : memref<64x768xf32, #tpu.memory_space<vmem>>, vector<8x768xf32>
    %c0_62 = arith.constant 0 : index
    %c0_63 = arith.constant 0 : index
    %214 = vector.load %arg8[%c0_62, %c0_63] : memref<256x768xf32, #tpu.memory_space<vmem>>, vector<256x768xf32>
    %cst_64 = arith.constant dense<0.000000e+00> : vector<8x768xf32>
    %215 = tpu.matmul %209, %214, %cst_64 {dimension_numbers = #tpu.dot_dimension_numbers<[1], [0], [0], [1], [0, 0, 1, 1], [], []>} : vector<8x256xf32>, vector<256x768xf32>, vector<8x768xf32> -> vector<8x768xf32>
    %216 = vector.extract_strided_slice %213 {offsets = [0, 0], sizes = [8, 512], strides = [1, 1]} : vector<8x768xf32> to vector<8x512xf32>
    %217 = vector.extract_strided_slice %215 {offsets = [0, 0], sizes = [8, 512], strides = [1, 1]} : vector<8x768xf32> to vector<8x512xf32>
    %218 = arith.addf %216, %217 : vector<8x512xf32>
    %219 = arith.negf %218 : vector<8x512xf32>
    %220 = math.exp %219 : vector<8x512xf32>
    %cst_65 = arith.constant 1.000000e+00 : f32
    %221 = vector.broadcast %cst_65 : f32 to vector<8x512xf32>
    %222 = arith.addf %221, %220 : vector<8x512xf32>
    %223 = arith.divf %221, %222 : vector<8x512xf32>
    %224 = vector.extract_strided_slice %223 {offsets = [0, 0], sizes = [8, 256], strides = [1, 1]} : vector<8x512xf32> to vector<8x256xf32>
    %225 = vector.extract_strided_slice %223 {offsets = [0, 256], sizes = [8, 256], strides = [1, 1]} : vector<8x512xf32> to vector<8x256xf32>
    %226 = vector.extract_strided_slice %213 {offsets = [0, 512], sizes = [8, 256], strides = [1, 1]} : vector<8x768xf32> to vector<8x256xf32>
    %227 = vector.extract_strided_slice %215 {offsets = [0, 512], sizes = [8, 256], strides = [1, 1]} : vector<8x768xf32> to vector<8x256xf32>
    %228 = arith.addf %227, %16 : vector<8x256xf32>
    %229 = arith.mulf %224, %228 : vector<8x256xf32>
    %230 = arith.addf %226, %229 : vector<8x256xf32>
    %231 = math.tanh %230 : vector<8x256xf32>
    %cst_66 = arith.constant 1.000000e+00 : f32
    %232 = vector.broadcast %cst_66 : f32 to vector<8x256xf32>
    %233 = arith.subf %232, %225 : vector<8x256xf32>
    %234 = arith.mulf %233, %231 : vector<8x256xf32>
    %235 = arith.mulf %225, %209 : vector<8x256xf32>
    %236 = arith.addf %234, %235 : vector<8x256xf32>
    %c8_i32_67 = arith.constant 8 : i32
    %c1_i32_68 = arith.constant 1 : i32
    %237 = tpu.memref_slice %arg10[%c1_i32_68] : memref<2x!tpu.dma_semaphore, #tpu.memory_space<semaphore_mem>> -> memref<1x!tpu.dma_semaphore, #tpu.memory_space<semaphore_mem>>
    %238 = tpu.memref_squeeze %237 : memref<1x!tpu.dma_semaphore, #tpu.memory_space<semaphore_mem>> -> memref<!tpu.dma_semaphore, #tpu.memory_space<semaphore_mem>>
    tpu.wait_dma2 semaphore(%238 : memref<!tpu.dma_semaphore, #tpu.memory_space<semaphore_mem>>) src(%arg4 : memref<256x128xf32, #tpu.memory_space<any>>) dst(%arg9 : memref<256x128xf32, #tpu.memory_space<vmem>>)
    %c0_69 = arith.constant 0 : index
    %c0_70 = arith.constant 0 : index
    %239 = vector.load %arg9[%c0_69, %c0_70] : memref<256x128xf32, #tpu.memory_space<vmem>>, vector<256x128xf32>
    %cst_71 = arith.constant dense<0.000000e+00> : vector<8x128xf32>
    %240 = tpu.matmul %236, %239, %cst_71 {dimension_numbers = #tpu.dot_dimension_numbers<[1], [0], [0], [1], [0, 0, 1, 1], [], []>} : vector<8x256xf32>, vector<256x128xf32>, vector<8x128xf32> -> vector<8x128xf32>
    %241 = vector.broadcast %17 : vector<1x128xf32> to vector<8x128xf32>
    %242 = arith.addf %240, %241 : vector<8x128xf32>
    %c0_72 = arith.constant 0 : index
    %c0_73 = arith.constant 0 : index
    %243 = vector.load %arg6[%c0_72, %c0_73] : memref<8x128xf32, #tpu.memory_space<vmem>>, vector<8x128xf32>
    tpu.vector_store %arg6[%c0_72, %c0_73], %242 {strides = array<i32>} : memref<8x128xf32, #tpu.memory_space<vmem>>, vector<8x128xf32>,
    return
  }
  func.func @transform_0(%arg0: i32) -> (i32, i32) {
    %c0_i32 = arith.constant 0 : i32
    %c0_i32_0 = arith.constant 0 : i32
    %c0_i32_1 = arith.constant 0 : i32
    return %c0_i32, %c0_i32_0 : i32, i32
  }
  func.func @transform_1(%arg0: i32) -> (i32, i32) {
    %c0_i32 = arith.constant 0 : i32
    %c0_i32_0 = arith.constant 0 : i32
    %c0_i32_1 = arith.constant 0 : i32
    return %c0_i32, %c0_i32_0 : i32, i32
  }
  func.func @transform_4(%arg0: i32) -> (i32, i32) {
    %c0_i32 = arith.constant 0 : i32
    %c0_i32_0 = arith.constant 0 : i32
    %c0_i32_1 = arith.constant 0 : i32
    return %c0_i32, %c0_i32_0 : i32, i32
  }
  func.func @transform_5(%arg0: i32) -> (i32, i32) {
    %c0_i32 = arith.constant 0 : i32
    %c0_i32_0 = arith.constant 0 : i32
    %c0_i32_1 = arith.constant 0 : i32
    return %c0_i32, %c0_i32_0 : i32, i32
  }
}

</mosaic_0001>

<bundles_post_ra>
// kernel: tpu_custom_call.1
= control target key start
LH: loop header
LB: loop body
LE: loop exit
PB: predicated region body
PF: predicated region fallthrough
CT: control target
= control target key end

     0   :  { %10 = vsyncpa [#allocation7], 0  ;;  %s6991_s0 = inlined_call_operand.vmem [shape: s32[64,1], index: 0, kind: input, shape index: {}]   ;;  %s6992_s1 = inlined_call_operand.hbm [shape: f32[128,768], index: 1, kind: input, shape index: {}]   ;;  %s6993_s2 = inlined_call_operand.hbm [shape: f32[256,768], index: 2, kind: input, shape index: {}]   ;;  %s6994_s3 = inlined_call_operand.hbm [shape: f32[256,128], index: 3, kind: input, shape index: {}]   ;;  %s6995_s4 = inlined_call_operand.vmem [shape: f32[1,384], index: 4, kind: input, shape index: {}]   ;;  %s6996_s5 = inlined_call_operand.hbm [shape: f32[8,128], index: 5, kind: output, shape index: {}]  }
   0x1   :  { %11 = vsyncpa [#allocation8], 0  ;;  %s3824_s18 = smov [#allocation6]  }
   0x2   :  { %s19_s19 = sshll.u32 %s3824_s18, 4  ;;  %s20_s19 = int_to_ptr.vmem [resolvable:$true] %s19_s19 }
   0x3   :  { %s3744_s20 = scalar_lea.vmem %s20_s19, 12288  ;;  %p3749_p1 = scmp.lt.s32.totalorder %s20_s19, %s20_s19 }
   0x4   :  { %p3745_p0 = scmp.ne.s32.totalorder %s20_s19, %s3744_s20  ;;  %p3750_p2 = scmp.lt.s32.totalorder %s3744_s20, %s3744_s20 }
   0x6   :  { %p3751_p3 = por %p3750_p2, %p3749_p1 }
   0x8   :  { %p3752_p4 = pnand %p3751_p3, %p3745_p0 }
   0xa   :  { %3755 = shalt.err (!%p3752_p4)
}
   0xb   :  { %s3825_s21 = smov 768   ;;  %s3826_s22 = smov 48  }
   0xc   :  { %25 = dma.hbm_to_vmem [thread:$0]  %s6992_s1, 12288, %s20_s19, [#allocation7], %s3825_s21, %s3825_s21, %s3826_s22  }
   0xd   :  { %3816 = dma.done.wait [#allocation7], 12288  }
   0xe   :  { %3817 = vsyncadd [#allocation7], 4294955008  ;;  %v3827_v0 = vmov 0   ;;  %v6997_v1 = vmov 0.0   ;;  %v3871_v2 = vld [vmem:[%s6995_s4 + $0x2] ss:$0 sm:$0xff]  ;;  %v62_v35 = vlaneseq }
   0xf   :  { %3191 = vset.pattern.permute.xlu1 %v3827_v0  ;;  %3190 = vset.pattern.permute.xlu0 %v3827_v0  ;;  %7675 = vst [vmem:[#allocation20_spill] sm:$0xff] %v3871_v2  ;;  %v56_v3 = vld [vmem:[%s6991_s0 + $0x10] sm:$0xff]  ;;  %v54_v4 = vld [vmem:[%s6991_s0] sm:$0xff]  ;;  %v57_v5 = vld [vmem:[%s6991_s0 + $0x18] sm:$0xff]  ;;  %s3831_s19 = smov [#allocation4]  }
  0x10   :  { %272 = vmatprep.mubr.f32.mxu0 %v6997_v1  ;;  %385 = vmatprep.mubr.f32.mxu1 %v6997_v1  ;;  %v55_v6 = vld [vmem:[%s6991_s0 + $0x8] sm:$0xff]  ;;  %v203_v7 = vld [vmem:[#allocation6 + $0x2d8] sm:$0xff]  ;;  %v202_v8 = vld [vmem:[#allocation6 + $0x2d0] sm:$0xff]  ;;  %v598_v40 = vshrl.u32 %v62_v35, 7  ;;  %s50_s20 = sshll.u32 %s3831_s19, 4  ;;  %s51_s20 = int_to_ptr.vmem [resolvable:$true] %s50_s20 }
  0x11   :  { %71 = vperm.xlu1 %3191, %v56_v3   ;;  %65 = vperm.xlu0 %3190, %v54_v4   ;;  %v205_v9 = vld [vmem:[#allocation6 + $0x2e8] sm:$0xff]  ;;  %v204_v11 = vld [vmem:[#allocation6 + $0x2e0] sm:$0xff]  ;;  %v199_v13 = vld [vmem:[#allocation6 + $0x2b8] sm:$0xff] }
  0x12   :  { %208 = vmatprep.subr.mxu0 %v203_v7  ;;  %321 = vmatprep.subr.mxu1 %v205_v9  ;;  %v197_v10 = vld [vmem:[#allocation6 + $0x2a8] sm:$0xff]  ;;  %v196_v12 = vld [vmem:[#allocation6 + $0x2a0] sm:$0xff]  ;;  %v198_v14 = vld [vmem:[#allocation6 + $0x2b0] sm:$0xff]  ;;  %v599_v49 = vsub.s32 0, %v598_v40  ;;  %v603_v50 = vsub.s32 1, %v598_v40 }
  0x13   :  { %v59_v15 = vld [vmem:[%s6991_s0 + $0x28] sm:$0xff]  ;;  %v58_v16 = vld [vmem:[%s6991_s0 + $0x20] sm:$0xff]  ;;  %209 = vmatpush1.msra.mxu0 %v202_v8  ;;  %322 = vmatpush1.msra.mxu1 %v204_v11  ;;  %v191_v17 = vld [vmem:[#allocation6 + $0x278] sm:$0xff] }
  0x14   :  { %210 = vmatprep.subr.mxu0 %v197_v10  ;;  %323 = vmatprep.subr.mxu1 %v199_v13  ;;  %v193_v18 = vld [vmem:[#allocation6 + $0x288] sm:$0xff]  ;;  %v190_v19 = vld [vmem:[#allocation6 + $0x270] sm:$0xff]  ;;  %v192_v20 = vld [vmem:[#allocation6 + $0x280] sm:$0xff] }
  0x15   :  { %74 = vperm.xlu1 %3191, %v57_v5   ;;  %68 = vperm.xlu0 %3190, %v55_v6   ;;  %v185_v21 = vld [vmem:[#allocation6 + $0x248] sm:$0xff]  ;;  %v187_v22 = vld [vmem:[#allocation6 + $0x258] sm:$0xff]  ;;  %v60_v24 = vld [vmem:[%s6991_s0 + $0x30] sm:$0xff] }
  0x16   :  { %211 = vmatpush1.msra.mxu0 %v196_v12  ;;  %324 = vmatpush1.msra.mxu1 %v198_v14  ;;  %v61_v23 = vld [vmem:[%s6991_s0 + $0x38] sm:$0xff]  ;;  %v184_v25 = vld [vmem:[#allocation6 + $0x240] sm:$0xff]  ;;  %v186_v26 = vld [vmem:[#allocation6 + $0x250] sm:$0xff] }
  0x17   :  { %212 = vmatprep.subr.mxu0 %v191_v17  ;;  %325 = vmatprep.subr.mxu1 %v193_v18  ;;  %v179_v27 = vld [vmem:[#allocation6 + $0x218] sm:$0xff]  ;;  %v181_v28 = vld [vmem:[#allocation6 + $0x228] sm:$0xff]  ;;  %v178_v29 = vld [vmem:[#allocation6 + $0x210] sm:$0xff] }
  0x18   :  { %213 = vmatpush1.msra.mxu0 %v190_v19  ;;  %326 = vmatpush1.msra.mxu1 %v192_v20  ;;  %v180_v30 = vld [vmem:[#allocation6 + $0x220] sm:$0xff]  ;;  %v173_v31 = vld [vmem:[#allocation6 + $0x1e8] sm:$0xff]  ;;  %v175_v32 = vld [vmem:[#allocation6 + $0x1f8] sm:$0xff] }
  0x19   :  { %80 = vperm.xlu1 %3191, %v59_v15   ;;  %77 = vperm.xlu0 %3190, %v58_v16   ;;  %v172_v33 = vld [vmem:[#allocation6 + $0x1e0] sm:$0xff]  ;;  %v174_v34 = vld [vmem:[#allocation6 + $0x1f0] sm:$0xff]  ;;  %v167_v36 = vld [vmem:[#allocation6 + $0x1b8] sm:$0xff] }
  0x1a   :  { %214 = vmatprep.subr.mxu0 %v185_v21  ;;  %327 = vmatprep.subr.mxu1 %v187_v22  ;;  %v169_v37 = vld [vmem:[#allocation6 + $0x1c8] sm:$0xff]  ;;  %v166_v38 = vld [vmem:[#allocation6 + $0x1b0] sm:$0xff]  ;;  %v168_v39 = vld [vmem:[#allocation6 + $0x1c0] sm:$0xff]  ;;  %v3906_v21 = vand.u32 127, %v62_v35 }
  0x1b   :  { %215 = vmatpush1.msra.mxu0 %v184_v25  ;;  %328 = vmatpush1.msra.mxu1 %v186_v26  ;;  %v161_v41 = vld [vmem:[#allocation6 + $0x188] sm:$0xff]  ;;  %v163_v42 = vld [vmem:[#allocation6 + $0x198] sm:$0xff]  ;;  %v160_v43 = vld [vmem:[#allocation6 + $0x180] sm:$0xff]  ;;  %v3829_v25 = vmov 1.0  }
  0x1c   :  { %216 = vmatprep.subr.mxu0 %v179_v27  ;;  %329 = vmatprep.subr.mxu1 %v181_v28  ;;  %v162_v44 = vld [vmem:[#allocation6 + $0x190] sm:$0xff]  ;;  %v155_v45 = vld [vmem:[#allocation6 + $0x158] sm:$0xff]  ;;  %v157_v46 = vld [vmem:[#allocation6 + $0x168] sm:$0xff] }
  0x1d   :  { %86 = vperm.xlu1 %3191, %v61_v23   ;;  %83 = vperm.xlu0 %3190, %v60_v24   ;;  %v154_v47 = vld [vmem:[#allocation6 + $0x150] sm:$0xff]  ;;  %v156_v48 = vld [vmem:[#allocation6 + $0x160] sm:$0xff]  ;;  %v149_v51 = vld [vmem:[#allocation6 + $0x128] sm:$0xff] }
  0x1e   :  { %217 = vmatpush1.msra.mxu0 %v178_v29  ;;  %330 = vmatpush1.msra.mxu1 %v180_v30  ;;  %v151_v52 = vld [vmem:[#allocation6 + $0x138] sm:$0xff]  ;;  %v148_v53 = vld [vmem:[#allocation6 + $0x120] sm:$0xff]  ;;  %v150_v54 = vld [vmem:[#allocation6 + $0x130] sm:$0xff] }
  0x1f   :  { %218 = vmatprep.subr.mxu0 %v173_v31  ;;  %331 = vmatprep.subr.mxu1 %v175_v32  ;;  %v143_v55 = vld [vmem:[#allocation6 + $0xf8] sm:$0xff]  ;;  %v145_v56 = vld [vmem:[#allocation6 + $0x108] sm:$0xff]  ;;  %v595_v57 = vld [vmem:[%s6995_s4] sm:$0x3]  ;;  %s3830_s4 = smov [#allocation3]  }
  0x20   :  { %219 = vmatpush1.msra.mxu0 %v172_v33  ;;  %332 = vmatpush1.msra.mxu1 %v174_v34  ;;  %v142_v58 = vld [vmem:[#allocation6 + $0xf0] sm:$0xff]  ;;  %v144_v59 = vld [vmem:[#allocation6 + $0x100] sm:$0xff]  ;;  %v3901_v60 = vrot.slane %v595_v57, %v599_v49  ;;  %v3903_v61 = vrot.slane %v595_v57, %v603_v50  ;;  %v137_v62 = vld [vmem:[#allocation6 + $0xc8] sm:$0xff]  ;;  %s38_s18 = sshll.u32 %s3830_s4, 4  ;;  %s39_s18 = int_to_ptr.vmem [resolvable:$true] %s38_s18 }
  0x21   :  { %220 = vmatprep.subr.mxu0 %v167_v36  ;;  %333 = vmatprep.subr.mxu1 %v169_v37  ;;  %v139_v63 = vld [vmem:[#allocation6 + $0xd8] sm:$0xff]  ;;  %v136_v0 = vld [vmem:[#allocation6 + $0xc0] sm:$0xff]  ;;  %v138_v3 = vld [vmem:[#allocation6 + $0xd0] sm:$0xff]  ;;  %s3764_s21 = scalar_lea.vmem %s39_s18, 24576  ;;  %p3769_p6 = scmp.lt.s32.totalorder %s39_s18, %s39_s18 }
  0x22   :  { %221 = vmatpush1.msra.mxu0 %v166_v38  ;;  %334 = vmatpush1.msra.mxu1 %v168_v39  ;;  %7676 = vst [vmem:[#allocation21_spill] sm:$0xff] %v3901_v60  ;;  %7677 = vst [vmem:[#allocation22_spill] sm:$0xff] %v3903_v61  ;;  %v131_v4 = vld [vmem:[#allocation6 + $0x98] sm:$0xff]  ;;  %v133_v5 = vld [vmem:[#allocation6 + $0xa8] sm:$0xff]  ;;  %p3765_p5 = scmp.ne.s32.totalorder %s39_s18, %s3764_s21  ;;  %p3770_p7 = scmp.lt.s32.totalorder %s3764_s21, %s3764_s21 }
  0x23   :  { %222 = vmatprep.subr.mxu0 %v161_v41  ;;  %335 = vmatprep.subr.mxu1 %v163_v42  ;;  %v130_v6 = vld [vmem:[#allocation6 + $0x90] sm:$0xff]  ;;  %v132_v7 = vld [vmem:[#allocation6 + $0xa0] sm:$0xff]  ;;  %v125_v8 = vld [vmem:[#allocation6 + $0x68] sm:$0xff] }
  0x24   :  { %223 = vmatpush1.msra.mxu0 %v160_v43  ;;  %336 = vmatpush1.msra.mxu1 %v162_v44  ;;  %v127_v9 = vld [vmem:[#allocation6 + $0x78] sm:$0xff]  ;;  %v124_v10 = vld [vmem:[#allocation6 + $0x60] sm:$0xff]  ;;  %v126_v11 = vld [vmem:[#allocation6 + $0x70] sm:$0xff]  ;;  %p3771_p8 = por %p3770_p7, %p3769_p6 }
  0x25   :  { %224 = vmatprep.subr.mxu0 %v155_v45  ;;  %337 = vmatprep.subr.mxu1 %v157_v46  ;;  %v119_v12 = vld [vmem:[#allocation6 + $0x38] sm:$0xff]  ;;  %v121_v13 = vld [vmem:[#allocation6 + $0x48] sm:$0xff]  ;;  %v118_v14 = vld [vmem:[#allocation6 + $0x30] sm:$0xff] }
  0x26   :  { %225 = vmatpush1.msra.mxu0 %v154_v47  ;;  %338 = vmatpush1.msra.mxu1 %v156_v48  ;;  %v120_v15 = vld [vmem:[#allocation6 + $0x40] sm:$0xff]  ;;  %v113_v16 = vld [vmem:[#allocation6 + $0x8] sm:$0xff]  ;;  %v115_v17 = vld [vmem:[#allocation6 + $0x18] sm:$0xff]  ;;  %p3772_p9 = pnand %p3771_p8, %p3765_p5 }
  0x27   :  { %226 = vmatprep.subr.mxu0 %v149_v51  ;;  %339 = vmatprep.subr.mxu1 %v151_v52  ;;  %v112_v18 = vld [vmem:[#allocation6] sm:$0xff]  ;;  %v114_v19 = vld [vmem:[#allocation6 + $0x10] sm:$0xff]  ;;  %v207_v20 = vld [vmem:[#allocation6 + $0x2f8] sm:$0xff] }
  0x28   :  { %227 = vmatpush1.msra.mxu0 %v148_v53  ;;  %340 = vmatpush1.msra.mxu1 %v150_v54  ;;  %v206_v23 = vld [vmem:[#allocation6 + $0x2f0] sm:$0xff]  ;;  %v201_v24 = vld [vmem:[#allocation6 + $0x2c8] sm:$0xff]  ;;  %v200_v26 = vld [vmem:[#allocation6 + $0x2c0] sm:$0xff] }
  0x29   :  { %228 = vmatprep.subr.mxu0 %v143_v55  ;;  %341 = vmatprep.subr.mxu1 %v145_v56  ;;  %v195_v27 = vld [vmem:[#allocation6 + $0x298] sm:$0xff]  ;;  %v194_v29 = vld [vmem:[#allocation6 + $0x290] sm:$0xff]  ;;  %v189_v30 = vld [vmem:[#allocation6 + $0x268] sm:$0xff] }
  0x2a   :  { %229 = vmatpush1.msra.mxu0 %v142_v58  ;;  %342 = vmatpush1.msra.mxu1 %v144_v59  ;;  %v188_v32 = vld [vmem:[#allocation6 + $0x260] sm:$0xff]  ;;  %v183_v33 = vld [vmem:[#allocation6 + $0x238] sm:$0xff]  ;;  %v182_v34 = vld [vmem:[#allocation6 + $0x230] sm:$0xff] }
  0x2b   :  { %230 = vmatprep.subr.mxu0 %v137_v62  ;;  %343 = vmatprep.subr.mxu1 %v139_v63  ;;  %v177_v35 = vld [vmem:[#allocation6 + $0x208] sm:$0xff]  ;;  %v176_v36 = vld [vmem:[#allocation6 + $0x200] sm:$0xff]  ;;  %v171_v37 = vld [vmem:[#allocation6 + $0x1d8] sm:$0xff] }
  0x2c   :  { %231 = vmatpush1.msra.mxu0 %v136_v0  ;;  %344 = vmatpush1.msra.mxu1 %v138_v3  ;;  %v170_v39 = vld [vmem:[#allocation6 + $0x1d0] sm:$0xff]  ;;  %v165_v40 = vld [vmem:[#allocation6 + $0x1a8] sm:$0xff]  ;;  %v164_v42 = vld [vmem:[#allocation6 + $0x1a0] sm:$0xff] }
  0x2d   :  { %232 = vmatprep.subr.mxu0 %v131_v4  ;;  %345 = vmatprep.subr.mxu1 %v133_v5  ;;  %v159_v43 = vld [vmem:[#allocation6 + $0x178] sm:$0xff]  ;;  %v158_v44 = vld [vmem:[#allocation6 + $0x170] sm:$0xff]  ;;  %v153_v45 = vld [vmem:[#allocation6 + $0x148] sm:$0xff] }
  0x2e   :  { %233 = vmatpush1.msra.mxu0 %v130_v6  ;;  %346 = vmatpush1.msra.mxu1 %v132_v7  ;;  %v152_v47 = vld [vmem:[#allocation6 + $0x140] sm:$0xff]  ;;  %v147_v48 = vld [vmem:[#allocation6 + $0x118] sm:$0xff]  ;;  %v146_v49 = vld [vmem:[#allocation6 + $0x110] sm:$0xff] }
  0x2f   :  { %234 = vmatprep.subr.mxu0 %v125_v8  ;;  %347 = vmatprep.subr.mxu1 %v127_v9  ;;  %v141_v50 = vld [vmem:[#allocation6 + $0xe8] sm:$0xff]  ;;  %v140_v52 = vld [vmem:[#allocation6 + $0xe0] sm:$0xff]  ;;  %v135_v53 = vld [vmem:[#allocation6 + $0xb8] sm:$0xff] }
  0x30   :  { %235 = vmatpush1.msra.mxu0 %v124_v10  ;;  %348 = vmatpush1.msra.mxu1 %v126_v11  ;;  %v134_v54 = vld [vmem:[#allocation6 + $0xb0] sm:$0xff]  ;;  %v129_v55 = vld [vmem:[#allocation6 + $0x88] sm:$0xff]  ;;  %v128_v57 = vld [vmem:[#allocation6 + $0x80] sm:$0xff] }
  0x31   :  { %236 = vmatprep.subr.mxu0 %v119_v12  ;;  %349 = vmatprep.subr.mxu1 %v121_v13  ;;  %v123_v58 = vld [vmem:[#allocation6 + $0x58] sm:$0xff]  ;;  %v122_v59 = vld [vmem:[#allocation6 + $0x50] sm:$0xff]  ;;  %v117_v62 = vld [vmem:[#allocation6 + $0x28] sm:$0xff] }
  0x32   :  { %237 = vmatpush1.msra.mxu0 %v118_v14  ;;  %350 = vmatpush1.msra.mxu1 %v120_v15  ;;  %v116_v63 = vld [vmem:[#allocation6 + $0x20] sm:$0xff] }
  0x33   :  { %238 = vmatprep.subr.mxu0 %v113_v16  ;;  %351 = vmatprep.subr.mxu1 %v115_v17 }
  0x34   :  { %239 = vmatpush1.msra.mxu0 %v112_v18  ;;  %352 = vmatpush1.msra.mxu1 %v114_v19 }
  0x35   :  { %434 = vmatprep.subr.mxu0 %v207_v20 }
  0x8c   :  { %v3908_v22 = vpop.permute.xlu0 %65  ;;  %v3926_v31 = vpop.permute.xlu1 %71 }
  0x8d   :  { %vm88_vm0 = vcmp.eq.s32.totalorder %v3908_v22, %v3906_v21  ;;  %vm90_vm2 = vcmp.eq.s32.totalorder %v3926_v31, %v3906_v21 }
  0x8e   :  { %3087 = vmatmul.mubr.msk.f32.vlgmr.msra.gmra.mxu0 %vm88_vm0, %v3829_v25  ;;  %3095 = vmatmul.mubr.msk.f32.vlgmr.msra.gmra.mxu1 %vm88_vm0, %v3829_v25 }
  0x8f   :  { %435 = vmatpush1.msra.mxu0 %v206_v23  ;;  %278 = vmatprep.mubr.f32.mxu0 %v6997_v1 }
  0x90   :  { %436 = vmatprep.subr.mxu0 %v201_v24  ;;  %v3921_v28 = vpop.permute.xlu0 %68  ;;  %391 = vmatprep.mubr.f32.mxu1 %v6997_v1  ;;  %v3948_v38 = vpop.permute.xlu1 %74 }
  0x91   :  { %437 = vmatpush1.msra.mxu0 %v200_v26  ;;  %vm89_vm1 = vcmp.eq.s32.totalorder %v3921_v28, %v3906_v21  ;;  %vm91_vm3 = vcmp.eq.s32.totalorder %v3948_v38, %v3906_v21 }
  0x92   :  { %438 = vmatprep.subr.mxu0 %v195_v27  ;;  %3088 = vmatmul.mubr.msk.f32.gmra.mxu0 %vm89_vm1, %v3829_v25 }
  0x93   :  { %3096 = vmatmul.mubr.msk.f32.gmra.mxu1 %vm89_vm1, %v3829_v25  ;;  %439 = vmatpush1.msra.mxu0 %v194_v29 }
  0x94   :  { %440 = vmatprep.subr.mxu0 %v189_v30  ;;  %284 = vmatprep.mubr.f32.mxu0 %v6997_v1  ;;  %v3954_v41 = vpop.permute.xlu0 %77  ;;  %v81_v46 = vpop.permute.xlu1 %80 }
  0x95   :  { %441 = vmatpush1.msra.mxu0 %v188_v32  ;;  %397 = vmatprep.mubr.f32.mxu1 %v6997_v1  ;;  %vm92_vm4 = vcmp.eq.s32.totalorder %v3954_v41, %v3906_v21  ;;  %vm93_vm5 = vcmp.eq.s32.totalorder %v81_v46, %v3906_v21 }
  0x96   :  { %442 = vmatprep.subr.mxu0 %v183_v33  ;;  %3089 = vmatmul.mubr.msk.f32.gmra.mxu0 %vm90_vm2, %v3829_v25 }
  0x97   :  { %3097 = vmatmul.mubr.msk.f32.gmra.mxu1 %vm90_vm2, %v3829_v25  ;;  %443 = vmatpush1.msra.mxu0 %v182_v34 }
  0x98   :  { %444 = vmatprep.subr.mxu0 %v177_v35  ;;  %290 = vmatprep.mubr.f32.mxu0 %v6997_v1  ;;  %v84_v51 = vpop.permute.xlu0 %83  ;;  %v87_v56 = vpop.permute.xlu1 %86 }
  0x99   :  { %445 = vmatpush1.msra.mxu0 %v176_v36  ;;  %403 = vmatprep.mubr.f32.mxu1 %v6997_v1  ;;  %vm94_vm6 = vcmp.eq.s32.totalorder %v84_v51, %v3906_v21  ;;  %vm95_vm7 = vcmp.eq.s32.totalorder %v87_v56, %v3906_v21 }
  0x9a   :  { %446 = vmatprep.subr.mxu0 %v171_v37  ;;  %3090 = vmatmul.mubr.msk.f32.gmra.mxu0 %vm91_vm3, %v3829_v25 }
  0x9b   :  { %3098 = vmatmul.mubr.msk.f32.gmra.mxu1 %vm91_vm3, %v3829_v25  ;;  %447 = vmatpush1.msra.mxu0 %v170_v39 }
  0x9c   :  { %448 = vmatprep.subr.mxu0 %v165_v40  ;;  %296 = vmatprep.mubr.f32.mxu0 %v6997_v1 }
  0x9d   :  { %449 = vmatpush1.msra.mxu0 %v164_v42  ;;  %409 = vmatprep.mubr.f32.mxu1 %v6997_v1 }
  0x9e   :  { %450 = vmatprep.subr.mxu0 %v159_v43  ;;  %3091 = vmatmul.mubr.msk.f32.gmra.mxu0 %vm92_vm4, %v3829_v25 }
  0x9f   :  { %3099 = vmatmul.mubr.msk.f32.gmra.mxu1 %vm92_vm4, %v3829_v25  ;;  %451 = vmatpush1.msra.mxu0 %v158_v44 }
  0xa0   :  { %452 = vmatprep.subr.mxu0 %v153_v45  ;;  %302 = vmatprep.mubr.f32.mxu0 %v6997_v1 }
  0xa1   :  { %453 = vmatpush1.msra.mxu0 %v152_v47  ;;  %415 = vmatprep.mubr.f32.mxu1 %v6997_v1 }
  0xa2   :  { %454 = vmatprep.subr.mxu0 %v147_v48  ;;  %3092 = vmatmul.mubr.msk.f32.gmra.mxu0 %vm93_vm5, %v3829_v25 }
  0xa3   :  { %3100 = vmatmul.mubr.msk.f32.gmra.mxu1 %vm93_vm5, %v3829_v25  ;;  %455 = vmatpush1.msra.mxu0 %v146_v49 }
  0xa4   :  { %456 = vmatprep.subr.mxu0 %v141_v50  ;;  %308 = vmatprep.mubr.f32.mxu0 %v6997_v1 }
  0xa5   :  { %457 = vmatpush1.msra.mxu0 %v140_v52  ;;  %421 = vmatprep.mubr.f32.mxu1 %v6997_v1 }
  0xa6   :  { %458 = vmatprep.subr.mxu0 %v135_v53  ;;  %3093 = vmatmul.mubr.msk.f32.gmra.mxu0 %vm94_vm6, %v3829_v25 }
  0xa7   :  { %3101 = vmatmul.mubr.msk.f32.gmra.mxu1 %vm94_vm6, %v3829_v25  ;;  %459 = vmatpush1.msra.mxu0 %v134_v54 }
  0xa8   :  { %460 = vmatprep.subr.mxu0 %v129_v55  ;;  %314 = vmatprep.mubr.f32.mxu0 %v6997_v1 }
  0xa9   :  { %461 = vmatpush1.msra.mxu0 %v128_v57  ;;  %427 = vmatprep.mubr.f32.mxu1 %v6997_v1 }
  0xaa   :  { %462 = vmatprep.subr.mxu0 %v123_v58  ;;  %3094 = vmatmul.mubr.msk.f32.gmra.mxu0 %vm95_vm7, %v3829_v25 }
  0xab   :  { %3102 = vmatmul.mubr.msk.f32.gmra.mxu1 %vm95_vm7, %v3829_v25  ;;  %463 = vmatpush1.msra.mxu0 %v122_v59 }
  0xac   :  { %464 = vmatprep.subr.mxu0 %v117_v62  ;;  %498 = vmatprep.mubr.f32.mxu0 %v6997_v1 }
  0xad   :  { %465 = vmatpush1.msra.mxu0 %v116_v63 }
  0xae   :  { %3103 = vmatmul.mubr.msk.f32.vlgmr.msra.gmra.mxu0 %vm88_vm0, %v3829_v25 }
  0xaf   :  { %504 = vmatprep.mubr.f32.mxu0 %v6997_v1 }
  0xb2   :  { %3104 = vmatmul.mubr.msk.f32.gmra.mxu0 %vm89_vm1, %v3829_v25 }
  0xb3   :  { %510 = vmatprep.mubr.f32.mxu0 %v6997_v1 }
  0xb6   :  { %3105 = vmatmul.mubr.msk.f32.gmra.mxu0 %vm90_vm2, %v3829_v25 }
  0xb7   :  { %516 = vmatprep.mubr.f32.mxu0 %v6997_v1 }
  0xba   :  { %3106 = vmatmul.mubr.msk.f32.gmra.mxu0 %vm91_vm3, %v3829_v25 }
  0xbb   :  { %522 = vmatprep.mubr.f32.mxu0 %v6997_v1 }
  0xbe   :  { %3107 = vmatmul.mubr.msk.f32.gmra.mxu0 %vm92_vm4, %v3829_v25 }
  0xbf   :  { %528 = vmatprep.mubr.f32.mxu0 %v6997_v1 }
  0xc2   :  { %3108 = vmatmul.mubr.msk.f32.gmra.mxu0 %vm93_vm5, %v3829_v25 }
  0xc3   :  { %534 = vmatprep.mubr.f32.mxu0 %v6997_v1 }
  0xc6   :  { %3109 = vmatmul.mubr.msk.f32.gmra.mxu0 %vm94_vm6, %v3829_v25 }
  0xc7   :  { %540 = vmatprep.mubr.f32.mxu0 %v6997_v1 }
  0xca   :  { %3110 = vmatmul.mubr.msk.f32.gmra.mxu0 %vm95_vm7, %v3829_v25 }
  0xcb   :  { %3775 = shalt.err (!%p3772_p9)  }
  0xcc   :  { %41 = dma.hbm_to_vmem [thread:$0]  %s6993_s2, 24576, %s39_s18, [#allocation5] }
  0xcd   :  { %s3784_s24 = scalar_lea.vmem %s51_s20, 4096  ;;  %p3789_p11 = scmp.lt.s32.totalorder %s51_s20, %s51_s20 }
  0xce   :  { %p3785_p10 = scmp.ne.s32.totalorder %s51_s20, %s3784_s24  ;;  %p3790_p12 = scmp.lt.s32.totalorder %s3784_s24, %s3784_s24 }
  0xd0   :  { %p3791_p13 = por %p3790_p12, %p3789_p11 }
  0xd2   :  { %p3792_p0 = pnand %p3791_p13, %p3785_p10 }
  0xd4   :  { %3795 = shalt.err (!%p3792_p0)  }
  0xd5   :  { %53 = dma.hbm_to_vmem [thread:$0]  %s6994_s3, 4096, %s51_s20, [#allocation5 + $0x1] }
 0x14e   :  { %v4046_v0 = vpop.f32.mrf.mxu0  ;;  %v4048_v3 = vpop.f32.mrf.mxu1 }
 0x14f   :  { %7678 = vst [vmem:[#allocation23_spill] sm:$0xff] %v4046_v0  ;;  %7679 = vst [vmem:[#allocation24_spill] sm:$0xff] %v4048_v3 }
 0x150   :  { %v4050_v4 = vpop.f32.mrf.mxu0  ;;  %v4052_v5 = vpop.f32.mrf.mxu1 }
 0x151   :  { %7680 = vst [vmem:[#allocation25_spill] sm:$0xff] %v4050_v4  ;;  %7681 = vst [vmem:[#allocation26_spill] sm:$0xff] %v4052_v5 }
 0x152   :  { %v4054_v6 = vpop.f32.mrf.mxu0 }
 0x153   :  { %7682 = vst [vmem:[#allocation27_spill] sm:$0xff] %v4054_v6  ;;  %v4056_v7 = vpop.f32.mrf.mxu1 }
 0x154   :  { %7683 = vst [vmem:[#allocation28_spill] sm:$0xff] %v4056_v7  ;;  %v4058_v8 = vpop.f32.mrf.mxu0 }
 0x155   :  { %7684 = vst [vmem:[#allocation29_spill] sm:$0xff] %v4058_v8  ;;  %v4060_v9 = vpop.f32.mrf.mxu1 }
 0x156   :  { %7685 = vst [vmem:[#allocation30_spill] sm:$0xff] %v4060_v9  ;;  %v4062_v10 = vpop.f32.mrf.mxu0 }
 0x157   :  { %7686 = vst [vmem:[#allocation31_spill] sm:$0xff] %v4062_v10  ;;  %v4064_v11 = vpop.f32.mrf.mxu1 }
 0x158   :  { %7687 = vst [vmem:[#allocation32_spill] sm:$0xff] %v4064_v11  ;;  %v4066_v12 = vpop.f32.mrf.mxu0 }
 0x159   :  { %7688 = vst [vmem:[#allocation33_spill] sm:$0xff] %v4066_v12  ;;  %v4068_v13 = vpop.f32.mrf.mxu1 }
 0x15a   :  { %7689 = vst [vmem:[#allocation34_spill] sm:$0xff] %v4068_v13  ;;  %v4070_v14 = vpop.f32.mrf.mxu0 }
 0x15b   :  { %7690 = vst [vmem:[#allocation35_spill] sm:$0xff] %v4070_v14  ;;  %v4072_v15 = vpop.f32.mrf.mxu1 }
 0x15c   :  { %7691 = vst [vmem:[#allocation36_spill] sm:$0xff] %v4072_v15  ;;  %v4074_v16 = vpop.f32.mrf.mxu0 }
 0x15d   :  { %7692 = vst [vmem:[#allocation37_spill] sm:$0xff] %v4074_v16  ;;  %v4076_v17 = vpop.f32.mrf.mxu1 }
 0x15e   :  { %7693 = vst [vmem:[#allocation38_spill] sm:$0xff] %v4076_v17  ;;  %v4078_v18 = vpop.f32.mrf.mxu0 }
 0x15f   :  { %7694 = vst [vmem:[#allocation39_spill] sm:$0xff] %v4078_v18  ;;  %v4080_v19 = vpop.f32.mrf.mxu1 }
 0x160   :  { %7695 = vst [vmem:[#allocation40_spill] sm:$0xff] %v4080_v19  ;;  %v4082_v20 = vpop.f32.mrf.mxu0 }
 0x161   :  { %7696 = vst [vmem:[#allocation41_spill] sm:$0xff] %v4082_v20  ;;  %v4084_v21 = vpop.f32.mrf.mxu1 }
 0x162   :  { %7697 = vst [vmem:[#allocation42_spill] sm:$0xff] %v4084_v21  ;;  %v4086_v22 = vpop.f32.mrf.mxu0 }
 0x163   :  { %7698 = vst [vmem:[#allocation43_spill] sm:$0xff] %v4086_v22  ;;  %v4088_v23 = vpop.f32.mrf.mxu1 }
 0x164   :  { %7699 = vst [vmem:[#allocation44_spill] sm:$0xff] %v4088_v23  ;;  %v4090_v24 = vpop.f32.mrf.mxu0 }
 0x165   :  { %7700 = vst [vmem:[#allocation45_spill] sm:$0xff] %v4090_v24  ;;  %v4092_v25 = vpop.f32.mrf.mxu1 }
 0x166   :  { %7701 = vst [vmem:[#allocation46_spill] sm:$0xff] %v4092_v25  ;;  %v4094_v26 = vpop.f32.mrf.mxu0 }
 0x167   :  { %7702 = vst [vmem:[#allocation47_spill] sm:$0xff] %v4094_v26  ;;  %v4096_v27 = vpop.f32.mrf.mxu1 }
 0x168   :  { %7703 = vst [vmem:[#allocation48_spill] sm:$0xff] %v4096_v27  ;;  %v4098_v28 = vpop.f32.mrf.mxu0 }
 0x169   :  { %7704 = vst [vmem:[#allocation49_spill] sm:$0xff] %v4098_v28  ;;  %v4100_v29 = vpop.f32.mrf.mxu1 }
 0x16a   :  { %7705 = vst [vmem:[#allocation50_spill] sm:$0xff] %v4100_v29  ;;  %v4102_v30 = vpop.f32.mrf.mxu0 }
 0x16b   :  { %7706 = vst [vmem:[#allocation51_spill] sm:$0xff] %v4102_v30  ;;  %v4104_v31 = vpop.f32.mrf.mxu1 }
 0x16c   :  { %7707 = vst [vmem:[#allocation52_spill] sm:$0xff] %v4104_v31  ;;  %v4106_v32 = vpop.f32.mrf.mxu0 }
 0x16d   :  { %7708 = vst [vmem:[#allocation53_spill] sm:$0xff] %v4106_v32  ;;  %v4108_v33 = vpop.f32.mrf.mxu1 }
 0x16e   :  { %7709 = vst [vmem:[#allocation54_spill] sm:$0xff] %v4108_v33  ;;  %v4110_v34 = vpop.f32.mrf.mxu0 }
 0x16f   :  { %7710 = vst [vmem:[#allocation55_spill] sm:$0xff] %v4110_v34 }
 0x170   :  { %v4112_v35 = vpop.f32.mrf.mxu0 }
 0x171   :  { %7711 = vst [vmem:[#allocation56_spill] sm:$0xff] %v4112_v35 }
 0x172   :  { %v4114_v36 = vpop.f32.mrf.mxu0 }
 0x173   :  { %7712 = vst [vmem:[#allocation57_spill] sm:$0xff] %v4114_v36 }
 0x174   :  { %v4116_v37 = vpop.f32.mrf.mxu0 }
 0x175   :  { %7713 = vst [vmem:[#allocation58_spill] sm:$0xff] %v4116_v37 }
 0x176   :  { %v4118_v38 = vpop.f32.mrf.mxu0 }
 0x177   :  { %7714 = vst [vmem:[#allocation59_spill] sm:$0xff] %v4118_v38 }
 0x178   :  { %v4120_v39 = vpop.f32.mrf.mxu0 }
 0x179   :  { %7715 = vst [vmem:[#allocation60_spill] sm:$0xff] %v4120_v39 }
 0x17a   :  { %v4122_v40 = vpop.f32.mrf.mxu0 }
 0x17b   :  { %7716 = vst [vmem:[#allocation61_spill] sm:$0xff] %v4122_v40 }
 0x17c   :  { %v4124_v41 = vpop.f32.mrf.mxu0 }
 0x17d   :  { %7717 = vst [vmem:[#allocation62_spill] sm:$0xff] %v4124_v41 }
 0x17e   :  { %v4126_v42 = vpop.f32.mrf.mxu0 }
 0x17f   :  { %7718 = vst [vmem:[#allocation63_spill] sm:$0xff] %v4126_v42 }
 0x180   :  { %v4128_v43 = vpop.f32.mrf.mxu0 }
 0x181   :  { %7719 = vst [vmem:[#allocation64_spill] sm:$0xff] %v4128_v43 }
 0x182   :  { %v4130_v44 = vpop.f32.mrf.mxu0 }
 0x183   :  { %7720 = vst [vmem:[#allocation65_spill] sm:$0xff] %v4130_v44 }
 0x184   :  { %v4132_v45 = vpop.f32.mrf.mxu0 }
 0x185   :  { %7721 = vst [vmem:[#allocation66_spill] sm:$0xff] %v4132_v45 }
 0x186   :  { %v4134_v46 = vpop.f32.mrf.mxu0 }
 0x187   :  { %7722 = vst [vmem:[#allocation67_spill] sm:$0xff] %v4134_v46 }
 0x188   :  { %v4136_v47 = vpop.f32.mrf.mxu0 }
 0x189   :  { %7723 = vst [vmem:[#allocation68_spill] sm:$0xff] %v4136_v47 }
 0x18a   :  { %v4138_v48 = vpop.f32.mrf.mxu0 }
 0x18b   :  { %7724 = vst [vmem:[#allocation69_spill] sm:$0xff] %v4138_v48 }
 0x18c   :  { %v4140_v49 = vpop.f32.mrf.mxu0 }
 0x18d   :  { %7725 = vst [vmem:[#allocation70_spill] sm:$0xff] %v4140_v49 }
 0x18e   :  { %3818 = dma.done.wait [#allocation5], 24576 }
 0x18f   :  { %3819 = vsyncadd [#allocation5], 4294942720  ;;  %877 = vmatprep.mubr.f32.mxu1 %v6997_v1  ;;  %948 = vmatprep.mubr.f32.mxu0 %v6997_v1  ;;  %v4144_v50 = vld [vmem:[#allocation3 + $0x2d8] sm:$0xff]  ;;  %v4146_v51 = vld [vmem:[#allocation3 + $0x2d0] sm:$0xff] }
 0x190   :  { %v4148_v52 = vld [vmem:[#allocation3 + $0x2a8] sm:$0xff]  ;;  %813 = vmatprep.subr.mxu1 %v4144_v50  ;;  %v4151_v53 = vld [vmem:[#allocation3 + $0x2a0] sm:$0xff]  ;;  %v4154_v54 = vld [vmem:[#allocation3 + $0x278] sm:$0xff] }
 0x191   :  { %814 = vmatpush1.msra.mxu1 %v4146_v51  ;;  %v4157_v55 = vld [vmem:[#allocation3 + $0x270] sm:$0xff]  ;;  %v4160_v56 = vld [vmem:[#allocation3 + $0x248] sm:$0xff]  ;;  %v4163_v57 = vld [vmem:[#allocation3 + $0x240] sm:$0xff] }
 0x192   :  { %815 = vmatprep.subr.mxu1 %v4148_v52  ;;  %v4166_v58 = vld [vmem:[#allocation3 + $0x218] sm:$0xff]  ;;  %v4169_v59 = vld [vmem:[#allocation3 + $0x210] sm:$0xff]  ;;  %v4172_v62 = vld [vmem:[#allocation3 + $0x1e8] sm:$0xff] }
 0x193   :  { %816 = vmatpush1.msra.mxu1 %v4151_v53  ;;  %v4175_v63 = vld [vmem:[#allocation3 + $0x1e0] sm:$0xff]  ;;  %v4178_v1 = vld [vmem:[#allocation3 + $0x1b8] sm:$0xff]  ;;  %v4181_v2 = vld [vmem:[#allocation3 + $0x1b0] sm:$0xff] }
 0x194   :  { %817 = vmatprep.subr.mxu1 %v4154_v54  ;;  %v4184_v49 = vld [vmem:[#allocation3 + $0x188] sm:$0xff]  ;;  %v4187_v48 = vld [vmem:[#allocation3 + $0x180] sm:$0xff]  ;;  %v4190_v33 = vld [vmem:[#allocation3 + $0x158] sm:$0xff] }
 0x195   :  { %818 = vmatpush1.msra.mxu1 %v4157_v55  ;;  %v4193_v31 = vld [vmem:[#allocation3 + $0x150] sm:$0xff]  ;;  %v4195_v32 = vld [vmem:[#allocation3 + $0x2e8] sm:$0xff]  ;;  %v4201_v47 = vld [vmem:[#allocation3 + $0x2e0] sm:$0xff] }
 0x196   :  { %819 = vmatprep.subr.mxu1 %v4160_v56  ;;  %v4198_v30 = vld [vmem:[#allocation3 + $0x128] sm:$0xff]  ;;  %884 = vmatprep.subr.mxu0 %v4195_v32  ;;  %v4204_v46 = vld [vmem:[#allocation3 + $0x120] sm:$0xff]  ;;  %v4207_v29 = vld [vmem:[#allocation3 + $0x2b8] sm:$0xff] }
 0x197   :  { %820 = vmatpush1.msra.mxu1 %v4163_v57  ;;  %885 = vmatpush1.msra.mxu0 %v4201_v47  ;;  %v4209_v27 = vld [vmem:[#allocation3 + $0x2b0] sm:$0xff]  ;;  %v4212_v28 = vld [vmem:[#allocation3 + $0xf8] sm:$0xff]  ;;  %v4215_v26 = vld [vmem:[#allocation3 + $0x288] sm:$0xff] }
 0x198   :  { %821 = vmatprep.subr.mxu1 %v4166_v58  ;;  %886 = vmatprep.subr.mxu0 %v4207_v29  ;;  %7726 = vst [vmem:[#allocation71_spill] sm:$0xff] %v4215_v26  ;;  %v4218_v45 = vld [vmem:[#allocation3 + $0xf0] sm:$0xff]  ;;  %v4221_v44 = vld [vmem:[#allocation3 + $0x280] sm:$0xff]  ;;  %v4223_v25 = vld [vmem:[#allocation3 + $0x258] sm:$0xff] }
 0x199   :  { %822 = vmatpush1.msra.mxu1 %v4169_v59  ;;  %887 = vmatpush1.msra.mxu0 %v4209_v27  ;;  %7727 = vst [vmem:[#allocation72_spill] sm:$0xff] %v4221_v44  ;;  %7728 = vst [vmem:[#allocation73_spill] sm:$0xff] %v4223_v25  ;;  %v4226_v23 = vld [vmem:[#allocation3 + $0xc8] sm:$0xff]  ;;  %v4229_v24 = vld [vmem:[#allocation3 + $0x250] sm:$0xff] }
 0x19a   :  { %823 = vmatprep.subr.mxu1 %v4172_v62  ;;  %888 = vmatprep.subr.mxu0 %v4215_v26  ;;  %7729 = vst [vmem:[#allocation74_spill] sm:$0xff] %v4229_v24  ;;  %v4232_v22 = vld [vmem:[#allocation3 + $0xc0] sm:$0xff]  ;;  %v4235_v43 = vld [vmem:[#allocation3 + $0x228] sm:$0xff]  ;;  %v4238_v42 = vld [vmem:[#allocation3 + $0x98] sm:$0xff] }
 0x19b   :  { %824 = vmatpush1.msra.mxu1 %v4175_v63  ;;  %889 = vmatpush1.msra.mxu0 %v4221_v44  ;;  %7730 = vst [vmem:[#allocation75_spill] sm:$0xff] %v4235_v43  ;;  %v4241_v21 = vld [vmem:[#allocation3 + $0x220] sm:$0xff]  ;;  %v4244_v19 = vld [vmem:[#allocation3 + $0x90] sm:$0xff]  ;;  %v4247_v20 = vld [vmem:[#allocation3 + $0x1f8] sm:$0xff] }
 0x19c   :  { %825 = vmatprep.subr.mxu1 %v4178_v1  ;;  %890 = vmatprep.subr.mxu0 %v4223_v25  ;;  %7731 = vst [vmem:[#allocation76_spill] sm:$0xff] %v4241_v21  ;;  %7732 = vst [vmem:[#allocation77_spill] sm:$0xff] %v4247_v20  ;;  %v4250_v18 = vld [vmem:[#allocation3 + $0x68] sm:$0xff]  ;;  %v4253_v41 = vld [vmem:[#allocation3 + $0x1f0] sm:$0xff] }
 0x19d   :  { %826 = vmatpush1.msra.mxu1 %v4181_v2  ;;  %891 = vmatpush1.msra.mxu0 %v4229_v24  ;;  %7733 = vst [vmem:[#allocation78_spill] sm:$0xff] %v4253_v41  ;;  %v4256_v40 = vld [vmem:[#allocation3 + $0x60] sm:$0xff]  ;;  %v4259_v17 = vld [vmem:[#allocation3 + $0x1c8] sm:$0xff]  ;;  %v4262_v15 = vld [vmem:[#allocation3 + $0x38] sm:$0xff] }
 0x19e   :  { %827 = vmatprep.subr.mxu1 %v4184_v49  ;;  %892 = vmatprep.subr.mxu0 %v4235_v43  ;;  %7734 = vst [vmem:[#allocation79_spill] sm:$0xff] %v4259_v17  ;;  %v4265_v16 = vld [vmem:[#allocation3 + $0x1c0] sm:$0xff]  ;;  %v4268_v14 = vld [vmem:[#allocation3 + $0x30] sm:$0xff]  ;;  %v4271_v39 = vld [vmem:[#allocation3 + $0x198] sm:$0xff] }
 0x19f   :  { %828 = vmatpush1.msra.mxu1 %v4187_v48  ;;  %893 = vmatpush1.msra.mxu0 %v4241_v21  ;;  %7735 = vst [vmem:[#allocation80_spill] sm:$0xff] %v4265_v16  ;;  %7736 = vst [vmem:[#allocation81_spill] sm:$0xff] %v4271_v39  ;;  %v4274_v38 = vld [vmem:[#allocation3 + $0x8] sm:$0xff]  ;;  %v4277_v13 = vld [vmem:[#allocation3 + $0x190] sm:$0xff] }
 0x1a0   :  { %829 = vmatprep.subr.mxu1 %v4190_v33  ;;  %894 = vmatprep.subr.mxu0 %v4247_v20  ;;  %7737 = vst [vmem:[#allocation82_spill] sm:$0xff] %v4277_v13  ;;  %v4280_v11 = vld [vmem:[#allocation3] sm:$0xff]  ;;  %v4283_v12 = vld [vmem:[#allocation3 + $0x168] sm:$0xff]  ;;  %v4286_v10 = vld [vmem:[#allocation3 + $0x5d8] sm:$0xff] }
 0x1a1   :  { %830 = vmatpush1.msra.mxu1 %v4193_v31  ;;  %895 = vmatpush1.msra.mxu0 %v4253_v41  ;;  %7738 = vst [vmem:[#allocation83_spill] sm:$0xff] %v4283_v12  ;;  %v4289_v37 = vld [vmem:[#allocation3 + $0x160] sm:$0xff]  ;;  %v4292_v36 = vld [vmem:[#allocation3 + $0x5d0] sm:$0xff]  ;;  %v4295_v9 = vld [vmem:[#allocation3 + $0x138] sm:$0xff] }
 0x1a2   :  { %831 = vmatprep.subr.mxu1 %v4198_v30  ;;  %896 = vmatprep.subr.mxu0 %v4259_v17  ;;  %7739 = vst [vmem:[#allocation84_spill] sm:$0xff] %v4289_v37  ;;  %7740 = vst [vmem:[#allocation85_spill] sm:$0xff] %v4295_v9  ;;  %v4298_v7 = vld [vmem:[#allocation3 + $0x5a8] sm:$0xff]  ;;  %v4301_v8 = vld [vmem:[#allocation3 + $0x130] sm:$0xff] }
 0x1a3   :  { %832 = vmatpush1.msra.mxu1 %v4204_v46  ;;  %897 = vmatpush1.msra.mxu0 %v4265_v16  ;;  %7741 = vst [vmem:[#allocation86_spill] sm:$0xff] %v4301_v8  ;;  %v4304_v6 = vld [vmem:[#allocation3 + $0x5a0] sm:$0xff]  ;;  %v4307_v35 = vld [vmem:[#allocation3 + $0x108] sm:$0xff]  ;;  %v4310_v34 = vld [vmem:[#allocation3 + $0x578] sm:$0xff] }
 0x1a4   :  { %833 = vmatprep.subr.mxu1 %v4212_v28  ;;  %898 = vmatprep.subr.mxu0 %v4271_v39  ;;  %7742 = vst [vmem:[#allocation87_spill] sm:$0xff] %v4307_v35  ;;  %v4313_v61 = vld [vmem:[#allocation3 + $0x100] sm:$0xff]  ;;  %v4316_v60 = vld [vmem:[#allocation3 + $0x570] sm:$0xff]  ;;  %v4319_v5 = vld [vmem:[#allocation3 + $0xd8] sm:$0xff] }
 0x1a5   :  { %834 = vmatpush1.msra.mxu1 %v4218_v45  ;;  %899 = vmatpush1.msra.mxu0 %v4277_v13  ;;  %7743 = vst [vmem:[#allocation88_spill] sm:$0xff] %v4313_v61  ;;  %7744 = vst [vmem:[#allocation89_spill] sm:$0xff] %v4319_v5  ;;  %v4322_v3 = vld [vmem:[#allocation3 + $0x548] sm:$0xff]  ;;  %v4325_v4 = vld [vmem:[#allocation3 + $0xd0] sm:$0xff] }
 0x1a6   :  { %835 = vmatprep.subr.mxu1 %v4226_v23  ;;  %900 = vmatprep.subr.mxu0 %v4283_v12  ;;  %7745 = vst [vmem:[#allocation90_spill] sm:$0xff] %v4325_v4  ;;  %v4328_v0 = vld [vmem:[#allocation3 + $0x540] sm:$0xff]  ;;  %v4343_v12 = vld [vmem:[#allocation3 + $0x78] sm:$0xff]  ;;  %v4349_v13 = vld [vmem:[#allocation3 + $0x70] sm:$0xff] }
 0x1a7   :  { %836 = vmatpush1.msra.mxu1 %v4232_v22  ;;  %901 = vmatpush1.msra.mxu0 %v4289_v37  ;;  %v4337_v37 = vld [vmem:[#allocation3 + $0xa0] sm:$0xff]  ;;  %7748 = vst [vmem:[#allocation93_spill] sm:$0xff] %v4343_v12  ;;  %7749 = vst [vmem:[#allocation94_spill] sm:$0xff] %v4349_v13  ;;  %v4355_v39 = vld [vmem:[#allocation3 + $0x48] sm:$0xff] }
 0x1a8   :  { %837 = vmatprep.subr.mxu1 %v4238_v42  ;;  %902 = vmatprep.subr.mxu0 %v4295_v9  ;;  %v4331_v9 = vld [vmem:[#allocation3 + $0xa8] sm:$0xff]  ;;  %7747 = vst [vmem:[#allocation92_spill] sm:$0xff] %v4337_v37  ;;  %7750 = vst [vmem:[#allocation95_spill] sm:$0xff] %v4355_v39  ;;  %v4361_v16 = vld [vmem:[#allocation3 + $0x40] sm:$0xff] }
 0x1a9   :  { %838 = vmatpush1.msra.mxu1 %v4244_v19  ;;  %903 = vmatpush1.msra.mxu0 %v4301_v8  ;;  %7746 = vst [vmem:[#allocation91_spill] sm:$0xff] %v4331_v9  ;;  %v4334_v8 = vld [vmem:[#allocation3 + $0x518] sm:$0xff]  ;;  %7751 = vst [vmem:[#allocation96_spill] sm:$0xff] %v4361_v16  ;;  %v4373_v41 = vld [vmem:[#allocation3 + $0x10] sm:$0xff] }
 0x1aa   :  { %839 = vmatprep.subr.mxu1 %v4250_v18  ;;  %904 = vmatprep.subr.mxu0 %v4307_v35  ;;  %v4340_v35 = vld [vmem:[#allocation3 + $0x510] sm:$0xff]  ;;  %v4367_v17 = vld [vmem:[#allocation3 + $0x18] sm:$0xff]  ;;  %7753 = vst [vmem:[#allocation98_spill] sm:$0xff] %v4373_v41  ;;  %v4379_v20 = vld [vmem:[#allocation3 + $0x5e8] sm:$0xff] }
 0x1ab   :  { %840 = vmatpush1.msra.mxu1 %v4256_v40  ;;  %905 = vmatpush1.msra.mxu0 %v4313_v61  ;;  %v4346_v61 = vld [vmem:[#allocation3 + $0x4e8] sm:$0xff]  ;;  %7752 = vst [vmem:[#allocation97_spill] sm:$0xff] %v4367_v17  ;;  %7754 = vst [vmem:[#allocation99_spill] sm:$0xff] %v4379_v20  ;;  %v4385_v21 = vld [vmem:[#allocation3 + $0x5e0] sm:$0xff] }
 0x1ac   :  { %841 = vmatprep.subr.mxu1 %v4262_v15  ;;  %906 = vmatprep.subr.mxu0 %v4319_v5  ;;  %v4352_v5 = vld [vmem:[#allocation3 + $0x4e0] sm:$0xff]  ;;  %7756 = vst [vmem:[#allocation101_spill] sm:$0xff] %v4385_v21  ;;  %v4391_v43 = vld [vmem:[#allocation3 + $0x5b8] sm:$0xff]  ;;  %v4397_v24 = vld [vmem:[#allocation3 + $0x5b0] sm:$0xff] }
 0x1ad   :  { %842 = vmatpush1.msra.mxu1 %v4268_v14  ;;  %907 = vmatpush1.msra.mxu0 %v4325_v4  ;;  %v4358_v4 = vld [vmem:[#allocation3 + $0x4b8] sm:$0xff]  ;;  %7758 = vst [vmem:[#allocation103_spill] sm:$0xff] %v4391_v43  ;;  %7760 = vst [vmem:[#allocation105_spill] sm:$0xff] %v4397_v24  ;;  %v4403_v25 = vld [vmem:[#allocation3 + $0x588] sm:$0xff] }
 0x1ae   :  { %843 = vmatprep.subr.mxu1 %v4274_v38  ;;  %908 = vmatprep.subr.mxu0 %v4331_v9  ;;  %v4364_v9 = vld [vmem:[#allocation3 + $0x4b0] sm:$0xff]  ;;  %7762 = vst [vmem:[#allocation107_spill] sm:$0xff] %v4403_v25  ;;  %v4409_v44 = vld [vmem:[#allocation3 + $0x580] sm:$0xff]  ;;  %v4415_v26 = vld [vmem:[#allocation3 + $0x558] sm:$0xff] }
 0x1af   :  { %844 = vmatpush1.msra.mxu1 %v4280_v11  ;;  %909 = vmatpush1.msra.mxu0 %v4337_v37  ;;  %v4370_v37 = vld [vmem:[#allocation3 + $0x488] sm:$0xff]  ;;  %7764 = vst [vmem:[#allocation109_spill] sm:$0xff] %v4409_v44  ;;  %7766 = vst [vmem:[#allocation111_spill] sm:$0xff] %v4415_v26 }
 0x1b0   :  { %845 = vmatprep.subr.mxu1 %v4286_v10  ;;  %910 = vmatprep.subr.mxu0 %v4343_v12  ;;  %v4376_v12 = vld [vmem:[#allocation3 + $0x480] sm:$0xff] }
 0x1b1   :  { %846 = vmatpush2.msra.mxu1 %v4292_v36  ;;  %911 = vmatpush1.msra.mxu0 %v4349_v13  ;;  %v4382_v13 = vld [vmem:[#allocation3 + $0x458] sm:$0xff] }
 0x1b2   :  { %847 = vmatprep.subr.mxu1 %v4298_v7  ;;  %912 = vmatprep.subr.mxu0 %v4355_v39  ;;  %7755 = vst [vmem:[#allocation100_spill] sm:$0xff] %v4382_v13  ;;  %v4388_v39 = vld [vmem:[#allocation3 + $0x450] sm:$0xff] }
 0x1b3   :  { %848 = vmatpush2.msra.mxu1 %v4304_v6  ;;  %913 = vmatpush1.msra.mxu0 %v4361_v16  ;;  %7757 = vst [vmem:[#allocation102_spill] sm:$0xff] %v4388_v39  ;;  %v4394_v16 = vld [vmem:[#allocation3 + $0x428] sm:$0xff] }
 0x1b4   :  { %849 = vmatprep.subr.mxu1 %v4310_v34  ;;  %914 = vmatprep.subr.mxu0 %v4367_v17  ;;  %7759 = vst [vmem:[#allocation104_spill] sm:$0xff] %v4394_v16  ;;  %v4400_v17 = vld [vmem:[#allocation3 + $0x420] sm:$0xff] }
 0x1b5   :  { %850 = vmatpush2.msra.mxu1 %v4316_v60  ;;  %915 = vmatpush1.msra.mxu0 %v4373_v41  ;;  %7761 = vst [vmem:[#allocation106_spill] sm:$0xff] %v4400_v17  ;;  %v4406_v41 = vld [vmem:[#allocation3 + $0x3f8] sm:$0xff] }
 0x1b6   :  { %851 = vmatprep.subr.mxu1 %v4322_v3  ;;  %916 = vmatprep.subr.mxu0 %v4379_v20  ;;  %7763 = vst [vmem:[#allocation108_spill] sm:$0xff] %v4406_v41  ;;  %v4412_v20 = vld [vmem:[#allocation3 + $0x3f0] sm:$0xff] }
 0x1b7   :  { %852 = vmatpush2.msra.mxu1 %v4328_v0  ;;  %917 = vmatpush2.msra.mxu0 %v4385_v21  ;;  %7765 = vst [vmem:[#allocation110_spill] sm:$0xff] %v4412_v20  ;;  %v4418_v21 = vld [vmem:[#allocation3 + $0x3c8] sm:$0xff] }
 0x1b8   :  { %853 = vmatprep.subr.mxu1 %v4334_v8  ;;  %918 = vmatprep.subr.mxu0 %v4391_v43  ;;  %7767 = vst [vmem:[#allocation112_spill] sm:$0xff] %v4418_v21  ;;  %v4424_v43 = vld [vmem:[#allocation3 + $0x3c0] sm:$0xff] }
 0x1b9   :  { %854 = vmatpush2.msra.mxu1 %v4340_v35  ;;  %919 = vmatpush2.msra.mxu0 %v4397_v24  ;;  %7769 = vst [vmem:[#allocation114_spill] sm:$0xff] %v4424_v43  ;;  %v4430_v24 = vld [vmem:[#allocation3 + $0x398] sm:$0xff] }
 0x1ba   :  { %855 = vmatprep.subr.mxu1 %v4346_v61  ;;  %920 = vmatprep.subr.mxu0 %v4403_v25  ;;  %7771 = vst [vmem:[#allocation116_spill] sm:$0xff] %v4430_v24  ;;  %v4436_v25 = vld [vmem:[#allocation3 + $0x390] sm:$0xff] }
 0x1bb   :  { %856 = vmatpush2.msra.mxu1 %v4352_v5  ;;  %921 = vmatpush2.msra.mxu0 %v4409_v44  ;;  %7773 = vst [vmem:[#allocation118_spill] sm:$0xff] %v4436_v25  ;;  %v4442_v44 = vld [vmem:[#allocation3 + $0x368] sm:$0xff] }
 0x1bc   :  { %857 = vmatprep.subr.mxu1 %v4358_v4  ;;  %922 = vmatprep.subr.mxu0 %v4415_v26  ;;  %7775 = vst [vmem:[#allocation120_spill] sm:$0xff] %v4442_v44  ;;  %v4448_v26 = vld [vmem:[#allocation3 + $0x360] sm:$0xff] }
 0x1bd   :  { %858 = vmatpush2.msra.mxu1 %v4364_v9  ;;  %7777 = vst [vmem:[#allocation122_spill] sm:$0xff] %v4448_v26 }
 0x1be   :  { %859 = vmatprep.subr.mxu1 %v4370_v37 }
 0x1bf   :  { %860 = vmatpush2.msra.mxu1 %v4376_v12 }
 0x1c0   :  { %861 = vmatprep.subr.mxu1 %v4382_v13  ;;  %v4509_v13 = vld [vmem:[#allocation3 + $0x400] sm:$0xff] }
 0x1c1   :  { %862 = vmatpush2.msra.mxu1 %v4388_v39  ;;  %v4421_v39 = vld [vmem:[#allocation3 + $0x550] sm:$0xff]  ;;  %7798 = vst [vmem:[#allocation142_spill] sm:$0xff] %v4509_v13 }
 0x1c2   :  { %863 = vmatprep.subr.mxu1 %v4394_v16  ;;  %7768 = vst [vmem:[#allocation113_spill] sm:$0xff] %v4421_v39  ;;  %v4427_v16 = vld [vmem:[#allocation3 + $0x528] sm:$0xff]  ;;  %923 = vmatpush2.msra.mxu0 %v4421_v39  ;;  %v4454_v39 = vld [vmem:[#allocation3 + $0x338] sm:$0xff] }
 0x1c3   :  { %864 = vmatpush2.msra.mxu1 %v4400_v17  ;;  %7770 = vst [vmem:[#allocation115_spill] sm:$0xff] %v4427_v16  ;;  %v4433_v17 = vld [vmem:[#allocation3 + $0x520] sm:$0xff]  ;;  %924 = vmatprep.subr.mxu0 %v4427_v16  ;;  %7779 = vst [vmem:[#allocation124_spill] sm:$0xff] %v4454_v39  ;;  %v4460_v16 = vld [vmem:[#allocation3 + $0x330] sm:$0xff] }
 0x1c4   :  { %865 = vmatprep.subr.mxu1 %v4406_v41  ;;  %7772 = vst [vmem:[#allocation117_spill] sm:$0xff] %v4433_v17  ;;  %v4439_v41 = vld [vmem:[#allocation3 + $0x4f8] sm:$0xff]  ;;  %925 = vmatpush2.msra.mxu0 %v4433_v17  ;;  %7781 = vst [vmem:[#allocation126_spill] sm:$0xff] %v4460_v16  ;;  %v4466_v17 = vld [vmem:[#allocation3 + $0x308] sm:$0xff] }
 0x1c5   :  { %866 = vmatpush2.msra.mxu1 %v4412_v20  ;;  %7774 = vst [vmem:[#allocation119_spill] sm:$0xff] %v4439_v41  ;;  %v4445_v20 = vld [vmem:[#allocation3 + $0x4f0] sm:$0xff]  ;;  %926 = vmatprep.subr.mxu0 %v4439_v41  ;;  %7783 = vst [vmem:[#allocation128_spill] sm:$0xff] %v4466_v17  ;;  %v4472_v41 = vld [vmem:[#allocation3 + $0x300] sm:$0xff] }
 0x1c6   :  { %867 = vmatprep.subr.mxu1 %v4418_v21  ;;  %7776 = vst [vmem:[#allocation121_spill] sm:$0xff] %v4445_v20  ;;  %v4451_v21 = vld [vmem:[#allocation3 + $0x4c8] sm:$0xff]  ;;  %927 = vmatpush2.msra.mxu0 %v4445_v20  ;;  %7785 = vst [vmem:[#allocation130_spill] sm:$0xff] %v4472_v41  ;;  %v4478_v20 = vld [vmem:[#allocation3 + $0x2f8] sm:$0xff] }
 0x1c7   :  { %868 = vmatpush2.msra.mxu1 %v4424_v43  ;;  %7778 = vst [vmem:[#allocation123_spill] sm:$0xff] %v4451_v21  ;;  %v4457_v43 = vld [vmem:[#allocation3 + $0x4c0] sm:$0xff]  ;;  %928 = vmatprep.subr.mxu0 %v4451_v21  ;;  %7787 = vst [vmem:[#allocation132_spill] sm:$0xff] %v4478_v20 }
 0x1c8   :  { %869 = vmatprep.subr.mxu1 %v4430_v24  ;;  %7780 = vst [vmem:[#allocation125_spill] sm:$0xff] %v4457_v43  ;;  %v4463_v24 = vld [vmem:[#allocation3 + $0x498] sm:$0xff]  ;;  %929 = vmatpush2.msra.mxu0 %v4457_v43  ;;  %v4485_v21 = vld [vmem:[#allocation3 + $0x460] sm:$0xff] }
 0x1c9   :  { %870 = vmatpush2.msra.mxu1 %v4436_v25  ;;  %7782 = vst [vmem:[#allocation127_spill] sm:$0xff] %v4463_v24  ;;  %v4469_v25 = vld [vmem:[#allocation3 + $0x490] sm:$0xff]  ;;  %930 = vmatprep.subr.mxu0 %v4463_v24  ;;  %7789 = vst [vmem:[#allocation134_spill] sm:$0xff] %v4485_v21  ;;  %v4491_v43 = vld [vmem:[#allocation3 + $0x438] sm:$0xff] }
 0x1ca   :  { %871 = vmatprep.subr.mxu1 %v4442_v44  ;;  %7784 = vst [vmem:[#allocation129_spill] sm:$0xff] %v4469_v25  ;;  %v4475_v44 = vld [vmem:[#allocation3 + $0x468] sm:$0xff]  ;;  %931 = vmatpush2.msra.mxu0 %v4469_v25  ;;  %7791 = vst [vmem:[#allocation136_spill] sm:$0xff] %v4491_v43  ;;  %v4495_v24 = vld [vmem:[#allocation3 + $0x2c0] sm:$0xff] }
 0x1cb   :  { %872 = vmatpush2.msra.mxu1 %v4448_v26  ;;  %7786 = vst [vmem:[#allocation131_spill] sm:$0xff] %v4475_v44  ;;  %v4482_v26 = vld [vmem:[#allocation3 + $0x2f0] sm:$0xff]  ;;  %932 = vmatprep.subr.mxu0 %v4475_v44  ;;  %7793 = vst [vmem:[#allocation137_spill] sm:$0xff] %v4495_v24  ;;  %v4500_v25 = vld [vmem:[#allocation3 + $0x298] sm:$0xff] }
 0x1cc   :  { %873 = vmatprep.subr.mxu1 %v4454_v39  ;;  %7788 = vst [vmem:[#allocation133_spill] sm:$0xff] %v4482_v26  ;;  %v4488_v39 = vld [vmem:[#allocation3 + $0x2c8] sm:$0xff]  ;;  %7795 = vst [vmem:[#allocation139_spill] sm:$0xff] %v4500_v25  ;;  %933 = vmatpush2.msra.mxu0 %v4485_v21  ;;  %v4506_v44 = vld [vmem:[#allocation3 + $0x290] sm:$0xff] }
 0x1cd   :  { %874 = vmatpush2.msra.mxu1 %v4460_v16  ;;  %7790 = vst [vmem:[#allocation135_spill] sm:$0xff] %v4488_v39  ;;  %v7792_v16 = vmov 0.0   ;;  %7797 = vst [vmem:[#allocation141_spill] sm:$0xff] %v4506_v44  ;;  %934 = vmatprep.subr.mxu0 %v4491_v43  ;;  %v4518_v21 = vld [vmem:[#allocation3 + $0x260] sm:$0xff]  ;;  %v4524_v43 = vld [vmem:[#allocation3 + $0x238] sm:$0xff] }
 0x1ce   :  { %875 = vmatprep.subr.mxu1 %v4466_v17  ;;  %v4497_v17 = vld [vmem:[#allocation3 + $0x430] sm:$0xff]  ;;  %7801 = vst [vmem:[#allocation145_spill] sm:$0xff] %v4518_v21  ;;  %7803 = vst [vmem:[#allocation147_spill] sm:$0xff] %v4524_v43 }
 0x1cf   :  { %876 = vmatpush2.msra.mxu1 %v4472_v41  ;;  %7794 = vst [vmem:[#allocation138_spill] sm:$0xff] %v4497_v17  ;;  %v4503_v41 = vld [vmem:[#allocation3 + $0x408] sm:$0xff]  ;;  %935 = vmatpush2.msra.mxu0 %v4497_v17  ;;  %v4530_v17 = vld [vmem:[#allocation3 + $0x230] sm:$0xff] }
 0x1d0   :  { %878 = vmatmul.mubr.f32.vlgmr.msra.gmra.mxu1 %v7792_v16  ;;  %955 = vmatprep.subr.mxu1 %v4478_v20  ;;  %7796 = vst [vmem:[#allocation140_spill] sm:$0xff] %v4503_v41  ;;  %v4512_v20 = vld [vmem:[#allocation3 + $0x268] sm:$0xff]  ;;  %7805 = vst [vmem:[#allocation149_spill] sm:$0xff] %v4530_v17 }
 0x1d1   :  { %956 = vmatpush1.msra.mxu1 %v4482_v26  ;;  %7799 = vst [vmem:[#allocation143_spill] sm:$0xff] %v4512_v20  ;;  %v4515_v26 = vld [vmem:[#allocation3 + $0x3d8] sm:$0xff]  ;;  %936 = vmatprep.subr.mxu0 %v4503_v41  ;;  %v4536_v41 = vld [vmem:[#allocation3 + $0x208] sm:$0xff] }
 0x1d2   :  { %957 = vmatprep.subr.mxu1 %v4488_v39  ;;  %7800 = vst [vmem:[#allocation144_spill] sm:$0xff] %v4515_v26  ;;  %v4521_v39 = vld [vmem:[#allocation3 + $0x3d0] sm:$0xff]  ;;  %937 = vmatpush2.msra.mxu0 %v4509_v13  ;;  %7807 = vst [vmem:[#allocation151_spill] sm:$0xff] %v4536_v41  ;;  %v4542_v13 = vld [vmem:[#allocation3 + $0x200] sm:$0xff] }
 0x1d3   :  { %958 = vmatpush1.msra.mxu1 %v4495_v24  ;;  %7802 = vst [vmem:[#allocation146_spill] sm:$0xff] %v4521_v39  ;;  %v4527_v24 = vld [vmem:[#allocation3 + $0x3a8] sm:$0xff]  ;;  %938 = vmatprep.subr.mxu0 %v4515_v26  ;;  %7809 = vst [vmem:[#allocation153_spill] sm:$0xff] %v4542_v13  ;;  %v4548_v26 = vld [vmem:[#allocation3 + $0x1d8] sm:$0xff] }
 0x1d4   :  { %959 = vmatprep.subr.mxu1 %v4500_v25  ;;  %7804 = vst [vmem:[#allocation148_spill] sm:$0xff] %v4527_v24  ;;  %v4533_v25 = vld [vmem:[#allocation3 + $0x3a0] sm:$0xff]  ;;  %939 = vmatpush2.msra.mxu0 %v4521_v39  ;;  %7811 = vst [vmem:[#allocation155_spill] sm:$0xff] %v4548_v26  ;;  %v4554_v39 = vld [vmem:[#allocation3 + $0x1d0] sm:$0xff] }
 0x1d5   :  { %960 = vmatpush1.msra.mxu1 %v4506_v44  ;;  %7806 = vst [vmem:[#allocation150_spill] sm:$0xff] %v4533_v25  ;;  %v4539_v44 = vld [vmem:[#allocation3 + $0x378] sm:$0xff]  ;;  %940 = vmatprep.subr.mxu0 %v4527_v24  ;;  %7813 = vst [vmem:[#allocation157_spill] sm:$0xff] %v4554_v39  ;;  %v4560_v24 = vld [vmem:[#allocation3 + $0x1a8] sm:$0xff] }
 0x1d6   :  { %961 = vmatprep.subr.mxu1 %v4512_v20  ;;  %7808 = vst [vmem:[#allocation152_spill] sm:$0xff] %v4539_v44  ;;  %v4545_v20 = vld [vmem:[#allocation3 + $0x370] sm:$0xff]  ;;  %941 = vmatpush2.msra.mxu0 %v4533_v25  ;;  %7815 = vst [vmem:[#allocation159_spill] sm:$0xff] %v4560_v24  ;;  %v4566_v25 = vld [vmem:[#allocation3 + $0x1a0] sm:$0xff] }
 0x1d7   :  { %962 = vmatpush1.msra.mxu1 %v4518_v21  ;;  %7810 = vst [vmem:[#allocation154_spill] sm:$0xff] %v4545_v20  ;;  %v4551_v21 = vld [vmem:[#allocation3 + $0x348] sm:$0xff]  ;;  %942 = vmatprep.subr.mxu0 %v4539_v44  ;;  %7817 = vst [vmem:[#allocation161_spill] sm:$0xff] %v4566_v25  ;;  %v4572_v44 = vld [vmem:[#allocation3 + $0x178] sm:$0xff] }
 0x1d8   :  { %963 = vmatprep.subr.mxu1 %v4524_v43  ;;  %7812 = vst [vmem:[#allocation156_spill] sm:$0xff] %v4551_v21  ;;  %v4557_v43 = vld [vmem:[#allocation3 + $0x340] sm:$0xff]  ;;  %943 = vmatpush2.msra.mxu0 %v4545_v20  ;;  %7819 = vst [vmem:[#allocation163_spill] sm:$0xff] %v4572_v44 }
 0x1d9   :  { %964 = vmatpush1.msra.mxu1 %v4530_v17  ;;  %7814 = vst [vmem:[#allocation158_spill] sm:$0xff] %v4557_v43  ;;  %v4563_v17 = vld [vmem:[#allocation3 + $0x318] sm:$0xff]  ;;  %944 = vmatprep.subr.mxu0 %v4551_v21  ;;  %v4584_v21 = vld [vmem:[#allocation3 + $0x140] sm:$0xff] }
 0x1da   :  { %965 = vmatprep.subr.mxu1 %v4536_v41  ;;  %7816 = vst [vmem:[#allocation160_spill] sm:$0xff] %v4563_v17  ;;  %v4569_v41 = vld [vmem:[#allocation3 + $0x310] sm:$0xff]  ;;  %945 = vmatpush2.msra.mxu0 %v4557_v43 }
 0x1db   :  { %966 = vmatpush1.msra.mxu1 %v4542_v13  ;;  %7818 = vst [vmem:[#allocation162_spill] sm:$0xff] %v4569_v41  ;;  %v4576_v13 = vld [vmem:[#allocation3 + $0x170] sm:$0xff]  ;;  %946 = vmatprep.subr.mxu0 %v4563_v17 }
 0x1dc   :  { %967 = vmatprep.subr.mxu1 %v4548_v26  ;;  %7820 = vst [vmem:[#allocation164_spill] sm:$0xff] %v4576_v13  ;;  %v4580_v26 = vld [vmem:[#allocation3 + $0x148] sm:$0xff]  ;;  %947 = vmatpush2.msra.mxu0 %v4569_v41 }
 0x1dd   :  { %968 = vmatpush1.msra.mxu1 %v4554_v39  ;;  %949 = vmatmul.mubr.f32.vlgmr.msra.gmra.mxu0 %v7792_v16  ;;  %v4588_v39 = vld [vmem:[#allocation3 + $0x118] sm:$0xff] }
 0x1de   :  { %969 = vmatprep.subr.mxu1 %v4560_v24  ;;  %1019 = vmatprep.mubr.f32.mxu1 %v7792_v16  ;;  %v4592_v24 = vld [vmem:[#allocation3 + $0x110] sm:$0xff] }
 0x1df   :  { %970 = vmatpush1.msra.mxu1 %v4566_v25  ;;  %1079 = vmatprep.subr.mxu0 %v4144_v50  ;;  %v4596_v25 = vld [vmem:[#allocation3 + $0xe8] sm:$0xff]  ;;  %v4608_v50 = vld [vmem:[#allocation3 + $0xb0] sm:$0xff] }
 0x1e0   :  { %971 = vmatprep.subr.mxu1 %v4572_v44  ;;  %1080 = vmatpush1.msra.mxu0 %v4146_v51  ;;  %v4600_v44 = vld [vmem:[#allocation3 + $0xe0] sm:$0xff]  ;;  %v4612_v51 = vld [vmem:[#allocation3 + $0x88] sm:$0xff] }
 0x1e1   :  { %972 = vmatpush1.msra.mxu1 %v4576_v13  ;;  %1081 = vmatprep.subr.mxu0 %v4148_v52  ;;  %v4604_v13 = vld [vmem:[#allocation3 + $0xb8] sm:$0xff]  ;;  %v4616_v52 = vld [vmem:[#allocation3 + $0x80] sm:$0xff] }
 0x1e2   :  { %973 = vmatprep.subr.mxu1 %v4580_v26  ;;  %1082 = vmatpush1.msra.mxu0 %v4151_v53  ;;  %v4620_v53 = vld [vmem:[#allocation3 + $0x58] sm:$0xff] }
 0x1e3   :  { %974 = vmatpush1.msra.mxu1 %v4584_v21  ;;  %1083 = vmatprep.subr.mxu0 %v4154_v54  ;;  %v4624_v54 = vld [vmem:[#allocation3 + $0x50] sm:$0xff] }
 0x1e4   :  { %975 = vmatprep.subr.mxu1 %v4588_v39  ;;  %1084 = vmatpush1.msra.mxu0 %v4157_v55  ;;  %v4628_v55 = vld [vmem:[#allocation3 + $0x28] sm:$0xff] }
 0x1e5   :  { %976 = vmatpush1.msra.mxu1 %v4592_v24  ;;  %1085 = vmatprep.subr.mxu0 %v4160_v56  ;;  %v4632_v56 = vld [vmem:[#allocation3 + $0x20] sm:$0xff] }
 0x1e6   :  { %977 = vmatprep.subr.mxu1 %v4596_v25  ;;  %1086 = vmatpush1.msra.mxu0 %v4163_v57  ;;  %v4636_v57 = vld [vmem:[#allocation3 + $0x5f8] sm:$0xff] }
 0x1e7   :  { %978 = vmatpush1.msra.mxu1 %v4600_v44  ;;  %1087 = vmatprep.subr.mxu0 %v4166_v58  ;;  %v4640_v58 = vld [vmem:[#allocation3 + $0x5f0] sm:$0xff] }
 0x1e8   :  { %979 = vmatprep.subr.mxu1 %v4604_v13  ;;  %1088 = vmatpush1.msra.mxu0 %v4169_v59  ;;  %v4644_v59 = vld [vmem:[#allocation3 + $0x5c8] sm:$0xff] }
 0x1e9   :  { %980 = vmatpush1.msra.mxu1 %v4608_v50  ;;  %1089 = vmatprep.subr.mxu0 %v4172_v62  ;;  %v4648_v62 = vld [vmem:[#allocation3 + $0x5c0] sm:$0xff] }
 0x1ea   :  { %981 = vmatprep.subr.mxu1 %v4612_v51  ;;  %1090 = vmatpush1.msra.mxu0 %v4175_v63  ;;  %v4652_v63 = vld [vmem:[#allocation3 + $0x598] sm:$0xff] }
 0x1eb   :  { %982 = vmatpush1.msra.mxu1 %v4616_v52  ;;  %1091 = vmatprep.subr.mxu0 %v4178_v1  ;;  %v4656_v1 = vld [vmem:[#allocation3 + $0x590] sm:$0xff] }
 0x1ec   :  { %983 = vmatprep.subr.mxu1 %v4620_v53  ;;  %1092 = vmatpush1.msra.mxu0 %v4181_v2  ;;  %v4660_v2 = vld [vmem:[#allocation3 + $0x568] sm:$0xff] }
 0x1ed   :  { %984 = vmatpush1.msra.mxu1 %v4624_v54  ;;  %1093 = vmatprep.subr.mxu0 %v4184_v49  ;;  %v4664_v49 = vld [vmem:[#allocation3 + $0x560] sm:$0xff] }
 0x1ee   :  { %985 = vmatprep.subr.mxu1 %v4628_v55  ;;  %1094 = vmatpush1.msra.mxu0 %v4187_v48  ;;  %v4668_v48 = vld [vmem:[#allocation3 + $0x538] sm:$0xff] }
 0x1ef   :  { %986 = vmatpush1.msra.mxu1 %v4632_v56  ;;  %1095 = vmatprep.subr.mxu0 %v4190_v33  ;;  %v4672_v33 = vld [vmem:[#allocation3 + $0x530] sm:$0xff] }
 0x1f0   :  { %987 = vmatprep.subr.mxu1 %v4636_v57  ;;  %1096 = vmatpush1.msra.mxu0 %v4193_v31  ;;  %v4676_v31 = vld [vmem:[#allocation3 + $0x508] sm:$0xff] }
 0x1f1   :  { %988 = vmatpush2.msra.mxu1 %v4640_v58  ;;  %1097 = vmatprep.subr.mxu0 %v4198_v30  ;;  %v4680_v30 = vld [vmem:[#allocation3 + $0x500] sm:$0xff] }
 0x1f2   :  { %989 = vmatprep.subr.mxu1 %v4644_v59  ;;  %1098 = vmatpush1.msra.mxu0 %v4204_v46  ;;  %v4684_v46 = vld [vmem:[#allocation3 + $0x4d8] sm:$0xff] }
 0x1f3   :  { %990 = vmatpush2.msra.mxu1 %v4648_v62  ;;  %1099 = vmatprep.subr.mxu0 %v4212_v28  ;;  %v4688_v28 = vld [vmem:[#allocation3 + $0x4d0] sm:$0xff] }
 0x1f4   :  { %991 = vmatprep.subr.mxu1 %v4652_v63  ;;  %1100 = vmatpush1.msra.mxu0 %v4218_v45  ;;  %v4692_v45 = vld [vmem:[#allocation3 + $0x4a8] sm:$0xff] }
 0x1f5   :  { %992 = vmatpush2.msra.mxu1 %v4656_v1  ;;  %1101 = vmatprep.subr.mxu0 %v4226_v23  ;;  %v4696_v23 = vld [vmem:[#allocation3 + $0x4a0] sm:$0xff] }
 0x1f6   :  { %993 = vmatprep.subr.mxu1 %v4660_v2  ;;  %1102 = vmatpush1.msra.mxu0 %v4232_v22  ;;  %v4700_v22 = vld [vmem:[#allocation3 + $0x478] sm:$0xff] }
 0x1f7   :  { %994 = vmatpush2.msra.mxu1 %v4664_v49  ;;  %1103 = vmatprep.subr.mxu0 %v4238_v42  ;;  %v4704_v42 = vld [vmem:[#allocation3 + $0x470] sm:$0xff] }
 0x1f8   :  { %995 = vmatprep.subr.mxu1 %v4668_v48  ;;  %1104 = vmatpush1.msra.mxu0 %v4244_v19  ;;  %v4708_v19 = vld [vmem:[#allocation3 + $0x448] sm:$0xff] }
 0x1f9   :  { %996 = vmatpush2.msra.mxu1 %v4672_v33  ;;  %1105 = vmatprep.subr.mxu0 %v4250_v18  ;;  %v4712_v18 = vld [vmem:[#allocation3 + $0x440] sm:$0xff] }
 0x1fa   :  { %997 = vmatprep.subr.mxu1 %v4676_v31  ;;  %1106 = vmatpush1.msra.mxu0 %v4256_v40  ;;  %v4716_v40 = vld [vmem:[#allocation3 + $0x418] sm:$0xff] }
 0x1fb   :  { %998 = vmatpush2.msra.mxu1 %v4680_v30  ;;  %1107 = vmatprep.subr.mxu0 %v4262_v15  ;;  %v4720_v15 = vld [vmem:[#allocation3 + $0x410] sm:$0xff] }
 0x1fc   :  { %999 = vmatprep.subr.mxu1 %v4684_v46  ;;  %1108 = vmatpush1.msra.mxu0 %v4268_v14  ;;  %v4724_v14 = vld [vmem:[#allocation3 + $0x3e8] sm:$0xff] }
 0x1fd   :  { %1000 = vmatpush2.msra.mxu1 %v4688_v28  ;;  %1109 = vmatprep.subr.mxu0 %v4274_v38  ;;  %v4728_v38 = vld [vmem:[#allocation3 + $0x3e0] sm:$0xff] }
 0x1fe   :  { %1001 = vmatprep.subr.mxu1 %v4692_v45  ;;  %1110 = vmatpush1.msra.mxu0 %v4280_v11  ;;  %v4732_v11 = vld [vmem:[#allocation3 + $0x3b8] sm:$0xff] }
 0x1ff   :  { %1002 = vmatpush2.msra.mxu1 %v4696_v23  ;;  %1111 = vmatprep.subr.mxu0 %v4286_v10  ;;  %7821 = vst [vmem:[#allocation165_spill] sm:$0xff] %v4732_v11  ;;  %v4736_v10 = vld [vmem:[#allocation3 + $0x3b0] sm:$0xff] }
 0x200   :  { %1003 = vmatprep.subr.mxu1 %v4700_v22  ;;  %1112 = vmatpush2.msra.mxu0 %v4292_v36  ;;  %7822 = vst [vmem:[#allocation166_spill] sm:$0xff] %v4736_v10  ;;  %v4740_v36 = vld [vmem:[#allocation3 + $0x388] sm:$0xff] }
 0x201   :  { %1004 = vmatpush2.msra.mxu1 %v4704_v42  ;;  %1113 = vmatprep.subr.mxu0 %v4298_v7  ;;  %7823 = vst [vmem:[#allocation167_spill] sm:$0xff] %v4740_v36  ;;  %v4744_v7 = vld [vmem:[#allocation3 + $0x380] sm:$0xff] }
 0x202   :  { %1005 = vmatprep.subr.mxu1 %v4708_v19  ;;  %1114 = vmatpush2.msra.mxu0 %v4304_v6  ;;  %7824 = vst [vmem:[#allocation168_spill] sm:$0xff] %v4744_v7  ;;  %v4748_v6 = vld [vmem:[#allocation3 + $0x358] sm:$0xff] }
 0x203   :  { %1006 = vmatpush2.msra.mxu1 %v4712_v18  ;;  %1115 = vmatprep.subr.mxu0 %v4310_v34  ;;  %7825 = vst [vmem:[#allocation169_spill] sm:$0xff] %v4748_v6  ;;  %v4752_v34 = vld [vmem:[#allocation3 + $0x350] sm:$0xff] }
 0x204   :  { %1007 = vmatprep.subr.mxu1 %v4716_v40  ;;  %1116 = vmatpush2.msra.mxu0 %v4316_v60  ;;  %7826 = vst [vmem:[#allocation170_spill] sm:$0xff] %v4752_v34  ;;  %v4756_v60 = vld [vmem:[#allocation3 + $0x328] sm:$0xff] }
 0x205   :  { %1008 = vmatpush2.msra.mxu1 %v4720_v15  ;;  %1117 = vmatprep.subr.mxu0 %v4322_v3  ;;  %7827 = vst [vmem:[#allocation171_spill] sm:$0xff] %v4756_v60  ;;  %v4760_v3 = vld [vmem:[#allocation3 + $0x320] sm:$0xff] }
 0x206   :  { %1009 = vmatprep.subr.mxu1 %v4724_v14  ;;  %1118 = vmatpush2.msra.mxu0 %v4328_v0  ;;  %7828 = vst [vmem:[#allocation172_spill] sm:$0xff] %v4760_v3  ;;  %v7830_v0 = vld [vmem:[#allocation71_spill] sm:$0xff] }
 0x207   :  { %1010 = vmatpush2.msra.mxu1 %v4728_v38  ;;  %1119 = vmatprep.subr.mxu0 %v4334_v8  ;;  %v7833_v8 = vld [vmem:[#allocation104_spill] sm:$0xff] }
 0x208   :  { %1011 = vmatprep.subr.mxu1 %v4732_v11  ;;  %1120 = vmatpush2.msra.mxu0 %v4340_v35  ;;  %v7840_v35 = vld [vmem:[#allocation76_spill] sm:$0xff] }
 0x209   :  { %1012 = vmatpush2.msra.mxu1 %v4736_v10  ;;  %1121 = vmatprep.subr.mxu0 %v4346_v61  ;;  %v7829_v61 = vld [vmem:[#allocation100_spill] sm:$0xff] }
 0x20a   :  { %1013 = vmatprep.subr.mxu1 %v4740_v36  ;;  %1122 = vmatpush2.msra.mxu0 %v4352_v5  ;;  %v7832_v5 = vld [vmem:[#allocation72_spill] sm:$0xff] }
 0x20b   :  { %1014 = vmatpush2.msra.mxu1 %v4744_v7  ;;  %1123 = vmatprep.subr.mxu0 %v4358_v4  ;;  %v7831_v4 = vld [vmem:[#allocation102_spill] sm:$0xff]  ;;  %v7858_v7 = vld [vmem:[#allocation85_spill] sm:$0xff] }
 0x20c   :  { %1015 = vmatprep.subr.mxu1 %v4748_v6  ;;  %1124 = vmatpush2.msra.mxu0 %v4364_v9  ;;  %v7834_v9 = vld [vmem:[#allocation73_spill] sm:$0xff]  ;;  %v7856_v6 = vld [vmem:[#allocation84_spill] sm:$0xff] }
 0x20d   :  { %1016 = vmatpush2.msra.mxu1 %v4752_v34  ;;  %1125 = vmatprep.subr.mxu0 %v4370_v37  ;;  %v7841_v37 = vld [vmem:[#allocation112_spill] sm:$0xff]  ;;  %v7854_v34 = vld [vmem:[#allocation83_spill] sm:$0xff] }
 0x20e   :  { %1017 = vmatprep.subr.mxu1 %v4756_v60  ;;  %1126 = vmatpush2.msra.mxu0 %v4376_v12  ;;  %v7838_v12 = vld [vmem:[#allocation75_spill] sm:$0xff]  ;;  %v7852_v60 = vld [vmem:[#allocation82_spill] sm:$0xff] }
 0x20f   :  { %1018 = vmatpush2.msra.mxu1 %v4760_v3  ;;  %1127 = vmatprep.subr.mxu0 %v7829_v61  ;;  %v7843_v61 = vld [vmem:[#allocation114_spill] sm:$0xff]  ;;  %v7850_v3 = vld [vmem:[#allocation81_spill] sm:$0xff] }
 0x210   :  { %1020 = vmatmul.mubr.f32.vlgmr.msra.gmra.mxu1 %v7792_v16  ;;  %1150 = vmatprep.subr.mxu1 %v4195_v32  ;;  %v7835_v16 = vld [vmem:[#allocation106_spill] sm:$0xff] }
 0x211   :  { %1151 = vmatpush1.msra.mxu1 %v4201_v47  ;;  %1128 = vmatpush2.msra.mxu0 %v7831_v4  ;;  %v7836_v32 = vld [vmem:[#allocation74_spill] sm:$0xff]  ;;  %v7842_v47 = vld [vmem:[#allocation77_spill] sm:$0xff]  ;;  %v7845_v4 = vld [vmem:[#allocation116_spill] sm:$0xff] }
 0x212   :  { %1152 = vmatprep.subr.mxu1 %v4207_v29  ;;  %1129 = vmatprep.subr.mxu0 %v7833_v8  ;;  %v7837_v29 = vld [vmem:[#allocation108_spill] sm:$0xff] }
 0x213   :  { %1153 = vmatpush1.msra.mxu1 %v4209_v27  ;;  %1130 = vmatpush2.msra.mxu0 %v7835_v16  ;;  %v7839_v27 = vld [vmem:[#allocation110_spill] sm:$0xff] }
 0x214   :  { %1154 = vmatprep.subr.mxu1 %v7830_v0  ;;  %1131 = vmatprep.subr.mxu0 %v7837_v29  ;;  %v7844_v0 = vld [vmem:[#allocation78_spill] sm:$0xff] }
 0x215   :  { %1155 = vmatpush1.msra.mxu1 %v7832_v5  ;;  %1132 = vmatpush2.msra.mxu0 %v7839_v27  ;;  %v7846_v5 = vld [vmem:[#allocation79_spill] sm:$0xff] }
 0x216   :  { %1156 = vmatprep.subr.mxu1 %v7834_v9  ;;  %1133 = vmatprep.subr.mxu0 %v7841_v37  ;;  %v7847_v9 = vld [vmem:[#allocation118_spill] sm:$0xff] }
 0x217   :  { %1157 = vmatpush1.msra.mxu1 %v7836_v32  ;;  %1134 = vmatpush2.msra.mxu0 %v7843_v61  ;;  %v7848_v32 = vld [vmem:[#allocation80_spill] sm:$0xff] }
 0x218   :  { %1158 = vmatprep.subr.mxu1 %v7838_v12  ;;  %1135 = vmatprep.subr.mxu0 %v7845_v4  ;;  %v7849_v12 = vld [vmem:[#allocation120_spill] sm:$0xff] }
 0x219   :  { %1159 = vmatpush1.msra.mxu1 %v7840_v35  ;;  %1136 = vmatpush2.msra.mxu0 %v7847_v9  ;;  %v7851_v35 = vld [vmem:[#allocation122_spill] sm:$0xff] }
 0x21a   :  { %1160 = vmatprep.subr.mxu1 %v7842_v47  ;;  %1137 = vmatprep.subr.mxu0 %v7849_v12  ;;  %v7853_v47 = vld [vmem:[#allocation124_spill] sm:$0xff]  ;;  %v7860_v12 = vld [vmem:[#allocation86_spill] sm:$0xff] }
 0x21b   :  { %1161 = vmatpush1.msra.mxu1 %v7844_v0  ;;  %1138 = vmatpush2.msra.mxu0 %v7851_v35  ;;  %v7855_v0 = vld [vmem:[#allocation126_spill] sm:$0xff]  ;;  %v7862_v35 = vld [vmem:[#allocation87_spill] sm:$0xff] }
 0x21c   :  { %1162 = vmatprep.subr.mxu1 %v7846_v5  ;;  %1139 = vmatprep.subr.mxu0 %v7853_v47  ;;  %v7857_v5 = vld [vmem:[#allocation128_spill] sm:$0xff]  ;;  %v7864_v47 = vld [vmem:[#allocation89_spill] sm:$0xff] }
 0x21d   :  { %1163 = vmatpush1.msra.mxu1 %v7848_v32  ;;  %1140 = vmatpush2.msra.mxu0 %v7855_v0  ;;  %v7859_v32 = vld [vmem:[#allocation130_spill] sm:$0xff]  ;;  %v7866_v0 = vld [vmem:[#allocation91_spill] sm:$0xff] }
 0x21e   :  { %1164 = vmatprep.subr.mxu1 %v7850_v3  ;;  %1141 = vmatprep.subr.mxu0 %v7857_v5  ;;  %v7861_v3 = vld [vmem:[#allocation132_spill] sm:$0xff]  ;;  %v7868_v5 = vld [vmem:[#allocation93_spill] sm:$0xff] }
 0x21f   :  { %1165 = vmatpush1.msra.mxu1 %v7852_v60  ;;  %1142 = vmatpush2.msra.mxu0 %v7859_v32  ;;  %v7863_v60 = vld [vmem:[#allocation88_spill] sm:$0xff]  ;;  %v7870_v32 = vld [vmem:[#allocation95_spill] sm:$0xff] }
 0x220   :  { %1166 = vmatprep.subr.mxu1 %v7854_v34  ;;  %1221 = vmatprep.subr.mxu0 %v7861_v3  ;;  %v7865_v34 = vld [vmem:[#allocation90_spill] sm:$0xff]  ;;  %v7872_v3 = vld [vmem:[#allocation97_spill] sm:$0xff] }
 0x221   :  { %1167 = vmatpush1.msra.mxu1 %v7856_v6  ;;  %v7867_v6 = vld [vmem:[#allocation92_spill] sm:$0xff] }
 0x222   :  { %1168 = vmatprep.subr.mxu1 %v7858_v7  ;;  %v7869_v7 = vld [vmem:[#allocation94_spill] sm:$0xff] }
 0x223   :  { %1169 = vmatpush1.msra.mxu1 %v7860_v12  ;;  %v7871_v12 = vld [vmem:[#allocation96_spill] sm:$0xff] }
 0x224   :  { %1170 = vmatprep.subr.mxu1 %v7862_v35  ;;  %v7873_v35 = vld [vmem:[#allocation98_spill] sm:$0xff] }
 0x225   :  { %1171 = vmatpush1.msra.mxu1 %v7863_v60  ;;  %v7874_v60 = vld [vmem:[#allocation99_spill] sm:$0xff] }
 0x226   :  { %1172 = vmatprep.subr.mxu1 %v7864_v47  ;;  %v7875_v47 = vld [vmem:[#allocation101_spill] sm:$0xff] }
 0x227   :  { %1173 = vmatpush1.msra.mxu1 %v7865_v34  ;;  %v7876_v34 = vld [vmem:[#allocation103_spill] sm:$0xff] }
 0x228   :  { %1174 = vmatprep.subr.mxu1 %v7866_v0  ;;  %v7877_v0 = vld [vmem:[#allocation105_spill] sm:$0xff] }
 0x229   :  { %1175 = vmatpush1.msra.mxu1 %v7867_v6  ;;  %v7878_v6 = vld [vmem:[#allocation107_spill] sm:$0xff] }
 0x22a   :  { %1176 = vmatprep.subr.mxu1 %v7868_v5  ;;  %v7879_v5 = vld [vmem:[#allocation109_spill] sm:$0xff] }
 0x22b   :  { %1177 = vmatpush1.msra.mxu1 %v7869_v7  ;;  %v7880_v7 = vld [vmem:[#allocation111_spill] sm:$0xff] }
 0x22c   :  { %1178 = vmatprep.subr.mxu1 %v7870_v32  ;;  %v7881_v32 = vld [vmem:[#allocation113_spill] sm:$0xff] }
 0x22d   :  { %1179 = vmatpush1.msra.mxu1 %v7871_v12  ;;  %v7882_v12 = vld [vmem:[#allocation115_spill] sm:$0xff] }
 0x22e   :  { %1180 = vmatprep.subr.mxu1 %v7872_v3  ;;  %v7883_v3 = vld [vmem:[#allocation117_spill] sm:$0xff] }
 0x22f   :  { %1181 = vmatpush1.msra.mxu1 %v7873_v35  ;;  %v7884_v35 = vld [vmem:[#allocation119_spill] sm:$0xff] }
 0x230   :  { %1182 = vmatprep.subr.mxu1 %v7874_v60  ;;  %v7885_v60 = vld [vmem:[#allocation121_spill] sm:$0xff] }
 0x231   :  { %1183 = vmatpush2.msra.mxu1 %v7875_v47  ;;  %v7886_v47 = vld [vmem:[#allocation123_spill] sm:$0xff] }
 0x232   :  { %1184 = vmatprep.subr.mxu1 %v7876_v34  ;;  %v7887_v34 = vld [vmem:[#allocation125_spill] sm:$0xff] }
 0x233   :  { %1185 = vmatpush2.msra.mxu1 %v7877_v0  ;;  %v7888_v0 = vld [vmem:[#allocation127_spill] sm:$0xff] }
 0x234   :  { %1186 = vmatprep.subr.mxu1 %v7878_v6  ;;  %v7889_v6 = vld [vmem:[#allocation129_spill] sm:$0xff] }
 0x235   :  { %1187 = vmatpush2.msra.mxu1 %v7879_v5  ;;  %v7890_v5 = vld [vmem:[#allocation131_spill] sm:$0xff] }
 0x236   :  { %1188 = vmatprep.subr.mxu1 %v7880_v7  ;;  %v7891_v7 = vld [vmem:[#allocation134_spill] sm:$0xff] }
 0x237   :  { %1189 = vmatpush2.msra.mxu1 %v7881_v32  ;;  %v7892_v32 = vld [vmem:[#allocation136_spill] sm:$0xff] }
 0x238   :  { %1190 = vmatprep.subr.mxu1 %v7882_v12  ;;  %v7893_v12 = vld [vmem:[#allocation138_spill] sm:$0xff] }
 0x239   :  { %1191 = vmatpush2.msra.mxu1 %v7883_v3  ;;  %v7894_v3 = vld [vmem:[#allocation140_spill] sm:$0xff] }
 0x23a   :  { %1192 = vmatprep.subr.mxu1 %v7884_v35  ;;  %v7895_v35 = vld [vmem:[#allocation142_spill] sm:$0xff] }
 0x23b   :  { %1193 = vmatpush2.msra.mxu1 %v7885_v60  ;;  %v7896_v60 = vld [vmem:[#allocation144_spill] sm:$0xff] }
 0x23c   :  { %1194 = vmatprep.subr.mxu1 %v7886_v47  ;;  %v7897_v47 = vld [vmem:[#allocation146_spill] sm:$0xff] }
 0x23d   :  { %1195 = vmatpush2.msra.mxu1 %v7887_v34  ;;  %v7898_v34 = vld [vmem:[#allocation148_spill] sm:$0xff] }
 0x23e   :  { %1196 = vmatprep.subr.mxu1 %v7888_v0  ;;  %v7899_v0 = vld [vmem:[#allocation150_spill] sm:$0xff] }
 0x23f   :  { %1197 = vmatpush2.msra.mxu1 %v7889_v6  ;;  %v7900_v6 = vld [vmem:[#allocation152_spill] sm:$0xff] }
 0x240   :  { %1198 = vmatprep.subr.mxu1 %v7890_v5  ;;  %v7901_v5 = vld [vmem:[#allocation156_spill] sm:$0xff] }
 0x241   :  { %1199 = vmatpush2.msra.mxu1 %v7891_v7  ;;  %v4853_v7 = vld [vmem:[#allocation3 + $0x2d8] sm:$0xff] }
 0x242   :  { %1200 = vmatprep.subr.mxu1 %v7892_v32  ;;  %7902 = vst [vmem:[#allocation100_spill] sm:$0xff] %v4853_v7 }
 0x243   :  { %1201 = vmatpush2.msra.mxu1 %v7893_v12 }
 0x244   :  { %1202 = vmatprep.subr.mxu1 %v7894_v3  ;;  %v7903_v3 = vld [vmem:[#allocation23_spill] sm:$0xff] }
 0x245   :  { %1203 = vmatpush2.msra.mxu1 %v7895_v35 }
 0x246   :  { %1204 = vmatprep.subr.mxu1 %v7896_v60  ;;  %v7906_v60 = vld [vmem:[#allocation26_spill] sm:$0xff] }
 0x247   :  { %1205 = vmatpush2.msra.mxu1 %v7897_v47 }
 0x248   :  { %1206 = vmatprep.subr.mxu1 %v7898_v34 }
 0x249   :  { %1207 = vmatpush2.msra.mxu1 %v7899_v0  ;;  %v7904_v0 = vld [vmem:[#allocation25_spill] sm:$0xff] }
 0x24a   :  { %1208 = vmatprep.subr.mxu1 %v7900_v6 }
 0x24b   :  { %1209 = vmatpush2.msra.mxu1 %v4545_v20 }
 0x24c   :  { %1210 = vmatprep.subr.mxu1 %v7901_v5 }
 0x24d   :  { %1211 = vmatpush2.msra.mxu1 %v4557_v43  ;;  %v7905_v43 = vld [vmem:[#allocation24_spill] sm:$0xff] }
 0x24e   :  { %1212 = vmatprep.subr.mxu1 %v4563_v17 }
 0x24f   :  { %1213 = vmatpush2.msra.mxu1 %v4569_v41 }
 0x250   :  { %1345 = vmatprep.subr.mxu1 %v4853_v7 }
 0x290   :  { %v879_v32 = vpop.f32.mrf.mxu1 }
 0x291   :  { %v1026_v35 = vadd.f32 %v879_v32, %v7903_v3  ;;  %v7907_v3 = vld [vmem:[#allocation21_spill] sm:$0xff] }
 0x292   :  { %v881_v12 = vpop.f32.mrf.mxu1 }
 0x293   :  { %v1027_v6 = vadd.f32 %v881_v12, %v7904_v0  ;;  %v3111_v34 = vmul.f32 -1.442695, %v1026_v35 }
 0x295   :  { %v3112_v20 = vmul.f32 -1.442695, %v1027_v6  ;;  %3192 = vpow2.f32 %v3111_v34 }
 0x297   :  { %3194 = vpow2.f32 %v3112_v20 }
 0x29d   :  { %v950_v5 = vpop.f32.mrf.mxu0 }
 0x29e   :  { %v1028_v47 = vadd.f32 %v950_v5, %v7905_v43 }
 0x29f   :  { %v952_v17 = vpop.f32.mrf.mxu0 }
 0x2a0   :  { %v1029_v41 = vadd.f32 %v952_v17, %v7906_v60  ;;  %v3113_v9 = vmul.f32 -1.442695, %v1028_v47 }
 0x2a2   :  { %v3114_v36 = vmul.f32 -1.442695, %v1029_v41  ;;  %v3193_v4 = vpop.eup %3192  ;;  %3196 = vpow2.f32 %v3113_v9  ;;  %v7908_v41 = vld [vmem:[#allocation22_spill] sm:$0xff] }
 0x2a3   :  { %v1042_v10 = vadd.f32 1.0, %v3193_v4  ;;  %v7909_v4 = vld [vmem:[#allocation55_spill] sm:$0xff] }
 0x2a4   :  { %v3195_v7 = vpop.eup %3194  ;;  %3198 = vpow2.f32 %v3114_v36 }
 0x2a5   :  { %v1043_v32 = vadd.f32 1.0, %v3195_v7  ;;  %3200 = vrcp.f32 %v1042_v10  ;;  %v7910_v10 = vld [vmem:[#allocation56_spill] sm:$0xff] }
 0x2a7   :  { %3202 = vrcp.f32 %v1043_v32 }
 0x2af   :  { %v3197_v0 = vpop.eup %3196 }
 0x2b0   :  { %v1044_v34 = vadd.f32 1.0, %v3197_v0 }
 0x2b1   :  { %v3199_v6 = vpop.eup %3198 }
 0x2b2   :  { %v1045_v20 = vadd.f32 1.0, %v3199_v6  ;;  %v3201_v5 = vpop.eup %3200  ;;  %3204 = vrcp.f32 %v1044_v34 }
 0x2b4   :  { %v3203_v9 = vpop.eup %3202  ;;  %3206 = vrcp.f32 %v1045_v20 }
 0x2bf   :  { %v3205_v32 = vpop.eup %3204 }
 0x2c0   :  { %v1062_v6 = vsub.f32 1.0, %v3205_v32 }
 0x2c1   :  { %v3207_v0 = vpop.eup %3206 }
 0x2d0   :  { %v1021_v12 = vpop.f32.mrf.mxu1 }
 0x2d1   :  { %v1054_v43 = vadd.f32 %v1021_v12, %v7907_v3  ;;  %v1063_v12 = vsub.f32 1.0, %v3207_v0 }
 0x2d2   :  { %v1023_v17 = vpop.f32.mrf.mxu1 }
 0x2d3   :  { %v1056_v60 = vmul.f32 %v3201_v5, %v1054_v43  ;;  %v1055_v47 = vadd.f32 %v1023_v17, %v7908_v41  ;;  %v1067_v43 = vmul.f32 0.0, %v3207_v0  ;;  %v1066_v5 = vmul.f32 0.0, %v3205_v32  ;;  %v7917_v32 = vld [vmem:[#allocation145_spill] sm:$0xff]  ;;  %v4895_v0 = vld [vmem:[#allocation3 + $0x248] sm:$0xff] }
 0x2d5   :  { %v1058_v36 = vadd.f32 %v1056_v60, %v7909_v4  ;;  %v1057_v7 = vmul.f32 %v3203_v9, %v1055_v47  ;;  %v7911_v60 = vld [vmem:[#allocation133_spill] sm:$0xff]  ;;  %v4879_v47 = vld [vmem:[#allocation3 + $0x2a8] sm:$0xff]  ;;  %v7914_v9 = vld [vmem:[#allocation139_spill] sm:$0xff] }
 0x2d6   :  { %v4883_v4 = vld [vmem:[#allocation3 + $0x2a0] sm:$0xff] }
 0x2d7   :  { %3208 = vtanh.f32 %v1058_v36  ;;  %v1059_v35 = vadd.f32 %v1057_v7, %v7910_v10  ;;  %v7915_v36 = vld [vmem:[#allocation141_spill] sm:$0xff]  ;;  %v4887_v7 = vld [vmem:[#allocation3 + $0x278] sm:$0xff]  ;;  %v7916_v10 = vld [vmem:[#allocation143_spill] sm:$0xff] }
 0x2d9   :  { %3210 = vtanh.f32 %v1059_v35  ;;  %v4891_v35 = vld [vmem:[#allocation3 + $0x270] sm:$0xff] }
 0x2e4   :  { %v3209_v61 = vpop.eup %3208 }
 0x2e5   :  { %v1064_v34 = vmul.f32 %v3209_v61, %v1062_v6  ;;  %v7912_v61 = vld [vmem:[#allocation135_spill] sm:$0xff] }
 0x2e6   :  { %v3211_v3 = vpop.eup %3210  ;;  %v7918_v6 = vld [vmem:[#allocation147_spill] sm:$0xff] }
 0x2e7   :  { %v1065_v11 = vmul.f32 %v3211_v3, %v1063_v12  ;;  %v4866_v20 = vadd.f32 %v1066_v5, %v1064_v34  ;;  %v4875_v3 = vld [vmem:[#allocation3 + $0x2d0] sm:$0xff]  ;;  %v4899_v12 = vld [vmem:[#allocation3 + $0x240] sm:$0xff] }
 0x2e8   :  { %v7919_v34 = vld [vmem:[#allocation149_spill] sm:$0xff]  ;;  %v7920_v5 = vld [vmem:[#allocation151_spill] sm:$0xff] }
 0x2e9   :  { %v4864_v17 = vadd.f32 %v1067_v43, %v1065_v11  ;;  %v7913_v11 = vld [vmem:[#allocation137_spill] sm:$0xff]  ;;  %v4903_v43 = vld [vmem:[#allocation3 + $0x218] sm:$0xff] }
 0x2eb   :  { %1143 = vmatprep.mubr.f32.mxu0 %v4864_v17  ;;  %1214 = vmatprep.mubr.f32.mxu1 %v4864_v17 }
 0x2ec   :  { %1144 = vmatmul.mubr.f32.vlgmr.msra.gmra.mxu0 %v4866_v20  ;;  %1215 = vmatmul.mubr.f32.vlgmr.msra.gmra.mxu1 %v4866_v20 }
 0x2ed   :  { %1222 = vmatpush1.msra.mxu0 %v7911_v60  ;;  %1285 = vmatprep.mubr.f32.mxu0 %v4864_v17  ;;  %v4907_v60 = vld [vmem:[#allocation3 + $0x210] sm:$0xff] }
 0x2ee   :  { %1223 = vmatprep.subr.mxu0 %v7912_v61  ;;  %1346 = vmatpush1.msra.mxu1 %v4875_v3  ;;  %v7921_v61 = vld [vmem:[#allocation153_spill] sm:$0xff] }
 0x2ef   :  { %1224 = vmatpush1.msra.mxu0 %v7913_v11  ;;  %1347 = vmatprep.subr.mxu1 %v4879_v47  ;;  %v4911_v11 = vld [vmem:[#allocation3 + $0x1e8] sm:$0xff] }
 0x2f0   :  { %1225 = vmatprep.subr.mxu0 %v7914_v9  ;;  %1348 = vmatpush1.msra.mxu1 %v4883_v4  ;;  %v7922_v9 = vld [vmem:[#allocation155_spill] sm:$0xff] }
 0x2f1   :  { %1226 = vmatpush1.msra.mxu0 %v7915_v36  ;;  %1349 = vmatprep.subr.mxu1 %v4887_v7  ;;  %v4915_v36 = vld [vmem:[#allocation3 + $0x1e0] sm:$0xff] }
 0x2f2   :  { %1227 = vmatprep.subr.mxu0 %v7916_v10  ;;  %1350 = vmatpush1.msra.mxu1 %v4891_v35  ;;  %7923 = vst [vmem:[#allocation71_spill] sm:$0xff] %v4915_v36  ;;  %v7924_v10 = vld [vmem:[#allocation157_spill] sm:$0xff] }
 0x2f3   :  { %1228 = vmatpush1.msra.mxu0 %v7917_v32  ;;  %1351 = vmatprep.subr.mxu1 %v4895_v0  ;;  %v4919_v32 = vld [vmem:[#allocation3 + $0x1b8] sm:$0xff] }
 0x2f4   :  { %1229 = vmatprep.subr.mxu0 %v7918_v6  ;;  %1352 = vmatpush1.msra.mxu1 %v4899_v12  ;;  %7925 = vst [vmem:[#allocation102_spill] sm:$0xff] %v4919_v32  ;;  %v7926_v6 = vld [vmem:[#allocation159_spill] sm:$0xff] }
 0x2f5   :  { %1230 = vmatpush1.msra.mxu0 %v7919_v34  ;;  %1353 = vmatprep.subr.mxu1 %v4903_v43  ;;  %v4923_v34 = vld [vmem:[#allocation3 + $0x1b0] sm:$0xff] }
 0x2f6   :  { %1231 = vmatprep.subr.mxu0 %v7920_v5  ;;  %1354 = vmatpush1.msra.mxu1 %v4907_v60  ;;  %v7927_v5 = vld [vmem:[#allocation161_spill] sm:$0xff] }
 0x2f7   :  { %1232 = vmatpush1.msra.mxu0 %v7921_v61  ;;  %1355 = vmatprep.subr.mxu1 %v4911_v11  ;;  %v4927_v61 = vld [vmem:[#allocation3 + $0x188] sm:$0xff] }
 0x2f8   :  { %1233 = vmatprep.subr.mxu0 %v7922_v9  ;;  %1356 = vmatpush1.msra.mxu1 %v4915_v36  ;;  %v7928_v9 = vld [vmem:[#allocation163_spill] sm:$0xff] }
 0x2f9   :  { %1234 = vmatpush1.msra.mxu0 %v7924_v10  ;;  %1357 = vmatprep.subr.mxu1 %v4919_v32  ;;  %v4931_v36 = vld [vmem:[#allocation3 + $0x180] sm:$0xff]  ;;  %v7929_v10 = vld [vmem:[#allocation164_spill] sm:$0xff]  ;;  %v4935_v32 = vld [vmem:[#allocation3 + $0x158] sm:$0xff] }
 0x2fa   :  { %1235 = vmatprep.subr.mxu0 %v7926_v6  ;;  %1358 = vmatpush1.msra.mxu1 %v4923_v34  ;;  %v4939_v6 = vld [vmem:[#allocation3 + $0x150] sm:$0xff] }
 0x2fb   :  { %1236 = vmatpush1.msra.mxu0 %v7927_v5  ;;  %1359 = vmatprep.subr.mxu1 %v4927_v61  ;;  %v4943_v5 = vld [vmem:[#allocation3 + $0x128] sm:$0xff] }
 0x2fc   :  { %1237 = vmatprep.subr.mxu0 %v7928_v9  ;;  %1360 = vmatpush1.msra.mxu1 %v4931_v36  ;;  %v4947_v9 = vld [vmem:[#allocation3 + $0x120] sm:$0xff] }
 0x2fd   :  { %1238 = vmatpush1.msra.mxu0 %v7929_v10  ;;  %1361 = vmatprep.subr.mxu1 %v4935_v32  ;;  %v4951_v10 = vld [vmem:[#allocation3 + $0xf8] sm:$0xff] }
 0x2fe   :  { %1239 = vmatprep.subr.mxu0 %v4580_v26  ;;  %1362 = vmatpush1.msra.mxu1 %v4939_v6  ;;  %v4955_v26 = vld [vmem:[#allocation3 + $0xf0] sm:$0xff] }
 0x2ff   :  { %1240 = vmatpush1.msra.mxu0 %v4584_v21  ;;  %1363 = vmatprep.subr.mxu1 %v4943_v5  ;;  %v4959_v21 = vld [vmem:[#allocation3 + $0xc8] sm:$0xff] }
 0x300   :  { %1241 = vmatprep.subr.mxu0 %v4588_v39  ;;  %1364 = vmatpush1.msra.mxu1 %v4947_v9  ;;  %v4963_v39 = vld [vmem:[#allocation3 + $0xc0] sm:$0xff] }
 0x301   :  { %1242 = vmatpush1.msra.mxu0 %v4592_v24  ;;  %1365 = vmatprep.subr.mxu1 %v4951_v10  ;;  %v4967_v24 = vld [vmem:[#allocation3 + $0x98] sm:$0xff] }
 0x302   :  { %1243 = vmatprep.subr.mxu0 %v4596_v25  ;;  %1366 = vmatpush1.msra.mxu1 %v4955_v26  ;;  %v4971_v25 = vld [vmem:[#allocation3 + $0x90] sm:$0xff] }
 0x303   :  { %1244 = vmatpush1.msra.mxu0 %v4600_v44  ;;  %1367 = vmatprep.subr.mxu1 %v4959_v21  ;;  %v4975_v44 = vld [vmem:[#allocation3 + $0x68] sm:$0xff] }
 0x304   :  { %1245 = vmatprep.subr.mxu0 %v4604_v13  ;;  %1368 = vmatpush1.msra.mxu1 %v4963_v39  ;;  %v4979_v13 = vld [vmem:[#allocation3 + $0x60] sm:$0xff] }
 0x305   :  { %1246 = vmatpush1.msra.mxu0 %v4608_v50  ;;  %1369 = vmatprep.subr.mxu1 %v4967_v24  ;;  %v4983_v50 = vld [vmem:[#allocation3 + $0x38] sm:$0xff] }
 0x306   :  { %1247 = vmatprep.subr.mxu0 %v4612_v51  ;;  %1370 = vmatpush1.msra.mxu1 %v4971_v25  ;;  %7930 = vst [vmem:[#allocation72_spill] sm:$0xff] %v4983_v50  ;;  %v4987_v51 = vld [vmem:[#allocation3 + $0x30] sm:$0xff] }
 0x307   :  { %1248 = vmatpush1.msra.mxu0 %v4616_v52  ;;  %1371 = vmatprep.subr.mxu1 %v4975_v44  ;;  %7931 = vst [vmem:[#allocation104_spill] sm:$0xff] %v4987_v51  ;;  %v4991_v52 = vld [vmem:[#allocation3 + $0x8] sm:$0xff] }
 0x308   :  { %1249 = vmatprep.subr.mxu0 %v4620_v53  ;;  %1372 = vmatpush1.msra.mxu1 %v4979_v13  ;;  %7932 = vst [vmem:[#allocation73_spill] sm:$0xff] %v4991_v52  ;;  %v4995_v53 = vld [vmem:[#allocation3] sm:$0xff] }
 0x309   :  { %1250 = vmatpush1.msra.mxu0 %v4624_v54  ;;  %1373 = vmatprep.subr.mxu1 %v4983_v50  ;;  %7933 = vst [vmem:[#allocation106_spill] sm:$0xff] %v4995_v53  ;;  %v4999_v54 = vld [vmem:[#allocation3 + $0x5d8] sm:$0xff] }
 0x30a   :  { %1251 = vmatprep.subr.mxu0 %v4628_v55  ;;  %1374 = vmatpush1.msra.mxu1 %v4987_v51  ;;  %7934 = vst [vmem:[#allocation74_spill] sm:$0xff] %v4999_v54  ;;  %v5003_v55 = vld [vmem:[#allocation3 + $0x5d0] sm:$0xff] }
 0x30b   :  { %1252 = vmatpush1.msra.mxu0 %v4632_v56  ;;  %1375 = vmatprep.subr.mxu1 %v4991_v52  ;;  %7935 = vst [vmem:[#allocation108_spill] sm:$0xff] %v5003_v55  ;;  %v5007_v56 = vld [vmem:[#allocation3 + $0x5a8] sm:$0xff] }
 0x30c   :  { %1253 = vmatprep.subr.mxu0 %v4636_v57  ;;  %1376 = vmatpush1.msra.mxu1 %v4995_v53  ;;  %7936 = vst [vmem:[#allocation75_spill] sm:$0xff] %v5007_v56  ;;  %v5011_v57 = vld [vmem:[#allocation3 + $0x5a0] sm:$0xff] }
 0x30d   :  { %1254 = vmatpush2.msra.mxu0 %v4640_v58  ;;  %1377 = vmatprep.subr.mxu1 %v4999_v54  ;;  %7937 = vst [vmem:[#allocation110_spill] sm:$0xff] %v5011_v57  ;;  %v5015_v58 = vld [vmem:[#allocation3 + $0x578] sm:$0xff] }
 0x30e   :  { %1255 = vmatprep.subr.mxu0 %v4644_v59  ;;  %1378 = vmatpush2.msra.mxu1 %v5003_v55  ;;  %7938 = vst [vmem:[#allocation76_spill] sm:$0xff] %v5015_v58  ;;  %v5019_v59 = vld [vmem:[#allocation3 + $0x570] sm:$0xff] }
 0x30f   :  { %1256 = vmatpush2.msra.mxu0 %v4648_v62  ;;  %1379 = vmatprep.subr.mxu1 %v5007_v56  ;;  %7939 = vst [vmem:[#allocation112_spill] sm:$0xff] %v5019_v59  ;;  %v5023_v62 = vld [vmem:[#allocation3 + $0x548] sm:$0xff] }
 0x310   :  { %1257 = vmatprep.subr.mxu0 %v4652_v63  ;;  %1380 = vmatpush2.msra.mxu1 %v5011_v57  ;;  %7940 = vst [vmem:[#allocation77_spill] sm:$0xff] %v5023_v62  ;;  %v5027_v63 = vld [vmem:[#allocation3 + $0x540] sm:$0xff] }
 0x311   :  { %1258 = vmatpush2.msra.mxu0 %v4656_v1  ;;  %1381 = vmatprep.subr.mxu1 %v5015_v58  ;;  %7941 = vst [vmem:[#allocation78_spill] sm:$0xff] %v5027_v63  ;;  %v5031_v1 = vld [vmem:[#allocation3 + $0x518] sm:$0xff] }
 0x312   :  { %1259 = vmatprep.subr.mxu0 %v4660_v2  ;;  %1382 = vmatpush2.msra.mxu1 %v5019_v59  ;;  %7942 = vst [vmem:[#allocation79_spill] sm:$0xff] %v5031_v1  ;;  %v5035_v2 = vld [vmem:[#allocation3 + $0x510] sm:$0xff] }
 0x313   :  { %1260 = vmatpush2.msra.mxu0 %v4664_v49  ;;  %1383 = vmatprep.subr.mxu1 %v5023_v62  ;;  %7943 = vst [vmem:[#allocation80_spill] sm:$0xff] %v5035_v2  ;;  %v5039_v49 = vld [vmem:[#allocation3 + $0x4e8] sm:$0xff] }
 0x314   :  { %1261 = vmatprep.subr.mxu0 %v4668_v48  ;;  %1384 = vmatpush2.msra.mxu1 %v5027_v63  ;;  %7944 = vst [vmem:[#allocation81_spill] sm:$0xff] %v5039_v49  ;;  %v5043_v48 = vld [vmem:[#allocation3 + $0x4e0] sm:$0xff] }
 0x315   :  { %1262 = vmatpush2.msra.mxu0 %v4672_v33  ;;  %1385 = vmatprep.subr.mxu1 %v5031_v1  ;;  %7945 = vst [vmem:[#allocation82_spill] sm:$0xff] %v5043_v48  ;;  %v5047_v33 = vld [vmem:[#allocation3 + $0x4b8] sm:$0xff] }
 0x316   :  { %1263 = vmatprep.subr.mxu0 %v4676_v31  ;;  %1386 = vmatpush2.msra.mxu1 %v5035_v2  ;;  %7946 = vst [vmem:[#allocation83_spill] sm:$0xff] %v5047_v33  ;;  %v5051_v31 = vld [vmem:[#allocation3 + $0x4b0] sm:$0xff] }
 0x317   :  { %1264 = vmatpush2.msra.mxu0 %v4680_v30  ;;  %1387 = vmatprep.subr.mxu1 %v5039_v49  ;;  %7947 = vst [vmem:[#allocation84_spill] sm:$0xff] %v5051_v31  ;;  %v5055_v30 = vld [vmem:[#allocation3 + $0x488] sm:$0xff] }
 0x318   :  { %1265 = vmatprep.subr.mxu0 %v4684_v46  ;;  %1388 = vmatpush2.msra.mxu1 %v5043_v48  ;;  %7948 = vst [vmem:[#allocation85_spill] sm:$0xff] %v5055_v30  ;;  %v5059_v46 = vld [vmem:[#allocation3 + $0x480] sm:$0xff] }
 0x319   :  { %1266 = vmatpush2.msra.mxu0 %v4688_v28  ;;  %1389 = vmatprep.subr.mxu1 %v5047_v33  ;;  %7949 = vst [vmem:[#allocation86_spill] sm:$0xff] %v5059_v46  ;;  %v5063_v28 = vld [vmem:[#allocation3 + $0x458] sm:$0xff] }
 0x31a   :  { %1267 = vmatprep.subr.mxu0 %v4692_v45  ;;  %1390 = vmatpush2.msra.mxu1 %v5051_v31  ;;  %7950 = vst [vmem:[#allocation87_spill] sm:$0xff] %v5063_v28  ;;  %v5067_v45 = vld [vmem:[#allocation3 + $0x450] sm:$0xff] }
 0x31b   :  { %1268 = vmatpush2.msra.mxu0 %v4696_v23  ;;  %1391 = vmatprep.subr.mxu1 %v5055_v30  ;;  %7951 = vst [vmem:[#allocation88_spill] sm:$0xff] %v5067_v45  ;;  %v7952_v23 = vld [vmem:[#allocation165_spill] sm:$0xff] }
 0x31c   :  { %1269 = vmatprep.subr.mxu0 %v4700_v22  ;;  %1392 = vmatpush2.msra.mxu1 %v5059_v46  ;;  %v7953_v22 = vld [vmem:[#allocation114_spill] sm:$0xff] }
 0x31d   :  { %1270 = vmatpush2.msra.mxu0 %v4704_v42  ;;  %1393 = vmatprep.subr.mxu1 %v5063_v28  ;;  %v7954_v42 = vld [vmem:[#allocation166_spill] sm:$0xff] }
 0x31e   :  { %1271 = vmatprep.subr.mxu0 %v4708_v19  ;;  %1394 = vmatpush2.msra.mxu1 %v5067_v45  ;;  %v7955_v19 = vld [vmem:[#allocation116_spill] sm:$0xff]  ;;  %v8038_v28 = vld [vmem:[#allocation30_spill] sm:$0xff] }
 0x31f   :  { %1272 = vmatpush2.msra.mxu0 %v4712_v18  ;;  %1395 = vmatprep.subr.mxu1 %v7833_v8  ;;  %v7956_v18 = vld [vmem:[#allocation167_spill] sm:$0xff]  ;;  %v7960_v8 = vld [vmem:[#allocation169_spill] sm:$0xff]  ;;  %v8037_v45 = vld [vmem:[#allocation28_spill] sm:$0xff] }
 0x320   :  { %1273 = vmatprep.subr.mxu0 %v4716_v40  ;;  %1396 = vmatpush2.msra.mxu1 %v7835_v16  ;;  %v7957_v40 = vld [vmem:[#allocation118_spill] sm:$0xff] }
 0x321   :  { %1274 = vmatpush2.msra.mxu0 %v4720_v15  ;;  %1397 = vmatprep.subr.mxu1 %v7837_v29  ;;  %v7958_v15 = vld [vmem:[#allocation168_spill] sm:$0xff]  ;;  %v7962_v16 = vld [vmem:[#allocation170_spill] sm:$0xff] }
 0x322   :  { %1275 = vmatprep.subr.mxu0 %v4724_v14  ;;  %1398 = vmatpush2.msra.mxu1 %v7839_v27  ;;  %v7959_v14 = vld [vmem:[#allocation120_spill] sm:$0xff]  ;;  %v7964_v27 = vld [vmem:[#allocation171_spill] sm:$0xff] }
 0x323   :  { %1276 = vmatpush2.msra.mxu0 %v4728_v38  ;;  %1399 = vmatprep.subr.mxu1 %v7841_v37  ;;  %v7961_v38 = vld [vmem:[#allocation122_spill] sm:$0xff]  ;;  %v7963_v29 = vld [vmem:[#allocation124_spill] sm:$0xff] }
 0x324   :  { %1277 = vmatprep.subr.mxu0 %v7952_v23  ;;  %1400 = vmatpush2.msra.mxu1 %v7953_v22  ;;  %v7965_v37 = vld [vmem:[#allocation126_spill] sm:$0xff]  ;;  %v7966_v23 = vld [vmem:[#allocation172_spill] sm:$0xff] }
 0x325   :  { %1278 = vmatpush2.msra.mxu0 %v7954_v42  ;;  %1401 = vmatprep.subr.mxu1 %v7955_v19  ;;  %v7967_v22 = vld [vmem:[#allocation128_spill] sm:$0xff]  ;;  %v5100_v19 = vld [vmem:[#allocation3 + $0x2e0] sm:$0xff] }
 0x326   :  { %1279 = vmatprep.subr.mxu0 %v7956_v18  ;;  %1402 = vmatpush2.msra.mxu1 %v7957_v40  ;;  %v5097_v42 = vld [vmem:[#allocation3 + $0x2e8] sm:$0xff]  ;;  %7969 = vst [vmem:[#allocation90_spill] sm:$0xff] %v5100_v19  ;;  %v7970_v18 = vld [vmem:[#allocation130_spill] sm:$0xff] }
 0x327   :  { %1280 = vmatpush2.msra.mxu0 %v7958_v15  ;;  %1403 = vmatprep.subr.mxu1 %v7959_v14  ;;  %7968 = vst [vmem:[#allocation89_spill] sm:$0xff] %v5097_v42  ;;  %v5104_v40 = vld [vmem:[#allocation3 + $0x2b8] sm:$0xff]  ;;  %v7972_v15 = vld [vmem:[#allocation132_spill] sm:$0xff]  ;;  %v5108_v14 = vld [vmem:[#allocation3 + $0x2b0] sm:$0xff] }
 0x328   :  { %1281 = vmatprep.subr.mxu0 %v7960_v8  ;;  %1404 = vmatpush2.msra.mxu1 %v7961_v38  ;;  %7971 = vst [vmem:[#allocation91_spill] sm:$0xff] %v5104_v40  ;;  %7973 = vst [vmem:[#allocation92_spill] sm:$0xff] %v5108_v14  ;;  %v5111_v8 = vld [vmem:[#allocation3 + $0x288] sm:$0xff]  ;;  %v5114_v38 = vld [vmem:[#allocation3 + $0x280] sm:$0xff] }
 0x329   :  { %1282 = vmatpush2.msra.mxu0 %v7962_v16  ;;  %1405 = vmatprep.subr.mxu1 %v7963_v29  ;;  %7974 = vst [vmem:[#allocation93_spill] sm:$0xff] %v5111_v8  ;;  %7975 = vst [vmem:[#allocation94_spill] sm:$0xff] %v5114_v38  ;;  %v5117_v16 = vld [vmem:[#allocation3 + $0x258] sm:$0xff]  ;;  %v5120_v29 = vld [vmem:[#allocation3 + $0x250] sm:$0xff] }
 0x32a   :  { %1283 = vmatprep.subr.mxu0 %v7964_v27  ;;  %1406 = vmatpush2.msra.mxu1 %v7965_v37  ;;  %7976 = vst [vmem:[#allocation95_spill] sm:$0xff] %v5117_v16  ;;  %7977 = vst [vmem:[#allocation96_spill] sm:$0xff] %v5120_v29  ;;  %v5123_v27 = vld [vmem:[#allocation3 + $0x228] sm:$0xff]  ;;  %v5126_v37 = vld [vmem:[#allocation3 + $0x220] sm:$0xff] }
 0x32b   :  { %1284 = vmatpush2.msra.mxu0 %v7966_v23  ;;  %1407 = vmatprep.subr.mxu1 %v7967_v22  ;;  %7978 = vst [vmem:[#allocation97_spill] sm:$0xff] %v5123_v27  ;;  %7979 = vst [vmem:[#allocation98_spill] sm:$0xff] %v5126_v37  ;;  %v5129_v23 = vld [vmem:[#allocation3 + $0x1f8] sm:$0xff]  ;;  %v5132_v22 = vld [vmem:[#allocation3 + $0x1f0] sm:$0xff] }
 0x32c   :  { %1286 = vmatmul.mubr.f32.vlgmr.msra.gmra.mxu0 %v4866_v20  ;;  %1416 = vmatprep.subr.mxu0 %v5097_v42  ;;  %7980 = vst [vmem:[#allocation99_spill] sm:$0xff] %v5129_v23  ;;  %7981 = vst [vmem:[#allocation101_spill] sm:$0xff] %v5132_v22 }
 0x32d   :  { %1417 = vmatpush1.msra.mxu0 %v5100_v19  ;;  %1408 = vmatpush2.msra.mxu1 %v7970_v18  ;;  %v5135_v18 = vld [vmem:[#allocation3 + $0x1c8] sm:$0xff]  ;;  %v8036_v19 = vld [vmem:[#allocation29_spill] sm:$0xff] }
 0x32e   :  { %1418 = vmatprep.subr.mxu0 %v5104_v40  ;;  %1487 = vmatprep.subr.mxu1 %v7972_v15  ;;  %7982 = vst [vmem:[#allocation103_spill] sm:$0xff] %v5135_v18  ;;  %v5138_v15 = vld [vmem:[#allocation3 + $0x1c0] sm:$0xff] }
 0x32f   :  { %1419 = vmatpush1.msra.mxu0 %v5108_v14  ;;  %7983 = vst [vmem:[#allocation105_spill] sm:$0xff] %v5138_v15  ;;  %v8033_v14 = vld [vmem:[#allocation162_spill] sm:$0xff]  ;;  %v8035_v40 = vld [vmem:[#allocation27_spill] sm:$0xff] }
 0x330   :  { %1420 = vmatprep.subr.mxu0 %v5111_v8  ;;  %v8031_v8 = vld [vmem:[#allocation158_spill] sm:$0xff] }
 0x331   :  { %1421 = vmatpush1.msra.mxu0 %v5114_v38  ;;  %v8029_v38 = vld [vmem:[#allocation154_spill] sm:$0xff] }
 0x332   :  { %1422 = vmatprep.subr.mxu0 %v5117_v16  ;;  %v8027_v16 = vld [vmem:[#allocation150_spill] sm:$0xff] }
 0x333   :  { %1423 = vmatpush1.msra.mxu0 %v5120_v29  ;;  %v8025_v29 = vld [vmem:[#allocation146_spill] sm:$0xff] }
 0x334   :  { %1424 = vmatprep.subr.mxu0 %v5123_v27  ;;  %v5141_v27 = vld [vmem:[#allocation3 + $0x198] sm:$0xff] }
 0x335   :  { %1425 = vmatpush1.msra.mxu0 %v5126_v37  ;;  %7984 = vst [vmem:[#allocation107_spill] sm:$0xff] %v5141_v27  ;;  %v5144_v37 = vld [vmem:[#allocation3 + $0x190] sm:$0xff] }
 0x336   :  { %1426 = vmatprep.subr.mxu0 %v5129_v23  ;;  %7985 = vst [vmem:[#allocation109_spill] sm:$0xff] %v5144_v37  ;;  %v5147_v23 = vld [vmem:[#allocation3 + $0x168] sm:$0xff] }
 0x337   :  { %1427 = vmatpush1.msra.mxu0 %v5132_v22  ;;  %7986 = vst [vmem:[#allocation111_spill] sm:$0xff] %v5147_v23  ;;  %v5150_v22 = vld [vmem:[#allocation3 + $0x160] sm:$0xff] }
 0x338   :  { %1428 = vmatprep.subr.mxu0 %v5135_v18  ;;  %7987 = vst [vmem:[#allocation113_spill] sm:$0xff] %v5150_v22  ;;  %v5153_v18 = vld [vmem:[#allocation3 + $0x138] sm:$0xff] }
 0x339   :  { %1429 = vmatpush1.msra.mxu0 %v5138_v15  ;;  %7988 = vst [vmem:[#allocation115_spill] sm:$0xff] %v5153_v18  ;;  %v5156_v15 = vld [vmem:[#allocation3 + $0x130] sm:$0xff] }
 0x33a   :  { %1430 = vmatprep.subr.mxu0 %v5141_v27  ;;  %7989 = vst [vmem:[#allocation117_spill] sm:$0xff] %v5156_v15  ;;  %v5159_v27 = vld [vmem:[#allocation3 + $0x108] sm:$0xff] }
 0x33b   :  { %1431 = vmatpush1.msra.mxu0 %v5144_v37  ;;  %7990 = vst [vmem:[#allocation119_spill] sm:$0xff] %v5159_v27  ;;  %v5162_v37 = vld [vmem:[#allocation3 + $0x100] sm:$0xff] }
 0x33c   :  { %1432 = vmatprep.subr.mxu0 %v5147_v23  ;;  %7991 = vst [vmem:[#allocation121_spill] sm:$0xff] %v5162_v37  ;;  %v5165_v23 = vld [vmem:[#allocation3 + $0xd8] sm:$0xff] }
 0x33d   :  { %1433 = vmatpush1.msra.mxu0 %v5150_v22  ;;  %7992 = vst [vmem:[#allocation123_spill] sm:$0xff] %v5165_v23  ;;  %v5168_v22 = vld [vmem:[#allocation3 + $0xd0] sm:$0xff] }
 0x33e   :  { %1434 = vmatprep.subr.mxu0 %v5153_v18  ;;  %7993 = vst [vmem:[#allocation125_spill] sm:$0xff] %v5168_v22  ;;  %v5171_v18 = vld [vmem:[#allocation3 + $0xa8] sm:$0xff] }
 0x33f   :  { %1435 = vmatpush1.msra.mxu0 %v5156_v15  ;;  %7994 = vst [vmem:[#allocation127_spill] sm:$0xff] %v5171_v18  ;;  %v5174_v15 = vld [vmem:[#allocation3 + $0xa0] sm:$0xff] }
 0x340   :  { %1436 = vmatprep.subr.mxu0 %v5159_v27  ;;  %7995 = vst [vmem:[#allocation129_spill] sm:$0xff] %v5174_v15  ;;  %v5177_v27 = vld [vmem:[#allocation3 + $0x78] sm:$0xff] }
 0x341   :  { %1437 = vmatpush1.msra.mxu0 %v5162_v37  ;;  %7996 = vst [vmem:[#allocation131_spill] sm:$0xff] %v5177_v27  ;;  %v5180_v37 = vld [vmem:[#allocation3 + $0x70] sm:$0xff] }
 0x342   :  { %1438 = vmatprep.subr.mxu0 %v5165_v23  ;;  %7997 = vst [vmem:[#allocation134_spill] sm:$0xff] %v5180_v37  ;;  %v5183_v23 = vld [vmem:[#allocation3 + $0x48] sm:$0xff] }
 0x343   :  { %1439 = vmatpush1.msra.mxu0 %v5168_v22  ;;  %7998 = vst [vmem:[#allocation136_spill] sm:$0xff] %v5183_v23  ;;  %v5186_v22 = vld [vmem:[#allocation3 + $0x40] sm:$0xff] }
 0x344   :  { %1440 = vmatprep.subr.mxu0 %v5171_v18  ;;  %7999 = vst [vmem:[#allocation138_spill] sm:$0xff] %v5186_v22  ;;  %v5189_v18 = vld [vmem:[#allocation3 + $0x18] sm:$0xff] }
 0x345   :  { %1441 = vmatpush1.msra.mxu0 %v5174_v15  ;;  %8000 = vst [vmem:[#allocation140_spill] sm:$0xff] %v5189_v18  ;;  %v5192_v15 = vld [vmem:[#allocation3 + $0x10] sm:$0xff] }
 0x346   :  { %1442 = vmatprep.subr.mxu0 %v5177_v27  ;;  %8001 = vst [vmem:[#allocation142_spill] sm:$0xff] %v5192_v15  ;;  %v5195_v27 = vld [vmem:[#allocation3 + $0x5e8] sm:$0xff] }
 0x347   :  { %1443 = vmatpush1.msra.mxu0 %v5180_v37  ;;  %8002 = vst [vmem:[#allocation23_spill] sm:$0xff] %v5195_v27  ;;  %v5198_v37 = vld [vmem:[#allocation3 + $0x5e0] sm:$0xff] }
 0x348   :  { %1444 = vmatprep.subr.mxu0 %v5183_v23  ;;  %8003 = vst [vmem:[#allocation25_spill] sm:$0xff] %v5198_v37  ;;  %v5201_v23 = vld [vmem:[#allocation3 + $0x5b8] sm:$0xff] }
 0x349   :  { %1445 = vmatpush1.msra.mxu0 %v5186_v22  ;;  %8004 = vst [vmem:[#allocation24_spill] sm:$0xff] %v5201_v23  ;;  %v5204_v22 = vld [vmem:[#allocation3 + $0x5b0] sm:$0xff] }
 0x34a   :  { %1446 = vmatprep.subr.mxu0 %v5189_v18  ;;  %8005 = vst [vmem:[#allocation26_spill] sm:$0xff] %v5204_v22  ;;  %v5207_v18 = vld [vmem:[#allocation3 + $0x588] sm:$0xff] }
 0x34b   :  { %1447 = vmatpush1.msra.mxu0 %v5192_v15  ;;  %8006 = vst [vmem:[#allocation22_spill] sm:$0xff] %v5207_v18  ;;  %v5210_v15 = vld [vmem:[#allocation3 + $0x580] sm:$0xff] }
 0x34c   :  { %1448 = vmatprep.subr.mxu0 %v5195_v27  ;;  %8007 = vst [vmem:[#allocation55_spill] sm:$0xff] %v5210_v15  ;;  %v5213_v27 = vld [vmem:[#allocation3 + $0x558] sm:$0xff] }
 0x34d   :  { %1449 = vmatpush2.msra.mxu0 %v5198_v37  ;;  %8008 = vst [vmem:[#allocation56_spill] sm:$0xff] %v5213_v27  ;;  %v5216_v37 = vld [vmem:[#allocation3 + $0x550] sm:$0xff] }
 0x34e   :  { %1450 = vmatprep.subr.mxu0 %v5201_v23  ;;  %8009 = vst [vmem:[#allocation133_spill] sm:$0xff] %v5216_v37  ;;  %v5219_v23 = vld [vmem:[#allocation3 + $0x528] sm:$0xff] }
 0x34f   :  { %1451 = vmatpush2.msra.mxu0 %v5204_v22  ;;  %8010 = vst [vmem:[#allocation135_spill] sm:$0xff] %v5219_v23  ;;  %v5222_v22 = vld [vmem:[#allocation3 + $0x520] sm:$0xff] }
 0x350   :  { %1452 = vmatprep.subr.mxu0 %v5207_v18  ;;  %8011 = vst [vmem:[#allocation137_spill] sm:$0xff] %v5222_v22  ;;  %v5225_v18 = vld [vmem:[#allocation3 + $0x4f8] sm:$0xff] }
 0x351   :  { %1453 = vmatpush2.msra.mxu0 %v5210_v15  ;;  %8012 = vst [vmem:[#allocation139_spill] sm:$0xff] %v5225_v18  ;;  %v5228_v15 = vld [vmem:[#allocation3 + $0x4f0] sm:$0xff] }
 0x352   :  { %1454 = vmatprep.subr.mxu0 %v5213_v27  ;;  %8013 = vst [vmem:[#allocation141_spill] sm:$0xff] %v5228_v15  ;;  %v5231_v27 = vld [vmem:[#allocation3 + $0x4c8] sm:$0xff] }
 0x353   :  { %1455 = vmatpush2.msra.mxu0 %v5216_v37  ;;  %8014 = vst [vmem:[#allocation143_spill] sm:$0xff] %v5231_v27  ;;  %v5234_v37 = vld [vmem:[#allocation3 + $0x4c0] sm:$0xff] }
 0x354   :  { %1456 = vmatprep.subr.mxu0 %v5219_v23  ;;  %8015 = vst [vmem:[#allocation145_spill] sm:$0xff] %v5234_v37  ;;  %v5237_v23 = vld [vmem:[#allocation3 + $0x498] sm:$0xff] }
 0x355   :  { %1457 = vmatpush2.msra.mxu0 %v5222_v22  ;;  %8016 = vst [vmem:[#allocation147_spill] sm:$0xff] %v5237_v23  ;;  %v5240_v22 = vld [vmem:[#allocation3 + $0x490] sm:$0xff] }
 0x356   :  { %1458 = vmatprep.subr.mxu0 %v5225_v18  ;;  %8017 = vst [vmem:[#allocation149_spill] sm:$0xff] %v5240_v22  ;;  %v5243_v18 = vld [vmem:[#allocation3 + $0x468] sm:$0xff] }
 0x357   :  { %1459 = vmatpush2.msra.mxu0 %v5228_v15  ;;  %8018 = vst [vmem:[#allocation151_spill] sm:$0xff] %v5243_v18  ;;  %v5246_v15 = vld [vmem:[#allocation3 + $0x460] sm:$0xff] }
 0x358   :  { %1460 = vmatprep.subr.mxu0 %v5231_v27  ;;  %8019 = vst [vmem:[#allocation153_spill] sm:$0xff] %v5246_v15  ;;  %v5249_v27 = vld [vmem:[#allocation3 + $0x438] sm:$0xff] }
 0x359   :  { %1461 = vmatpush2.msra.mxu0 %v5234_v37  ;;  %8020 = vst [vmem:[#allocation155_spill] sm:$0xff] %v5249_v27  ;;  %v5252_v37 = vld [vmem:[#allocation3 + $0x430] sm:$0xff] }
 0x35a   :  { %1462 = vmatprep.subr.mxu0 %v5237_v23  ;;  %8021 = vst [vmem:[#allocation157_spill] sm:$0xff] %v5252_v37  ;;  %v5255_v23 = vld [vmem:[#allocation3 + $0x408] sm:$0xff] }
 0x35b   :  { %1463 = vmatpush2.msra.mxu0 %v5240_v22  ;;  %8022 = vst [vmem:[#allocation159_spill] sm:$0xff] %v5255_v23  ;;  %v5258_v22 = vld [vmem:[#allocation3 + $0x400] sm:$0xff] }
 0x35c   :  { %1464 = vmatprep.subr.mxu0 %v5243_v18  ;;  %8023 = vst [vmem:[#allocation161_spill] sm:$0xff] %v5258_v22  ;;  %v8024_v18 = vld [vmem:[#allocation144_spill] sm:$0xff] }
 0x35d   :  { %1465 = vmatpush2.msra.mxu0 %v5246_v15  ;;  %v8026_v15 = vld [vmem:[#allocation148_spill] sm:$0xff] }
 0x35e   :  { %1466 = vmatprep.subr.mxu0 %v5249_v27  ;;  %v8028_v27 = vld [vmem:[#allocation152_spill] sm:$0xff] }
 0x35f   :  { %1467 = vmatpush2.msra.mxu0 %v5252_v37  ;;  %v8030_v37 = vld [vmem:[#allocation156_spill] sm:$0xff] }
 0x360   :  { %1468 = vmatprep.subr.mxu0 %v5255_v23  ;;  %v8032_v23 = vld [vmem:[#allocation160_spill] sm:$0xff] }
 0x361   :  { %1469 = vmatpush2.msra.mxu0 %v5258_v22  ;;  %v8034_v22 = vld [vmem:[#allocation100_spill] sm:$0xff] }
 0x362   :  { %1470 = vmatprep.subr.mxu0 %v8024_v18 }
 0x363   :  { %1471 = vmatpush2.msra.mxu0 %v8025_v29 }
 0x364   :  { %1472 = vmatprep.subr.mxu0 %v8026_v15 }
 0x365   :  { %1473 = vmatpush2.msra.mxu0 %v8027_v16 }
 0x366   :  { %1474 = vmatprep.subr.mxu0 %v8028_v27 }
 0x367   :  { %1475 = vmatpush2.msra.mxu0 %v8029_v38 }
 0x368   :  { %1476 = vmatprep.subr.mxu0 %v8030_v37 }
 0x369   :  { %1477 = vmatpush2.msra.mxu0 %v8031_v8 }
 0x36a   :  { %1478 = vmatprep.subr.mxu0 %v8032_v23 }
 0x36b   :  { %1479 = vmatpush2.msra.mxu0 %v8033_v14 }
 0x36c   :  { %1611 = vmatprep.subr.mxu0 %v8034_v22 }
 0x3ac   :  { %v1145_v18 = vpop.f32.mrf.mxu0  ;;  %v1216_v38 = vpop.f32.mrf.mxu1 }
 0x3ad   :  { %v1292_v15 = vadd.f32 %v1145_v18, %v8035_v40  ;;  %v1294_v8 = vadd.f32 %v1216_v38, %v8037_v45 }
 0x3ae   :  { %v1147_v29 = vpop.f32.mrf.mxu0  ;;  %v1218_v37 = vpop.f32.mrf.mxu1 }
 0x3af   :  { %v1293_v16 = vadd.f32 %v1147_v29, %v8036_v19  ;;  %v3115_v42 = vmul.f32 -1.442695, %v1292_v15  ;;  %v1295_v23 = vadd.f32 %v1218_v37, %v8038_v28  ;;  %v3117_v46 = vmul.f32 -1.442695, %v1294_v8 }
 0x3b1   :  { %v3116_v27 = vmul.f32 -1.442695, %v1293_v16  ;;  %3212 = vpow2.f32 %v3115_v42  ;;  %v3118_v14 = vmul.f32 -1.442695, %v1295_v23  ;;  %v8039_v16 = vld [vmem:[#allocation21_spill] sm:$0xff] }
 0x3b3   :  { %3214 = vpow2.f32 %v3116_v27 }
 0x3b4   :  { %3216 = vpow2.f32 %v3117_v46 }
 0x3b5   :  { %3218 = vpow2.f32 %v3118_v14 }
 0x3be   :  { %v3213_v30 = vpop.eup %3212 }
 0x3bf   :  { %v1308_v31 = vadd.f32 1.0, %v3213_v30  ;;  %v8040_v30 = vld [vmem:[#allocation57_spill] sm:$0xff] }
 0x3c0   :  { %v3215_v22 = vpop.eup %3214 }
 0x3c1   :  { %v1309_v40 = vadd.f32 1.0, %v3215_v22  ;;  %3220 = vrcp.f32 %v1308_v31  ;;  %v3217_v19 = vpop.eup %3216  ;;  %v8041_v31 = vld [vmem:[#allocation58_spill] sm:$0xff] }
 0x3c2   :  { %v3219_v18 = vpop.eup %3218  ;;  %v1310_v42 = vadd.f32 1.0, %v3217_v19 }
 0x3c3   :  { %3222 = vrcp.f32 %v1309_v40  ;;  %v1311_v15 = vadd.f32 1.0, %v3219_v18 }
 0x3c4   :  { %3224 = vrcp.f32 %v1310_v42 }
 0x3c5   :  { %3226 = vrcp.f32 %v1311_v15 }
 0x3ce   :  { %v3221_v45 = vpop.eup %3220 }
 0x3d0   :  { %v3223_v8 = vpop.eup %3222 }
 0x3d1   :  { %v3225_v14 = vpop.eup %3224 }
 0x3d2   :  { %v3227_v40 = vpop.eup %3226  ;;  %v1328_v18 = vsub.f32 1.0, %v3225_v14  ;;  %v1332_v42 = vmul.f32 %v3225_v14, %v4866_v20  ;;  %v5298_v20 = vld [vmem:[#allocation3 + $0x2c0] sm:$0xff] }
 0x3d3   :  { %v8042_v14 = vld [vmem:[#allocation71_spill] sm:$0xff] }
 0x3ec   :  { %v1287_v29 = vpop.f32.mrf.mxu0 }
 0x3ed   :  { %v1320_v27 = vadd.f32 %v1287_v29, %v8039_v16  ;;  %v1329_v29 = vsub.f32 1.0, %v3227_v40 }
 0x3ee   :  { %v1289_v38 = vpop.f32.mrf.mxu0 }
 0x3ef   :  { %v1322_v28 = vmul.f32 %v3221_v45, %v1320_v27  ;;  %v1321_v37 = vadd.f32 %v1289_v38, %v7908_v41  ;;  %v1333_v45 = vmul.f32 %v3227_v40, %v4864_v17  ;;  %v5294_v17 = vld [vmem:[#allocation3 + $0x2c8] sm:$0xff]  ;;  %v5338_v40 = vld [vmem:[#allocation3 + $0x1d0] sm:$0xff] }
 0x3f1   :  { %v1324_v46 = vadd.f32 %v1322_v28, %v8040_v30  ;;  %v1323_v22 = vmul.f32 %v3223_v8, %v1321_v37  ;;  %v5290_v28 = vld [vmem:[#allocation3 + $0x2f0] sm:$0xff]  ;;  %v5310_v37 = vld [vmem:[#allocation3 + $0x268] sm:$0xff]  ;;  %v5314_v8 = vld [vmem:[#allocation3 + $0x260] sm:$0xff] }
 0x3f2   :  { %v5318_v30 = vld [vmem:[#allocation3 + $0x238] sm:$0xff] }
 0x3f3   :  { %3228 = vtanh.f32 %v1324_v46  ;;  %v1325_v23 = vadd.f32 %v1323_v22, %v8041_v31  ;;  %v5322_v46 = vld [vmem:[#allocation3 + $0x230] sm:$0xff]  ;;  %v5326_v22 = vld [vmem:[#allocation3 + $0x208] sm:$0xff]  ;;  %v5330_v31 = vld [vmem:[#allocation3 + $0x200] sm:$0xff] }
 0x3f5   :  { %3230 = vtanh.f32 %v1325_v23  ;;  %v5334_v23 = vld [vmem:[#allocation3 + $0x1d8] sm:$0xff] }
 0x400   :  { %v3229_v19 = vpop.eup %3228 }
 0x401   :  { %v1330_v33 = vmul.f32 %v3229_v19, %v1328_v18  ;;  %v8043_v19 = vld [vmem:[#allocation102_spill] sm:$0xff]  ;;  %v5342_v18 = vld [vmem:[#allocation3 + $0x1a8] sm:$0xff] }
 0x402   :  { %v3231_v16 = vpop.eup %3230 }
 0x403   :  { %v1331_v27 = vmul.f32 %v3231_v16, %v1329_v29  ;;  %v5284_v38 = vadd.f32 %v1332_v42, %v1330_v33  ;;  %v5302_v33 = vld [vmem:[#allocation3 + $0x298] sm:$0xff]  ;;  %v5306_v16 = vld [vmem:[#allocation3 + $0x290] sm:$0xff]  ;;  %v5346_v29 = vld [vmem:[#allocation3 + $0x1a0] sm:$0xff] }
 0x404   :  { %8044 = vst [vmem:[#allocation163_spill] sm:$0xff] %v5346_v29  ;;  %v5358_v42 = vld [vmem:[#allocation3 + $0x148] sm:$0xff] }
 0x405   :  { %v5282_v15 = vadd.f32 %v1333_v45, %v1331_v27  ;;  %v5350_v27 = vld [vmem:[#allocation3 + $0x178] sm:$0xff]  ;;  %v5354_v45 = vld [vmem:[#allocation3 + $0x170] sm:$0xff]  ;;  %8047 = vst [vmem:[#allocation114_spill] sm:$0xff] %v5358_v42 }
 0x406   :  { %8045 = vst [vmem:[#allocation164_spill] sm:$0xff] %v5350_v27  ;;  %8046 = vst [vmem:[#allocation165_spill] sm:$0xff] %v5354_v45 }
 0x407   :  { %1409 = vmatprep.mubr.f32.mxu1 %v5282_v15  ;;  %1480 = vmatprep.mubr.f32.mxu0 %v5282_v15 }
 0x408   :  { %1410 = vmatmul.mubr.f32.vlgmr.msra.gmra.mxu1 %v5284_v38  ;;  %1481 = vmatmul.mubr.f32.vlgmr.msra.gmra.mxu0 %v5284_v38 }
 0x409   :  { %1488 = vmatpush1.msra.mxu1 %v5290_v28  ;;  %1551 = vmatprep.mubr.f32.mxu1 %v5282_v15 }
 0x40a   :  { %1489 = vmatprep.subr.mxu1 %v5294_v17  ;;  %1612 = vmatpush1.msra.mxu0 %v4875_v3 }
 0x40b   :  { %1490 = vmatpush1.msra.mxu1 %v5298_v20  ;;  %1613 = vmatprep.subr.mxu0 %v4879_v47 }
 0x40c   :  { %1491 = vmatprep.subr.mxu1 %v5302_v33  ;;  %1614 = vmatpush1.msra.mxu0 %v4883_v4 }
 0x40d   :  { %1492 = vmatpush1.msra.mxu1 %v5306_v16  ;;  %1615 = vmatprep.subr.mxu0 %v4887_v7 }
 0x40e   :  { %1493 = vmatprep.subr.mxu1 %v5310_v37  ;;  %1616 = vmatpush1.msra.mxu0 %v4891_v35 }
 0x40f   :  { %1494 = vmatpush1.msra.mxu1 %v5314_v8  ;;  %1617 = vmatprep.subr.mxu0 %v4895_v0 }
 0x410   :  { %1495 = vmatprep.subr.mxu1 %v5318_v30  ;;  %1618 = vmatpush1.msra.mxu0 %v4899_v12 }
 0x411   :  { %1496 = vmatpush1.msra.mxu1 %v5322_v46  ;;  %1619 = vmatprep.subr.mxu0 %v4903_v43 }
 0x412   :  { %1497 = vmatprep.subr.mxu1 %v5326_v22  ;;  %1620 = vmatpush1.msra.mxu0 %v4907_v60 }
 0x413   :  { %1498 = vmatpush1.msra.mxu1 %v5330_v31  ;;  %1621 = vmatprep.subr.mxu0 %v4911_v11 }
 0x414   :  { %1499 = vmatprep.subr.mxu1 %v5334_v23  ;;  %1622 = vmatpush1.msra.mxu0 %v8042_v14 }
 0x415   :  { %1500 = vmatpush1.msra.mxu1 %v5338_v40  ;;  %1623 = vmatprep.subr.mxu0 %v8043_v19 }
 0x416   :  { %1501 = vmatprep.subr.mxu1 %v5342_v18  ;;  %1624 = vmatpush1.msra.mxu0 %v4923_v34 }
 0x417   :  { %1502 = vmatpush1.msra.mxu1 %v5346_v29  ;;  %1625 = vmatprep.subr.mxu0 %v4927_v61  ;;  %v5362_v29 = vld [vmem:[#allocation3 + $0x140] sm:$0xff] }
 0x418   :  { %1503 = vmatprep.subr.mxu1 %v5350_v27  ;;  %1626 = vmatpush1.msra.mxu0 %v4931_v36  ;;  %8048 = vst [vmem:[#allocation166_spill] sm:$0xff] %v5362_v29  ;;  %v5366_v27 = vld [vmem:[#allocation3 + $0x118] sm:$0xff] }
 0x419   :  { %1504 = vmatpush1.msra.mxu1 %v5354_v45  ;;  %1627 = vmatprep.subr.mxu0 %v4935_v32  ;;  %8049 = vst [vmem:[#allocation116_spill] sm:$0xff] %v5366_v27  ;;  %v5370_v45 = vld [vmem:[#allocation3 + $0x110] sm:$0xff] }
 0x41a   :  { %1505 = vmatprep.subr.mxu1 %v5358_v42  ;;  %1628 = vmatpush1.msra.mxu0 %v4939_v6  ;;  %8050 = vst [vmem:[#allocation167_spill] sm:$0xff] %v5370_v45  ;;  %v5374_v42 = vld [vmem:[#allocation3 + $0xe8] sm:$0xff] }
 0x41b   :  { %1506 = vmatpush1.msra.mxu1 %v5362_v29  ;;  %1629 = vmatprep.subr.mxu0 %v4943_v5  ;;  %8051 = vst [vmem:[#allocation118_spill] sm:$0xff] %v5374_v42  ;;  %v5378_v29 = vld [vmem:[#allocation3 + $0xe0] sm:$0xff] }
 0x41c   :  { %1507 = vmatprep.subr.mxu1 %v5366_v27  ;;  %1630 = vmatpush1.msra.mxu0 %v4947_v9  ;;  %8052 = vst [vmem:[#allocation168_spill] sm:$0xff] %v5378_v29  ;;  %v5382_v27 = vld [vmem:[#allocation3 + $0xb8] sm:$0xff] }
 0x41d   :  { %1508 = vmatpush1.msra.mxu1 %v5370_v45  ;;  %1631 = vmatprep.subr.mxu0 %v4951_v10  ;;  %8053 = vst [vmem:[#allocation120_spill] sm:$0xff] %v5382_v27  ;;  %v5386_v45 = vld [vmem:[#allocation3 + $0xb0] sm:$0xff] }
 0x41e   :  { %1509 = vmatprep.subr.mxu1 %v5374_v42  ;;  %1632 = vmatpush1.msra.mxu0 %v4955_v26  ;;  %8054 = vst [vmem:[#allocation169_spill] sm:$0xff] %v5386_v45  ;;  %v5390_v42 = vld [vmem:[#allocation3 + $0x88] sm:$0xff] }
 0x41f   :  { %1510 = vmatpush1.msra.mxu1 %v5378_v29  ;;  %1633 = vmatprep.subr.mxu0 %v4959_v21  ;;  %8055 = vst [vmem:[#allocation122_spill] sm:$0xff] %v5390_v42  ;;  %v5394_v29 = vld [vmem:[#allocation3 + $0x80] sm:$0xff] }
 0x420   :  { %1511 = vmatprep.subr.mxu1 %v5382_v27  ;;  %1634 = vmatpush1.msra.mxu0 %v4963_v39  ;;  %8056 = vst [vmem:[#allocation170_spill] sm:$0xff] %v5394_v29  ;;  %v5398_v27 = vld [vmem:[#allocation3 + $0x58] sm:$0xff] }
 0x421   :  { %1512 = vmatpush1.msra.mxu1 %v5386_v45  ;;  %1635 = vmatprep.subr.mxu0 %v4967_v24  ;;  %8057 = vst [vmem:[#allocation124_spill] sm:$0xff] %v5398_v27  ;;  %v5402_v45 = vld [vmem:[#allocation3 + $0x50] sm:$0xff] }
 0x422   :  { %1513 = vmatprep.subr.mxu1 %v5390_v42  ;;  %1636 = vmatpush1.msra.mxu0 %v4971_v25  ;;  %8058 = vst [vmem:[#allocation171_spill] sm:$0xff] %v5402_v45  ;;  %v5406_v42 = vld [vmem:[#allocation3 + $0x28] sm:$0xff] }
 0x423   :  { %1514 = vmatpush1.msra.mxu1 %v5394_v29  ;;  %1637 = vmatprep.subr.mxu0 %v4975_v44  ;;  %8059 = vst [vmem:[#allocation126_spill] sm:$0xff] %v5406_v42  ;;  %v5410_v29 = vld [vmem:[#allocation3 + $0x20] sm:$0xff] }
 0x424   :  { %1515 = vmatprep.subr.mxu1 %v5398_v27  ;;  %1638 = vmatpush1.msra.mxu0 %v4979_v13  ;;  %8060 = vst [vmem:[#allocation172_spill] sm:$0xff] %v5410_v29  ;;  %v5414_v27 = vld [vmem:[#allocation3 + $0x5f8] sm:$0xff] }
 0x425   :  { %1516 = vmatpush1.msra.mxu1 %v5402_v45  ;;  %1639 = vmatprep.subr.mxu0 %v4983_v50  ;;  %8061 = vst [vmem:[#allocation128_spill] sm:$0xff] %v5414_v27  ;;  %v5418_v45 = vld [vmem:[#allocation3 + $0x5f0] sm:$0xff] }
 0x426   :  { %1517 = vmatprep.subr.mxu1 %v5406_v42  ;;  %1640 = vmatpush1.msra.mxu0 %v4987_v51  ;;  %8062 = vst [vmem:[#allocation130_spill] sm:$0xff] %v5418_v45  ;;  %v5422_v42 = vld [vmem:[#allocation3 + $0x5c8] sm:$0xff] }
 0x427   :  { %1518 = vmatpush1.msra.mxu1 %v5410_v29  ;;  %1641 = vmatprep.subr.mxu0 %v4991_v52  ;;  %8063 = vst [vmem:[#allocation132_spill] sm:$0xff] %v5422_v42  ;;  %v5426_v29 = vld [vmem:[#allocation3 + $0x5c0] sm:$0xff] }
 0x428   :  { %1519 = vmatprep.subr.mxu1 %v5414_v27  ;;  %1642 = vmatpush1.msra.mxu0 %v4995_v53  ;;  %8064 = vst [vmem:[#allocation144_spill] sm:$0xff] %v5426_v29  ;;  %v5430_v27 = vld [vmem:[#allocation3 + $0x598] sm:$0xff] }
 0x429   :  { %1520 = vmatpush2.msra.mxu1 %v5418_v45  ;;  %1643 = vmatprep.subr.mxu0 %v4999_v54  ;;  %8065 = vst [vmem:[#allocation146_spill] sm:$0xff] %v5430_v27  ;;  %v5434_v45 = vld [vmem:[#allocation3 + $0x590] sm:$0xff] }
 0x42a   :  { %1521 = vmatprep.subr.mxu1 %v5422_v42  ;;  %1644 = vmatpush2.msra.mxu0 %v5003_v55  ;;  %8066 = vst [vmem:[#allocation148_spill] sm:$0xff] %v5434_v45  ;;  %v5438_v42 = vld [vmem:[#allocation3 + $0x568] sm:$0xff]  ;;  %v8182_v55 = vld [vmem:[#allocation34_spill] sm:$0xff] }
 0x42b   :  { %1522 = vmatpush2.msra.mxu1 %v5426_v29  ;;  %1645 = vmatprep.subr.mxu0 %v5007_v56  ;;  %8067 = vst [vmem:[#allocation150_spill] sm:$0xff] %v5438_v42  ;;  %v5442_v29 = vld [vmem:[#allocation3 + $0x560] sm:$0xff]  ;;  %v8181_v56 = vld [vmem:[#allocation32_spill] sm:$0xff] }
 0x42c   :  { %1523 = vmatprep.subr.mxu1 %v5430_v27  ;;  %1646 = vmatpush2.msra.mxu0 %v5011_v57  ;;  %8068 = vst [vmem:[#allocation152_spill] sm:$0xff] %v5442_v29  ;;  %v5446_v27 = vld [vmem:[#allocation3 + $0x538] sm:$0xff] }
 0x42d   :  { %1524 = vmatpush2.msra.mxu1 %v5434_v45  ;;  %1647 = vmatprep.subr.mxu0 %v5015_v58  ;;  %8069 = vst [vmem:[#allocation154_spill] sm:$0xff] %v5446_v27  ;;  %v5450_v45 = vld [vmem:[#allocation3 + $0x530] sm:$0xff] }
 0x42e   :  { %1525 = vmatprep.subr.mxu1 %v5438_v42  ;;  %1648 = vmatpush2.msra.mxu0 %v5019_v59  ;;  %8070 = vst [vmem:[#allocation156_spill] sm:$0xff] %v5450_v45  ;;  %v5454_v42 = vld [vmem:[#allocation3 + $0x508] sm:$0xff]  ;;  %v8126_v59 = vld [vmem:[#allocation103_spill] sm:$0xff] }
 0x42f   :  { %1526 = vmatpush2.msra.mxu1 %v5442_v29  ;;  %1649 = vmatprep.subr.mxu0 %v5023_v62  ;;  %8071 = vst [vmem:[#allocation158_spill] sm:$0xff] %v5454_v42  ;;  %v5458_v29 = vld [vmem:[#allocation3 + $0x500] sm:$0xff]  ;;  %v8123_v62 = vld [vmem:[#allocation98_spill] sm:$0xff] }
 0x430   :  { %1527 = vmatprep.subr.mxu1 %v5446_v27  ;;  %1650 = vmatpush2.msra.mxu0 %v5027_v63  ;;  %8072 = vst [vmem:[#allocation160_spill] sm:$0xff] %v5458_v29  ;;  %v5462_v27 = vld [vmem:[#allocation3 + $0x4d8] sm:$0xff]  ;;  %v8120_v63 = vld [vmem:[#allocation95_spill] sm:$0xff] }
 0x431   :  { %1528 = vmatpush2.msra.mxu1 %v5450_v45  ;;  %1651 = vmatprep.subr.mxu0 %v5031_v1  ;;  %8073 = vst [vmem:[#allocation162_spill] sm:$0xff] %v5462_v27  ;;  %v5466_v45 = vld [vmem:[#allocation3 + $0x4d0] sm:$0xff]  ;;  %v8075_v1 = vld [vmem:[#allocation83_spill] sm:$0xff] }
 0x432   :  { %1529 = vmatprep.subr.mxu1 %v5454_v42  ;;  %1652 = vmatpush2.msra.mxu0 %v5035_v2  ;;  %8074 = vst [vmem:[#allocation27_spill] sm:$0xff] %v5466_v45  ;;  %v5470_v42 = vld [vmem:[#allocation3 + $0x4a8] sm:$0xff] }
 0x433   :  { %1530 = vmatpush2.msra.mxu1 %v5458_v29  ;;  %1653 = vmatprep.subr.mxu0 %v5039_v49  ;;  %8076 = vst [vmem:[#allocation29_spill] sm:$0xff] %v5470_v42  ;;  %v8077_v2 = vld [vmem:[#allocation84_spill] sm:$0xff]  ;;  %v5474_v29 = vld [vmem:[#allocation3 + $0x4a0] sm:$0xff]  ;;  %v8079_v49 = vld [vmem:[#allocation85_spill] sm:$0xff] }
 0x434   :  { %1531 = vmatprep.subr.mxu1 %v5462_v27  ;;  %1654 = vmatpush2.msra.mxu0 %v5043_v48  ;;  %8078 = vst [vmem:[#allocation28_spill] sm:$0xff] %v5474_v29  ;;  %v5478_v27 = vld [vmem:[#allocation3 + $0x478] sm:$0xff] }
 0x435   :  { %1532 = vmatpush2.msra.mxu1 %v5466_v45  ;;  %1655 = vmatprep.subr.mxu0 %v8075_v1  ;;  %8080 = vst [vmem:[#allocation30_spill] sm:$0xff] %v5478_v27  ;;  %v8081_v48 = vld [vmem:[#allocation86_spill] sm:$0xff]  ;;  %v5482_v45 = vld [vmem:[#allocation3 + $0x470] sm:$0xff]  ;;  %v8083_v1 = vld [vmem:[#allocation87_spill] sm:$0xff] }
 0x436   :  { %1533 = vmatprep.subr.mxu1 %v5470_v42  ;;  %1656 = vmatpush2.msra.mxu0 %v8077_v2  ;;  %8082 = vst [vmem:[#allocation57_spill] sm:$0xff] %v5482_v45  ;;  %v5486_v42 = vld [vmem:[#allocation3 + $0x448] sm:$0xff] }
 0x437   :  { %1534 = vmatpush2.msra.mxu1 %v5474_v29  ;;  %1657 = vmatprep.subr.mxu0 %v8079_v49  ;;  %8084 = vst [vmem:[#allocation58_spill] sm:$0xff] %v5486_v42  ;;  %v8085_v2 = vld [vmem:[#allocation88_spill] sm:$0xff]  ;;  %v5490_v29 = vld [vmem:[#allocation3 + $0x440] sm:$0xff] }
 0x438   :  { %1535 = vmatprep.subr.mxu1 %v5478_v27  ;;  %1658 = vmatpush2.msra.mxu0 %v8081_v48  ;;  %8086 = vst [vmem:[#allocation71_spill] sm:$0xff] %v5490_v29  ;;  %v5493_v49 = vld [vmem:[#allocation3 + $0x428] sm:$0xff]  ;;  %v5496_v48 = vld [vmem:[#allocation3 + $0x418] sm:$0xff]  ;;  %v8118_v27 = vld [vmem:[#allocation93_spill] sm:$0xff] }
 0x439   :  { %1536 = vmatpush2.msra.mxu1 %v5482_v45  ;;  %1659 = vmatprep.subr.mxu0 %v8083_v1  ;;  %8087 = vst [vmem:[#allocation102_spill] sm:$0xff] %v5493_v49  ;;  %8088 = vst [vmem:[#allocation173_spill] sm:$0xff] %v5496_v48  ;;  %v5499_v45 = vld [vmem:[#allocation3 + $0x420] sm:$0xff]  ;;  %v5502_v1 = vld [vmem:[#allocation3 + $0x410] sm:$0xff] }
 0x43a   :  { %1537 = vmatprep.subr.mxu1 %v5486_v42  ;;  %1660 = vmatpush2.msra.mxu0 %v8085_v2  ;;  %8089 = vst [vmem:[#allocation174_spill] sm:$0xff] %v5499_v45  ;;  %8090 = vst [vmem:[#allocation175_spill] sm:$0xff] %v5502_v1  ;;  %v5505_v2 = vld [vmem:[#allocation3 + $0x3f8] sm:$0xff]  ;;  %v5571_v42 = vld [vmem:[#allocation3 + $0x300] sm:$0xff] }
 0x43b   :  { %1538 = vmatpush2.msra.mxu1 %v5490_v29  ;;  %1661 = vmatprep.subr.mxu0 %v5493_v49  ;;  %8091 = vst [vmem:[#allocation176_spill] sm:$0xff] %v5505_v2  ;;  %v5508_v29 = vld [vmem:[#allocation3 + $0x3e8] sm:$0xff]  ;;  %v5511_v49 = vld [vmem:[#allocation3 + $0x3f0] sm:$0xff]  ;;  %8114 = vst [vmem:[#allocation197_spill] sm:$0xff] %v5571_v42 }
 0x43c   :  { %1539 = vmatprep.subr.mxu1 %v5496_v48  ;;  %1662 = vmatpush2.msra.mxu0 %v5499_v45  ;;  %8092 = vst [vmem:[#allocation177_spill] sm:$0xff] %v5508_v29  ;;  %8093 = vst [vmem:[#allocation178_spill] sm:$0xff] %v5511_v49  ;;  %v5514_v48 = vld [vmem:[#allocation3 + $0x3e0] sm:$0xff]  ;;  %v5517_v45 = vld [vmem:[#allocation3 + $0x3c8] sm:$0xff] }
 0x43d   :  { %1540 = vmatpush2.msra.mxu1 %v5502_v1  ;;  %1663 = vmatprep.subr.mxu0 %v5505_v2  ;;  %8094 = vst [vmem:[#allocation179_spill] sm:$0xff] %v5514_v48  ;;  %8095 = vst [vmem:[#allocation180_spill] sm:$0xff] %v5517_v45  ;;  %v5520_v1 = vld [vmem:[#allocation3 + $0x3b8] sm:$0xff]  ;;  %v5523_v2 = vld [vmem:[#allocation3 + $0x3c0] sm:$0xff] }
 0x43e   :  { %1541 = vmatprep.subr.mxu1 %v5508_v29  ;;  %1664 = vmatpush2.msra.mxu0 %v5511_v49  ;;  %8096 = vst [vmem:[#allocation181_spill] sm:$0xff] %v5520_v1  ;;  %8097 = vst [vmem:[#allocation182_spill] sm:$0xff] %v5523_v2  ;;  %v5526_v29 = vld [vmem:[#allocation3 + $0x3b0] sm:$0xff]  ;;  %v5529_v49 = vld [vmem:[#allocation3 + $0x398] sm:$0xff] }
 0x43f   :  { %1542 = vmatpush2.msra.mxu1 %v5514_v48  ;;  %1665 = vmatprep.subr.mxu0 %v5517_v45  ;;  %8098 = vst [vmem:[#allocation183_spill] sm:$0xff] %v5526_v29  ;;  %8099 = vst [vmem:[#allocation184_spill] sm:$0xff] %v5529_v49  ;;  %v5532_v48 = vld [vmem:[#allocation3 + $0x388] sm:$0xff]  ;;  %v5535_v45 = vld [vmem:[#allocation3 + $0x390] sm:$0xff] }
 0x440   :  { %1543 = vmatprep.subr.mxu1 %v5520_v1  ;;  %1666 = vmatpush2.msra.mxu0 %v5523_v2  ;;  %8100 = vst [vmem:[#allocation185_spill] sm:$0xff] %v5532_v48  ;;  %8101 = vst [vmem:[#allocation186_spill] sm:$0xff] %v5535_v45  ;;  %v5538_v1 = vld [vmem:[#allocation3 + $0x380] sm:$0xff]  ;;  %v5541_v2 = vld [vmem:[#allocation3 + $0x368] sm:$0xff] }
 0x441   :  { %1544 = vmatpush2.msra.mxu1 %v5526_v29  ;;  %1667 = vmatprep.subr.mxu0 %v5529_v49  ;;  %8102 = vst [vmem:[#allocation187_spill] sm:$0xff] %v5538_v1  ;;  %8103 = vst [vmem:[#allocation188_spill] sm:$0xff] %v5541_v2  ;;  %v5544_v29 = vld [vmem:[#allocation3 + $0x358] sm:$0xff]  ;;  %v5547_v49 = vld [vmem:[#allocation3 + $0x360] sm:$0xff] }
 0x442   :  { %1545 = vmatprep.subr.mxu1 %v5532_v48  ;;  %1668 = vmatpush2.msra.mxu0 %v5535_v45  ;;  %8104 = vst [vmem:[#allocation189_spill] sm:$0xff] %v5544_v29  ;;  %8105 = vst [vmem:[#allocation190_spill] sm:$0xff] %v5547_v49  ;;  %v5550_v48 = vld [vmem:[#allocation3 + $0x350] sm:$0xff]  ;;  %v5553_v45 = vld [vmem:[#allocation3 + $0x338] sm:$0xff] }
 0x443   :  { %1546 = vmatpush2.msra.mxu1 %v5538_v1  ;;  %1669 = vmatprep.subr.mxu0 %v5541_v2  ;;  %8106 = vst [vmem:[#allocation191_spill] sm:$0xff] %v5550_v48  ;;  %8107 = vst [vmem:[#allocation192_spill] sm:$0xff] %v5553_v45  ;;  %v5556_v1 = vld [vmem:[#allocation3 + $0x328] sm:$0xff]  ;;  %v5559_v2 = vld [vmem:[#allocation3 + $0x330] sm:$0xff] }
 0x444   :  { %1547 = vmatprep.subr.mxu1 %v5544_v29  ;;  %1670 = vmatpush2.msra.mxu0 %v5547_v49  ;;  %8108 = vst [vmem:[#allocation193_spill] sm:$0xff] %v5556_v1  ;;  %8109 = vst [vmem:[#allocation194_spill] sm:$0xff] %v5559_v2  ;;  %v5562_v29 = vld [vmem:[#allocation3 + $0x320] sm:$0xff]  ;;  %v5565_v49 = vld [vmem:[#allocation3 + $0x308] sm:$0xff] }
 0x445   :  { %1548 = vmatpush2.msra.mxu1 %v5550_v48  ;;  %1671 = vmatprep.subr.mxu0 %v5553_v45  ;;  %8110 = vst [vmem:[#allocation195_spill] sm:$0xff] %v5562_v29  ;;  %8111 = vst [vmem:[#allocation196_spill] sm:$0xff] %v5565_v49  ;;  %v8112_v48 = vld [vmem:[#allocation89_spill] sm:$0xff]  ;;  %v8113_v45 = vld [vmem:[#allocation90_spill] sm:$0xff] }
 0x446   :  { %1549 = vmatprep.subr.mxu1 %v5556_v1  ;;  %1672 = vmatpush2.msra.mxu0 %v5559_v2  ;;  %v8115_v1 = vld [vmem:[#allocation91_spill] sm:$0xff]  ;;  %v5575_v2 = vld [vmem:[#allocation3 + $0x2f8] sm:$0xff] }
 0x447   :  { %1550 = vmatpush2.msra.mxu1 %v5562_v29  ;;  %1673 = vmatprep.subr.mxu0 %v5565_v49  ;;  %8116 = vst [vmem:[#allocation198_spill] sm:$0xff] %v5575_v2  ;;  %v8117_v29 = vld [vmem:[#allocation92_spill] sm:$0xff]  ;;  %v8119_v49 = vld [vmem:[#allocation94_spill] sm:$0xff] }
 0x448   :  { %1552 = vmatmul.mubr.f32.vlgmr.msra.gmra.mxu1 %v5284_v38  ;;  %1682 = vmatprep.subr.mxu1 %v8112_v48  ;;  %v8121_v48 = vld [vmem:[#allocation96_spill] sm:$0xff] }
 0x449   :  { %1683 = vmatpush1.msra.mxu1 %v8113_v45  ;;  %1674 = vmatpush2.msra.mxu0 %v5571_v42  ;;  %v8122_v45 = vld [vmem:[#allocation97_spill] sm:$0xff]  ;;  %v8124_v42 = vld [vmem:[#allocation99_spill] sm:$0xff] }
 0x44a   :  { %1684 = vmatprep.subr.mxu1 %v8115_v1  ;;  %1753 = vmatprep.subr.mxu0 %v5575_v2  ;;  %v8125_v1 = vld [vmem:[#allocation101_spill] sm:$0xff] }
 0x44b   :  { %1685 = vmatpush1.msra.mxu1 %v8117_v29  ;;  %v8127_v2 = vld [vmem:[#allocation105_spill] sm:$0xff]  ;;  %v8128_v29 = vld [vmem:[#allocation107_spill] sm:$0xff] }
 0x44c   :  { %1686 = vmatprep.subr.mxu1 %v8118_v27  ;;  %v8129_v27 = vld [vmem:[#allocation109_spill] sm:$0xff] }
 0x44d   :  { %1687 = vmatpush1.msra.mxu1 %v8119_v49  ;;  %v8130_v49 = vld [vmem:[#allocation111_spill] sm:$0xff] }
 0x44e   :  { %1688 = vmatprep.subr.mxu1 %v8120_v63  ;;  %v8131_v63 = vld [vmem:[#allocation113_spill] sm:$0xff] }
 0x44f   :  { %1689 = vmatpush1.msra.mxu1 %v8121_v48  ;;  %v8132_v48 = vld [vmem:[#allocation115_spill] sm:$0xff] }
 0x450   :  { %1690 = vmatprep.subr.mxu1 %v8122_v45  ;;  %v8133_v45 = vld [vmem:[#allocation117_spill] sm:$0xff] }
 0x451   :  { %1691 = vmatpush1.msra.mxu1 %v8123_v62  ;;  %v8134_v62 = vld [vmem:[#allocation119_spill] sm:$0xff] }
 0x452   :  { %1692 = vmatprep.subr.mxu1 %v8124_v42  ;;  %v8135_v42 = vld [vmem:[#allocation121_spill] sm:$0xff] }
 0x453   :  { %1693 = vmatpush1.msra.mxu1 %v8125_v1  ;;  %v8136_v1 = vld [vmem:[#allocation123_spill] sm:$0xff] }
 0x454   :  { %1694 = vmatprep.subr.mxu1 %v8126_v59  ;;  %v8137_v59 = vld [vmem:[#allocation125_spill] sm:$0xff] }
 0x455   :  { %1695 = vmatpush1.msra.mxu1 %v8127_v2  ;;  %v8138_v2 = vld [vmem:[#allocation127_spill] sm:$0xff] }
 0x456   :  { %1696 = vmatprep.subr.mxu1 %v8128_v29  ;;  %v8139_v29 = vld [vmem:[#allocation129_spill] sm:$0xff] }
 0x457   :  { %1697 = vmatpush1.msra.mxu1 %v8129_v27  ;;  %v8140_v27 = vld [vmem:[#allocation131_spill] sm:$0xff] }
 0x458   :  { %1698 = vmatprep.subr.mxu1 %v8130_v49  ;;  %v8141_v49 = vld [vmem:[#allocation134_spill] sm:$0xff] }
 0x459   :  { %1699 = vmatpush1.msra.mxu1 %v8131_v63  ;;  %v8142_v63 = vld [vmem:[#allocation136_spill] sm:$0xff] }
 0x45a   :  { %1700 = vmatprep.subr.mxu1 %v8132_v48  ;;  %v8143_v48 = vld [vmem:[#allocation138_spill] sm:$0xff] }
 0x45b   :  { %1701 = vmatpush1.msra.mxu1 %v8133_v45  ;;  %v8144_v45 = vld [vmem:[#allocation140_spill] sm:$0xff] }
 0x45c   :  { %1702 = vmatprep.subr.mxu1 %v8134_v62  ;;  %v8145_v62 = vld [vmem:[#allocation142_spill] sm:$0xff] }
 0x45d   :  { %1703 = vmatpush1.msra.mxu1 %v8135_v42  ;;  %v8146_v42 = vld [vmem:[#allocation23_spill] sm:$0xff] }
 0x45e   :  { %1704 = vmatprep.subr.mxu1 %v8136_v1  ;;  %v8147_v1 = vld [vmem:[#allocation25_spill] sm:$0xff] }
 0x45f   :  { %1705 = vmatpush1.msra.mxu1 %v8137_v59  ;;  %v8148_v59 = vld [vmem:[#allocation24_spill] sm:$0xff] }
 0x460   :  { %1706 = vmatprep.subr.mxu1 %v8138_v2  ;;  %v8149_v2 = vld [vmem:[#allocation26_spill] sm:$0xff] }
 0x461   :  { %1707 = vmatpush1.msra.mxu1 %v8139_v29  ;;  %v8150_v29 = vld [vmem:[#allocation22_spill] sm:$0xff] }
 0x462   :  { %1708 = vmatprep.subr.mxu1 %v8140_v27  ;;  %v8151_v27 = vld [vmem:[#allocation55_spill] sm:$0xff] }
 0x463   :  { %1709 = vmatpush1.msra.mxu1 %v8141_v49  ;;  %v8152_v49 = vld [vmem:[#allocation56_spill] sm:$0xff] }
 0x464   :  { %1710 = vmatprep.subr.mxu1 %v8142_v63  ;;  %v8153_v63 = vld [vmem:[#allocation133_spill] sm:$0xff] }
 0x465   :  { %1711 = vmatpush1.msra.mxu1 %v8143_v48  ;;  %v8154_v48 = vld [vmem:[#allocation135_spill] sm:$0xff] }
 0x466   :  { %1712 = vmatprep.subr.mxu1 %v8144_v45  ;;  %v8155_v45 = vld [vmem:[#allocation137_spill] sm:$0xff] }
 0x467   :  { %1713 = vmatpush1.msra.mxu1 %v8145_v62  ;;  %v8156_v62 = vld [vmem:[#allocation139_spill] sm:$0xff] }
 0x468   :  { %1714 = vmatprep.subr.mxu1 %v8146_v42  ;;  %v8157_v42 = vld [vmem:[#allocation141_spill] sm:$0xff] }
 0x469   :  { %1715 = vmatpush2.msra.mxu1 %v8147_v1  ;;  %v8158_v1 = vld [vmem:[#allocation143_spill] sm:$0xff] }
 0x46a   :  { %1716 = vmatprep.subr.mxu1 %v8148_v59  ;;  %v8159_v59 = vld [vmem:[#allocation145_spill] sm:$0xff] }
 0x46b   :  { %1717 = vmatpush2.msra.mxu1 %v8149_v2  ;;  %v8160_v2 = vld [vmem:[#allocation147_spill] sm:$0xff] }
 0x46c   :  { %1718 = vmatprep.subr.mxu1 %v8150_v29  ;;  %v8161_v29 = vld [vmem:[#allocation149_spill] sm:$0xff] }
 0x46d   :  { %1719 = vmatpush2.msra.mxu1 %v8151_v27  ;;  %v8162_v27 = vld [vmem:[#allocation151_spill] sm:$0xff] }
 0x46e   :  { %1720 = vmatprep.subr.mxu1 %v8152_v49  ;;  %v8163_v49 = vld [vmem:[#allocation153_spill] sm:$0xff] }
 0x46f   :  { %1721 = vmatpush2.msra.mxu1 %v8153_v63  ;;  %v8164_v63 = vld [vmem:[#allocation155_spill] sm:$0xff] }
 0x470   :  { %1722 = vmatprep.subr.mxu1 %v8154_v48  ;;  %v8165_v48 = vld [vmem:[#allocation157_spill] sm:$0xff] }
 0x471   :  { %1723 = vmatpush2.msra.mxu1 %v8155_v45  ;;  %v8166_v45 = vld [vmem:[#allocation159_spill] sm:$0xff] }
 0x472   :  { %1724 = vmatprep.subr.mxu1 %v8156_v62  ;;  %v8167_v62 = vld [vmem:[#allocation161_spill] sm:$0xff] }
 0x473   :  { %1725 = vmatpush2.msra.mxu1 %v8157_v42  ;;  %v5629_v42 = vld [vmem:[#allocation3 + $0x3d8] sm:$0xff] }
 0x474   :  { %1726 = vmatprep.subr.mxu1 %v8158_v1  ;;  %8168 = vst [vmem:[#allocation199_spill] sm:$0xff] %v5629_v42 }
 0x475   :  { %1727 = vmatpush2.msra.mxu1 %v8159_v59  ;;  %v5632_v59 = vld [vmem:[#allocation3 + $0x3d0] sm:$0xff] }
 0x476   :  { %1728 = vmatprep.subr.mxu1 %v8160_v2  ;;  %8169 = vst [vmem:[#allocation200_spill] sm:$0xff] %v5632_v59  ;;  %v8180_v2 = vld [vmem:[#allocation33_spill] sm:$0xff] }
 0x477   :  { %1729 = vmatpush2.msra.mxu1 %v8161_v29  ;;  %v5635_v29 = vld [vmem:[#allocation3 + $0x3a8] sm:$0xff] }
 0x478   :  { %1730 = vmatprep.subr.mxu1 %v8162_v27  ;;  %8170 = vst [vmem:[#allocation201_spill] sm:$0xff] %v5635_v29 }
 0x479   :  { %1731 = vmatpush2.msra.mxu1 %v8163_v49  ;;  %v5638_v49 = vld [vmem:[#allocation3 + $0x3a0] sm:$0xff] }
 0x47a   :  { %1732 = vmatprep.subr.mxu1 %v8164_v63  ;;  %8171 = vst [vmem:[#allocation202_spill] sm:$0xff] %v5638_v49  ;;  %v8179_v63 = vld [vmem:[#allocation31_spill] sm:$0xff] }
 0x47b   :  { %1733 = vmatpush2.msra.mxu1 %v8165_v48  ;;  %v5641_v48 = vld [vmem:[#allocation3 + $0x378] sm:$0xff] }
 0x47c   :  { %1734 = vmatprep.subr.mxu1 %v8166_v45  ;;  %8172 = vst [vmem:[#allocation203_spill] sm:$0xff] %v5641_v48 }
 0x47d   :  { %1735 = vmatpush2.msra.mxu1 %v8167_v62  ;;  %v5644_v62 = vld [vmem:[#allocation3 + $0x370] sm:$0xff] }
 0x47e   :  { %1736 = vmatprep.subr.mxu1 %v5629_v42  ;;  %8173 = vst [vmem:[#allocation204_spill] sm:$0xff] %v5644_v62  ;;  %v5647_v42 = vld [vmem:[#allocation3 + $0x348] sm:$0xff] }
 0x47f   :  { %1737 = vmatpush2.msra.mxu1 %v5632_v59  ;;  %8174 = vst [vmem:[#allocation205_spill] sm:$0xff] %v5647_v42  ;;  %v5650_v59 = vld [vmem:[#allocation3 + $0x340] sm:$0xff] }
 0x480   :  { %1738 = vmatprep.subr.mxu1 %v5635_v29  ;;  %8175 = vst [vmem:[#allocation206_spill] sm:$0xff] %v5650_v59  ;;  %v5653_v29 = vld [vmem:[#allocation3 + $0x318] sm:$0xff] }
 0x481   :  { %1739 = vmatpush2.msra.mxu1 %v5638_v49  ;;  %8176 = vst [vmem:[#allocation207_spill] sm:$0xff] %v5653_v29  ;;  %v5656_v49 = vld [vmem:[#allocation3 + $0x310] sm:$0xff] }
 0x482   :  { %1740 = vmatprep.subr.mxu1 %v5641_v48  ;;  %8177 = vst [vmem:[#allocation208_spill] sm:$0xff] %v5656_v49  ;;  %v8178_v48 = vld [vmem:[#allocation100_spill] sm:$0xff] }
 0x483   :  { %1741 = vmatpush2.msra.mxu1 %v5644_v62 }
 0x484   :  { %1742 = vmatprep.subr.mxu1 %v5647_v42 }
 0x485   :  { %1743 = vmatpush2.msra.mxu1 %v5650_v59 }
 0x486   :  { %1744 = vmatprep.subr.mxu1 %v5653_v29 }
 0x487   :  { %1745 = vmatpush2.msra.mxu1 %v5656_v49 }
 0x488   :  { %1877 = vmatprep.subr.mxu1 %v8178_v48 }
 0x4c8   :  { %v1411_v45 = vpop.f32.mrf.mxu1  ;;  %v1482_v59 = vpop.f32.mrf.mxu0 }
 0x4c9   :  { %v1558_v27 = vadd.f32 %v1411_v45, %v8179_v63  ;;  %v1560_v29 = vadd.f32 %v1482_v59, %v8181_v56  ;;  %v8183_v45 = vld [vmem:[#allocation21_spill] sm:$0xff] }
 0x4ca   :  { %v1413_v62 = vpop.f32.mrf.mxu1  ;;  %v1484_v57 = vpop.f32.mrf.mxu0 }
 0x4cb   :  { %v1559_v42 = vadd.f32 %v1413_v62, %v8180_v2  ;;  %v3119_v1 = vmul.f32 -1.442695, %v1558_v27  ;;  %v1561_v54 = vadd.f32 %v1484_v57, %v8182_v55  ;;  %v3121_v53 = vmul.f32 -1.442695, %v1560_v29 }
 0x4cd   :  { %v3120_v58 = vmul.f32 -1.442695, %v1559_v42  ;;  %3232 = vpow2.f32 %v3119_v1  ;;  %v3122_v49 = vmul.f32 -1.442695, %v1561_v54 }
 0x4cf   :  { %3234 = vpow2.f32 %v3120_v58 }
 0x4d0   :  { %3236 = vpow2.f32 %v3121_v53 }
 0x4d1   :  { %3238 = vpow2.f32 %v3122_v49 }
 0x4da   :  { %v3233_v52 = vpop.eup %3232 }
 0x4db   :  { %v1574_v51 = vadd.f32 1.0, %v3233_v52  ;;  %v8184_v52 = vld [vmem:[#allocation59_spill] sm:$0xff] }
 0x4dc   :  { %v3235_v48 = vpop.eup %3234 }
 0x4dd   :  { %v1575_v63 = vadd.f32 1.0, %v3235_v48  ;;  %3240 = vrcp.f32 %v1574_v51  ;;  %v3237_v62 = vpop.eup %3236  ;;  %v8185_v51 = vld [vmem:[#allocation60_spill] sm:$0xff] }
 0x4de   :  { %v3239_v2 = vpop.eup %3238  ;;  %v1576_v1 = vadd.f32 1.0, %v3237_v62 }
 0x4df   :  { %3242 = vrcp.f32 %v1575_v63  ;;  %v1577_v58 = vadd.f32 1.0, %v3239_v2 }
 0x4e0   :  { %3244 = vrcp.f32 %v1576_v1 }
 0x4e1   :  { %3246 = vrcp.f32 %v1577_v58 }
 0x4ea   :  { %v3241_v56 = vpop.eup %3240 }
 0x4ec   :  { %v3243_v57 = vpop.eup %3242 }
 0x4ed   :  { %v3245_v48 = vpop.eup %3244 }
 0x4ee   :  { %v3247_v63 = vpop.eup %3246  ;;  %v1594_v2 = vsub.f32 1.0, %v3245_v48  ;;  %v1598_v1 = vmul.f32 %v3245_v48, %v5284_v38  ;;  %v8213_v38 = vld [vmem:[#allocation75_spill] sm:$0xff] }
 0x4ef   :  { %v8225_v48 = vld [vmem:[#allocation79_spill] sm:$0xff] }
 0x508   :  { %v1553_v27 = vpop.f32.mrf.mxu1 }
 0x509   :  { %v1586_v42 = vadd.f32 %v1553_v27, %v8183_v45  ;;  %v1595_v27 = vsub.f32 1.0, %v3247_v63 }
 0x50a   :  { %v1555_v59 = vpop.f32.mrf.mxu1 }
 0x50b   :  { %v1588_v55 = vmul.f32 %v3241_v56, %v1586_v42  ;;  %v1587_v54 = vadd.f32 %v1555_v59, %v7908_v41  ;;  %v1599_v56 = vmul.f32 %v3247_v63, %v5282_v15  ;;  %v8212_v15 = vld [vmem:[#allocation144_spill] sm:$0xff]  ;;  %v8226_v63 = vld [vmem:[#allocation158_spill] sm:$0xff] }
 0x50d   :  { %v1590_v53 = vadd.f32 %v1588_v55, %v8184_v52  ;;  %v1589_v49 = vmul.f32 %v3243_v57, %v1587_v54  ;;  %v8217_v55 = vld [vmem:[#allocation76_spill] sm:$0xff]  ;;  %v8218_v54 = vld [vmem:[#allocation150_spill] sm:$0xff] }
 0x50e   :  { %v8219_v57 = vld [vmem:[#allocation112_spill] sm:$0xff] }
 0x50f   :  { %3248 = vtanh.f32 %v1590_v53  ;;  %v1591_v29 = vadd.f32 %v1589_v49, %v8185_v51  ;;  %v8220_v52 = vld [vmem:[#allocation152_spill] sm:$0xff]  ;;  %v8221_v53 = vld [vmem:[#allocation77_spill] sm:$0xff]  ;;  %v8222_v49 = vld [vmem:[#allocation154_spill] sm:$0xff] }
 0x510   :  { %v8223_v51 = vld [vmem:[#allocation78_spill] sm:$0xff] }
 0x511   :  { %3250 = vtanh.f32 %v1591_v29  ;;  %v8224_v29 = vld [vmem:[#allocation156_spill] sm:$0xff] }
 0x51c   :  { %v3249_v62 = vpop.eup %3248 }
 0x51d   :  { %v1596_v50 = vmul.f32 %v3249_v62, %v1594_v2  ;;  %v8227_v62 = vld [vmem:[#allocation80_spill] sm:$0xff] }
 0x51e   :  { %v3251_v45 = vpop.eup %3250  ;;  %v8228_v2 = vld [vmem:[#allocation160_spill] sm:$0xff] }
 0x51f   :  { %v1597_v42 = vmul.f32 %v3251_v45, %v1595_v27  ;;  %v5672_v59 = vadd.f32 %v1598_v1, %v1596_v50  ;;  %v8211_v50 = vld [vmem:[#allocation108_spill] sm:$0xff]  ;;  %v8229_v27 = vld [vmem:[#allocation81_spill] sm:$0xff]  ;;  %v8232_v1 = vld [vmem:[#allocation27_spill] sm:$0xff] }
 0x520   :  { %v8216_v45 = vld [vmem:[#allocation148_spill] sm:$0xff] }
 0x521   :  { %v5670_v58 = vadd.f32 %v1599_v56, %v1597_v42  ;;  %v8230_v42 = vld [vmem:[#allocation162_spill] sm:$0xff] }
 0x522   :  { %v8231_v56 = vld [vmem:[#allocation82_spill] sm:$0xff] }
 0x523   :  { %1675 = vmatprep.mubr.f32.mxu0 %v5670_v58  ;;  %1746 = vmatprep.mubr.f32.mxu1 %v5670_v58 }
 0x524   :  { %1676 = vmatmul.mubr.f32.vlgmr.msra.gmra.mxu0 %v5672_v59  ;;  %1747 = vmatmul.mubr.f32.vlgmr.msra.gmra.mxu1 %v5672_v59 }
 0x525   :  { %1754 = vmatpush1.msra.mxu0 %v5290_v28  ;;  %1817 = vmatprep.mubr.f32.mxu0 %v5670_v58 }
 0x526   :  { %1755 = vmatprep.subr.mxu0 %v5294_v17  ;;  %1878 = vmatpush1.msra.mxu1 %v4875_v3  ;;  %v8186_v3 = vld [vmem:[#allocation163_spill] sm:$0xff] }
 0x527   :  { %1756 = vmatpush1.msra.mxu0 %v5298_v20  ;;  %1879 = vmatprep.subr.mxu1 %v4879_v47  ;;  %v8187_v47 = vld [vmem:[#allocation164_spill] sm:$0xff] }
 0x528   :  { %1757 = vmatprep.subr.mxu0 %v5302_v33  ;;  %1880 = vmatpush1.msra.mxu1 %v4883_v4  ;;  %v8188_v4 = vld [vmem:[#allocation165_spill] sm:$0xff] }
 0x529   :  { %1758 = vmatpush1.msra.mxu0 %v5306_v16  ;;  %1881 = vmatprep.subr.mxu1 %v4887_v7  ;;  %v8189_v7 = vld [vmem:[#allocation114_spill] sm:$0xff] }
 0x52a   :  { %1759 = vmatprep.subr.mxu0 %v5310_v37  ;;  %1882 = vmatpush1.msra.mxu1 %v4891_v35  ;;  %v8190_v35 = vld [vmem:[#allocation166_spill] sm:$0xff] }
 0x52b   :  { %1760 = vmatpush1.msra.mxu0 %v5314_v8  ;;  %1883 = vmatprep.subr.mxu1 %v4895_v0  ;;  %v8191_v0 = vld [vmem:[#allocation116_spill] sm:$0xff] }
 0x52c   :  { %1761 = vmatprep.subr.mxu0 %v5318_v30  ;;  %1884 = vmatpush1.msra.mxu1 %v4899_v12  ;;  %v8192_v12 = vld [vmem:[#allocation167_spill] sm:$0xff] }
 0x52d   :  { %1762 = vmatpush1.msra.mxu0 %v5322_v46  ;;  %1885 = vmatprep.subr.mxu1 %v4903_v43  ;;  %v8193_v43 = vld [vmem:[#allocation118_spill] sm:$0xff] }
 0x52e   :  { %1763 = vmatprep.subr.mxu0 %v5326_v22  ;;  %1886 = vmatpush1.msra.mxu1 %v4907_v60  ;;  %v8194_v60 = vld [vmem:[#allocation168_spill] sm:$0xff] }
 0x52f   :  { %1764 = vmatpush1.msra.mxu0 %v5330_v31  ;;  %1887 = vmatprep.subr.mxu1 %v4911_v11  ;;  %v8195_v11 = vld [vmem:[#allocation120_spill] sm:$0xff] }
 0x530   :  { %1765 = vmatprep.subr.mxu0 %v5334_v23  ;;  %1888 = vmatpush1.msra.mxu1 %v8042_v14  ;;  %v8214_v14 = vld [vmem:[#allocation146_spill] sm:$0xff] }
 0x531   :  { %1766 = vmatpush1.msra.mxu0 %v5338_v40  ;;  %1889 = vmatprep.subr.mxu1 %v8043_v19  ;;  %v8215_v19 = vld [vmem:[#allocation110_spill] sm:$0xff] }
 0x532   :  { %1767 = vmatprep.subr.mxu0 %v5342_v18  ;;  %1890 = vmatpush1.msra.mxu1 %v4923_v34  ;;  %v8198_v34 = vld [vmem:[#allocation170_spill] sm:$0xff] }
 0x533   :  { %1768 = vmatpush1.msra.mxu0 %v8186_v3  ;;  %1891 = vmatprep.subr.mxu1 %v4927_v61  ;;  %v8199_v61 = vld [vmem:[#allocation124_spill] sm:$0xff] }
 0x534   :  { %1769 = vmatprep.subr.mxu0 %v8187_v47  ;;  %1892 = vmatpush1.msra.mxu1 %v4931_v36  ;;  %v8196_v36 = vld [vmem:[#allocation169_spill] sm:$0xff] }
 0x535   :  { %1770 = vmatpush1.msra.mxu0 %v8188_v4  ;;  %1893 = vmatprep.subr.mxu1 %v4935_v32  ;;  %v8197_v32 = vld [vmem:[#allocation122_spill] sm:$0xff] }
 0x536   :  { %1771 = vmatprep.subr.mxu0 %v8189_v7  ;;  %1894 = vmatpush1.msra.mxu1 %v4939_v6  ;;  %v8200_v6 = vld [vmem:[#allocation171_spill] sm:$0xff] }
 0x537   :  { %1772 = vmatpush1.msra.mxu0 %v8190_v35  ;;  %1895 = vmatprep.subr.mxu1 %v4943_v5  ;;  %v8201_v5 = vld [vmem:[#allocation72_spill] sm:$0xff] }
 0x538   :  { %1773 = vmatprep.subr.mxu0 %v8191_v0  ;;  %1896 = vmatpush1.msra.mxu1 %v4947_v9  ;;  %v8202_v9 = vld [vmem:[#allocation126_spill] sm:$0xff] }
 0x539   :  { %1774 = vmatpush1.msra.mxu0 %v8192_v12  ;;  %1897 = vmatprep.subr.mxu1 %v4951_v10  ;;  %v8203_v10 = vld [vmem:[#allocation104_spill] sm:$0xff] }
 0x53a   :  { %1775 = vmatprep.subr.mxu0 %v8193_v43  ;;  %1898 = vmatpush1.msra.mxu1 %v4955_v26  ;;  %v8204_v26 = vld [vmem:[#allocation172_spill] sm:$0xff] }
 0x53b   :  { %1776 = vmatpush1.msra.mxu0 %v8194_v60  ;;  %1899 = vmatprep.subr.mxu1 %v4959_v21  ;;  %v8205_v21 = vld [vmem:[#allocation73_spill] sm:$0xff] }
 0x53c   :  { %1777 = vmatprep.subr.mxu0 %v8195_v11  ;;  %1900 = vmatpush1.msra.mxu1 %v4963_v39  ;;  %v8206_v39 = vld [vmem:[#allocation128_spill] sm:$0xff] }
 0x53d   :  { %1778 = vmatpush1.msra.mxu0 %v8196_v36  ;;  %1901 = vmatprep.subr.mxu1 %v4967_v24  ;;  %v8207_v24 = vld [vmem:[#allocation106_spill] sm:$0xff] }
 0x53e   :  { %1779 = vmatprep.subr.mxu0 %v8197_v32  ;;  %1902 = vmatpush1.msra.mxu1 %v4971_v25  ;;  %v8208_v25 = vld [vmem:[#allocation130_spill] sm:$0xff] }
 0x53f   :  { %1780 = vmatpush1.msra.mxu0 %v8198_v34  ;;  %1903 = vmatprep.subr.mxu1 %v4975_v44  ;;  %v8209_v44 = vld [vmem:[#allocation74_spill] sm:$0xff] }
 0x540   :  { %1781 = vmatprep.subr.mxu0 %v8199_v61  ;;  %1904 = vmatpush1.msra.mxu1 %v4979_v13  ;;  %v8210_v13 = vld [vmem:[#allocation132_spill] sm:$0xff] }
 0x541   :  { %1782 = vmatpush1.msra.mxu0 %v8200_v6  ;;  %1905 = vmatprep.subr.mxu1 %v8201_v5  ;;  %v8233_v5 = vld [vmem:[#allocation83_spill] sm:$0xff] }
 0x542   :  { %1783 = vmatprep.subr.mxu0 %v8202_v9  ;;  %1906 = vmatpush1.msra.mxu1 %v8203_v10  ;;  %v8234_v10 = vld [vmem:[#allocation29_spill] sm:$0xff] }
 0x543   :  { %1784 = vmatpush1.msra.mxu0 %v8204_v26  ;;  %1907 = vmatprep.subr.mxu1 %v8205_v21  ;;  %v8235_v21 = vld [vmem:[#allocation84_spill] sm:$0xff] }
 0x544   :  { %1785 = vmatprep.subr.mxu0 %v8206_v39  ;;  %1908 = vmatpush1.msra.mxu1 %v8207_v24  ;;  %v8236_v24 = vld [vmem:[#allocation28_spill] sm:$0xff] }
 0x545   :  { %1786 = vmatpush2.msra.mxu0 %v8208_v25  ;;  %1909 = vmatprep.subr.mxu1 %v8209_v44  ;;  %v8237_v44 = vld [vmem:[#allocation85_spill] sm:$0xff] }
 0x546   :  { %1787 = vmatprep.subr.mxu0 %v8210_v13  ;;  %1910 = vmatpush2.msra.mxu1 %v8211_v50  ;;  %v8238_v50 = vld [vmem:[#allocation30_spill] sm:$0xff] }
 0x547   :  { %1788 = vmatpush2.msra.mxu0 %v8212_v15  ;;  %1911 = vmatprep.subr.mxu1 %v8213_v38  ;;  %v8239_v38 = vld [vmem:[#allocation86_spill] sm:$0xff] }
 0x548   :  { %1789 = vmatprep.subr.mxu0 %v8214_v14  ;;  %1912 = vmatpush2.msra.mxu1 %v8215_v19  ;;  %v8240_v19 = vld [vmem:[#allocation57_spill] sm:$0xff] }
 0x549   :  { %1790 = vmatpush2.msra.mxu0 %v8216_v45  ;;  %1913 = vmatprep.subr.mxu1 %v8217_v55  ;;  %v8241_v55 = vld [vmem:[#allocation87_spill] sm:$0xff] }
 0x54a   :  { %1791 = vmatprep.subr.mxu0 %v8218_v54  ;;  %1914 = vmatpush2.msra.mxu1 %v8219_v57  ;;  %v8242_v57 = vld [vmem:[#allocation58_spill] sm:$0xff] }
 0x54b   :  { %1792 = vmatpush2.msra.mxu0 %v8220_v52  ;;  %1915 = vmatprep.subr.mxu1 %v8221_v53  ;;  %v8243_v53 = vld [vmem:[#allocation88_spill] sm:$0xff] }
 0x54c   :  { %1793 = vmatprep.subr.mxu0 %v8222_v49  ;;  %1916 = vmatpush2.msra.mxu1 %v8223_v51  ;;  %v8244_v51 = vld [vmem:[#allocation71_spill] sm:$0xff] }
 0x54d   :  { %1794 = vmatpush2.msra.mxu0 %v8224_v29  ;;  %1917 = vmatprep.subr.mxu1 %v8225_v48  ;;  %v8245_v48 = vld [vmem:[#allocation102_spill] sm:$0xff] }
 0x54e   :  { %1795 = vmatprep.subr.mxu0 %v8226_v63  ;;  %1918 = vmatpush2.msra.mxu1 %v8227_v62  ;;  %v8246_v62 = vld [vmem:[#allocation173_spill] sm:$0xff] }
 0x54f   :  { %1796 = vmatpush2.msra.mxu0 %v8228_v2  ;;  %1919 = vmatprep.subr.mxu1 %v8229_v27  ;;  %v8247_v27 = vld [vmem:[#allocation174_spill] sm:$0xff] }
 0x550   :  { %1797 = vmatprep.subr.mxu0 %v8230_v42  ;;  %1920 = vmatpush2.msra.mxu1 %v8231_v56  ;;  %v8248_v56 = vld [vmem:[#allocation175_spill] sm:$0xff] }
 0x551   :  { %1798 = vmatpush2.msra.mxu0 %v8232_v1  ;;  %1921 = vmatprep.subr.mxu1 %v8233_v5  ;;  %v8249_v5 = vld [vmem:[#allocation176_spill] sm:$0xff] }
 0x552   :  { %1799 = vmatprep.subr.mxu0 %v8234_v10  ;;  %1922 = vmatpush2.msra.mxu1 %v8235_v21  ;;  %v8250_v21 = vld [vmem:[#allocation177_spill] sm:$0xff] }
 0x553   :  { %1800 = vmatpush2.msra.mxu0 %v8236_v24  ;;  %1923 = vmatprep.subr.mxu1 %v8237_v44  ;;  %v8251_v44 = vld [vmem:[#allocation178_spill] sm:$0xff] }
 0x554   :  { %1801 = vmatprep.subr.mxu0 %v8238_v50  ;;  %1924 = vmatpush2.msra.mxu1 %v8239_v38  ;;  %v8252_v38 = vld [vmem:[#allocation179_spill] sm:$0xff]  ;;  %v8339_v50 = vld [vmem:[#allocation36_spill] sm:$0xff]  ;;  %v8340_v24 = vld [vmem:[#allocation38_spill] sm:$0xff] }
 0x555   :  { %1802 = vmatpush2.msra.mxu0 %v8240_v19  ;;  %1925 = vmatprep.subr.mxu1 %v8241_v55  ;;  %v8253_v55 = vld [vmem:[#allocation180_spill] sm:$0xff] }
 0x556   :  { %1803 = vmatprep.subr.mxu0 %v8242_v57  ;;  %1926 = vmatpush2.msra.mxu1 %v8243_v53  ;;  %v8254_v53 = vld [vmem:[#allocation181_spill] sm:$0xff] }
 0x557   :  { %1804 = vmatpush2.msra.mxu0 %v8244_v51  ;;  %1927 = vmatprep.subr.mxu1 %v8245_v48  ;;  %v8255_v51 = vld [vmem:[#allocation182_spill] sm:$0xff]  ;;  %v8256_v48 = vld [vmem:[#allocation183_spill] sm:$0xff]  ;;  %v8338_v57 = vld [vmem:[#allocation37_spill] sm:$0xff] }
 0x558   :  { %1805 = vmatprep.subr.mxu0 %v8246_v62  ;;  %1928 = vmatpush2.msra.mxu1 %v8247_v27  ;;  %v8257_v62 = vld [vmem:[#allocation184_spill] sm:$0xff]  ;;  %v8258_v27 = vld [vmem:[#allocation185_spill] sm:$0xff] }
 0x559   :  { %1806 = vmatpush2.msra.mxu0 %v8248_v56  ;;  %1929 = vmatprep.subr.mxu1 %v8249_v5  ;;  %v8259_v56 = vld [vmem:[#allocation186_spill] sm:$0xff]  ;;  %v8260_v5 = vld [vmem:[#allocation187_spill] sm:$0xff] }
 0x55a   :  { %1807 = vmatprep.subr.mxu0 %v8250_v21  ;;  %1930 = vmatpush2.msra.mxu1 %v8251_v44  ;;  %v8261_v21 = vld [vmem:[#allocation188_spill] sm:$0xff]  ;;  %v8262_v44 = vld [vmem:[#allocation189_spill] sm:$0xff] }
 0x55b   :  { %1808 = vmatpush2.msra.mxu0 %v8252_v38  ;;  %1931 = vmatprep.subr.mxu1 %v8253_v55  ;;  %v8263_v38 = vld [vmem:[#allocation190_spill] sm:$0xff]  ;;  %v8264_v55 = vld [vmem:[#allocation191_spill] sm:$0xff] }
 0x55c   :  { %1809 = vmatprep.subr.mxu0 %v8254_v53  ;;  %1932 = vmatpush2.msra.mxu1 %v8255_v51  ;;  %v8265_v53 = vld [vmem:[#allocation192_spill] sm:$0xff]  ;;  %v8266_v51 = vld [vmem:[#allocation193_spill] sm:$0xff] }
 0x55d   :  { %1810 = vmatpush2.msra.mxu0 %v8256_v48  ;;  %1933 = vmatprep.subr.mxu1 %v8257_v62  ;;  %v8267_v48 = vld [vmem:[#allocation194_spill] sm:$0xff]  ;;  %v8268_v62 = vld [vmem:[#allocation195_spill] sm:$0xff] }
 0x55e   :  { %1811 = vmatprep.subr.mxu0 %v8258_v27  ;;  %1934 = vmatpush2.msra.mxu1 %v8259_v56  ;;  %v8269_v27 = vld [vmem:[#allocation196_spill] sm:$0xff]  ;;  %v8280_v56 = vld [vmem:[#allocation97_spill] sm:$0xff] }
 0x55f   :  { %1812 = vmatpush2.msra.mxu0 %v8260_v5  ;;  %1935 = vmatprep.subr.mxu1 %v8261_v21  ;;  %v8270_v5 = vld [vmem:[#allocation89_spill] sm:$0xff]  ;;  %v8271_v21 = vld [vmem:[#allocation90_spill] sm:$0xff] }
 0x560   :  { %1813 = vmatprep.subr.mxu0 %v8262_v44  ;;  %1936 = vmatpush2.msra.mxu1 %v8263_v38  ;;  %v8272_v44 = vld [vmem:[#allocation197_spill] sm:$0xff]  ;;  %v8273_v38 = vld [vmem:[#allocation91_spill] sm:$0xff] }
 0x561   :  { %1814 = vmatpush2.msra.mxu0 %v8264_v55  ;;  %1937 = vmatprep.subr.mxu1 %v8265_v53  ;;  %v8274_v55 = vld [vmem:[#allocation198_spill] sm:$0xff]  ;;  %v8275_v53 = vld [vmem:[#allocation92_spill] sm:$0xff] }
 0x562   :  { %1815 = vmatprep.subr.mxu0 %v8266_v51  ;;  %1938 = vmatpush2.msra.mxu1 %v8267_v48  ;;  %v8276_v51 = vld [vmem:[#allocation93_spill] sm:$0xff]  ;;  %v8277_v48 = vld [vmem:[#allocation94_spill] sm:$0xff] }
 0x563   :  { %1816 = vmatpush2.msra.mxu0 %v8268_v62  ;;  %1939 = vmatprep.subr.mxu1 %v8269_v27  ;;  %v8278_v62 = vld [vmem:[#allocation95_spill] sm:$0xff]  ;;  %v8279_v27 = vld [vmem:[#allocation96_spill] sm:$0xff] }
 0x564   :  { %1818 = vmatmul.mubr.f32.vlgmr.msra.gmra.mxu0 %v5672_v59  ;;  %1948 = vmatprep.subr.mxu0 %v8270_v5  ;;  %v8281_v5 = vld [vmem:[#allocation98_spill] sm:$0xff] }
 0x565   :  { %1949 = vmatpush1.msra.mxu0 %v8271_v21  ;;  %1940 = vmatpush2.msra.mxu1 %v8272_v44  ;;  %v8282_v21 = vld [vmem:[#allocation99_spill] sm:$0xff]  ;;  %v8283_v44 = vld [vmem:[#allocation101_spill] sm:$0xff] }
 0x566   :  { %1950 = vmatprep.subr.mxu0 %v8273_v38  ;;  %2019 = vmatprep.subr.mxu1 %v8274_v55  ;;  %v8284_v38 = vld [vmem:[#allocation103_spill] sm:$0xff]  ;;  %v8285_v55 = vld [vmem:[#allocation105_spill] sm:$0xff] }
 0x567   :  { %1951 = vmatpush1.msra.mxu0 %v8275_v53  ;;  %v8286_v53 = vld [vmem:[#allocation107_spill] sm:$0xff] }
 0x568   :  { %1952 = vmatprep.subr.mxu0 %v8276_v51  ;;  %v8287_v51 = vld [vmem:[#allocation109_spill] sm:$0xff] }
 0x569   :  { %1953 = vmatpush1.msra.mxu0 %v8277_v48  ;;  %v8288_v48 = vld [vmem:[#allocation111_spill] sm:$0xff] }
 0x56a   :  { %1954 = vmatprep.subr.mxu0 %v8278_v62  ;;  %v8289_v62 = vld [vmem:[#allocation113_spill] sm:$0xff] }
 0x56b   :  { %1955 = vmatpush1.msra.mxu0 %v8279_v27  ;;  %v8290_v27 = vld [vmem:[#allocation115_spill] sm:$0xff] }
 0x56c   :  { %1956 = vmatprep.subr.mxu0 %v8280_v56  ;;  %v8291_v56 = vld [vmem:[#allocation117_spill] sm:$0xff] }
 0x56d   :  { %1957 = vmatpush1.msra.mxu0 %v8281_v5  ;;  %v8292_v5 = vld [vmem:[#allocation119_spill] sm:$0xff] }
 0x56e   :  { %1958 = vmatprep.subr.mxu0 %v8282_v21  ;;  %v8293_v21 = vld [vmem:[#allocation121_spill] sm:$0xff] }
 0x56f   :  { %1959 = vmatpush1.msra.mxu0 %v8283_v44  ;;  %v8294_v44 = vld [vmem:[#allocation123_spill] sm:$0xff] }
 0x570   :  { %1960 = vmatprep.subr.mxu0 %v8284_v38  ;;  %v8295_v38 = vld [vmem:[#allocation125_spill] sm:$0xff] }
 0x571   :  { %1961 = vmatpush1.msra.mxu0 %v8285_v55  ;;  %v8296_v55 = vld [vmem:[#allocation127_spill] sm:$0xff] }
 0x572   :  { %1962 = vmatprep.subr.mxu0 %v8286_v53  ;;  %v8297_v53 = vld [vmem:[#allocation129_spill] sm:$0xff] }
 0x573   :  { %1963 = vmatpush1.msra.mxu0 %v8287_v51  ;;  %v8298_v51 = vld [vmem:[#allocation131_spill] sm:$0xff] }
 0x574   :  { %1964 = vmatprep.subr.mxu0 %v8288_v48  ;;  %v8299_v48 = vld [vmem:[#allocation134_spill] sm:$0xff] }
 0x575   :  { %1965 = vmatpush1.msra.mxu0 %v8289_v62  ;;  %v8300_v62 = vld [vmem:[#allocation136_spill] sm:$0xff] }
 0x576   :  { %1966 = vmatprep.subr.mxu0 %v8290_v27  ;;  %v8301_v27 = vld [vmem:[#allocation138_spill] sm:$0xff] }
 0x577   :  { %1967 = vmatpush1.msra.mxu0 %v8291_v56  ;;  %v8302_v56 = vld [vmem:[#allocation140_spill] sm:$0xff] }
 0x578   :  { %1968 = vmatprep.subr.mxu0 %v8292_v5  ;;  %v8303_v5 = vld [vmem:[#allocation142_spill] sm:$0xff] }
 0x579   :  { %1969 = vmatpush1.msra.mxu0 %v8293_v21  ;;  %v8304_v21 = vld [vmem:[#allocation23_spill] sm:$0xff] }
 0x57a   :  { %1970 = vmatprep.subr.mxu0 %v8294_v44  ;;  %v8305_v44 = vld [vmem:[#allocation25_spill] sm:$0xff] }
 0x57b   :  { %1971 = vmatpush1.msra.mxu0 %v8295_v38  ;;  %v8306_v38 = vld [vmem:[#allocation24_spill] sm:$0xff] }
 0x57c   :  { %1972 = vmatprep.subr.mxu0 %v8296_v55  ;;  %v8307_v55 = vld [vmem:[#allocation26_spill] sm:$0xff] }
 0x57d   :  { %1973 = vmatpush1.msra.mxu0 %v8297_v53  ;;  %v8308_v53 = vld [vmem:[#allocation22_spill] sm:$0xff] }
 0x57e   :  { %1974 = vmatprep.subr.mxu0 %v8298_v51  ;;  %v8309_v51 = vld [vmem:[#allocation55_spill] sm:$0xff] }
 0x57f   :  { %1975 = vmatpush1.msra.mxu0 %v8299_v48  ;;  %v8310_v48 = vld [vmem:[#allocation56_spill] sm:$0xff] }
 0x580   :  { %1976 = vmatprep.subr.mxu0 %v8300_v62  ;;  %v8311_v62 = vld [vmem:[#allocation133_spill] sm:$0xff] }
 0x581   :  { %1977 = vmatpush1.msra.mxu0 %v8301_v27  ;;  %v8312_v27 = vld [vmem:[#allocation135_spill] sm:$0xff] }
 0x582   :  { %1978 = vmatprep.subr.mxu0 %v8302_v56  ;;  %v8313_v56 = vld [vmem:[#allocation137_spill] sm:$0xff] }
 0x583   :  { %1979 = vmatpush1.msra.mxu0 %v8303_v5  ;;  %v8314_v5 = vld [vmem:[#allocation139_spill] sm:$0xff] }
 0x584   :  { %1980 = vmatprep.subr.mxu0 %v8304_v21  ;;  %v8315_v21 = vld [vmem:[#allocation141_spill] sm:$0xff] }
 0x585   :  { %1981 = vmatpush2.msra.mxu0 %v8305_v44  ;;  %v8316_v44 = vld [vmem:[#allocation143_spill] sm:$0xff] }
 0x586   :  { %1982 = vmatprep.subr.mxu0 %v8306_v38  ;;  %v8317_v38 = vld [vmem:[#allocation145_spill] sm:$0xff] }
 0x587   :  { %1983 = vmatpush2.msra.mxu0 %v8307_v55  ;;  %v8318_v55 = vld [vmem:[#allocation147_spill] sm:$0xff] }
 0x588   :  { %1984 = vmatprep.subr.mxu0 %v8308_v53  ;;  %v8319_v53 = vld [vmem:[#allocation149_spill] sm:$0xff] }
 0x589   :  { %1985 = vmatpush2.msra.mxu0 %v8309_v51  ;;  %v8320_v51 = vld [vmem:[#allocation151_spill] sm:$0xff] }
 0x58a   :  { %1986 = vmatprep.subr.mxu0 %v8310_v48  ;;  %v8321_v48 = vld [vmem:[#allocation153_spill] sm:$0xff] }
 0x58b   :  { %1987 = vmatpush2.msra.mxu0 %v8311_v62  ;;  %v8322_v62 = vld [vmem:[#allocation155_spill] sm:$0xff] }
 0x58c   :  { %1988 = vmatprep.subr.mxu0 %v8312_v27  ;;  %v8323_v27 = vld [vmem:[#allocation157_spill] sm:$0xff] }
 0x58d   :  { %1989 = vmatpush2.msra.mxu0 %v8313_v56  ;;  %v8324_v56 = vld [vmem:[#allocation159_spill] sm:$0xff] }
 0x58e   :  { %1990 = vmatprep.subr.mxu0 %v8314_v5  ;;  %v8325_v5 = vld [vmem:[#allocation161_spill] sm:$0xff] }
 0x58f   :  { %1991 = vmatpush2.msra.mxu0 %v8315_v21  ;;  %v8326_v21 = vld [vmem:[#allocation199_spill] sm:$0xff] }
 0x590   :  { %1992 = vmatprep.subr.mxu0 %v8316_v44  ;;  %v8327_v44 = vld [vmem:[#allocation200_spill] sm:$0xff] }
 0x591   :  { %1993 = vmatpush2.msra.mxu0 %v8317_v38  ;;  %v8328_v38 = vld [vmem:[#allocation201_spill] sm:$0xff] }
 0x592   :  { %1994 = vmatprep.subr.mxu0 %v8318_v55  ;;  %v8329_v55 = vld [vmem:[#allocation202_spill] sm:$0xff] }
 0x593   :  { %1995 = vmatpush2.msra.mxu0 %v8319_v53  ;;  %v8330_v53 = vld [vmem:[#allocation203_spill] sm:$0xff] }
 0x594   :  { %1996 = vmatprep.subr.mxu0 %v8320_v51  ;;  %v8331_v51 = vld [vmem:[#allocation204_spill] sm:$0xff] }
 0x595   :  { %1997 = vmatpush2.msra.mxu0 %v8321_v48  ;;  %v8332_v48 = vld [vmem:[#allocation205_spill] sm:$0xff] }
 0x596   :  { %1998 = vmatprep.subr.mxu0 %v8322_v62  ;;  %v8333_v62 = vld [vmem:[#allocation206_spill] sm:$0xff] }
 0x597   :  { %1999 = vmatpush2.msra.mxu0 %v8323_v27  ;;  %v8334_v27 = vld [vmem:[#allocation207_spill] sm:$0xff] }
 0x598   :  { %2000 = vmatprep.subr.mxu0 %v8324_v56  ;;  %v8335_v56 = vld [vmem:[#allocation208_spill] sm:$0xff] }
 0x599   :  { %2001 = vmatpush2.msra.mxu0 %v8325_v5  ;;  %v5871_v5 = vld [vmem:[#allocation3 + $0x2d8] sm:$0xff] }
 0x59a   :  { %2002 = vmatprep.subr.mxu0 %v8326_v21  ;;  %8336 = vst [vmem:[#allocation100_spill] sm:$0xff] %v5871_v5  ;;  %v8337_v21 = vld [vmem:[#allocation35_spill] sm:$0xff] }
 0x59b   :  { %2003 = vmatpush2.msra.mxu0 %v8327_v44 }
 0x59c   :  { %2004 = vmatprep.subr.mxu0 %v8328_v38 }
 0x59d   :  { %2005 = vmatpush2.msra.mxu0 %v8329_v55 }
 0x59e   :  { %2006 = vmatprep.subr.mxu0 %v8330_v53 }
 0x59f   :  { %2007 = vmatpush2.msra.mxu0 %v8331_v51 }
 0x5a0   :  { %2008 = vmatprep.subr.mxu0 %v8332_v48 }
 0x5a1   :  { %2009 = vmatpush2.msra.mxu0 %v8333_v62 }
 0x5a2   :  { %2010 = vmatprep.subr.mxu0 %v8334_v27 }
 0x5a3   :  { %2011 = vmatpush2.msra.mxu0 %v8335_v56 }
 0x5a4   :  { %2143 = vmatprep.subr.mxu0 %v5871_v5 }
 0x5e4   :  { %v1677_v44 = vpop.f32.mrf.mxu0  ;;  %v1748_v48 = vpop.f32.mrf.mxu1 }
 0x5e5   :  { %v1824_v55 = vadd.f32 %v1677_v44, %v8337_v21  ;;  %v1826_v27 = vadd.f32 %v1748_v48, %v8339_v50 }
 0x5e6   :  { %v1679_v38 = vpop.f32.mrf.mxu0  ;;  %v1750_v62 = vpop.f32.mrf.mxu1 }
 0x5e7   :  { %v1825_v53 = vadd.f32 %v1679_v38, %v8338_v57  ;;  %v3123_v19 = vmul.f32 -1.442695, %v1824_v55  ;;  %v1827_v56 = vadd.f32 %v1750_v62, %v8340_v24  ;;  %v3125_v10 = vmul.f32 -1.442695, %v1826_v27 }
 0x5e9   :  { %v3124_v51 = vmul.f32 -1.442695, %v1825_v53  ;;  %3252 = vpow2.f32 %v3123_v19  ;;  %v3126_v1 = vmul.f32 -1.442695, %v1827_v56  ;;  %v8341_v53 = vld [vmem:[#allocation21_spill] sm:$0xff] }
 0x5eb   :  { %3254 = vpow2.f32 %v3124_v51 }
 0x5ec   :  { %3256 = vpow2.f32 %v3125_v10 }
 0x5ed   :  { %3258 = vpow2.f32 %v3126_v1 }
 0x5f6   :  { %v3253_v42 = vpop.eup %3252 }
 0x5f7   :  { %v1840_v2 = vadd.f32 1.0, %v3253_v42  ;;  %v8342_v42 = vld [vmem:[#allocation61_spill] sm:$0xff] }
 0x5f8   :  { %v3255_v5 = vpop.eup %3254 }
 0x5f9   :  { %v1841_v21 = vadd.f32 1.0, %v3255_v5  ;;  %3260 = vrcp.f32 %v1840_v2  ;;  %v3257_v57 = vpop.eup %3256  ;;  %v8343_v2 = vld [vmem:[#allocation62_spill] sm:$0xff] }
 0x5fa   :  { %v3259_v44 = vpop.eup %3258  ;;  %v1842_v19 = vadd.f32 1.0, %v3257_v57 }
 0x5fb   :  { %3262 = vrcp.f32 %v1841_v21  ;;  %v1843_v55 = vadd.f32 1.0, %v3259_v44 }
 0x5fc   :  { %3264 = vrcp.f32 %v1842_v19 }
 0x5fd   :  { %3266 = vrcp.f32 %v1843_v55 }
 0x606   :  { %v3261_v50 = vpop.eup %3260 }
 0x608   :  { %v3263_v27 = vpop.eup %3262 }
 0x609   :  { %v3265_v5 = vpop.eup %3264 }
 0x60a   :  { %v3267_v21 = vpop.eup %3266  ;;  %v1860_v44 = vsub.f32 1.0, %v3265_v5  ;;  %v1864_v19 = vmul.f32 %v3265_v5, %v5672_v59  ;;  %v5899_v59 = vld [vmem:[#allocation3 + $0x2a8] sm:$0xff]  ;;  %v6079_v5 = vld [vmem:[#allocation3 + $0x480] sm:$0xff] }
 0x60b   :  { %8372 = vst [vmem:[#allocation72_spill] sm:$0xff] %v6079_v5 }
 0x624   :  { %v1819_v38 = vpop.f32.mrf.mxu0 }
 0x625   :  { %v1852_v51 = vadd.f32 %v1819_v38, %v8341_v53  ;;  %v1861_v38 = vsub.f32 1.0, %v3267_v21 }
 0x626   :  { %v1821_v48 = vpop.f32.mrf.mxu0 }
 0x627   :  { %v1854_v24 = vmul.f32 %v3261_v50, %v1852_v51  ;;  %v1853_v62 = vadd.f32 %v1821_v48, %v7908_v41  ;;  %v1865_v50 = vmul.f32 %v3267_v21, %v5670_v58  ;;  %v5895_v58 = vld [vmem:[#allocation3 + $0x2d0] sm:$0xff] }
 0x628   :  { %v8373_v21 = vld [vmem:[#allocation57_spill] sm:$0xff] }
 0x629   :  { %v1856_v1 = vadd.f32 %v1854_v24, %v8342_v42  ;;  %v1855_v10 = vmul.f32 %v3263_v27, %v1853_v62  ;;  %v6059_v24 = vld [vmem:[#allocation3 + $0x4e8] sm:$0xff]  ;;  %v6063_v62 = vld [vmem:[#allocation3 + $0x4e0] sm:$0xff]  ;;  %v6067_v27 = vld [vmem:[#allocation3 + $0x4b8] sm:$0xff] }
 0x62a   :  { %8362 = vst [vmem:[#allocation169_spill] sm:$0xff] %v6059_v24  ;;  %8364 = vst [vmem:[#allocation122_spill] sm:$0xff] %v6063_v62  ;;  %v8367_v42 = vld [vmem:[#allocation29_spill] sm:$0xff] }
 0x62b   :  { %3268 = vtanh.f32 %v1856_v1  ;;  %v1857_v56 = vadd.f32 %v1855_v10, %v8343_v2  ;;  %8366 = vst [vmem:[#allocation170_spill] sm:$0xff] %v6067_v27  ;;  %v6071_v1 = vld [vmem:[#allocation3 + $0x4b0] sm:$0xff]  ;;  %v8369_v10 = vld [vmem:[#allocation28_spill] sm:$0xff] }
 0x62c   :  { %8368 = vst [vmem:[#allocation124_spill] sm:$0xff] %v6071_v1  ;;  %v6075_v2 = vld [vmem:[#allocation3 + $0x488] sm:$0xff] }
 0x62d   :  { %3270 = vtanh.f32 %v1857_v56  ;;  %8370 = vst [vmem:[#allocation171_spill] sm:$0xff] %v6075_v2  ;;  %v8371_v56 = vld [vmem:[#allocation30_spill] sm:$0xff] }
 0x638   :  { %v3269_v57 = vpop.eup %3268 }
 0x639   :  { %v1862_v63 = vmul.f32 %v3269_v57, %v1860_v44  ;;  %v6083_v57 = vld [vmem:[#allocation3 + $0x458] sm:$0xff] }
 0x63a   :  { %v3271_v53 = vpop.eup %3270  ;;  %8374 = vst [vmem:[#allocation126_spill] sm:$0xff] %v6083_v57  ;;  %v8375_v44 = vld [vmem:[#allocation58_spill] sm:$0xff] }
 0x63b   :  { %v1863_v51 = vmul.f32 %v3271_v53, %v1861_v38  ;;  %v5886_v48 = vadd.f32 %v1864_v19, %v1862_v63  ;;  %v5903_v63 = vld [vmem:[#allocation3 + $0x2a0] sm:$0xff]  ;;  %v6055_v53 = vld [vmem:[#allocation3 + $0x510] sm:$0xff] }
 0x63c   :  { %8360 = vst [vmem:[#allocation120_spill] sm:$0xff] %v6055_v53  ;;  %v6087_v38 = vld [vmem:[#allocation3 + $0x450] sm:$0xff] }
 0x63d   :  { %v5884_v55 = vadd.f32 %v1865_v50, %v1863_v51  ;;  %8376 = vst [vmem:[#allocation104_spill] sm:$0xff] %v6087_v38  ;;  %v8377_v51 = vld [vmem:[#allocation71_spill] sm:$0xff]  ;;  %v8378_v50 = vld [vmem:[#allocation102_spill] sm:$0xff]  ;;  %v8379_v19 = vld [vmem:[#allocation173_spill] sm:$0xff] }
 0x63f   :  { %1941 = vmatprep.mubr.f32.mxu1 %v5884_v55  ;;  %2012 = vmatprep.mubr.f32.mxu0 %v5884_v55 }
 0x640   :  { %1942 = vmatmul.mubr.f32.vlgmr.msra.gmra.mxu1 %v5886_v48  ;;  %2013 = vmatmul.mubr.f32.vlgmr.msra.gmra.mxu0 %v5886_v48 }
 0x641   :  { %2020 = vmatpush1.msra.mxu1 %v5290_v28  ;;  %2083 = vmatprep.mubr.f32.mxu1 %v5884_v55  ;;  %v5907_v28 = vld [vmem:[#allocation3 + $0x278] sm:$0xff] }
 0x642   :  { %2021 = vmatprep.subr.mxu1 %v5294_v17  ;;  %2144 = vmatpush1.msra.mxu0 %v5895_v58  ;;  %v5911_v17 = vld [vmem:[#allocation3 + $0x270] sm:$0xff] }
 0x643   :  { %2022 = vmatpush1.msra.mxu1 %v5298_v20  ;;  %2145 = vmatprep.subr.mxu0 %v5899_v59  ;;  %v5915_v20 = vld [vmem:[#allocation3 + $0x248] sm:$0xff] }
 0x644   :  { %2023 = vmatprep.subr.mxu1 %v5302_v33  ;;  %2146 = vmatpush1.msra.mxu0 %v5903_v63  ;;  %v5919_v33 = vld [vmem:[#allocation3 + $0x240] sm:$0xff] }
 0x645   :  { %2024 = vmatpush1.msra.mxu1 %v5306_v16  ;;  %2147 = vmatprep.subr.mxu0 %v5907_v28  ;;  %v5923_v16 = vld [vmem:[#allocation3 + $0x218] sm:$0xff] }
 0x646   :  { %2025 = vmatprep.subr.mxu1 %v5310_v37  ;;  %2148 = vmatpush1.msra.mxu0 %v5911_v17  ;;  %v5927_v37 = vld [vmem:[#allocation3 + $0x210] sm:$0xff] }
 0x647   :  { %2026 = vmatpush1.msra.mxu1 %v5314_v8  ;;  %2149 = vmatprep.subr.mxu0 %v5915_v20  ;;  %v5931_v8 = vld [vmem:[#allocation3 + $0x1e8] sm:$0xff] }
 0x648   :  { %2027 = vmatprep.subr.mxu1 %v5318_v30  ;;  %2150 = vmatpush1.msra.mxu0 %v5919_v33  ;;  %v5935_v30 = vld [vmem:[#allocation3 + $0x1e0] sm:$0xff] }
 0x649   :  { %2028 = vmatpush1.msra.mxu1 %v5322_v46  ;;  %2151 = vmatprep.subr.mxu0 %v5923_v16  ;;  %v5939_v46 = vld [vmem:[#allocation3 + $0x1b8] sm:$0xff] }
 0x64a   :  { %2029 = vmatprep.subr.mxu1 %v5326_v22  ;;  %2152 = vmatpush1.msra.mxu0 %v5927_v37  ;;  %v5943_v22 = vld [vmem:[#allocation3 + $0x1b0] sm:$0xff] }
 0x64b   :  { %2030 = vmatpush1.msra.mxu1 %v5330_v31  ;;  %2153 = vmatprep.subr.mxu0 %v5931_v8  ;;  %v5947_v31 = vld [vmem:[#allocation3 + $0x188] sm:$0xff] }
 0x64c   :  { %2031 = vmatprep.subr.mxu1 %v5334_v23  ;;  %2154 = vmatpush1.msra.mxu0 %v5935_v30  ;;  %v5951_v23 = vld [vmem:[#allocation3 + $0x180] sm:$0xff] }
 0x64d   :  { %2032 = vmatpush1.msra.mxu1 %v5338_v40  ;;  %2155 = vmatprep.subr.mxu0 %v5939_v46  ;;  %v5955_v40 = vld [vmem:[#allocation3 + $0x158] sm:$0xff] }
 0x64e   :  { %2033 = vmatprep.subr.mxu1 %v5342_v18  ;;  %2156 = vmatpush1.msra.mxu0 %v5943_v22  ;;  %v5959_v18 = vld [vmem:[#allocation3 + $0x150] sm:$0xff] }
 0x64f   :  { %2034 = vmatpush1.msra.mxu1 %v8186_v3  ;;  %2157 = vmatprep.subr.mxu0 %v5947_v31  ;;  %v5963_v3 = vld [vmem:[#allocation3 + $0x128] sm:$0xff] }
 0x650   :  { %2035 = vmatprep.subr.mxu1 %v8187_v47  ;;  %2158 = vmatpush1.msra.mxu0 %v5951_v23  ;;  %v5967_v47 = vld [vmem:[#allocation3 + $0x120] sm:$0xff] }
 0x651   :  { %2036 = vmatpush1.msra.mxu1 %v8188_v4  ;;  %2159 = vmatprep.subr.mxu0 %v5955_v40  ;;  %v5971_v4 = vld [vmem:[#allocation3 + $0xf8] sm:$0xff] }
 0x652   :  { %2037 = vmatprep.subr.mxu1 %v8189_v7  ;;  %2160 = vmatpush1.msra.mxu0 %v5959_v18  ;;  %v5975_v7 = vld [vmem:[#allocation3 + $0xf0] sm:$0xff] }
 0x653   :  { %2038 = vmatpush1.msra.mxu1 %v8190_v35  ;;  %2161 = vmatprep.subr.mxu0 %v5963_v3  ;;  %v5979_v35 = vld [vmem:[#allocation3 + $0xc8] sm:$0xff] }
 0x654   :  { %2039 = vmatprep.subr.mxu1 %v8191_v0  ;;  %2162 = vmatpush1.msra.mxu0 %v5967_v47  ;;  %v5983_v0 = vld [vmem:[#allocation3 + $0xc0] sm:$0xff] }
 0x655   :  { %2040 = vmatpush1.msra.mxu1 %v8192_v12  ;;  %2163 = vmatprep.subr.mxu0 %v5971_v4  ;;  %v5987_v12 = vld [vmem:[#allocation3 + $0x98] sm:$0xff] }
 0x656   :  { %2041 = vmatprep.subr.mxu1 %v8193_v43  ;;  %2164 = vmatpush1.msra.mxu0 %v5975_v7  ;;  %v5991_v43 = vld [vmem:[#allocation3 + $0x90] sm:$0xff] }
 0x657   :  { %2042 = vmatpush1.msra.mxu1 %v8194_v60  ;;  %2165 = vmatprep.subr.mxu0 %v5979_v35  ;;  %v5995_v60 = vld [vmem:[#allocation3 + $0x68] sm:$0xff] }
 0x658   :  { %2043 = vmatprep.subr.mxu1 %v8195_v11  ;;  %2166 = vmatpush1.msra.mxu0 %v5983_v0  ;;  %8344 = vst [vmem:[#allocation31_spill] sm:$0xff] %v5995_v60  ;;  %v5999_v11 = vld [vmem:[#allocation3 + $0x60] sm:$0xff] }
 0x659   :  { %2044 = vmatpush1.msra.mxu1 %v8196_v36  ;;  %2167 = vmatprep.subr.mxu0 %v5987_v12  ;;  %8345 = vst [vmem:[#allocation33_spill] sm:$0xff] %v5999_v11  ;;  %v6003_v36 = vld [vmem:[#allocation3 + $0x38] sm:$0xff] }
 0x65a   :  { %2045 = vmatprep.subr.mxu1 %v8197_v32  ;;  %2168 = vmatpush1.msra.mxu0 %v5991_v43  ;;  %8346 = vst [vmem:[#allocation32_spill] sm:$0xff] %v6003_v36  ;;  %v6007_v32 = vld [vmem:[#allocation3 + $0x30] sm:$0xff] }
 0x65b   :  { %2046 = vmatpush1.msra.mxu1 %v8198_v34  ;;  %2169 = vmatprep.subr.mxu0 %v5995_v60  ;;  %8347 = vst [vmem:[#allocation34_spill] sm:$0xff] %v6007_v32  ;;  %v6011_v34 = vld [vmem:[#allocation3 + $0x8] sm:$0xff] }
 0x65c   :  { %2047 = vmatprep.subr.mxu1 %v8199_v61  ;;  %2170 = vmatpush1.msra.mxu0 %v5999_v11  ;;  %8348 = vst [vmem:[#allocation59_spill] sm:$0xff] %v6011_v34  ;;  %v6015_v61 = vld [vmem:[#allocation3] sm:$0xff] }
 0x65d   :  { %2048 = vmatpush1.msra.mxu1 %v8200_v6  ;;  %2171 = vmatprep.subr.mxu0 %v6003_v36  ;;  %8349 = vst [vmem:[#allocation60_spill] sm:$0xff] %v6015_v61  ;;  %v6019_v6 = vld [vmem:[#allocation3 + $0x5d8] sm:$0xff] }
 0x65e   :  { %2049 = vmatprep.subr.mxu1 %v8202_v9  ;;  %2172 = vmatpush1.msra.mxu0 %v6007_v32  ;;  %8350 = vst [vmem:[#allocation163_spill] sm:$0xff] %v6019_v6  ;;  %v6023_v9 = vld [vmem:[#allocation3 + $0x5d0] sm:$0xff] }
 0x65f   :  { %2050 = vmatpush1.msra.mxu1 %v8204_v26  ;;  %2173 = vmatprep.subr.mxu0 %v6011_v34  ;;  %8351 = vst [vmem:[#allocation164_spill] sm:$0xff] %v6023_v9  ;;  %v6027_v26 = vld [vmem:[#allocation3 + $0x5a8] sm:$0xff] }
 0x660   :  { %2051 = vmatprep.subr.mxu1 %v8206_v39  ;;  %2174 = vmatpush1.msra.mxu0 %v6015_v61  ;;  %8352 = vst [vmem:[#allocation165_spill] sm:$0xff] %v6027_v26  ;;  %v6031_v39 = vld [vmem:[#allocation3 + $0x5a0] sm:$0xff] }
 0x661   :  { %2052 = vmatpush2.msra.mxu1 %v8208_v25  ;;  %2175 = vmatprep.subr.mxu0 %v6019_v6  ;;  %8353 = vst [vmem:[#allocation114_spill] sm:$0xff] %v6031_v39  ;;  %v6035_v25 = vld [vmem:[#allocation3 + $0x578] sm:$0xff] }
 0x662   :  { %2053 = vmatprep.subr.mxu1 %v8210_v13  ;;  %2176 = vmatpush2.msra.mxu0 %v6023_v9  ;;  %8354 = vst [vmem:[#allocation166_spill] sm:$0xff] %v6035_v25  ;;  %v6039_v13 = vld [vmem:[#allocation3 + $0x570] sm:$0xff] }
 0x663   :  { %2054 = vmatpush2.msra.mxu1 %v8212_v15  ;;  %2177 = vmatprep.subr.mxu0 %v6027_v26  ;;  %8355 = vst [vmem:[#allocation116_spill] sm:$0xff] %v6039_v13  ;;  %v6043_v15 = vld [vmem:[#allocation3 + $0x548] sm:$0xff] }
 0x664   :  { %2055 = vmatprep.subr.mxu1 %v8214_v14  ;;  %2178 = vmatpush2.msra.mxu0 %v6031_v39  ;;  %8356 = vst [vmem:[#allocation167_spill] sm:$0xff] %v6043_v15  ;;  %v6047_v14 = vld [vmem:[#allocation3 + $0x540] sm:$0xff] }
 0x665   :  { %2056 = vmatpush2.msra.mxu1 %v8216_v45  ;;  %2179 = vmatprep.subr.mxu0 %v6035_v25  ;;  %8357 = vst [vmem:[#allocation118_spill] sm:$0xff] %v6047_v14  ;;  %v6051_v45 = vld [vmem:[#allocation3 + $0x518] sm:$0xff] }
 0x666   :  { %2057 = vmatprep.subr.mxu1 %v8218_v54  ;;  %2180 = vmatpush2.msra.mxu0 %v6039_v13  ;;  %8358 = vst [vmem:[#allocation168_spill] sm:$0xff] %v6051_v45  ;;  %v8359_v54 = vld [vmem:[#allocation158_spill] sm:$0xff] }
 0x667   :  { %2058 = vmatpush2.msra.mxu1 %v8220_v52  ;;  %2181 = vmatprep.subr.mxu0 %v6043_v15  ;;  %v8361_v52 = vld [vmem:[#allocation160_spill] sm:$0xff] }
 0x668   :  { %2059 = vmatprep.subr.mxu1 %v8222_v49  ;;  %2182 = vmatpush2.msra.mxu0 %v6047_v14  ;;  %v8363_v49 = vld [vmem:[#allocation162_spill] sm:$0xff] }
 0x669   :  { %2060 = vmatpush2.msra.mxu1 %v8224_v29  ;;  %2183 = vmatprep.subr.mxu0 %v6051_v45  ;;  %v8365_v29 = vld [vmem:[#allocation27_spill] sm:$0xff] }
 0x66a   :  { %2061 = vmatprep.subr.mxu1 %v8359_v54  ;;  %2184 = vmatpush2.msra.mxu0 %v6055_v53  ;;  %v8380_v54 = vld [vmem:[#allocation174_spill] sm:$0xff] }
 0x66b   :  { %2062 = vmatpush2.msra.mxu1 %v8361_v52  ;;  %2185 = vmatprep.subr.mxu0 %v6059_v24  ;;  %v8381_v52 = vld [vmem:[#allocation175_spill] sm:$0xff] }
 0x66c   :  { %2063 = vmatprep.subr.mxu1 %v8363_v49  ;;  %2186 = vmatpush2.msra.mxu0 %v6063_v62  ;;  %v8382_v49 = vld [vmem:[#allocation176_spill] sm:$0xff] }
 0x66d   :  { %2064 = vmatpush2.msra.mxu1 %v8365_v29  ;;  %2187 = vmatprep.subr.mxu0 %v6067_v27  ;;  %v8383_v29 = vld [vmem:[#allocation177_spill] sm:$0xff] }
 0x66e   :  { %2065 = vmatprep.subr.mxu1 %v8367_v42  ;;  %2188 = vmatpush2.msra.mxu0 %v6071_v1  ;;  %v8384_v42 = vld [vmem:[#allocation178_spill] sm:$0xff] }
 0x66f   :  { %2066 = vmatpush2.msra.mxu1 %v8369_v10  ;;  %2189 = vmatprep.subr.mxu0 %v6075_v2  ;;  %v8385_v10 = vld [vmem:[#allocation179_spill] sm:$0xff]  ;;  %v8473_v2 = vld [vmem:[#allocation42_spill] sm:$0xff] }
 0x670   :  { %2067 = vmatprep.subr.mxu1 %v8371_v56  ;;  %2190 = vmatpush2.msra.mxu0 %v6079_v5  ;;  %v8386_v56 = vld [vmem:[#allocation180_spill] sm:$0xff] }
 0x671   :  { %2068 = vmatpush2.msra.mxu1 %v8373_v21  ;;  %2191 = vmatprep.subr.mxu0 %v6083_v57  ;;  %v8387_v21 = vld [vmem:[#allocation181_spill] sm:$0xff]  ;;  %v8472_v5 = vld [vmem:[#allocation40_spill] sm:$0xff] }
 0x672   :  { %2069 = vmatprep.subr.mxu1 %v8375_v44  ;;  %2192 = vmatpush2.msra.mxu0 %v6087_v38  ;;  %v8388_v44 = vld [vmem:[#allocation182_spill] sm:$0xff]  ;;  %v8471_v38 = vld [vmem:[#allocation41_spill] sm:$0xff] }
 0x673   :  { %2070 = vmatpush2.msra.mxu1 %v8377_v51  ;;  %2193 = vmatprep.subr.mxu0 %v8378_v50  ;;  %v8389_v51 = vld [vmem:[#allocation183_spill] sm:$0xff]  ;;  %v8390_v50 = vld [vmem:[#allocation184_spill] sm:$0xff] }
 0x674   :  { %2071 = vmatprep.subr.mxu1 %v8379_v19  ;;  %2194 = vmatpush2.msra.mxu0 %v8380_v54  ;;  %v8391_v19 = vld [vmem:[#allocation185_spill] sm:$0xff]  ;;  %v8392_v54 = vld [vmem:[#allocation186_spill] sm:$0xff] }
 0x675   :  { %2072 = vmatpush2.msra.mxu1 %v8381_v52  ;;  %2195 = vmatprep.subr.mxu0 %v8382_v49  ;;  %v8393_v52 = vld [vmem:[#allocation187_spill] sm:$0xff]  ;;  %v8394_v49 = vld [vmem:[#allocation188_spill] sm:$0xff] }
 0x676   :  { %2073 = vmatprep.subr.mxu1 %v8383_v29  ;;  %2196 = vmatpush2.msra.mxu0 %v8384_v42  ;;  %v8395_v29 = vld [vmem:[#allocation189_spill] sm:$0xff]  ;;  %v8396_v42 = vld [vmem:[#allocation190_spill] sm:$0xff] }
 0x677   :  { %2074 = vmatpush2.msra.mxu1 %v8385_v10  ;;  %2197 = vmatprep.subr.mxu0 %v8386_v56  ;;  %v8397_v10 = vld [vmem:[#allocation191_spill] sm:$0xff]  ;;  %v8398_v56 = vld [vmem:[#allocation192_spill] sm:$0xff] }
 0x678   :  { %2075 = vmatprep.subr.mxu1 %v8387_v21  ;;  %2198 = vmatpush2.msra.mxu0 %v8388_v44  ;;  %v8399_v21 = vld [vmem:[#allocation193_spill] sm:$0xff]  ;;  %v8400_v44 = vld [vmem:[#allocation194_spill] sm:$0xff] }
 0x679   :  { %2076 = vmatpush2.msra.mxu1 %v8389_v51  ;;  %2199 = vmatprep.subr.mxu0 %v8390_v50  ;;  %v8401_v51 = vld [vmem:[#allocation195_spill] sm:$0xff]  ;;  %v8402_v50 = vld [vmem:[#allocation196_spill] sm:$0xff] }
 0x67a   :  { %2077 = vmatprep.subr.mxu1 %v8391_v19  ;;  %2200 = vmatpush2.msra.mxu0 %v8392_v54  ;;  %v6117_v19 = vld [vmem:[#allocation3 + $0x2e8] sm:$0xff]  ;;  %v6120_v54 = vld [vmem:[#allocation3 + $0x2e0] sm:$0xff] }
 0x67b   :  { %2078 = vmatpush2.msra.mxu1 %v8393_v52  ;;  %2201 = vmatprep.subr.mxu0 %v8394_v49  ;;  %8403 = vst [vmem:[#allocation172_spill] sm:$0xff] %v6117_v19  ;;  %8404 = vst [vmem:[#allocation73_spill] sm:$0xff] %v6120_v54  ;;  %v8405_v52 = vld [vmem:[#allocation197_spill] sm:$0xff]  ;;  %v6124_v49 = vld [vmem:[#allocation3 + $0x2b8] sm:$0xff] }
 0x67c   :  { %2079 = vmatprep.subr.mxu1 %v8395_v29  ;;  %2202 = vmatpush2.msra.mxu0 %v8396_v42  ;;  %8406 = vst [vmem:[#allocation128_spill] sm:$0xff] %v6124_v49  ;;  %v8407_v29 = vld [vmem:[#allocation198_spill] sm:$0xff]  ;;  %v6128_v42 = vld [vmem:[#allocation3 + $0x2b0] sm:$0xff] }
 0x67d   :  { %2080 = vmatpush2.msra.mxu1 %v8397_v10  ;;  %2203 = vmatprep.subr.mxu0 %v8398_v56  ;;  %8408 = vst [vmem:[#allocation106_spill] sm:$0xff] %v6128_v42  ;;  %v6131_v10 = vld [vmem:[#allocation3 + $0x288] sm:$0xff]  ;;  %v6134_v56 = vld [vmem:[#allocation3 + $0x280] sm:$0xff] }
 0x67e   :  { %2081 = vmatprep.subr.mxu1 %v8399_v21  ;;  %2204 = vmatpush2.msra.mxu0 %v8400_v44  ;;  %8409 = vst [vmem:[#allocation130_spill] sm:$0xff] %v6131_v10  ;;  %8410 = vst [vmem:[#allocation74_spill] sm:$0xff] %v6134_v56  ;;  %v6137_v21 = vld [vmem:[#allocation3 + $0x258] sm:$0xff]  ;;  %v6140_v44 = vld [vmem:[#allocation3 + $0x250] sm:$0xff] }
 0x67f   :  { %2082 = vmatpush2.msra.mxu1 %v8401_v51  ;;  %2205 = vmatprep.subr.mxu0 %v8402_v50  ;;  %8411 = vst [vmem:[#allocation132_spill] sm:$0xff] %v6137_v21  ;;  %8412 = vst [vmem:[#allocation108_spill] sm:$0xff] %v6140_v44  ;;  %v6143_v51 = vld [vmem:[#allocation3 + $0x228] sm:$0xff]  ;;  %v6146_v50 = vld [vmem:[#allocation3 + $0x220] sm:$0xff] }
 0x680   :  { %2084 = vmatmul.mubr.f32.vlgmr.msra.gmra.mxu1 %v5886_v48  ;;  %2214 = vmatprep.subr.mxu1 %v6117_v19  ;;  %8413 = vst [vmem:[#allocation144_spill] sm:$0xff] %v6143_v51  ;;  %8414 = vst [vmem:[#allocation75_spill] sm:$0xff] %v6146_v50  ;;  %v8470_v19 = vld [vmem:[#allocation39_spill] sm:$0xff] }
 0x681   :  { %2215 = vmatpush1.msra.mxu1 %v6120_v54  ;;  %2206 = vmatpush2.msra.mxu0 %v8405_v52  ;;  %v6149_v52 = vld [vmem:[#allocation3 + $0x1f8] sm:$0xff]  ;;  %v8468_v54 = vld [vmem:[#allocation208_spill] sm:$0xff] }
 0x682   :  { %2216 = vmatprep.subr.mxu1 %v6124_v49  ;;  %2285 = vmatprep.subr.mxu0 %v8407_v29  ;;  %8415 = vst [vmem:[#allocation146_spill] sm:$0xff] %v6149_v52  ;;  %v6152_v29 = vld [vmem:[#allocation3 + $0x1f0] sm:$0xff]  ;;  %v8466_v49 = vld [vmem:[#allocation206_spill] sm:$0xff] }
 0x683   :  { %2217 = vmatpush1.msra.mxu1 %v6128_v42  ;;  %8416 = vst [vmem:[#allocation110_spill] sm:$0xff] %v6152_v29  ;;  %v8464_v42 = vld [vmem:[#allocation204_spill] sm:$0xff] }
 0x684   :  { %2218 = vmatprep.subr.mxu1 %v6131_v10  ;;  %v8462_v10 = vld [vmem:[#allocation202_spill] sm:$0xff] }
 0x685   :  { %2219 = vmatpush1.msra.mxu1 %v6134_v56  ;;  %v8460_v56 = vld [vmem:[#allocation200_spill] sm:$0xff] }
 0x686   :  { %2220 = vmatprep.subr.mxu1 %v6137_v21  ;;  %v6155_v21 = vld [vmem:[#allocation3 + $0x1c8] sm:$0xff] }
 0x687   :  { %2221 = vmatpush1.msra.mxu1 %v6140_v44  ;;  %8417 = vst [vmem:[#allocation148_spill] sm:$0xff] %v6155_v21  ;;  %v6158_v44 = vld [vmem:[#allocation3 + $0x1c0] sm:$0xff] }
 0x688   :  { %2222 = vmatprep.subr.mxu1 %v6143_v51  ;;  %8418 = vst [vmem:[#allocation76_spill] sm:$0xff] %v6158_v44  ;;  %v6161_v51 = vld [vmem:[#allocation3 + $0x198] sm:$0xff] }
 0x689   :  { %2223 = vmatpush1.msra.mxu1 %v6146_v50  ;;  %8419 = vst [vmem:[#allocation150_spill] sm:$0xff] %v6161_v51  ;;  %v6164_v50 = vld [vmem:[#allocation3 + $0x190] sm:$0xff] }
 0x68a   :  { %2224 = vmatprep.subr.mxu1 %v6149_v52  ;;  %8420 = vst [vmem:[#allocation112_spill] sm:$0xff] %v6164_v50  ;;  %v6167_v52 = vld [vmem:[#allocation3 + $0x168] sm:$0xff] }
 0x68b   :  { %2225 = vmatpush1.msra.mxu1 %v6152_v29  ;;  %8421 = vst [vmem:[#allocation152_spill] sm:$0xff] %v6167_v52  ;;  %v6170_v29 = vld [vmem:[#allocation3 + $0x160] sm:$0xff] }
 0x68c   :  { %2226 = vmatprep.subr.mxu1 %v6155_v21  ;;  %8422 = vst [vmem:[#allocation77_spill] sm:$0xff] %v6170_v29  ;;  %v6173_v21 = vld [vmem:[#allocation3 + $0x138] sm:$0xff] }
 0x68d   :  { %2227 = vmatpush1.msra.mxu1 %v6158_v44  ;;  %8423 = vst [vmem:[#allocation154_spill] sm:$0xff] %v6173_v21  ;;  %v6176_v44 = vld [vmem:[#allocation3 + $0x130] sm:$0xff] }
 0x68e   :  { %2228 = vmatprep.subr.mxu1 %v6161_v51  ;;  %8424 = vst [vmem:[#allocation78_spill] sm:$0xff] %v6176_v44  ;;  %v6179_v51 = vld [vmem:[#allocation3 + $0x108] sm:$0xff] }
 0x68f   :  { %2229 = vmatpush1.msra.mxu1 %v6164_v50  ;;  %8425 = vst [vmem:[#allocation156_spill] sm:$0xff] %v6179_v51  ;;  %v6182_v50 = vld [vmem:[#allocation3 + $0x100] sm:$0xff] }
 0x690   :  { %2230 = vmatprep.subr.mxu1 %v6167_v52  ;;  %8426 = vst [vmem:[#allocation79_spill] sm:$0xff] %v6182_v50  ;;  %v6185_v52 = vld [vmem:[#allocation3 + $0xd8] sm:$0xff] }
 0x691   :  { %2231 = vmatpush1.msra.mxu1 %v6170_v29  ;;  %8427 = vst [vmem:[#allocation80_spill] sm:$0xff] %v6185_v52  ;;  %v6188_v29 = vld [vmem:[#allocation3 + $0xd0] sm:$0xff] }
 0x692   :  { %2232 = vmatprep.subr.mxu1 %v6173_v21  ;;  %8428 = vst [vmem:[#allocation81_spill] sm:$0xff] %v6188_v29  ;;  %v6191_v21 = vld [vmem:[#allocation3 + $0xa8] sm:$0xff] }
 0x693   :  { %2233 = vmatpush1.msra.mxu1 %v6176_v44  ;;  %8429 = vst [vmem:[#allocation82_spill] sm:$0xff] %v6191_v21  ;;  %v6194_v44 = vld [vmem:[#allocation3 + $0xa0] sm:$0xff] }
 0x694   :  { %2234 = vmatprep.subr.mxu1 %v6179_v51  ;;  %8430 = vst [vmem:[#allocation83_spill] sm:$0xff] %v6194_v44  ;;  %v6197_v51 = vld [vmem:[#allocation3 + $0x78] sm:$0xff] }
 0x695   :  { %2235 = vmatpush1.msra.mxu1 %v6182_v50  ;;  %8431 = vst [vmem:[#allocation84_spill] sm:$0xff] %v6197_v51  ;;  %v6200_v50 = vld [vmem:[#allocation3 + $0x70] sm:$0xff] }
 0x696   :  { %2236 = vmatprep.subr.mxu1 %v6185_v52  ;;  %8432 = vst [vmem:[#allocation85_spill] sm:$0xff] %v6200_v50  ;;  %v6203_v52 = vld [vmem:[#allocation3 + $0x48] sm:$0xff] }
 0x697   :  { %2237 = vmatpush1.msra.mxu1 %v6188_v29  ;;  %8433 = vst [vmem:[#allocation86_spill] sm:$0xff] %v6203_v52  ;;  %v6206_v29 = vld [vmem:[#allocation3 + $0x40] sm:$0xff] }
 0x698   :  { %2238 = vmatprep.subr.mxu1 %v6191_v21  ;;  %8434 = vst [vmem:[#allocation87_spill] sm:$0xff] %v6206_v29  ;;  %v6209_v21 = vld [vmem:[#allocation3 + $0x18] sm:$0xff] }
 0x699   :  { %2239 = vmatpush1.msra.mxu1 %v6194_v44  ;;  %8435 = vst [vmem:[#allocation88_spill] sm:$0xff] %v6209_v21  ;;  %v6212_v44 = vld [vmem:[#allocation3 + $0x10] sm:$0xff] }
 0x69a   :  { %2240 = vmatprep.subr.mxu1 %v6197_v51  ;;  %8436 = vst [vmem:[#allocation89_spill] sm:$0xff] %v6212_v44  ;;  %v6215_v51 = vld [vmem:[#allocation3 + $0x5e8] sm:$0xff] }
 0x69b   :  { %2241 = vmatpush1.msra.mxu1 %v6200_v50  ;;  %8437 = vst [vmem:[#allocation90_spill] sm:$0xff] %v6215_v51  ;;  %v6218_v50 = vld [vmem:[#allocation3 + $0x5e0] sm:$0xff] }
 0x69c   :  { %2242 = vmatprep.subr.mxu1 %v6203_v52  ;;  %8438 = vst [vmem:[#allocation91_spill] sm:$0xff] %v6218_v50  ;;  %v6221_v52 = vld [vmem:[#allocation3 + $0x5b8] sm:$0xff] }
 0x69d   :  { %2243 = vmatpush1.msra.mxu1 %v6206_v29  ;;  %8439 = vst [vmem:[#allocation92_spill] sm:$0xff] %v6221_v52  ;;  %v6224_v29 = vld [vmem:[#allocation3 + $0x5b0] sm:$0xff] }
 0x69e   :  { %2244 = vmatprep.subr.mxu1 %v6209_v21  ;;  %8440 = vst [vmem:[#allocation93_spill] sm:$0xff] %v6224_v29  ;;  %v6227_v21 = vld [vmem:[#allocation3 + $0x588] sm:$0xff] }
 0x69f   :  { %2245 = vmatpush1.msra.mxu1 %v6212_v44  ;;  %8441 = vst [vmem:[#allocation94_spill] sm:$0xff] %v6227_v21  ;;  %v6230_v44 = vld [vmem:[#allocation3 + $0x580] sm:$0xff] }
 0x6a0   :  { %2246 = vmatprep.subr.mxu1 %v6215_v51  ;;  %8442 = vst [vmem:[#allocation95_spill] sm:$0xff] %v6230_v44  ;;  %v6233_v51 = vld [vmem:[#allocation3 + $0x558] sm:$0xff] }
 0x6a1   :  { %2247 = vmatpush2.msra.mxu1 %v6218_v50  ;;  %8443 = vst [vmem:[#allocation96_spill] sm:$0xff] %v6233_v51  ;;  %v6236_v50 = vld [vmem:[#allocation3 + $0x550] sm:$0xff] }
 0x6a2   :  { %2248 = vmatprep.subr.mxu1 %v6221_v52  ;;  %8444 = vst [vmem:[#allocation97_spill] sm:$0xff] %v6236_v50  ;;  %v6239_v52 = vld [vmem:[#allocation3 + $0x528] sm:$0xff] }
 0x6a3   :  { %2249 = vmatpush2.msra.mxu1 %v6224_v29  ;;  %8445 = vst [vmem:[#allocation98_spill] sm:$0xff] %v6239_v52  ;;  %v6242_v29 = vld [vmem:[#allocation3 + $0x520] sm:$0xff] }
 0x6a4   :  { %2250 = vmatprep.subr.mxu1 %v6227_v21  ;;  %8446 = vst [vmem:[#allocation99_spill] sm:$0xff] %v6242_v29  ;;  %v6245_v21 = vld [vmem:[#allocation3 + $0x4f8] sm:$0xff] }
 0x6a5   :  { %2251 = vmatpush2.msra.mxu1 %v6230_v44  ;;  %8447 = vst [vmem:[#allocation101_spill] sm:$0xff] %v6245_v21  ;;  %v6248_v44 = vld [vmem:[#allocation3 + $0x4f0] sm:$0xff] }
 0x6a6   :  { %2252 = vmatprep.subr.mxu1 %v6233_v51  ;;  %8448 = vst [vmem:[#allocation103_spill] sm:$0xff] %v6248_v44  ;;  %v6251_v51 = vld [vmem:[#allocation3 + $0x4c8] sm:$0xff] }
 0x6a7   :  { %2253 = vmatpush2.msra.mxu1 %v6236_v50  ;;  %8449 = vst [vmem:[#allocation105_spill] sm:$0xff] %v6251_v51  ;;  %v6254_v50 = vld [vmem:[#allocation3 + $0x4c0] sm:$0xff] }
 0x6a8   :  { %2254 = vmatprep.subr.mxu1 %v6239_v52  ;;  %8450 = vst [vmem:[#allocation107_spill] sm:$0xff] %v6254_v50  ;;  %v6257_v52 = vld [vmem:[#allocation3 + $0x498] sm:$0xff] }
 0x6a9   :  { %2255 = vmatpush2.msra.mxu1 %v6242_v29  ;;  %8451 = vst [vmem:[#allocation109_spill] sm:$0xff] %v6257_v52  ;;  %v6260_v29 = vld [vmem:[#allocation3 + $0x490] sm:$0xff] }
 0x6aa   :  { %2256 = vmatprep.subr.mxu1 %v6245_v21  ;;  %8452 = vst [vmem:[#allocation111_spill] sm:$0xff] %v6260_v29  ;;  %v6263_v21 = vld [vmem:[#allocation3 + $0x468] sm:$0xff] }
 0x6ab   :  { %2257 = vmatpush2.msra.mxu1 %v6248_v44  ;;  %8453 = vst [vmem:[#allocation113_spill] sm:$0xff] %v6263_v21  ;;  %v6266_v44 = vld [vmem:[#allocation3 + $0x460] sm:$0xff] }
 0x6ac   :  { %2258 = vmatprep.subr.mxu1 %v6251_v51  ;;  %8454 = vst [vmem:[#allocation115_spill] sm:$0xff] %v6266_v44  ;;  %v6269_v51 = vld [vmem:[#allocation3 + $0x438] sm:$0xff] }
 0x6ad   :  { %2259 = vmatpush2.msra.mxu1 %v6254_v50  ;;  %8455 = vst [vmem:[#allocation117_spill] sm:$0xff] %v6269_v51  ;;  %v6272_v50 = vld [vmem:[#allocation3 + $0x430] sm:$0xff] }
 0x6ae   :  { %2260 = vmatprep.subr.mxu1 %v6257_v52  ;;  %8456 = vst [vmem:[#allocation119_spill] sm:$0xff] %v6272_v50  ;;  %v6275_v52 = vld [vmem:[#allocation3 + $0x408] sm:$0xff] }
 0x6af   :  { %2261 = vmatpush2.msra.mxu1 %v6260_v29  ;;  %8457 = vst [vmem:[#allocation121_spill] sm:$0xff] %v6275_v52  ;;  %v6278_v29 = vld [vmem:[#allocation3 + $0x400] sm:$0xff] }
 0x6b0   :  { %2262 = vmatprep.subr.mxu1 %v6263_v21  ;;  %8458 = vst [vmem:[#allocation123_spill] sm:$0xff] %v6278_v29  ;;  %v8459_v21 = vld [vmem:[#allocation199_spill] sm:$0xff] }
 0x6b1   :  { %2263 = vmatpush2.msra.mxu1 %v6266_v44  ;;  %v8461_v44 = vld [vmem:[#allocation201_spill] sm:$0xff] }
 0x6b2   :  { %2264 = vmatprep.subr.mxu1 %v6269_v51  ;;  %v8463_v51 = vld [vmem:[#allocation203_spill] sm:$0xff] }
 0x6b3   :  { %2265 = vmatpush2.msra.mxu1 %v6272_v50  ;;  %v8465_v50 = vld [vmem:[#allocation205_spill] sm:$0xff] }
 0x6b4   :  { %2266 = vmatprep.subr.mxu1 %v6275_v52  ;;  %v8467_v52 = vld [vmem:[#allocation207_spill] sm:$0xff] }
 0x6b5   :  { %2267 = vmatpush2.msra.mxu1 %v6278_v29  ;;  %v8469_v29 = vld [vmem:[#allocation100_spill] sm:$0xff] }
 0x6b6   :  { %2268 = vmatprep.subr.mxu1 %v8459_v21 }
 0x6b7   :  { %2269 = vmatpush2.msra.mxu1 %v8460_v56 }
 0x6b8   :  { %2270 = vmatprep.subr.mxu1 %v8461_v44 }
 0x6b9   :  { %2271 = vmatpush2.msra.mxu1 %v8462_v10 }
 0x6ba   :  { %2272 = vmatprep.subr.mxu1 %v8463_v51 }
 0x6bb   :  { %2273 = vmatpush2.msra.mxu1 %v8464_v42 }
 0x6bc   :  { %2274 = vmatprep.subr.mxu1 %v8465_v50 }
 0x6bd   :  { %2275 = vmatpush2.msra.mxu1 %v8466_v49 }
 0x6be   :  { %2276 = vmatprep.subr.mxu1 %v8467_v52 }
 0x6bf   :  { %2277 = vmatpush2.msra.mxu1 %v8468_v54 }
 0x6c0   :  { %2409 = vmatprep.subr.mxu1 %v8469_v29 }
 0x700   :  { %v1943_v21 = vpop.f32.mrf.mxu1  ;;  %v2014_v42 = vpop.f32.mrf.mxu0 }
 0x701   :  { %v2090_v44 = vadd.f32 %v1943_v21, %v8470_v19  ;;  %v2092_v49 = vadd.f32 %v2014_v42, %v8472_v5 }
 0x702   :  { %v1945_v56 = vpop.f32.mrf.mxu1  ;;  %v2016_v50 = vpop.f32.mrf.mxu0 }
 0x703   :  { %v2091_v10 = vadd.f32 %v1945_v56, %v8471_v38  ;;  %v3127_v57 = vmul.f32 -1.442695, %v2090_v44  ;;  %v2093_v52 = vadd.f32 %v2016_v50, %v8473_v2  ;;  %v3129_v1 = vmul.f32 -1.442695, %v2092_v49 }
 0x705   :  { %v3128_v51 = vmul.f32 -1.442695, %v2091_v10  ;;  %3272 = vpow2.f32 %v3127_v57  ;;  %v3130_v54 = vmul.f32 -1.442695, %v2093_v52  ;;  %v8474_v10 = vld [vmem:[#allocation21_spill] sm:$0xff] }
 0x707   :  { %3274 = vpow2.f32 %v3128_v51 }
 0x708   :  { %3276 = vpow2.f32 %v3129_v1 }
 0x709   :  { %3278 = vpow2.f32 %v3130_v54 }
 0x712   :  { %v3273_v27 = vpop.eup %3272 }
 0x713   :  { %v2106_v62 = vadd.f32 1.0, %v3273_v27  ;;  %v8475_v27 = vld [vmem:[#allocation63_spill] sm:$0xff] }
 0x714   :  { %v3275_v29 = vpop.eup %3274 }
 0x715   :  { %v2107_v19 = vadd.f32 1.0, %v3275_v29  ;;  %3280 = vrcp.f32 %v2106_v62  ;;  %v3277_v38 = vpop.eup %3276  ;;  %v8476_v62 = vld [vmem:[#allocation64_spill] sm:$0xff] }
 0x716   :  { %v3279_v21 = vpop.eup %3278  ;;  %v2108_v57 = vadd.f32 1.0, %v3277_v38 }
 0x717   :  { %3282 = vrcp.f32 %v2107_v19  ;;  %v2109_v44 = vadd.f32 1.0, %v3279_v21 }
 0x718   :  { %3284 = vrcp.f32 %v2108_v57 }
 0x719   :  { %3286 = vrcp.f32 %v2109_v44 }
 0x722   :  { %v3281_v5 = vpop.eup %3280 }
 0x724   :  { %v3283_v49 = vpop.eup %3282 }
 0x725   :  { %v3285_v54 = vpop.eup %3284 }
 0x726   :  { %v3287_v19 = vpop.eup %3286  ;;  %v2126_v21 = vsub.f32 1.0, %v3285_v54  ;;  %v2130_v57 = vmul.f32 %v3285_v54, %v5886_v48  ;;  %v6318_v48 = vld [vmem:[#allocation3 + $0x2c0] sm:$0xff]  ;;  %v6358_v54 = vld [vmem:[#allocation3 + $0x1d0] sm:$0xff] }
 0x740   :  { %v2085_v56 = vpop.f32.mrf.mxu1 }
 0x741   :  { %v2118_v51 = vadd.f32 %v2085_v56, %v8474_v10  ;;  %v2127_v56 = vsub.f32 1.0, %v3287_v19 }
 0x742   :  { %v2087_v42 = vpop.f32.mrf.mxu1 }
 0x743   :  { %v2120_v2 = vmul.f32 %v3281_v5, %v2118_v51  ;;  %v2119_v50 = vadd.f32 %v2087_v42, %v7908_v41  ;;  %v2131_v5 = vmul.f32 %v3287_v19, %v5884_v55  ;;  %v6314_v55 = vld [vmem:[#allocation3 + $0x2c8] sm:$0xff] }
 0x744   :  { %v6362_v19 = vld [vmem:[#allocation3 + $0x1a8] sm:$0xff] }
 0x745   :  { %v2122_v1 = vadd.f32 %v2120_v2, %v8475_v27  ;;  %v2121_v29 = vmul.f32 %v3283_v49, %v2119_v50  ;;  %v6310_v2 = vld [vmem:[#allocation3 + $0x2f0] sm:$0xff]  ;;  %v6330_v50 = vld [vmem:[#allocation3 + $0x268] sm:$0xff]  ;;  %v6334_v49 = vld [vmem:[#allocation3 + $0x260] sm:$0xff] }
 0x746   :  { %v6338_v27 = vld [vmem:[#allocation3 + $0x238] sm:$0xff] }
 0x747   :  { %3288 = vtanh.f32 %v2122_v1  ;;  %v2123_v52 = vadd.f32 %v2121_v29, %v8476_v62  ;;  %v6342_v1 = vld [vmem:[#allocation3 + $0x230] sm:$0xff]  ;;  %v6346_v29 = vld [vmem:[#allocation3 + $0x208] sm:$0xff]  ;;  %v6350_v62 = vld [vmem:[#allocation3 + $0x200] sm:$0xff] }
 0x749   :  { %3290 = vtanh.f32 %v2123_v52  ;;  %v6354_v52 = vld [vmem:[#allocation3 + $0x1d8] sm:$0xff] }
 0x754   :  { %v3289_v38 = vpop.eup %3288 }
 0x755   :  { %v2128_v24 = vmul.f32 %v3289_v38, %v2126_v21  ;;  %v6366_v38 = vld [vmem:[#allocation3 + $0x1a0] sm:$0xff]  ;;  %v6370_v21 = vld [vmem:[#allocation3 + $0x178] sm:$0xff] }
 0x756   :  { %v3291_v10 = vpop.eup %3290 }
 0x757   :  { %v2129_v51 = vmul.f32 %v3291_v10, %v2127_v56  ;;  %v6304_v42 = vadd.f32 %v2130_v57, %v2128_v24  ;;  %v6322_v24 = vld [vmem:[#allocation3 + $0x298] sm:$0xff]  ;;  %v6326_v10 = vld [vmem:[#allocation3 + $0x290] sm:$0xff] }
 0x758   :  { %v6374_v56 = vld [vmem:[#allocation3 + $0x170] sm:$0xff]  ;;  %v6386_v57 = vld [vmem:[#allocation3 + $0x118] sm:$0xff] }
 0x759   :  { %v6302_v44 = vadd.f32 %v2131_v5, %v2129_v51  ;;  %8477 = vst [vmem:[#allocation125_spill] sm:$0xff] %v6374_v56  ;;  %v6378_v51 = vld [vmem:[#allocation3 + $0x148] sm:$0xff]  ;;  %v6382_v5 = vld [vmem:[#allocation3 + $0x140] sm:$0xff]  ;;  %8480 = vst [vmem:[#allocation131_spill] sm:$0xff] %v6386_v57 }
 0x75a   :  { %8478 = vst [vmem:[#allocation127_spill] sm:$0xff] %v6378_v51  ;;  %8479 = vst [vmem:[#allocation129_spill] sm:$0xff] %v6382_v5 }
 0x75b   :  { %2207 = vmatprep.mubr.f32.mxu0 %v6302_v44  ;;  %2278 = vmatprep.mubr.f32.mxu1 %v6302_v44 }
 0x75c   :  { %2208 = vmatmul.mubr.f32.vlgmr.msra.gmra.mxu0 %v6304_v42  ;;  %2279 = vmatmul.mubr.f32.vlgmr.msra.gmra.mxu1 %v6304_v42 }
 0x75d   :  { %2286 = vmatpush1.msra.mxu0 %v6310_v2  ;;  %2349 = vmatprep.mubr.f32.mxu0 %v6302_v44 }
 0x75e   :  { %2287 = vmatprep.subr.mxu0 %v6314_v55  ;;  %2410 = vmatpush1.msra.mxu1 %v5895_v58 }
 0x75f   :  { %2288 = vmatpush1.msra.mxu0 %v6318_v48  ;;  %2411 = vmatprep.subr.mxu1 %v5899_v59 }
 0x760   :  { %2289 = vmatprep.subr.mxu0 %v6322_v24  ;;  %2412 = vmatpush1.msra.mxu1 %v5903_v63 }
 0x761   :  { %2290 = vmatpush1.msra.mxu0 %v6326_v10  ;;  %2413 = vmatprep.subr.mxu1 %v5907_v28 }
 0x762   :  { %2291 = vmatprep.subr.mxu0 %v6330_v50  ;;  %2414 = vmatpush1.msra.mxu1 %v5911_v17 }
 0x763   :  { %2292 = vmatpush1.msra.mxu0 %v6334_v49  ;;  %2415 = vmatprep.subr.mxu1 %v5915_v20 }
 0x764   :  { %2293 = vmatprep.subr.mxu0 %v6338_v27  ;;  %2416 = vmatpush1.msra.mxu1 %v5919_v33 }
 0x765   :  { %2294 = vmatpush1.msra.mxu0 %v6342_v1  ;;  %2417 = vmatprep.subr.mxu1 %v5923_v16 }
 0x766   :  { %2295 = vmatprep.subr.mxu0 %v6346_v29  ;;  %2418 = vmatpush1.msra.mxu1 %v5927_v37 }
 0x767   :  { %2296 = vmatpush1.msra.mxu0 %v6350_v62  ;;  %2419 = vmatprep.subr.mxu1 %v5931_v8 }
 0x768   :  { %2297 = vmatprep.subr.mxu0 %v6354_v52  ;;  %2420 = vmatpush1.msra.mxu1 %v5935_v30 }
 0x769   :  { %2298 = vmatpush1.msra.mxu0 %v6358_v54  ;;  %2421 = vmatprep.subr.mxu1 %v5939_v46 }
 0x76a   :  { %2299 = vmatprep.subr.mxu0 %v6362_v19  ;;  %2422 = vmatpush1.msra.mxu1 %v5943_v22 }
 0x76b   :  { %2300 = vmatpush1.msra.mxu0 %v6366_v38  ;;  %2423 = vmatprep.subr.mxu1 %v5947_v31 }
 0x76c   :  { %2301 = vmatprep.subr.mxu0 %v6370_v21  ;;  %2424 = vmatpush1.msra.mxu1 %v5951_v23 }
 0x76d   :  { %2302 = vmatpush1.msra.mxu0 %v6374_v56  ;;  %2425 = vmatprep.subr.mxu1 %v5955_v40  ;;  %v6390_v56 = vld [vmem:[#allocation3 + $0x110] sm:$0xff] }
 0x76e   :  { %2303 = vmatprep.subr.mxu0 %v6378_v51  ;;  %2426 = vmatpush1.msra.mxu1 %v5959_v18  ;;  %8481 = vst [vmem:[#allocation134_spill] sm:$0xff] %v6390_v56  ;;  %v6394_v51 = vld [vmem:[#allocation3 + $0xe8] sm:$0xff] }
 0x76f   :  { %2304 = vmatpush1.msra.mxu0 %v6382_v5  ;;  %2427 = vmatprep.subr.mxu1 %v5963_v3  ;;  %8482 = vst [vmem:[#allocation136_spill] sm:$0xff] %v6394_v51  ;;  %v6398_v5 = vld [vmem:[#allocation3 + $0xe0] sm:$0xff] }
 0x770   :  { %2305 = vmatprep.subr.mxu0 %v6386_v57  ;;  %2428 = vmatpush1.msra.mxu1 %v5967_v47  ;;  %8483 = vst [vmem:[#allocation138_spill] sm:$0xff] %v6398_v5  ;;  %v6402_v57 = vld [vmem:[#allocation3 + $0xb8] sm:$0xff] }
 0x771   :  { %2306 = vmatpush1.msra.mxu0 %v6390_v56  ;;  %2429 = vmatprep.subr.mxu1 %v5971_v4  ;;  %8484 = vst [vmem:[#allocation140_spill] sm:$0xff] %v6402_v57  ;;  %v6406_v56 = vld [vmem:[#allocation3 + $0xb0] sm:$0xff] }
 0x772   :  { %2307 = vmatprep.subr.mxu0 %v6394_v51  ;;  %2430 = vmatpush1.msra.mxu1 %v5975_v7  ;;  %8485 = vst [vmem:[#allocation142_spill] sm:$0xff] %v6406_v56  ;;  %v6410_v51 = vld [vmem:[#allocation3 + $0x88] sm:$0xff] }
 0x773   :  { %2308 = vmatpush1.msra.mxu0 %v6398_v5  ;;  %2431 = vmatprep.subr.mxu1 %v5979_v35  ;;  %8486 = vst [vmem:[#allocation23_spill] sm:$0xff] %v6410_v51  ;;  %v6414_v5 = vld [vmem:[#allocation3 + $0x80] sm:$0xff] }
 0x774   :  { %2309 = vmatprep.subr.mxu0 %v6402_v57  ;;  %2432 = vmatpush1.msra.mxu1 %v5983_v0  ;;  %8487 = vst [vmem:[#allocation25_spill] sm:$0xff] %v6414_v5  ;;  %v6418_v57 = vld [vmem:[#allocation3 + $0x58] sm:$0xff] }
 0x775   :  { %2310 = vmatpush1.msra.mxu0 %v6406_v56  ;;  %2433 = vmatprep.subr.mxu1 %v5987_v12  ;;  %8488 = vst [vmem:[#allocation24_spill] sm:$0xff] %v6418_v57  ;;  %v6422_v56 = vld [vmem:[#allocation3 + $0x50] sm:$0xff] }
 0x776   :  { %2311 = vmatprep.subr.mxu0 %v6410_v51  ;;  %2434 = vmatpush1.msra.mxu1 %v5991_v43  ;;  %8489 = vst [vmem:[#allocation26_spill] sm:$0xff] %v6422_v56  ;;  %v6426_v51 = vld [vmem:[#allocation3 + $0x28] sm:$0xff] }
 0x777   :  { %2312 = vmatpush1.msra.mxu0 %v6414_v5  ;;  %2435 = vmatprep.subr.mxu1 %v5995_v60  ;;  %8490 = vst [vmem:[#allocation22_spill] sm:$0xff] %v6426_v51  ;;  %v6430_v5 = vld [vmem:[#allocation3 + $0x20] sm:$0xff] }
 0x778   :  { %2313 = vmatprep.subr.mxu0 %v6418_v57  ;;  %2436 = vmatpush1.msra.mxu1 %v5999_v11  ;;  %8491 = vst [vmem:[#allocation55_spill] sm:$0xff] %v6430_v5  ;;  %v6434_v57 = vld [vmem:[#allocation3 + $0x5f8] sm:$0xff] }
 0x779   :  { %2314 = vmatpush1.msra.mxu0 %v6422_v56  ;;  %2437 = vmatprep.subr.mxu1 %v6003_v36  ;;  %8492 = vst [vmem:[#allocation56_spill] sm:$0xff] %v6434_v57  ;;  %v6438_v56 = vld [vmem:[#allocation3 + $0x5f0] sm:$0xff] }
 0x77a   :  { %2315 = vmatprep.subr.mxu0 %v6426_v51  ;;  %2438 = vmatpush1.msra.mxu1 %v6007_v32  ;;  %8493 = vst [vmem:[#allocation133_spill] sm:$0xff] %v6438_v56  ;;  %v6442_v51 = vld [vmem:[#allocation3 + $0x5c8] sm:$0xff] }
 0x77b   :  { %2316 = vmatpush1.msra.mxu0 %v6430_v5  ;;  %2439 = vmatprep.subr.mxu1 %v6011_v34  ;;  %8494 = vst [vmem:[#allocation135_spill] sm:$0xff] %v6442_v51  ;;  %v6446_v5 = vld [vmem:[#allocation3 + $0x5c0] sm:$0xff] }
 0x77c   :  { %2317 = vmatprep.subr.mxu0 %v6434_v57  ;;  %2440 = vmatpush1.msra.mxu1 %v6015_v61  ;;  %8495 = vst [vmem:[#allocation137_spill] sm:$0xff] %v6446_v5  ;;  %v6450_v57 = vld [vmem:[#allocation3 + $0x598] sm:$0xff] }
 0x77d   :  { %2318 = vmatpush2.msra.mxu0 %v6438_v56  ;;  %2441 = vmatprep.subr.mxu1 %v6019_v6  ;;  %8496 = vst [vmem:[#allocation139_spill] sm:$0xff] %v6450_v57  ;;  %v6454_v56 = vld [vmem:[#allocation3 + $0x590] sm:$0xff]  ;;  %v8614_v6 = vld [vmem:[#allocation44_spill] sm:$0xff]  ;;  %v8615_v61 = vld [vmem:[#allocation46_spill] sm:$0xff] }
 0x77e   :  { %2319 = vmatprep.subr.mxu0 %v6442_v51  ;;  %2442 = vmatpush2.msra.mxu1 %v6023_v9  ;;  %8497 = vst [vmem:[#allocation141_spill] sm:$0xff] %v6454_v56  ;;  %v6458_v51 = vld [vmem:[#allocation3 + $0x568] sm:$0xff] }
 0x77f   :  { %2320 = vmatpush2.msra.mxu0 %v6446_v5  ;;  %2443 = vmatprep.subr.mxu1 %v6027_v26  ;;  %8498 = vst [vmem:[#allocation143_spill] sm:$0xff] %v6458_v51  ;;  %v6462_v5 = vld [vmem:[#allocation3 + $0x560] sm:$0xff] }
 0x780   :  { %2321 = vmatprep.subr.mxu0 %v6450_v57  ;;  %2444 = vmatpush2.msra.mxu1 %v6031_v39  ;;  %8499 = vst [vmem:[#allocation145_spill] sm:$0xff] %v6462_v5  ;;  %v6466_v57 = vld [vmem:[#allocation3 + $0x538] sm:$0xff]  ;;  %v8559_v39 = vld [vmem:[#allocation148_spill] sm:$0xff] }
 0x781   :  { %2322 = vmatpush2.msra.mxu0 %v6454_v56  ;;  %2445 = vmatprep.subr.mxu1 %v6035_v25  ;;  %8500 = vst [vmem:[#allocation147_spill] sm:$0xff] %v6466_v57  ;;  %v6470_v56 = vld [vmem:[#allocation3 + $0x530] sm:$0xff]  ;;  %v8556_v25 = vld [vmem:[#allocation75_spill] sm:$0xff] }
 0x782   :  { %2323 = vmatprep.subr.mxu0 %v6458_v51  ;;  %2446 = vmatpush2.msra.mxu1 %v6039_v13  ;;  %8501 = vst [vmem:[#allocation149_spill] sm:$0xff] %v6470_v56  ;;  %v6474_v51 = vld [vmem:[#allocation3 + $0x508] sm:$0xff] }
 0x783   :  { %2324 = vmatpush2.msra.mxu0 %v6462_v5  ;;  %2447 = vmatprep.subr.mxu1 %v6043_v15  ;;  %8502 = vst [vmem:[#allocation151_spill] sm:$0xff] %v6474_v51  ;;  %v6478_v5 = vld [vmem:[#allocation3 + $0x500] sm:$0xff]  ;;  %v8504_v15 = vld [vmem:[#allocation169_spill] sm:$0xff]  ;;  %v8553_v13 = vld [vmem:[#allocation132_spill] sm:$0xff] }
 0x784   :  { %2325 = vmatprep.subr.mxu0 %v6466_v57  ;;  %2448 = vmatpush2.msra.mxu1 %v6047_v14  ;;  %8503 = vst [vmem:[#allocation153_spill] sm:$0xff] %v6478_v5  ;;  %v6482_v57 = vld [vmem:[#allocation3 + $0x4d8] sm:$0xff] }
 0x785   :  { %2326 = vmatpush2.msra.mxu0 %v6470_v56  ;;  %2449 = vmatprep.subr.mxu1 %v6051_v45  ;;  %8505 = vst [vmem:[#allocation155_spill] sm:$0xff] %v6482_v57  ;;  %v8506_v14 = vld [vmem:[#allocation122_spill] sm:$0xff]  ;;  %v6486_v56 = vld [vmem:[#allocation3 + $0x4d0] sm:$0xff] }
 0x786   :  { %2327 = vmatprep.subr.mxu0 %v6474_v51  ;;  %2450 = vmatpush2.msra.mxu1 %v6055_v53  ;;  %8507 = vst [vmem:[#allocation157_spill] sm:$0xff] %v6486_v56  ;;  %v8508_v45 = vld [vmem:[#allocation170_spill] sm:$0xff]  ;;  %v6490_v51 = vld [vmem:[#allocation3 + $0x4a8] sm:$0xff] }
 0x787   :  { %2328 = vmatpush2.msra.mxu0 %v6478_v5  ;;  %2451 = vmatprep.subr.mxu1 %v8504_v15  ;;  %8509 = vst [vmem:[#allocation159_spill] sm:$0xff] %v6490_v51  ;;  %v8510_v53 = vld [vmem:[#allocation124_spill] sm:$0xff]  ;;  %v6494_v5 = vld [vmem:[#allocation3 + $0x4a0] sm:$0xff] }
 0x788   :  { %2329 = vmatprep.subr.mxu0 %v6482_v57  ;;  %2452 = vmatpush2.msra.mxu1 %v8506_v14  ;;  %8511 = vst [vmem:[#allocation161_spill] sm:$0xff] %v6494_v5  ;;  %v8512_v15 = vld [vmem:[#allocation171_spill] sm:$0xff]  ;;  %v6498_v57 = vld [vmem:[#allocation3 + $0x478] sm:$0xff]  ;;  %v8514_v14 = vld [vmem:[#allocation72_spill] sm:$0xff] }
 0x789   :  { %2330 = vmatpush2.msra.mxu0 %v6486_v56  ;;  %2453 = vmatprep.subr.mxu1 %v8508_v45  ;;  %8513 = vst [vmem:[#allocation35_spill] sm:$0xff] %v6498_v57  ;;  %v6502_v56 = vld [vmem:[#allocation3 + $0x470] sm:$0xff]  ;;  %v8516_v45 = vld [vmem:[#allocation126_spill] sm:$0xff] }
 0x78a   :  { %2331 = vmatprep.subr.mxu0 %v6490_v51  ;;  %2454 = vmatpush2.msra.mxu1 %v8510_v53  ;;  %8515 = vst [vmem:[#allocation37_spill] sm:$0xff] %v6502_v56  ;;  %v6506_v51 = vld [vmem:[#allocation3 + $0x448] sm:$0xff] }
 0x78b   :  { %2332 = vmatpush2.msra.mxu0 %v6494_v5  ;;  %2455 = vmatprep.subr.mxu1 %v8512_v15  ;;  %8517 = vst [vmem:[#allocation36_spill] sm:$0xff] %v6506_v51  ;;  %v8518_v53 = vld [vmem:[#allocation104_spill] sm:$0xff]  ;;  %v6510_v5 = vld [vmem:[#allocation3 + $0x440] sm:$0xff] }
 0x78c   :  { %2333 = vmatprep.subr.mxu0 %v6498_v57  ;;  %2456 = vmatpush2.msra.mxu1 %v8514_v14  ;;  %8519 = vst [vmem:[#allocation38_spill] sm:$0xff] %v6510_v5  ;;  %v6513_v15 = vld [vmem:[#allocation3 + $0x428] sm:$0xff]  ;;  %v6516_v14 = vld [vmem:[#allocation3 + $0x418] sm:$0xff] }
 0x78d   :  { %2334 = vmatpush2.msra.mxu0 %v6502_v56  ;;  %2457 = vmatprep.subr.mxu1 %v8516_v45  ;;  %8520 = vst [vmem:[#allocation61_spill] sm:$0xff] %v6513_v15  ;;  %8521 = vst [vmem:[#allocation62_spill] sm:$0xff] %v6516_v14  ;;  %v6519_v56 = vld [vmem:[#allocation3 + $0x420] sm:$0xff]  ;;  %v6522_v45 = vld [vmem:[#allocation3 + $0x410] sm:$0xff] }
 0x78e   :  { %2335 = vmatprep.subr.mxu0 %v6506_v51  ;;  %2458 = vmatpush2.msra.mxu1 %v8518_v53  ;;  %8522 = vst [vmem:[#allocation158_spill] sm:$0xff] %v6519_v56  ;;  %8523 = vst [vmem:[#allocation160_spill] sm:$0xff] %v6522_v45  ;;  %v6525_v53 = vld [vmem:[#allocation3 + $0x3f8] sm:$0xff]  ;;  %v6591_v51 = vld [vmem:[#allocation3 + $0x300] sm:$0xff] }
 0x78f   :  { %2336 = vmatpush2.msra.mxu0 %v6510_v5  ;;  %2459 = vmatprep.subr.mxu1 %v6513_v15  ;;  %8524 = vst [vmem:[#allocation162_spill] sm:$0xff] %v6525_v53  ;;  %v6528_v5 = vld [vmem:[#allocation3 + $0x3e8] sm:$0xff]  ;;  %v6531_v15 = vld [vmem:[#allocation3 + $0x3f0] sm:$0xff]  ;;  %8547 = vst [vmem:[#allocation185_spill] sm:$0xff] %v6591_v51 }
 0x790   :  { %2337 = vmatprep.subr.mxu0 %v6516_v14  ;;  %2460 = vmatpush2.msra.mxu1 %v6519_v56  ;;  %8525 = vst [vmem:[#allocation27_spill] sm:$0xff] %v6528_v5  ;;  %8526 = vst [vmem:[#allocation29_spill] sm:$0xff] %v6531_v15  ;;  %v6534_v14 = vld [vmem:[#allocation3 + $0x3e0] sm:$0xff]  ;;  %v6537_v56 = vld [vmem:[#allocation3 + $0x3c8] sm:$0xff] }
 0x791   :  { %2338 = vmatpush2.msra.mxu0 %v6522_v45  ;;  %2461 = vmatprep.subr.mxu1 %v6525_v53  ;;  %8527 = vst [vmem:[#allocation28_spill] sm:$0xff] %v6534_v14  ;;  %8528 = vst [vmem:[#allocation30_spill] sm:$0xff] %v6537_v56  ;;  %v6540_v45 = vld [vmem:[#allocation3 + $0x3b8] sm:$0xff]  ;;  %v6543_v53 = vld [vmem:[#allocation3 + $0x3c0] sm:$0xff] }
 0x792   :  { %2339 = vmatprep.subr.mxu0 %v6528_v5  ;;  %2462 = vmatpush2.msra.mxu1 %v6531_v15  ;;  %8529 = vst [vmem:[#allocation57_spill] sm:$0xff] %v6540_v45  ;;  %8530 = vst [vmem:[#allocation58_spill] sm:$0xff] %v6543_v53  ;;  %v6546_v5 = vld [vmem:[#allocation3 + $0x3b0] sm:$0xff]  ;;  %v6549_v15 = vld [vmem:[#allocation3 + $0x398] sm:$0xff] }
 0x793   :  { %2340 = vmatpush2.msra.mxu0 %v6534_v14  ;;  %2463 = vmatprep.subr.mxu1 %v6537_v56  ;;  %8531 = vst [vmem:[#allocation71_spill] sm:$0xff] %v6546_v5  ;;  %8532 = vst [vmem:[#allocation102_spill] sm:$0xff] %v6549_v15  ;;  %v6552_v14 = vld [vmem:[#allocation3 + $0x388] sm:$0xff]  ;;  %v6555_v56 = vld [vmem:[#allocation3 + $0x390] sm:$0xff] }
 0x794   :  { %2341 = vmatprep.subr.mxu0 %v6540_v45  ;;  %2464 = vmatpush2.msra.mxu1 %v6543_v53  ;;  %8533 = vst [vmem:[#allocation173_spill] sm:$0xff] %v6552_v14  ;;  %8534 = vst [vmem:[#allocation174_spill] sm:$0xff] %v6555_v56  ;;  %v6558_v45 = vld [vmem:[#allocation3 + $0x380] sm:$0xff]  ;;  %v6561_v53 = vld [vmem:[#allocation3 + $0x368] sm:$0xff] }
 0x795   :  { %2342 = vmatpush2.msra.mxu0 %v6546_v5  ;;  %2465 = vmatprep.subr.mxu1 %v6549_v15  ;;  %8535 = vst [vmem:[#allocation175_spill] sm:$0xff] %v6558_v45  ;;  %8536 = vst [vmem:[#allocation176_spill] sm:$0xff] %v6561_v53  ;;  %v6564_v5 = vld [vmem:[#allocation3 + $0x358] sm:$0xff]  ;;  %v6567_v15 = vld [vmem:[#allocation3 + $0x360] sm:$0xff] }
 0x796   :  { %2343 = vmatprep.subr.mxu0 %v6552_v14  ;;  %2466 = vmatpush2.msra.mxu1 %v6555_v56  ;;  %8537 = vst [vmem:[#allocation177_spill] sm:$0xff] %v6564_v5  ;;  %8538 = vst [vmem:[#allocation178_spill] sm:$0xff] %v6567_v15  ;;  %v6570_v14 = vld [vmem:[#allocation3 + $0x350] sm:$0xff]  ;;  %v6573_v56 = vld [vmem:[#allocation3 + $0x338] sm:$0xff] }
 0x797   :  { %2344 = vmatpush2.msra.mxu0 %v6558_v45  ;;  %2467 = vmatprep.subr.mxu1 %v6561_v53  ;;  %8539 = vst [vmem:[#allocation179_spill] sm:$0xff] %v6570_v14  ;;  %8540 = vst [vmem:[#allocation180_spill] sm:$0xff] %v6573_v56  ;;  %v6576_v45 = vld [vmem:[#allocation3 + $0x328] sm:$0xff]  ;;  %v6579_v53 = vld [vmem:[#allocation3 + $0x330] sm:$0xff] }
 0x798   :  { %2345 = vmatprep.subr.mxu0 %v6564_v5  ;;  %2468 = vmatpush2.msra.mxu1 %v6567_v15  ;;  %8541 = vst [vmem:[#allocation181_spill] sm:$0xff] %v6576_v45  ;;  %8542 = vst [vmem:[#allocation182_spill] sm:$0xff] %v6579_v53  ;;  %v6582_v5 = vld [vmem:[#allocation3 + $0x320] sm:$0xff]  ;;  %v6585_v15 = vld [vmem:[#allocation3 + $0x308] sm:$0xff] }
 0x799   :  { %2346 = vmatpush2.msra.mxu0 %v6570_v14  ;;  %2469 = vmatprep.subr.mxu1 %v6573_v56  ;;  %8543 = vst [vmem:[#allocation183_spill] sm:$0xff] %v6582_v5  ;;  %8544 = vst [vmem:[#allocation184_spill] sm:$0xff] %v6585_v15  ;;  %v8545_v14 = vld [vmem:[#allocation172_spill] sm:$0xff]  ;;  %v8546_v56 = vld [vmem:[#allocation73_spill] sm:$0xff] }
 0x79a   :  { %2347 = vmatprep.subr.mxu0 %v6576_v45  ;;  %2470 = vmatpush2.msra.mxu1 %v6579_v53  ;;  %v8548_v45 = vld [vmem:[#allocation128_spill] sm:$0xff]  ;;  %v6595_v53 = vld [vmem:[#allocation3 + $0x2f8] sm:$0xff] }
 0x79b   :  { %2348 = vmatpush2.msra.mxu0 %v6582_v5  ;;  %2471 = vmatprep.subr.mxu1 %v6585_v15  ;;  %8549 = vst [vmem:[#allocation186_spill] sm:$0xff] %v6595_v53  ;;  %v8550_v5 = vld [vmem:[#allocation106_spill] sm:$0xff] }
 0x79c   :  { %2350 = vmatmul.mubr.f32.vlgmr.msra.gmra.mxu0 %v6304_v42  ;;  %2480 = vmatprep.subr.mxu0 %v8545_v14  ;;  %v8551_v57 = vld [vmem:[#allocation130_spill] sm:$0xff]  ;;  %v8554_v14 = vld [vmem:[#allocation108_spill] sm:$0xff] }
 0x79d   :  { %2481 = vmatpush1.msra.mxu0 %v8546_v56  ;;  %2472 = vmatpush2.msra.mxu1 %v6591_v51  ;;  %v8552_v15 = vld [vmem:[#allocation74_spill] sm:$0xff]  ;;  %v8555_v56 = vld [vmem:[#allocation144_spill] sm:$0xff] }
 0x79e   :  { %2482 = vmatprep.subr.mxu0 %v8548_v45  ;;  %2551 = vmatprep.subr.mxu1 %v6595_v53  ;;  %v8557_v51 = vld [vmem:[#allocation146_spill] sm:$0xff]  ;;  %v8560_v53 = vld [vmem:[#allocation76_spill] sm:$0xff] }
 0x79f   :  { %2483 = vmatpush1.msra.mxu0 %v8550_v5  ;;  %v8558_v45 = vld [vmem:[#allocation110_spill] sm:$0xff] }
 0x7a0   :  { %2484 = vmatprep.subr.mxu0 %v8551_v57  ;;  %v8561_v5 = vld [vmem:[#allocation150_spill] sm:$0xff]  ;;  %v8562_v57 = vld [vmem:[#allocation112_spill] sm:$0xff] }
 0x7a1   :  { %2485 = vmatpush1.msra.mxu0 %v8552_v15  ;;  %v8563_v15 = vld [vmem:[#allocation152_spill] sm:$0xff] }
 0x7a2   :  { %2486 = vmatprep.subr.mxu0 %v8553_v13  ;;  %v8564_v13 = vld [vmem:[#allocation77_spill] sm:$0xff] }
 0x7a3   :  { %2487 = vmatpush1.msra.mxu0 %v8554_v14  ;;  %v8565_v14 = vld [vmem:[#allocation154_spill] sm:$0xff] }
 0x7a4   :  { %2488 = vmatprep.subr.mxu0 %v8555_v56  ;;  %v8566_v56 = vld [vmem:[#allocation78_spill] sm:$0xff] }
 0x7a5   :  { %2489 = vmatpush1.msra.mxu0 %v8556_v25  ;;  %v8567_v25 = vld [vmem:[#allocation156_spill] sm:$0xff] }
 0x7a6   :  { %2490 = vmatprep.subr.mxu0 %v8557_v51  ;;  %v8568_v51 = vld [vmem:[#allocation79_spill] sm:$0xff] }
 0x7a7   :  { %2491 = vmatpush1.msra.mxu0 %v8558_v45  ;;  %v8569_v45 = vld [vmem:[#allocation80_spill] sm:$0xff] }
 0x7a8   :  { %2492 = vmatprep.subr.mxu0 %v8559_v39  ;;  %v8570_v39 = vld [vmem:[#allocation81_spill] sm:$0xff] }
 0x7a9   :  { %2493 = vmatpush1.msra.mxu0 %v8560_v53  ;;  %v8571_v53 = vld [vmem:[#allocation82_spill] sm:$0xff] }
 0x7aa   :  { %2494 = vmatprep.subr.mxu0 %v8561_v5  ;;  %v8572_v5 = vld [vmem:[#allocation83_spill] sm:$0xff] }
 0x7ab   :  { %2495 = vmatpush1.msra.mxu0 %v8562_v57  ;;  %v8573_v57 = vld [vmem:[#allocation84_spill] sm:$0xff] }
 0x7ac   :  { %2496 = vmatprep.subr.mxu0 %v8563_v15  ;;  %v8574_v15 = vld [vmem:[#allocation85_spill] sm:$0xff] }
 0x7ad   :  { %2497 = vmatpush1.msra.mxu0 %v8564_v13  ;;  %v8575_v13 = vld [vmem:[#allocation86_spill] sm:$0xff] }
 0x7ae   :  { %2498 = vmatprep.subr.mxu0 %v8565_v14  ;;  %v8576_v14 = vld [vmem:[#allocation87_spill] sm:$0xff] }
 0x7af   :  { %2499 = vmatpush1.msra.mxu0 %v8566_v56  ;;  %v8577_v56 = vld [vmem:[#allocation88_spill] sm:$0xff] }
 0x7b0   :  { %2500 = vmatprep.subr.mxu0 %v8567_v25  ;;  %v8578_v25 = vld [vmem:[#allocation89_spill] sm:$0xff] }
 0x7b1   :  { %2501 = vmatpush1.msra.mxu0 %v8568_v51  ;;  %v8579_v51 = vld [vmem:[#allocation90_spill] sm:$0xff] }
 0x7b2   :  { %2502 = vmatprep.subr.mxu0 %v8569_v45  ;;  %v8580_v45 = vld [vmem:[#allocation91_spill] sm:$0xff] }
 0x7b3   :  { %2503 = vmatpush1.msra.mxu0 %v8570_v39  ;;  %v8581_v39 = vld [vmem:[#allocation92_spill] sm:$0xff] }
 0x7b4   :  { %2504 = vmatprep.subr.mxu0 %v8571_v53  ;;  %v8582_v53 = vld [vmem:[#allocation93_spill] sm:$0xff] }
 0x7b5   :  { %2505 = vmatpush1.msra.mxu0 %v8572_v5  ;;  %v8583_v5 = vld [vmem:[#allocation94_spill] sm:$0xff] }
 0x7b6   :  { %2506 = vmatprep.subr.mxu0 %v8573_v57  ;;  %v8584_v57 = vld [vmem:[#allocation95_spill] sm:$0xff] }
 0x7b7   :  { %2507 = vmatpush1.msra.mxu0 %v8574_v15  ;;  %v8585_v15 = vld [vmem:[#allocation96_spill] sm:$0xff] }
 0x7b8   :  { %2508 = vmatprep.subr.mxu0 %v8575_v13  ;;  %v8586_v13 = vld [vmem:[#allocation97_spill] sm:$0xff] }
 0x7b9   :  { %2509 = vmatpush1.msra.mxu0 %v8576_v14  ;;  %v8587_v14 = vld [vmem:[#allocation98_spill] sm:$0xff] }
 0x7ba   :  { %2510 = vmatprep.subr.mxu0 %v8577_v56  ;;  %v8588_v56 = vld [vmem:[#allocation99_spill] sm:$0xff] }
 0x7bb   :  { %2511 = vmatpush1.msra.mxu0 %v8578_v25  ;;  %v8589_v25 = vld [vmem:[#allocation101_spill] sm:$0xff] }
 0x7bc   :  { %2512 = vmatprep.subr.mxu0 %v8579_v51  ;;  %v8590_v51 = vld [vmem:[#allocation103_spill] sm:$0xff] }
 0x7bd   :  { %2513 = vmatpush2.msra.mxu0 %v8580_v45  ;;  %v8591_v45 = vld [vmem:[#allocation105_spill] sm:$0xff] }
 0x7be   :  { %2514 = vmatprep.subr.mxu0 %v8581_v39  ;;  %v8592_v39 = vld [vmem:[#allocation107_spill] sm:$0xff] }
 0x7bf   :  { %2515 = vmatpush2.msra.mxu0 %v8582_v53  ;;  %v8593_v53 = vld [vmem:[#allocation109_spill] sm:$0xff] }
 0x7c0   :  { %2516 = vmatprep.subr.mxu0 %v8583_v5  ;;  %v8594_v5 = vld [vmem:[#allocation111_spill] sm:$0xff] }
 0x7c1   :  { %2517 = vmatpush2.msra.mxu0 %v8584_v57  ;;  %v8595_v57 = vld [vmem:[#allocation113_spill] sm:$0xff] }
 0x7c2   :  { %2518 = vmatprep.subr.mxu0 %v8585_v15  ;;  %v8596_v15 = vld [vmem:[#allocation115_spill] sm:$0xff] }
 0x7c3   :  { %2519 = vmatpush2.msra.mxu0 %v8586_v13  ;;  %v8597_v13 = vld [vmem:[#allocation117_spill] sm:$0xff] }
 0x7c4   :  { %2520 = vmatprep.subr.mxu0 %v8587_v14  ;;  %v8598_v14 = vld [vmem:[#allocation119_spill] sm:$0xff] }
 0x7c5   :  { %2521 = vmatpush2.msra.mxu0 %v8588_v56  ;;  %v8599_v56 = vld [vmem:[#allocation121_spill] sm:$0xff] }
 0x7c6   :  { %2522 = vmatprep.subr.mxu0 %v8589_v25  ;;  %v8600_v25 = vld [vmem:[#allocation123_spill] sm:$0xff] }
 0x7c7   :  { %2523 = vmatpush2.msra.mxu0 %v8590_v51  ;;  %v6649_v51 = vld [vmem:[#allocation3 + $0x3d8] sm:$0xff] }
 0x7c8   :  { %2524 = vmatprep.subr.mxu0 %v8591_v45  ;;  %8601 = vst [vmem:[#allocation187_spill] sm:$0xff] %v6649_v51 }
 0x7c9   :  { %2525 = vmatpush2.msra.mxu0 %v8592_v39  ;;  %v6652_v39 = vld [vmem:[#allocation3 + $0x3d0] sm:$0xff] }
 0x7ca   :  { %2526 = vmatprep.subr.mxu0 %v8593_v53  ;;  %8602 = vst [vmem:[#allocation188_spill] sm:$0xff] %v6652_v39  ;;  %v8613_v53 = vld [vmem:[#allocation45_spill] sm:$0xff] }
 0x7cb   :  { %2527 = vmatpush2.msra.mxu0 %v8594_v5  ;;  %v6655_v5 = vld [vmem:[#allocation3 + $0x3a8] sm:$0xff] }
 0x7cc   :  { %2528 = vmatprep.subr.mxu0 %v8595_v57  ;;  %8603 = vst [vmem:[#allocation189_spill] sm:$0xff] %v6655_v5 }
 0x7cd   :  { %2529 = vmatpush2.msra.mxu0 %v8596_v15  ;;  %v6658_v15 = vld [vmem:[#allocation3 + $0x3a0] sm:$0xff] }
 0x7ce   :  { %2530 = vmatprep.subr.mxu0 %v8597_v13  ;;  %8604 = vst [vmem:[#allocation190_spill] sm:$0xff] %v6658_v15  ;;  %v8612_v13 = vld [vmem:[#allocation43_spill] sm:$0xff] }
 0x7cf   :  { %2531 = vmatpush2.msra.mxu0 %v8598_v14  ;;  %v6661_v14 = vld [vmem:[#allocation3 + $0x378] sm:$0xff] }
 0x7d0   :  { %2532 = vmatprep.subr.mxu0 %v8599_v56  ;;  %8605 = vst [vmem:[#allocation191_spill] sm:$0xff] %v6661_v14 }
 0x7d1   :  { %2533 = vmatpush2.msra.mxu0 %v8600_v25  ;;  %v6664_v25 = vld [vmem:[#allocation3 + $0x370] sm:$0xff] }
 0x7d2   :  { %2534 = vmatprep.subr.mxu0 %v6649_v51  ;;  %8606 = vst [vmem:[#allocation192_spill] sm:$0xff] %v6664_v25  ;;  %v6667_v51 = vld [vmem:[#allocation3 + $0x348] sm:$0xff] }
 0x7d3   :  { %2535 = vmatpush2.msra.mxu0 %v6652_v39  ;;  %8607 = vst [vmem:[#allocation193_spill] sm:$0xff] %v6667_v51  ;;  %v6670_v39 = vld [vmem:[#allocation3 + $0x340] sm:$0xff] }
 0x7d4   :  { %2536 = vmatprep.subr.mxu0 %v6655_v5  ;;  %8608 = vst [vmem:[#allocation194_spill] sm:$0xff] %v6670_v39  ;;  %v6673_v5 = vld [vmem:[#allocation3 + $0x318] sm:$0xff] }
 0x7d5   :  { %2537 = vmatpush2.msra.mxu0 %v6658_v15  ;;  %8609 = vst [vmem:[#allocation195_spill] sm:$0xff] %v6673_v5  ;;  %v6676_v15 = vld [vmem:[#allocation3 + $0x310] sm:$0xff] }
 0x7d6   :  { %2538 = vmatprep.subr.mxu0 %v6661_v14  ;;  %8610 = vst [vmem:[#allocation196_spill] sm:$0xff] %v6676_v15  ;;  %v8611_v14 = vld [vmem:[#allocation100_spill] sm:$0xff] }
 0x7d7   :  { %2539 = vmatpush2.msra.mxu0 %v6664_v25 }
 0x7d8   :  { %2540 = vmatprep.subr.mxu0 %v6667_v51 }
 0x7d9   :  { %2541 = vmatpush2.msra.mxu0 %v6670_v39 }
 0x7da   :  { %2542 = vmatprep.subr.mxu0 %v6673_v5 }
 0x7db   :  { %2543 = vmatpush2.msra.mxu0 %v6676_v15 }
 0x7dc   :  { %2675 = vmatprep.subr.mxu0 %v8611_v14 }
 0x81c   :  { %v2209_v56 = vpop.f32.mrf.mxu0  ;;  %v2280_v39 = vpop.f32.mrf.mxu1 }
 0x81d   :  { %v2356_v57 = vadd.f32 %v2209_v56, %v8612_v13  ;;  %v2358_v5 = vadd.f32 %v2280_v39, %v8614_v6 }
 0x81e   :  { %v2211_v25 = vpop.f32.mrf.mxu0  ;;  %v2282_v9 = vpop.f32.mrf.mxu1 }
 0x81f   :  { %v2357_v51 = vadd.f32 %v2211_v25, %v8613_v53  ;;  %v3131_v45 = vmul.f32 -1.442695, %v2356_v57  ;;  %v2359_v34 = vadd.f32 %v2282_v9, %v8615_v61  ;;  %v3133_v32 = vmul.f32 -1.442695, %v2358_v5 }
 0x821   :  { %v3132_v26 = vmul.f32 -1.442695, %v2357_v51  ;;  %3292 = vpow2.f32 %v3131_v45  ;;  %v3134_v15 = vmul.f32 -1.442695, %v2359_v34  ;;  %v8616_v51 = vld [vmem:[#allocation21_spill] sm:$0xff] }
 0x823   :  { %3294 = vpow2.f32 %v3132_v26 }
 0x824   :  { %3296 = vpow2.f32 %v3133_v32 }
 0x825   :  { %3298 = vpow2.f32 %v3134_v15 }
 0x82e   :  { %v3293_v36 = vpop.eup %3292 }
 0x82f   :  { %v2372_v11 = vadd.f32 1.0, %v3293_v36  ;;  %v8617_v36 = vld [vmem:[#allocation65_spill] sm:$0xff] }
 0x830   :  { %v3295_v14 = vpop.eup %3294 }
 0x831   :  { %v2373_v13 = vadd.f32 1.0, %v3295_v14  ;;  %3300 = vrcp.f32 %v2372_v11  ;;  %v3297_v25 = vpop.eup %3296  ;;  %v8618_v11 = vld [vmem:[#allocation66_spill] sm:$0xff] }
 0x832   :  { %v3299_v53 = vpop.eup %3298  ;;  %v2374_v45 = vadd.f32 1.0, %v3297_v25 }
 0x833   :  { %3302 = vrcp.f32 %v2373_v13  ;;  %v2375_v26 = vadd.f32 1.0, %v3299_v53 }
 0x834   :  { %3304 = vrcp.f32 %v2374_v45 }
 0x835   :  { %3306 = vrcp.f32 %v2375_v26 }
 0x83e   :  { %v3301_v6 = vpop.eup %3300 }
 0x840   :  { %v3303_v9 = vpop.eup %3302 }
 0x841   :  { %v3305_v14 = vpop.eup %3304 }
 0x842   :  { %v3307_v13 = vpop.eup %3306  ;;  %v2392_v53 = vsub.f32 1.0, %v3305_v14  ;;  %v2396_v45 = vmul.f32 %v3305_v14, %v6304_v42  ;;  %v8646_v42 = vld [vmem:[#allocation165_spill] sm:$0xff]  ;;  %v8656_v14 = vld [vmem:[#allocation118_spill] sm:$0xff] }
 0x85c   :  { %v2351_v56 = vpop.f32.mrf.mxu0 }
 0x85d   :  { %v2384_v57 = vadd.f32 %v2351_v56, %v8616_v51  ;;  %v2393_v56 = vsub.f32 1.0, %v3307_v13 }
 0x85e   :  { %v2353_v39 = vpop.f32.mrf.mxu0 }
 0x85f   :  { %v2386_v61 = vmul.f32 %v3301_v6, %v2384_v57  ;;  %v2385_v34 = vadd.f32 %v2353_v39, %v7908_v41  ;;  %v2397_v6 = vmul.f32 %v3307_v13, %v6302_v44  ;;  %v8645_v44 = vld [vmem:[#allocation137_spill] sm:$0xff] }
 0x860   :  { %v8657_v13 = vld [vmem:[#allocation149_spill] sm:$0xff] }
 0x861   :  { %v2388_v32 = vadd.f32 %v2386_v61, %v8617_v36  ;;  %v2387_v15 = vmul.f32 %v3303_v9, %v2385_v34  ;;  %v8648_v61 = vld [vmem:[#allocation114_spill] sm:$0xff]  ;;  %v8649_v34 = vld [vmem:[#allocation141_spill] sm:$0xff]  ;;  %v8651_v36 = vld [vmem:[#allocation143_spill] sm:$0xff] }
 0x862   :  { %v8650_v9 = vld [vmem:[#allocation166_spill] sm:$0xff] }
 0x863   :  { %3308 = vtanh.f32 %v2388_v32  ;;  %v2389_v5 = vadd.f32 %v2387_v15, %v8618_v11  ;;  %v8652_v32 = vld [vmem:[#allocation116_spill] sm:$0xff]  ;;  %v8653_v15 = vld [vmem:[#allocation145_spill] sm:$0xff]  ;;  %v8654_v11 = vld [vmem:[#allocation167_spill] sm:$0xff] }
 0x865   :  { %3310 = vtanh.f32 %v2389_v5  ;;  %v8655_v5 = vld [vmem:[#allocation147_spill] sm:$0xff] }
 0x870   :  { %v3309_v25 = vpop.eup %3308 }
 0x871   :  { %v2394_v60 = vmul.f32 %v3309_v25, %v2392_v53  ;;  %v8658_v25 = vld [vmem:[#allocation168_spill] sm:$0xff]  ;;  %v8659_v53 = vld [vmem:[#allocation151_spill] sm:$0xff] }
 0x872   :  { %v3311_v51 = vpop.eup %3310 }
 0x873   :  { %v2395_v57 = vmul.f32 %v3311_v51, %v2393_v56  ;;  %v6692_v39 = vadd.f32 %v2396_v45, %v2394_v60  ;;  %v8644_v60 = vld [vmem:[#allocation164_spill] sm:$0xff]  ;;  %v8647_v51 = vld [vmem:[#allocation139_spill] sm:$0xff] }
 0x874   :  { %v8660_v56 = vld [vmem:[#allocation120_spill] sm:$0xff]  ;;  %v8663_v45 = vld [vmem:[#allocation155_spill] sm:$0xff] }
 0x875   :  { %v6690_v26 = vadd.f32 %v2397_v6, %v2395_v57  ;;  %v8661_v57 = vld [vmem:[#allocation153_spill] sm:$0xff] }
 0x876   :  { %v8662_v6 = vld [vmem:[#allocation169_spill] sm:$0xff] }
 0x877   :  { %2473 = vmatprep.mubr.f32.mxu1 %v6690_v26  ;;  %2544 = vmatprep.mubr.f32.mxu0 %v6690_v26 }
 0x878   :  { %2474 = vmatmul.mubr.f32.vlgmr.msra.gmra.mxu1 %v6692_v39  ;;  %2545 = vmatmul.mubr.f32.vlgmr.msra.gmra.mxu0 %v6692_v39 }
 0x879   :  { %2552 = vmatpush1.msra.mxu1 %v6310_v2  ;;  %2615 = vmatprep.mubr.f32.mxu1 %v6690_v26 }
 0x87a   :  { %2553 = vmatprep.subr.mxu1 %v6314_v55  ;;  %2676 = vmatpush1.msra.mxu0 %v5895_v58  ;;  %v8619_v58 = vld [vmem:[#allocation125_spill] sm:$0xff] }
 0x87b   :  { %2554 = vmatpush1.msra.mxu1 %v6318_v48  ;;  %2677 = vmatprep.subr.mxu0 %v5899_v59  ;;  %v8620_v59 = vld [vmem:[#allocation127_spill] sm:$0xff] }
 0x87c   :  { %2555 = vmatprep.subr.mxu1 %v6322_v24  ;;  %2678 = vmatpush1.msra.mxu0 %v5903_v63  ;;  %v8621_v63 = vld [vmem:[#allocation129_spill] sm:$0xff] }
 0x87d   :  { %2556 = vmatpush1.msra.mxu1 %v6326_v10  ;;  %2679 = vmatprep.subr.mxu0 %v5907_v28  ;;  %v8622_v28 = vld [vmem:[#allocation131_spill] sm:$0xff] }
 0x87e   :  { %2557 = vmatprep.subr.mxu1 %v6330_v50  ;;  %2680 = vmatpush1.msra.mxu0 %v5911_v17  ;;  %v8623_v17 = vld [vmem:[#allocation134_spill] sm:$0xff] }
 0x87f   :  { %2558 = vmatpush1.msra.mxu1 %v6334_v49  ;;  %2681 = vmatprep.subr.mxu0 %v5915_v20  ;;  %v8624_v20 = vld [vmem:[#allocation136_spill] sm:$0xff] }
 0x880   :  { %2559 = vmatprep.subr.mxu1 %v6338_v27  ;;  %2682 = vmatpush1.msra.mxu0 %v5919_v33  ;;  %v8625_v33 = vld [vmem:[#allocation138_spill] sm:$0xff] }
 0x881   :  { %2560 = vmatpush1.msra.mxu1 %v6342_v1  ;;  %2683 = vmatprep.subr.mxu0 %v5923_v16  ;;  %v8626_v16 = vld [vmem:[#allocation140_spill] sm:$0xff] }
 0x882   :  { %2561 = vmatprep.subr.mxu1 %v6346_v29  ;;  %2684 = vmatpush1.msra.mxu0 %v5927_v37  ;;  %v8627_v37 = vld [vmem:[#allocation142_spill] sm:$0xff] }
 0x883   :  { %2562 = vmatpush1.msra.mxu1 %v6350_v62  ;;  %2685 = vmatprep.subr.mxu0 %v5931_v8  ;;  %v8628_v8 = vld [vmem:[#allocation23_spill] sm:$0xff] }
 0x884   :  { %2563 = vmatprep.subr.mxu1 %v6354_v52  ;;  %2686 = vmatpush1.msra.mxu0 %v5935_v30  ;;  %v8629_v30 = vld [vmem:[#allocation25_spill] sm:$0xff] }
 0x885   :  { %2564 = vmatpush1.msra.mxu1 %v6358_v54  ;;  %2687 = vmatprep.subr.mxu0 %v5939_v46  ;;  %v8630_v46 = vld [vmem:[#allocation31_spill] sm:$0xff] }
 0x886   :  { %2565 = vmatprep.subr.mxu1 %v6362_v19  ;;  %2688 = vmatpush1.msra.mxu0 %v5943_v22  ;;  %v8631_v22 = vld [vmem:[#allocation24_spill] sm:$0xff] }
 0x887   :  { %2566 = vmatpush1.msra.mxu1 %v6366_v38  ;;  %2689 = vmatprep.subr.mxu0 %v5947_v31  ;;  %v8632_v31 = vld [vmem:[#allocation33_spill] sm:$0xff] }
 0x888   :  { %2567 = vmatprep.subr.mxu1 %v6370_v21  ;;  %2690 = vmatpush1.msra.mxu0 %v5951_v23  ;;  %v8633_v23 = vld [vmem:[#allocation26_spill] sm:$0xff] }
 0x889   :  { %2568 = vmatpush1.msra.mxu1 %v8619_v58  ;;  %2691 = vmatprep.subr.mxu0 %v5955_v40  ;;  %v8634_v40 = vld [vmem:[#allocation32_spill] sm:$0xff] }
 0x88a   :  { %2569 = vmatprep.subr.mxu1 %v8620_v59  ;;  %2692 = vmatpush1.msra.mxu0 %v5959_v18  ;;  %v8635_v18 = vld [vmem:[#allocation22_spill] sm:$0xff] }
 0x88b   :  { %2570 = vmatpush1.msra.mxu1 %v8621_v63  ;;  %2693 = vmatprep.subr.mxu0 %v5963_v3  ;;  %v8636_v3 = vld [vmem:[#allocation34_spill] sm:$0xff] }
 0x88c   :  { %2571 = vmatprep.subr.mxu1 %v8622_v28  ;;  %2694 = vmatpush1.msra.mxu0 %v5967_v47  ;;  %v8637_v47 = vld [vmem:[#allocation55_spill] sm:$0xff] }
 0x88d   :  { %2572 = vmatpush1.msra.mxu1 %v8623_v17  ;;  %2695 = vmatprep.subr.mxu0 %v5971_v4  ;;  %v8638_v4 = vld [vmem:[#allocation59_spill] sm:$0xff] }
 0x88e   :  { %2573 = vmatprep.subr.mxu1 %v8624_v20  ;;  %2696 = vmatpush1.msra.mxu0 %v5975_v7  ;;  %v8639_v7 = vld [vmem:[#allocation56_spill] sm:$0xff] }
 0x88f   :  { %2574 = vmatpush1.msra.mxu1 %v8625_v33  ;;  %2697 = vmatprep.subr.mxu0 %v5979_v35  ;;  %v8640_v35 = vld [vmem:[#allocation60_spill] sm:$0xff] }
 0x890   :  { %2575 = vmatprep.subr.mxu1 %v8626_v16  ;;  %2698 = vmatpush1.msra.mxu0 %v5983_v0  ;;  %v8641_v0 = vld [vmem:[#allocation133_spill] sm:$0xff] }
 0x891   :  { %2576 = vmatpush1.msra.mxu1 %v8627_v37  ;;  %2699 = vmatprep.subr.mxu0 %v5987_v12  ;;  %v8642_v12 = vld [vmem:[#allocation163_spill] sm:$0xff] }
 0x892   :  { %2577 = vmatprep.subr.mxu1 %v8628_v8  ;;  %2700 = vmatpush1.msra.mxu0 %v5991_v43  ;;  %v8643_v43 = vld [vmem:[#allocation135_spill] sm:$0xff] }
 0x893   :  { %2578 = vmatpush1.msra.mxu1 %v8629_v30  ;;  %2701 = vmatprep.subr.mxu0 %v8630_v46  ;;  %v8664_v46 = vld [vmem:[#allocation122_spill] sm:$0xff] }
 0x894   :  { %2579 = vmatprep.subr.mxu1 %v8631_v22  ;;  %2702 = vmatpush1.msra.mxu0 %v8632_v31  ;;  %v8665_v31 = vld [vmem:[#allocation157_spill] sm:$0xff] }
 0x895   :  { %2580 = vmatpush1.msra.mxu1 %v8633_v23  ;;  %2703 = vmatprep.subr.mxu0 %v8634_v40  ;;  %v8666_v40 = vld [vmem:[#allocation170_spill] sm:$0xff] }
 0x896   :  { %2581 = vmatprep.subr.mxu1 %v8635_v18  ;;  %2704 = vmatpush1.msra.mxu0 %v8636_v3  ;;  %v8667_v3 = vld [vmem:[#allocation159_spill] sm:$0xff] }
 0x897   :  { %2582 = vmatpush1.msra.mxu1 %v8637_v47  ;;  %2705 = vmatprep.subr.mxu0 %v8638_v4  ;;  %v8668_v4 = vld [vmem:[#allocation124_spill] sm:$0xff] }
 0x898   :  { %2583 = vmatprep.subr.mxu1 %v8639_v7  ;;  %2706 = vmatpush1.msra.mxu0 %v8640_v35  ;;  %v8669_v35 = vld [vmem:[#allocation161_spill] sm:$0xff] }
 0x899   :  { %2584 = vmatpush2.msra.mxu1 %v8641_v0  ;;  %2707 = vmatprep.subr.mxu0 %v8642_v12  ;;  %v8670_v12 = vld [vmem:[#allocation171_spill] sm:$0xff] }
 0x89a   :  { %2585 = vmatprep.subr.mxu1 %v8643_v43  ;;  %2708 = vmatpush2.msra.mxu0 %v8644_v60  ;;  %v8671_v60 = vld [vmem:[#allocation35_spill] sm:$0xff] }
 0x89b   :  { %2586 = vmatpush2.msra.mxu1 %v8645_v44  ;;  %2709 = vmatprep.subr.mxu0 %v8646_v42  ;;  %v8672_v42 = vld [vmem:[#allocation72_spill] sm:$0xff] }
 0x89c   :  { %2587 = vmatprep.subr.mxu1 %v8647_v51  ;;  %2710 = vmatpush2.msra.mxu0 %v8648_v61  ;;  %v8673_v61 = vld [vmem:[#allocation37_spill] sm:$0xff] }
 0x89d   :  { %2588 = vmatpush2.msra.mxu1 %v8649_v34  ;;  %2711 = vmatprep.subr.mxu0 %v8650_v9  ;;  %v8674_v9 = vld [vmem:[#allocation126_spill] sm:$0xff] }
 0x89e   :  { %2589 = vmatprep.subr.mxu1 %v8651_v36  ;;  %2712 = vmatpush2.msra.mxu0 %v8652_v32  ;;  %v8675_v32 = vld [vmem:[#allocation36_spill] sm:$0xff] }
 0x89f   :  { %2590 = vmatpush2.msra.mxu1 %v8653_v15  ;;  %2713 = vmatprep.subr.mxu0 %v8654_v11  ;;  %v8676_v11 = vld [vmem:[#allocation104_spill] sm:$0xff] }
 0x8a0   :  { %2591 = vmatprep.subr.mxu1 %v8655_v5  ;;  %2714 = vmatpush2.msra.mxu0 %v8656_v14  ;;  %v8677_v14 = vld [vmem:[#allocation38_spill] sm:$0xff] }
 0x8a1   :  { %2592 = vmatpush2.msra.mxu1 %v8657_v13  ;;  %2715 = vmatprep.subr.mxu0 %v8658_v25  ;;  %v8678_v25 = vld [vmem:[#allocation61_spill] sm:$0xff] }
 0x8a2   :  { %2593 = vmatprep.subr.mxu1 %v8659_v53  ;;  %2716 = vmatpush2.msra.mxu0 %v8660_v56  ;;  %v8679_v56 = vld [vmem:[#allocation62_spill] sm:$0xff] }
 0x8a3   :  { %2594 = vmatpush2.msra.mxu1 %v8661_v57  ;;  %2717 = vmatprep.subr.mxu0 %v8662_v6  ;;  %v8680_v6 = vld [vmem:[#allocation158_spill] sm:$0xff] }
 0x8a4   :  { %2595 = vmatprep.subr.mxu1 %v8663_v45  ;;  %2718 = vmatpush2.msra.mxu0 %v8664_v46  ;;  %v8681_v46 = vld [vmem:[#allocation160_spill] sm:$0xff] }
 0x8a5   :  { %2596 = vmatpush2.msra.mxu1 %v8665_v31  ;;  %2719 = vmatprep.subr.mxu0 %v8666_v40  ;;  %v8682_v40 = vld [vmem:[#allocation162_spill] sm:$0xff] }
 0x8a6   :  { %2597 = vmatprep.subr.mxu1 %v8667_v3  ;;  %2720 = vmatpush2.msra.mxu0 %v8668_v4  ;;  %v8683_v4 = vld [vmem:[#allocation27_spill] sm:$0xff]  ;;  %v8772_v3 = vld [vmem:[#allocation50_spill] sm:$0xff] }
 0x8a7   :  { %2598 = vmatpush2.msra.mxu1 %v8669_v35  ;;  %2721 = vmatprep.subr.mxu0 %v8670_v12  ;;  %v8684_v12 = vld [vmem:[#allocation29_spill] sm:$0xff]  ;;  %v8771_v35 = vld [vmem:[#allocation48_spill] sm:$0xff] }
 0x8a8   :  { %2599 = vmatprep.subr.mxu1 %v8671_v60  ;;  %2722 = vmatpush2.msra.mxu0 %v8672_v42  ;;  %v8685_v42 = vld [vmem:[#allocation28_spill] sm:$0xff] }
 0x8a9   :  { %2600 = vmatpush2.msra.mxu1 %v8673_v61  ;;  %2723 = vmatprep.subr.mxu0 %v8674_v9  ;;  %v8686_v9 = vld [vmem:[#allocation30_spill] sm:$0xff]  ;;  %v8770_v61 = vld [vmem:[#allocation49_spill] sm:$0xff] }
 0x8aa   :  { %2601 = vmatprep.subr.mxu1 %v8675_v32  ;;  %2724 = vmatpush2.msra.mxu0 %v8676_v11  ;;  %v8687_v11 = vld [vmem:[#allocation57_spill] sm:$0xff]  ;;  %v8769_v32 = vld [vmem:[#allocation47_spill] sm:$0xff] }
 0x8ab   :  { %2602 = vmatpush2.msra.mxu1 %v8677_v14  ;;  %2725 = vmatprep.subr.mxu0 %v8678_v25  ;;  %v8688_v14 = vld [vmem:[#allocation58_spill] sm:$0xff]  ;;  %v8689_v25 = vld [vmem:[#allocation71_spill] sm:$0xff] }
 0x8ac   :  { %2603 = vmatprep.subr.mxu1 %v8679_v56  ;;  %2726 = vmatpush2.msra.mxu0 %v8680_v6  ;;  %v8690_v56 = vld [vmem:[#allocation102_spill] sm:$0xff]  ;;  %v8691_v6 = vld [vmem:[#allocation173_spill] sm:$0xff] }
 0x8ad   :  { %2604 = vmatpush2.msra.mxu1 %v8681_v46  ;;  %2727 = vmatprep.subr.mxu0 %v8682_v40  ;;  %v8692_v46 = vld [vmem:[#allocation174_spill] sm:$0xff]  ;;  %v8693_v40 = vld [vmem:[#allocation175_spill] sm:$0xff] }
 0x8ae   :  { %2605 = vmatprep.subr.mxu1 %v8683_v4  ;;  %2728 = vmatpush2.msra.mxu0 %v8684_v12  ;;  %v8694_v4 = vld [vmem:[#allocation176_spill] sm:$0xff]  ;;  %v8695_v12 = vld [vmem:[#allocation177_spill] sm:$0xff] }
 0x8af   :  { %2606 = vmatpush2.msra.mxu1 %v8685_v42  ;;  %2729 = vmatprep.subr.mxu0 %v8686_v9  ;;  %v8696_v42 = vld [vmem:[#allocation178_spill] sm:$0xff]  ;;  %v8697_v9 = vld [vmem:[#allocation179_spill] sm:$0xff] }
 0x8b0   :  { %2607 = vmatprep.subr.mxu1 %v8687_v11  ;;  %2730 = vmatpush2.msra.mxu0 %v8688_v14  ;;  %v8698_v11 = vld [vmem:[#allocation180_spill] sm:$0xff]  ;;  %v8699_v14 = vld [vmem:[#allocation181_spill] sm:$0xff] }
 0x8b1   :  { %2608 = vmatpush2.msra.mxu1 %v8689_v25  ;;  %2731 = vmatprep.subr.mxu0 %v8690_v56  ;;  %v8700_v25 = vld [vmem:[#allocation182_spill] sm:$0xff]  ;;  %v8701_v56 = vld [vmem:[#allocation183_spill] sm:$0xff] }
 0x8b2   :  { %2609 = vmatprep.subr.mxu1 %v8691_v6  ;;  %2732 = vmatpush2.msra.mxu0 %v8692_v46  ;;  %v8702_v6 = vld [vmem:[#allocation184_spill] sm:$0xff] }
 0x8b3   :  { %2610 = vmatpush2.msra.mxu1 %v8693_v40  ;;  %2733 = vmatprep.subr.mxu0 %v8694_v4  ;;  %v8703_v46 = vld [vmem:[#allocation172_spill] sm:$0xff]  ;;  %v8704_v4 = vld [vmem:[#allocation73_spill] sm:$0xff] }
 0x8b4   :  { %2611 = vmatprep.subr.mxu1 %v8695_v12  ;;  %2734 = vmatpush2.msra.mxu0 %v8696_v42  ;;  %v8705_v12 = vld [vmem:[#allocation185_spill] sm:$0xff]  ;;  %v8706_v42 = vld [vmem:[#allocation128_spill] sm:$0xff] }
 0x8b5   :  { %2612 = vmatpush2.msra.mxu1 %v8697_v9  ;;  %2735 = vmatprep.subr.mxu0 %v8698_v11  ;;  %v8707_v9 = vld [vmem:[#allocation186_spill] sm:$0xff]  ;;  %v8713_v40 = vld [vmem:[#allocation144_spill] sm:$0xff] }
 0x8b6   :  { %2613 = vmatprep.subr.mxu1 %v8699_v14  ;;  %2736 = vmatpush2.msra.mxu0 %v8700_v25  ;;  %v8708_v11 = vld [vmem:[#allocation106_spill] sm:$0xff] }
 0x8b7   :  { %2614 = vmatpush2.msra.mxu1 %v8701_v56  ;;  %2737 = vmatprep.subr.mxu0 %v8702_v6  ;;  %v8709_v14 = vld [vmem:[#allocation130_spill] sm:$0xff]  ;;  %v8711_v56 = vld [vmem:[#allocation132_spill] sm:$0xff] }
 0x8b8   :  { %2616 = vmatmul.mubr.f32.vlgmr.msra.gmra.mxu1 %v6692_v39  ;;  %2746 = vmatprep.subr.mxu1 %v8703_v46  ;;  %v8710_v25 = vld [vmem:[#allocation74_spill] sm:$0xff]  ;;  %v8712_v6 = vld [vmem:[#allocation108_spill] sm:$0xff]  ;;  %v8714_v46 = vld [vmem:[#allocation75_spill] sm:$0xff] }
 0x8b9   :  { %2747 = vmatpush1.msra.mxu1 %v8704_v4  ;;  %2738 = vmatpush2.msra.mxu0 %v8705_v12  ;;  %v8715_v4 = vld [vmem:[#allocation146_spill] sm:$0xff] }
 0x8ba   :  { %2748 = vmatprep.subr.mxu1 %v8706_v42  ;;  %2817 = vmatprep.subr.mxu0 %v8707_v9  ;;  %v8716_v12 = vld [vmem:[#allocation110_spill] sm:$0xff]  ;;  %v8717_v42 = vld [vmem:[#allocation148_spill] sm:$0xff] }
 0x8bb   :  { %2749 = vmatpush1.msra.mxu1 %v8708_v11  ;;  %v8718_v9 = vld [vmem:[#allocation76_spill] sm:$0xff]  ;;  %v8719_v11 = vld [vmem:[#allocation150_spill] sm:$0xff] }
 0x8bc   :  { %2750 = vmatprep.subr.mxu1 %v8709_v14  ;;  %v8720_v14 = vld [vmem:[#allocation112_spill] sm:$0xff] }
 0x8bd   :  { %2751 = vmatpush1.msra.mxu1 %v8710_v25  ;;  %v8721_v25 = vld [vmem:[#allocation152_spill] sm:$0xff] }
 0x8be   :  { %2752 = vmatprep.subr.mxu1 %v8711_v56  ;;  %v8722_v56 = vld [vmem:[#allocation77_spill] sm:$0xff] }
 0x8bf   :  { %2753 = vmatpush1.msra.mxu1 %v8712_v6  ;;  %v8723_v6 = vld [vmem:[#allocation154_spill] sm:$0xff] }
 0x8c0   :  { %2754 = vmatprep.subr.mxu1 %v8713_v40  ;;  %v8724_v40 = vld [vmem:[#allocation78_spill] sm:$0xff] }
 0x8c1   :  { %2755 = vmatpush1.msra.mxu1 %v8714_v46  ;;  %v8725_v46 = vld [vmem:[#allocation156_spill] sm:$0xff] }
 0x8c2   :  { %2756 = vmatprep.subr.mxu1 %v8715_v4  ;;  %v8726_v4 = vld [vmem:[#allocation79_spill] sm:$0xff] }
 0x8c3   :  { %2757 = vmatpush1.msra.mxu1 %v8716_v12  ;;  %v8727_v12 = vld [vmem:[#allocation80_spill] sm:$0xff] }
 0x8c4   :  { %2758 = vmatprep.subr.mxu1 %v8717_v42  ;;  %v8728_v42 = vld [vmem:[#allocation81_spill] sm:$0xff] }
 0x8c5   :  { %2759 = vmatpush1.msra.mxu1 %v8718_v9  ;;  %v8729_v9 = vld [vmem:[#allocation82_spill] sm:$0xff] }
 0x8c6   :  { %2760 = vmatprep.subr.mxu1 %v8719_v11  ;;  %v8730_v11 = vld [vmem:[#allocation83_spill] sm:$0xff] }
 0x8c7   :  { %2761 = vmatpush1.msra.mxu1 %v8720_v14  ;;  %v8731_v14 = vld [vmem:[#allocation84_spill] sm:$0xff] }
 0x8c8   :  { %2762 = vmatprep.subr.mxu1 %v8721_v25  ;;  %v8732_v25 = vld [vmem:[#allocation85_spill] sm:$0xff] }
 0x8c9   :  { %2763 = vmatpush1.msra.mxu1 %v8722_v56  ;;  %v8733_v56 = vld [vmem:[#allocation86_spill] sm:$0xff] }
 0x8ca   :  { %2764 = vmatprep.subr.mxu1 %v8723_v6  ;;  %v8734_v6 = vld [vmem:[#allocation87_spill] sm:$0xff] }
 0x8cb   :  { %2765 = vmatpush1.msra.mxu1 %v8724_v40  ;;  %v8735_v40 = vld [vmem:[#allocation88_spill] sm:$0xff] }
 0x8cc   :  { %2766 = vmatprep.subr.mxu1 %v8725_v46  ;;  %v8736_v46 = vld [vmem:[#allocation89_spill] sm:$0xff] }
 0x8cd   :  { %2767 = vmatpush1.msra.mxu1 %v8726_v4  ;;  %v8737_v4 = vld [vmem:[#allocation90_spill] sm:$0xff] }
 0x8ce   :  { %2768 = vmatprep.subr.mxu1 %v8727_v12  ;;  %v8738_v12 = vld [vmem:[#allocation91_spill] sm:$0xff] }
 0x8cf   :  { %2769 = vmatpush1.msra.mxu1 %v8728_v42  ;;  %v8739_v42 = vld [vmem:[#allocation92_spill] sm:$0xff] }
 0x8d0   :  { %2770 = vmatprep.subr.mxu1 %v8729_v9  ;;  %v8740_v9 = vld [vmem:[#allocation93_spill] sm:$0xff] }
 0x8d1   :  { %2771 = vmatpush1.msra.mxu1 %v8730_v11  ;;  %v8741_v11 = vld [vmem:[#allocation94_spill] sm:$0xff] }
 0x8d2   :  { %2772 = vmatprep.subr.mxu1 %v8731_v14  ;;  %v8742_v14 = vld [vmem:[#allocation95_spill] sm:$0xff] }
 0x8d3   :  { %2773 = vmatpush1.msra.mxu1 %v8732_v25  ;;  %v8743_v25 = vld [vmem:[#allocation96_spill] sm:$0xff] }
 0x8d4   :  { %2774 = vmatprep.subr.mxu1 %v8733_v56  ;;  %v8744_v56 = vld [vmem:[#allocation97_spill] sm:$0xff] }
 0x8d5   :  { %2775 = vmatpush1.msra.mxu1 %v8734_v6  ;;  %v8745_v6 = vld [vmem:[#allocation98_spill] sm:$0xff] }
 0x8d6   :  { %2776 = vmatprep.subr.mxu1 %v8735_v40  ;;  %v8746_v40 = vld [vmem:[#allocation99_spill] sm:$0xff] }
 0x8d7   :  { %2777 = vmatpush1.msra.mxu1 %v8736_v46  ;;  %v8747_v46 = vld [vmem:[#allocation101_spill] sm:$0xff] }
 0x8d8   :  { %2778 = vmatprep.subr.mxu1 %v8737_v4  ;;  %v8748_v4 = vld [vmem:[#allocation103_spill] sm:$0xff] }
 0x8d9   :  { %2779 = vmatpush2.msra.mxu1 %v8738_v12  ;;  %v8749_v12 = vld [vmem:[#allocation105_spill] sm:$0xff] }
 0x8da   :  { %2780 = vmatprep.subr.mxu1 %v8739_v42  ;;  %v8750_v42 = vld [vmem:[#allocation107_spill] sm:$0xff] }
 0x8db   :  { %2781 = vmatpush2.msra.mxu1 %v8740_v9  ;;  %v8751_v9 = vld [vmem:[#allocation109_spill] sm:$0xff] }
 0x8dc   :  { %2782 = vmatprep.subr.mxu1 %v8741_v11  ;;  %v8752_v11 = vld [vmem:[#allocation111_spill] sm:$0xff] }
 0x8dd   :  { %2783 = vmatpush2.msra.mxu1 %v8742_v14  ;;  %v8753_v14 = vld [vmem:[#allocation113_spill] sm:$0xff] }
 0x8de   :  { %2784 = vmatprep.subr.mxu1 %v8743_v25  ;;  %v8754_v25 = vld [vmem:[#allocation115_spill] sm:$0xff] }
 0x8df   :  { %2785 = vmatpush2.msra.mxu1 %v8744_v56  ;;  %v8755_v56 = vld [vmem:[#allocation117_spill] sm:$0xff] }
 0x8e0   :  { %2786 = vmatprep.subr.mxu1 %v8745_v6  ;;  %v8756_v6 = vld [vmem:[#allocation119_spill] sm:$0xff] }
 0x8e1   :  { %2787 = vmatpush2.msra.mxu1 %v8746_v40  ;;  %v8757_v40 = vld [vmem:[#allocation121_spill] sm:$0xff] }
 0x8e2   :  { %2788 = vmatprep.subr.mxu1 %v8747_v46  ;;  %v8758_v46 = vld [vmem:[#allocation123_spill] sm:$0xff] }
 0x8e3   :  { %2789 = vmatpush2.msra.mxu1 %v8748_v4  ;;  %v8759_v4 = vld [vmem:[#allocation187_spill] sm:$0xff] }
 0x8e4   :  { %2790 = vmatprep.subr.mxu1 %v8749_v12  ;;  %v8760_v12 = vld [vmem:[#allocation188_spill] sm:$0xff] }
 0x8e5   :  { %2791 = vmatpush2.msra.mxu1 %v8750_v42  ;;  %v8761_v42 = vld [vmem:[#allocation189_spill] sm:$0xff] }
 0x8e6   :  { %2792 = vmatprep.subr.mxu1 %v8751_v9  ;;  %v8762_v9 = vld [vmem:[#allocation190_spill] sm:$0xff] }
 0x8e7   :  { %2793 = vmatpush2.msra.mxu1 %v8752_v11  ;;  %v8763_v11 = vld [vmem:[#allocation191_spill] sm:$0xff] }
 0x8e8   :  { %2794 = vmatprep.subr.mxu1 %v8753_v14  ;;  %v8764_v14 = vld [vmem:[#allocation192_spill] sm:$0xff] }
 0x8e9   :  { %2795 = vmatpush2.msra.mxu1 %v8754_v25  ;;  %v8765_v25 = vld [vmem:[#allocation193_spill] sm:$0xff] }
 0x8ea   :  { %2796 = vmatprep.subr.mxu1 %v8755_v56  ;;  %v8766_v56 = vld [vmem:[#allocation194_spill] sm:$0xff] }
 0x8eb   :  { %2797 = vmatpush2.msra.mxu1 %v8756_v6  ;;  %v8767_v6 = vld [vmem:[#allocation195_spill] sm:$0xff] }
 0x8ec   :  { %2798 = vmatprep.subr.mxu1 %v8757_v40  ;;  %v8768_v40 = vld [vmem:[#allocation196_spill] sm:$0xff] }
 0x8ed   :  { %2799 = vmatpush2.msra.mxu1 %v8758_v46 }
 0x8ee   :  { %2800 = vmatprep.subr.mxu1 %v8759_v4 }
 0x8ef   :  { %2801 = vmatpush2.msra.mxu1 %v8760_v12 }
 0x8f0   :  { %2802 = vmatprep.subr.mxu1 %v8761_v42 }
 0x8f1   :  { %2803 = vmatpush2.msra.mxu1 %v8762_v9 }
 0x8f2   :  { %2804 = vmatprep.subr.mxu1 %v8763_v11 }
 0x8f3   :  { %2805 = vmatpush2.msra.mxu1 %v8764_v14 }
 0x8f4   :  { %2806 = vmatprep.subr.mxu1 %v8765_v25 }
 0x8f5   :  { %2807 = vmatpush2.msra.mxu1 %v8766_v56 }
 0x8f6   :  { %2808 = vmatprep.subr.mxu1 %v8767_v6 }
 0x8f7   :  { %2809 = vmatpush2.msra.mxu1 %v8768_v40 }
 0x938   :  { %v2475_v46 = vpop.f32.mrf.mxu1  ;;  %v2546_v11 = vpop.f32.mrf.mxu0 }
 0x939   :  { %v2622_v12 = vadd.f32 %v2475_v46, %v8769_v32  ;;  %v2624_v25 = vadd.f32 %v2546_v11, %v8771_v35 }
 0x93a   :  { %v2477_v4 = vpop.f32.mrf.mxu1  ;;  %v2548_v14 = vpop.f32.mrf.mxu0 }
 0x93b   :  { %v2623_v42 = vadd.f32 %v2477_v4, %v8770_v61  ;;  %v3135_v60 = vmul.f32 -1.442695, %v2622_v12  ;;  %v2625_v56 = vadd.f32 %v2548_v14, %v8772_v3  ;;  %v3137_v31 = vmul.f32 -1.442695, %v2624_v25 }
 0x93d   :  { %v3136_v9 = vmul.f32 -1.442695, %v2623_v42  ;;  %3312 = vpow2.f32 %v3135_v60  ;;  %v3138_v6 = vmul.f32 -1.442695, %v2625_v56  ;;  %v8773_v42 = vld [vmem:[#allocation21_spill] sm:$0xff] }
 0x93f   :  { %3314 = vpow2.f32 %v3136_v9 }
 0x940   :  { %3316 = vpow2.f32 %v3137_v31 }
 0x941   :  { %3318 = vpow2.f32 %v3138_v6 }
 0x94a   :  { %v3313_v45 = vpop.eup %3312 }
 0x94b   :  { %v2638_v57 = vadd.f32 1.0, %v3313_v45  ;;  %v8774_v45 = vld [vmem:[#allocation67_spill] sm:$0xff] }
 0x94c   :  { %v3315_v40 = vpop.eup %3314 }
 0x94d   :  { %v2639_v32 = vadd.f32 1.0, %v3315_v40  ;;  %3320 = vrcp.f32 %v2638_v57  ;;  %v3317_v61 = vpop.eup %3316  ;;  %v8775_v57 = vld [vmem:[#allocation68_spill] sm:$0xff] }
 0x94e   :  { %v3319_v46 = vpop.eup %3318  ;;  %v2640_v60 = vadd.f32 1.0, %v3317_v61 }
 0x94f   :  { %3322 = vrcp.f32 %v2639_v32  ;;  %v2641_v12 = vadd.f32 1.0, %v3319_v46 }
 0x950   :  { %3324 = vrcp.f32 %v2640_v60 }
 0x951   :  { %3326 = vrcp.f32 %v2641_v12 }
 0x95a   :  { %v3321_v35 = vpop.eup %3320 }
 0x95c   :  { %v3323_v25 = vpop.eup %3322 }
 0x95d   :  { %v3325_v40 = vpop.eup %3324 }
 0x95e   :  { %v3327_v32 = vpop.eup %3326  ;;  %v2658_v46 = vsub.f32 1.0, %v3325_v40  ;;  %v2662_v60 = vmul.f32 %v3325_v40, %v6692_v39  ;;  %v8793_v39 = vld [vmem:[#allocation175_spill] sm:$0xff] }
 0x978   :  { %v2617_v4 = vpop.f32.mrf.mxu1 }
 0x979   :  { %v2650_v9 = vadd.f32 %v2617_v4, %v8773_v42  ;;  %v2659_v4 = vsub.f32 1.0, %v3327_v32 }
 0x97a   :  { %v2619_v11 = vpop.f32.mrf.mxu1 }
 0x97b   :  { %v2652_v3 = vmul.f32 %v3321_v35, %v2650_v9  ;;  %v2651_v14 = vadd.f32 %v2619_v11, %v7908_v41  ;;  %v2663_v35 = vmul.f32 %v3327_v32, %v6690_v26  ;;  %v8792_v26 = vld [vmem:[#allocation173_spill] sm:$0xff] }
 0x97c   :  { %v8803_v32 = vld [vmem:[#allocation69_spill] sm:$0xff] }
 0x97d   :  { %v2654_v31 = vadd.f32 %v2652_v3, %v8774_v45  ;;  %v2653_v56 = vmul.f32 %v3323_v25, %v2651_v14  ;;  %v8802_v25 = vld [vmem:[#allocation21_spill] sm:$0xff] }
 0x97f   :  { %3328 = vtanh.f32 %v2654_v31  ;;  %v2655_v6 = vadd.f32 %v2653_v56, %v8775_v57 }
 0x981   :  { %3330 = vtanh.f32 %v2655_v6 }
 0x98c   :  { %v3329_v61 = vpop.eup %3328 }
 0x98d   :  { %v2660_v53 = vmul.f32 %v3329_v61, %v2658_v46 }
 0x98e   :  { %v3331_v42 = vpop.eup %3330 }
 0x98f   :  { %v2661_v9 = vmul.f32 %v3331_v42, %v2659_v4  ;;  %v6903_v11 = vadd.f32 %v2662_v60, %v2660_v53  ;;  %v8804_v4 = vld [vmem:[#allocation70_spill] sm:$0xff] }
 0x991   :  { %v6901_v12 = vadd.f32 %v2663_v35, %v2661_v9 }
 0x993   :  { %2739 = vmatprep.mubr.f32.mxu0 %v6901_v12  ;;  %2810 = vmatprep.mubr.f32.mxu1 %v6901_v12 }
 0x994   :  { %2740 = vmatmul.mubr.f32.vlgmr.msra.gmra.mxu0 %v6903_v11  ;;  %2811 = vmatmul.mubr.f32.vlgmr.msra.gmra.mxu1 %v6903_v11 }
 0x995   :  { %2818 = vmatpush1.msra.mxu0 %v6310_v2  ;;  %2881 = vmatprep.mubr.f32.mxu0 %v6901_v12  ;;  %v8776_v2 = vld [vmem:[#allocation151_spill] sm:$0xff] }
 0x996   :  { %2819 = vmatprep.subr.mxu0 %v6314_v55  ;;  %v8777_v55 = vld [vmem:[#allocation153_spill] sm:$0xff] }
 0x997   :  { %2820 = vmatpush1.msra.mxu0 %v6318_v48  ;;  %v8778_v48 = vld [vmem:[#allocation155_spill] sm:$0xff] }
 0x998   :  { %2821 = vmatprep.subr.mxu0 %v6322_v24  ;;  %v8779_v24 = vld [vmem:[#allocation157_spill] sm:$0xff] }
 0x999   :  { %2822 = vmatpush1.msra.mxu0 %v6326_v10  ;;  %v8780_v10 = vld [vmem:[#allocation159_spill] sm:$0xff] }
 0x99a   :  { %2823 = vmatprep.subr.mxu0 %v6330_v50  ;;  %v8781_v50 = vld [vmem:[#allocation161_spill] sm:$0xff] }
 0x99b   :  { %2824 = vmatpush1.msra.mxu0 %v6334_v49  ;;  %v8782_v49 = vld [vmem:[#allocation35_spill] sm:$0xff] }
 0x99c   :  { %2825 = vmatprep.subr.mxu0 %v6338_v27  ;;  %v8783_v27 = vld [vmem:[#allocation37_spill] sm:$0xff] }
 0x99d   :  { %2826 = vmatpush1.msra.mxu0 %v6342_v1  ;;  %v8784_v1 = vld [vmem:[#allocation36_spill] sm:$0xff] }
 0x99e   :  { %2827 = vmatprep.subr.mxu0 %v6346_v29  ;;  %v8785_v29 = vld [vmem:[#allocation38_spill] sm:$0xff] }
 0x99f   :  { %2828 = vmatpush1.msra.mxu0 %v6350_v62  ;;  %v8786_v62 = vld [vmem:[#allocation62_spill] sm:$0xff] }
 0x9a0   :  { %2829 = vmatprep.subr.mxu0 %v6354_v52  ;;  %v8787_v52 = vld [vmem:[#allocation160_spill] sm:$0xff] }
 0x9a1   :  { %2830 = vmatpush1.msra.mxu0 %v6358_v54  ;;  %v8788_v54 = vld [vmem:[#allocation27_spill] sm:$0xff] }
 0x9a2   :  { %2831 = vmatprep.subr.mxu0 %v6362_v19  ;;  %v8789_v19 = vld [vmem:[#allocation28_spill] sm:$0xff] }
 0x9a3   :  { %2832 = vmatpush1.msra.mxu0 %v6366_v38  ;;  %v8790_v38 = vld [vmem:[#allocation57_spill] sm:$0xff] }
 0x9a4   :  { %2833 = vmatprep.subr.mxu0 %v6370_v21  ;;  %v8791_v21 = vld [vmem:[#allocation71_spill] sm:$0xff] }
 0x9a5   :  { %2834 = vmatpush1.msra.mxu0 %v8619_v58  ;;  %v8794_v58 = vld [vmem:[#allocation177_spill] sm:$0xff] }
 0x9a6   :  { %2835 = vmatprep.subr.mxu0 %v8620_v59  ;;  %v8795_v59 = vld [vmem:[#allocation179_spill] sm:$0xff] }
 0x9a7   :  { %2836 = vmatpush1.msra.mxu0 %v8621_v63  ;;  %v8796_v63 = vld [vmem:[#allocation181_spill] sm:$0xff] }
 0x9a8   :  { %2837 = vmatprep.subr.mxu0 %v8622_v28  ;;  %v8797_v28 = vld [vmem:[#allocation183_spill] sm:$0xff] }
 0x9a9   :  { %2838 = vmatpush1.msra.mxu0 %v8623_v17 }
 0x9aa   :  { %2839 = vmatprep.subr.mxu0 %v8624_v20 }
 0x9ab   :  { %2840 = vmatpush1.msra.mxu0 %v8625_v33  ;;  %v8798_v33 = vld [vmem:[#allocation51_spill] sm:$0xff] }
 0x9ac   :  { %2841 = vmatprep.subr.mxu0 %v8626_v16 }
 0x9ad   :  { %2842 = vmatpush1.msra.mxu0 %v8627_v37  ;;  %v8799_v37 = vld [vmem:[#allocation53_spill] sm:$0xff] }
 0x9ae   :  { %2843 = vmatprep.subr.mxu0 %v8628_v8 }
 0x9af   :  { %2844 = vmatpush1.msra.mxu0 %v8629_v30 }
 0x9b0   :  { %2845 = vmatprep.subr.mxu0 %v8631_v22 }
 0x9b1   :  { %2846 = vmatpush1.msra.mxu0 %v8633_v23 }
 0x9b2   :  { %2847 = vmatprep.subr.mxu0 %v8635_v18 }
 0x9b3   :  { %2848 = vmatpush1.msra.mxu0 %v8637_v47  ;;  %v8800_v47 = vld [vmem:[#allocation52_spill] sm:$0xff] }
 0x9b4   :  { %2849 = vmatprep.subr.mxu0 %v8639_v7 }
 0x9b5   :  { %2850 = vmatpush2.msra.mxu0 %v8641_v0  ;;  %v8801_v0 = vld [vmem:[#allocation54_spill] sm:$0xff] }
 0x9b6   :  { %2851 = vmatprep.subr.mxu0 %v8643_v43 }
 0x9b7   :  { %2852 = vmatpush2.msra.mxu0 %v8645_v44 }
 0x9b8   :  { %2853 = vmatprep.subr.mxu0 %v8647_v51 }
 0x9b9   :  { %2854 = vmatpush2.msra.mxu0 %v8649_v34 }
 0x9ba   :  { %2855 = vmatprep.subr.mxu0 %v8651_v36 }
 0x9bb   :  { %2856 = vmatpush2.msra.mxu0 %v8653_v15 }
 0x9bc   :  { %2857 = vmatprep.subr.mxu0 %v8655_v5 }
 0x9bd   :  { %2858 = vmatpush2.msra.mxu0 %v8657_v13 }
 0x9be   :  { %2859 = vmatprep.subr.mxu0 %v8776_v2 }
 0x9bf   :  { %2860 = vmatpush2.msra.mxu0 %v8777_v55 }
 0x9c0   :  { %2861 = vmatprep.subr.mxu0 %v8778_v48 }
 0x9c1   :  { %2862 = vmatpush2.msra.mxu0 %v8779_v24 }
 0x9c2   :  { %2863 = vmatprep.subr.mxu0 %v8780_v10 }
 0x9c3   :  { %2864 = vmatpush2.msra.mxu0 %v8781_v50 }
 0x9c4   :  { %2865 = vmatprep.subr.mxu0 %v8782_v49 }
 0x9c5   :  { %2866 = vmatpush2.msra.mxu0 %v8783_v27 }
 0x9c6   :  { %2867 = vmatprep.subr.mxu0 %v8784_v1 }
 0x9c7   :  { %2868 = vmatpush2.msra.mxu0 %v8785_v29 }
 0x9c8   :  { %2869 = vmatprep.subr.mxu0 %v8786_v62 }
 0x9c9   :  { %2870 = vmatpush2.msra.mxu0 %v8787_v52 }
 0x9ca   :  { %2871 = vmatprep.subr.mxu0 %v8788_v54 }
 0x9cb   :  { %2872 = vmatpush2.msra.mxu0 %v8789_v19 }
 0x9cc   :  { %2873 = vmatprep.subr.mxu0 %v8790_v38 }
 0x9cd   :  { %2874 = vmatpush2.msra.mxu0 %v8791_v21 }
 0x9ce   :  { %2875 = vmatprep.subr.mxu0 %v8792_v26 }
 0x9cf   :  { %2876 = vmatpush2.msra.mxu0 %v8793_v39 }
 0x9d0   :  { %2877 = vmatprep.subr.mxu0 %v8794_v58 }
 0x9d1   :  { %2878 = vmatpush2.msra.mxu0 %v8795_v59 }
 0x9d2   :  { %2879 = vmatprep.subr.mxu0 %v8796_v63 }
 0x9d3   :  { %2880 = vmatpush2.msra.mxu0 %v8797_v28 }
 0x9d4   :  { %2882 = vmatmul.mubr.f32.vlgmr.msra.gmra.mxu0 %v6903_v11 }
 0xa54   :  { %v2741_v17 = vpop.f32.mrf.mxu0  ;;  %v2812_v23 = vpop.f32.mrf.mxu1 }
 0xa55   :  { %v2888_v16 = vadd.f32 %v2741_v17, %v8798_v33  ;;  %v2890_v7 = vadd.f32 %v2812_v23, %v8800_v47 }
 0xa56   :  { %v2743_v20 = vpop.f32.mrf.mxu0  ;;  %v2814_v18 = vpop.f32.mrf.mxu1 }
 0xa57   :  { %v2889_v8 = vadd.f32 %v2743_v20, %v8799_v37  ;;  %v3139_v30 = vmul.f32 -1.442695, %v2888_v16  ;;  %v2891_v43 = vadd.f32 %v2814_v18, %v8801_v0  ;;  %v3141_v44 = vmul.f32 -1.442695, %v2890_v7 }
 0xa59   :  { %v3140_v22 = vmul.f32 -1.442695, %v2889_v8  ;;  %3332 = vpow2.f32 %v3139_v30  ;;  %v3142_v51 = vmul.f32 -1.442695, %v2891_v43 }
 0xa5b   :  { %3334 = vpow2.f32 %v3140_v22 }
 0xa5c   :  { %3336 = vpow2.f32 %v3141_v44 }
 0xa5d   :  { %3338 = vpow2.f32 %v3142_v51 }
 0xa66   :  { %v3333_v34 = vpop.eup %3332 }
 0xa67   :  { %v2904_v15 = vadd.f32 1.0, %v3333_v34 }
 0xa68   :  { %v3335_v36 = vpop.eup %3334 }
 0xa69   :  { %v2905_v5 = vadd.f32 1.0, %v3335_v36  ;;  %3340 = vrcp.f32 %v2904_v15  ;;  %v3337_v13 = vpop.eup %3336 }
 0xa6a   :  { %v3339_v53 = vpop.eup %3338  ;;  %v2906_v42 = vadd.f32 1.0, %v3337_v13 }
 0xa6b   :  { %3342 = vrcp.f32 %v2905_v5  ;;  %v2907_v14 = vadd.f32 1.0, %v3339_v53 }
 0xa6c   :  { %3344 = vrcp.f32 %v2906_v42 }
 0xa6d   :  { %3346 = vrcp.f32 %v2907_v14 }
 0xa76   :  { %v3341_v31 = vpop.eup %3340 }
 0xa78   :  { %v3343_v40 = vpop.eup %3342 }
 0xa79   :  { %v3345_v35 = vpop.eup %3344 }
 0xa7a   :  { %v3347_v60 = vpop.eup %3346  ;;  %v2924_v2 = vsub.f32 1.0, %v3345_v35  ;;  %v2928_v48 = vmul.f32 %v3345_v35, %v6903_v11 }
 0xa7b   :  { %v2925_v10 = vsub.f32 1.0, %v3347_v60 }
 0xa94   :  { %v2883_v3 = vpop.f32.mrf.mxu0 }
 0xa95   :  { %v2916_v45 = vadd.f32 %v2883_v3, %v8802_v25 }
 0xa96   :  { %v2885_v56 = vpop.f32.mrf.mxu0 }
 0xa97   :  { %v2918_v57 = vmul.f32 %v3341_v31, %v2916_v45  ;;  %v2917_v6 = vadd.f32 %v2885_v56, %v7908_v41  ;;  %v2929_v41 = vmul.f32 %v3347_v60, %v6901_v12 }
 0xa99   :  { %v2920_v61 = vadd.f32 %v2918_v57, %v8803_v32  ;;  %v2919_v46 = vmul.f32 %v3343_v40, %v2917_v6 }
 0xa9b   :  { %3348 = vtanh.f32 %v2920_v61  ;;  %v2921_v9 = vadd.f32 %v2919_v46, %v8804_v4 }
 0xa9d   :  { %3350 = vtanh.f32 %v2921_v9 }
 0xaa8   :  { %v3349_v55 = vpop.eup %3348 }
 0xaa9   :  { %v2926_v24 = vmul.f32 %v3349_v55, %v2924_v2 }
 0xaaa   :  { %v3351_v50 = vpop.eup %3350 }
 0xaab   :  { %v6984_v49 = vadd.f32 %v2928_v48, %v2926_v24  ;;  %v2927_v27 = vmul.f32 %v3351_v50, %v2925_v10 }
 0xaad   :  { %v2931_v1 = vadd.f32 %v2929_v41, %v2927_v27 }
 0xaae   :  { %3820 = dma.done.wait [#allocation5 + $0x1], 4096 }
 0xaaf   :  { %3821 = vsyncadd [#allocation5 + $0x1], 4294963200  ;;  %3037 = vmatprep.mubr.f32.mxu1 %v2931_v1  ;;  %v2966_v29 = vld [vmem:[#allocation4 + $0xf8] sm:$0xff]  ;;  %v2965_v52 = vld [vmem:[#allocation4 + $0xf0] sm:$0xff]  ;;  %s3832_s2 = smov [#allocation9]  }
 0xab0   :  { %v2950_v62 = vld [vmem:[#allocation4 + $0x78] sm:$0xff]  ;;  %3146 = vmatprep.subr.mxu1 %v2966_v29  ;;  %v2949_v54 = vld [vmem:[#allocation4 + $0x70] sm:$0xff]  ;;  %v2964_v19 = vld [vmem:[#allocation4 + $0xe8] sm:$0xff]  ;;  %s3050_s3 = sshll.u32 %s3832_s2, 4  ;;  %s3051_s3 = int_to_ptr.vmem [resolvable:$true] %s3050_s3 }
 0xab1   :  { %3147 = vmatpush3.msra.mxu1 %v2950_v62  ;;  %v2948_v11 = vld [vmem:[#allocation4 + $0x68] sm:$0xff]  ;;  %v2963_v38 = vld [vmem:[#allocation4 + $0xe0] sm:$0xff]  ;;  %v2962_v21 = vld [vmem:[#allocation4 + $0xd8] sm:$0xff]  ;;  %s3796_s27 = scalar_lea.vmem %s3051_s3, 128  ;;  %p3801_p2 = scmp.lt.s32.totalorder %s3051_s3, %s3051_s3 }
 0xab2   :  { %3148 = vmatprep.subr.mxu1 %v2965_v52  ;;  %v2947_v12 = vld [vmem:[#allocation4 + $0x60] sm:$0xff]  ;;  %v2946_v26 = vld [vmem:[#allocation4 + $0x58] sm:$0xff]  ;;  %v2961_v39 = vld [vmem:[#allocation4 + $0xd0] sm:$0xff]  ;;  %p3797_p1 = scmp.ne.s32.totalorder %s3051_s3, %s3796_s27  ;;  %p3802_p3 = scmp.lt.s32.totalorder %s3796_s27, %s3796_s27 }
 0xab3   :  { %3149 = vmatpush3.msra.mxu1 %v2949_v54  ;;  %v2945_v58 = vld [vmem:[#allocation4 + $0x50] sm:$0xff]  ;;  %v2960_v59 = vld [vmem:[#allocation4 + $0xc8] sm:$0xff]  ;;  %v2959_v28 = vld [vmem:[#allocation4 + $0xc0] sm:$0xff] }
 0xab4   :  { %3150 = vmatprep.subr.mxu1 %v2964_v19  ;;  %v2944_v63 = vld [vmem:[#allocation4 + $0x48] sm:$0xff]  ;;  %v2943_v17 = vld [vmem:[#allocation4 + $0x40] sm:$0xff]  ;;  %v2958_v20 = vld [vmem:[#allocation4 + $0xb8] sm:$0xff]  ;;  %p3803_p4 = por %p3802_p3, %p3801_p2 }
 0xab5   :  { %3151 = vmatpush3.msra.mxu1 %v2948_v11  ;;  %v2942_v33 = vld [vmem:[#allocation4 + $0x38] sm:$0xff]  ;;  %v2957_v16 = vld [vmem:[#allocation4 + $0xb0] sm:$0xff]  ;;  %v2956_v8 = vld [vmem:[#allocation4 + $0xa8] sm:$0xff] }
 0xab6   :  { %3152 = vmatprep.subr.mxu1 %v2963_v38  ;;  %v2941_v37 = vld [vmem:[#allocation4 + $0x30] sm:$0xff]  ;;  %v2940_v30 = vld [vmem:[#allocation4 + $0x28] sm:$0xff]  ;;  %v2955_v22 = vld [vmem:[#allocation4 + $0xa0] sm:$0xff]  ;;  %p3804_p5 = pnand %p3803_p4, %p3797_p1 }
 0xab7   :  { %3153 = vmatpush3.msra.mxu1 %v2947_v12  ;;  %v2939_v23 = vld [vmem:[#allocation4 + $0x20] sm:$0xff]  ;;  %v2954_v18 = vld [vmem:[#allocation4 + $0x98] sm:$0xff]  ;;  %v2953_v7 = vld [vmem:[#allocation4 + $0x90] sm:$0xff] }
 0xab8   :  { %3154 = vmatprep.subr.mxu1 %v2962_v21  ;;  %v2938_v47 = vld [vmem:[#allocation4 + $0x18] sm:$0xff]  ;;  %v2937_v0 = vld [vmem:[#allocation4 + $0x10] sm:$0xff]  ;;  %v2952_v43 = vld [vmem:[#allocation4 + $0x88] sm:$0xff] }
 0xab9   :  { %3155 = vmatpush3.msra.mxu1 %v2946_v26  ;;  %v2936_v44 = vld [vmem:[#allocation4 + $0x8] sm:$0xff]  ;;  %v2951_v51 = vld [vmem:[#allocation4 + $0x80] sm:$0xff] }
 0xaba   :  { %3156 = vmatprep.subr.mxu1 %v2961_v39  ;;  %v2935_v34 = vld [vmem:[#allocation4] sm:$0xff]  ;;  %v8805_v13 = vld [vmem:[#allocation20_spill] sm:$0xff] }
 0xabb   :  { %3157 = vmatpush3.msra.mxu1 %v2945_v58 }
 0xabc   :  { %3158 = vmatprep.subr.mxu1 %v2960_v59 }
 0xabd   :  { %3159 = vmatpush3.msra.mxu1 %v2944_v63 }
 0xabe   :  { %3160 = vmatprep.subr.mxu1 %v2959_v28 }
 0xabf   :  { %3161 = vmatpush3.msra.mxu1 %v2943_v17 }
 0xac0   :  { %3162 = vmatprep.subr.mxu1 %v2958_v20 }
 0xac1   :  { %3163 = vmatpush3.msra.mxu1 %v2942_v33 }
 0xac2   :  { %3164 = vmatprep.subr.mxu1 %v2957_v16 }
 0xac3   :  { %3165 = vmatpush3.msra.mxu1 %v2941_v37 }
 0xac4   :  { %3166 = vmatprep.subr.mxu1 %v2956_v8 }
 0xac5   :  { %3167 = vmatpush3.msra.mxu1 %v2940_v30 }
 0xac6   :  { %3168 = vmatprep.subr.mxu1 %v2955_v22 }
 0xac7   :  { %3169 = vmatpush3.msra.mxu1 %v2939_v23 }
 0xac8   :  { %3170 = vmatprep.subr.mxu1 %v2954_v18 }
 0xac9   :  { %3171 = vmatpush3.msra.mxu1 %v2938_v47 }
 0xaca   :  { %3172 = vmatprep.subr.mxu1 %v2953_v7 }
 0xacb   :  { %3173 = vmatpush3.msra.mxu1 %v2937_v0 }
 0xacc   :  { %3174 = vmatprep.subr.mxu1 %v2952_v43 }
 0xacd   :  { %3175 = vmatpush3.msra.mxu1 %v2936_v44 }
 0xace   :  { %3176 = vmatprep.subr.mxu1 %v2951_v51 }
 0xacf   :  { %3177 = vmatpush3.msra.mxu1 %v2935_v34 }
 0xad0   :  { %3038 = vmatmul.mubr.f32.vlgmr.msra.gmra.mxu1 %v6984_v49 }
 0xb90   :  { %v3178_v36 = vpop.f32.mrf.mxu1 }
 0xb92   :  { %v3179_v15 = vpop.f32.mrf.mxu1 }
 0xb93   :  { %v3180_v5 = vadd.f32 %v3179_v15, %v3178_v36 }
 0xb95   :  { %v3040_v53 = vadd.f32 %v3180_v5, %v8805_v13 }
 0xb97   :  { %3043 = vst [vmem:[#allocation9] sm:$0xff] %v3040_v53 }
 0xb98   :  { %3807 = shalt.err (!%p3804_p5)
}
 0xb99   :  { %3053 = dma.vmem_to_hbm [thread:$0]  %s3051_s3, 128, %s6996_s5, [#allocation8]  }
 0xb9a   :  { %3822 = dma.done.wait [#allocation8], 128  }
 0xb9b   :  { %3823 = vsyncadd [#allocation8], 4294967168 }
 0xb9c   :  { %3057 = vsyncpa [#allocation7], 1 }
 0xb9d   :  { %3058 = vsyncpa [#allocation8], 1 }
 0xb9e   :  { %3059 = vsyncmov [#allocation5] }
 0xba1   :  { %s3060_s29 = vpop.sfrf %3059 }
 0xba2   :  { %p3144_p6 = scmp.ne.s32.totalorder %s3060_s29, 0 }
 0xba4   :  { %3064 = shalt.err (%p3144_p6)  }
 0xba5   :  { %3066 = vsyncmov [#allocation5 + $0x1] }
 0xba8   :  { %s3067_s30 = vpop.sfrf %3066 }
 0xba9   :  { %p3145_p7 = scmp.ne.s32.totalorder %s3067_s30, 0 }
 0xbab   :  { %3071 = shalt.err (%p3145_p7)  }

</bundles_post_ra>
